<compile_context>
chip_gen: v7x
topology: tpu7x:2x2x1
jax: 0.10.0
libtpu: 0.0.40
codegen_flags: <defaults>
</compile_context>

<pallas_src>
import functools

import jax
import jax.numpy as jnp
import numpy as np
from jax import lax
from jax.experimental import pallas as pl
from jax.experimental.pallas import tpu as pltpu


# ----------------------------------------------------------------------------
# Fused Pallas kernel: one grid step == one batch element.
# ----------------------------------------------------------------------------
def _decoder_kernel(dsc_ref, low_ref, mid_ref, high_ref,        # per-batch acts
                    cold_ref, colm_ref, colh_ref,               # (W, Win) interp
                    wred_ref, bred_ref, beta_ref,               # 1x1 reduce + beta
                    w1h_ref, w1ml_ref, c1_ref,                  # conv1 (split) + BN1 bias
                    w2_ref, c2_ref,                             # conv2 + BN2 bias
                    wclst_ref, bcls_ref,                        # class conv
                    out_ref,                                    # (1, nc, H*W)
                    acc_ref,                                    # VMEM scratch (HW, 256)
                    *, H, W):
    f32 = jnp.float32
    bf16 = jnp.bfloat16
    HW = H * W

    def upsample_w(t3, col_ref):
        # Column (W-axis) align_corners interpolation of an (H, Win, C) bf16
        # array that is already row(H)-interpolated: one batched MXU matmul
        # (batch = H) with a KB-scale (W, Win) weight matrix.
        win, c = t3.shape[1], t3.shape[2]
        cwb = jnp.broadcast_to(col_ref[...], (H, W, win))
        up = lax.dot_general(cwb, t3,
                             dimension_numbers=(((2,), (1,)), ((0,), (0,))),
                             preferred_element_type=f32)          # (H, W, C)
        return up.reshape(HW, c)

    def conv3x3_acc(x, w_ref_, dil):
        # 3x3 conv (stride 1, dilation = padding = dil) of a bf16 (HW, Cin)
        # map, accumulated into acc_ref (f32).  Only 3 W-shifted operands are
        # built (one per dx, reused across dy); H shifts are free leading-axis
        # slices of the H-padded buffer.
        cin = x.shape[-1]
        x3 = x.reshape(H, W, cin)
        zrow = jnp.zeros((dil, W, cin), bf16)
        for dx in range(3):
            off = (dx - 1) * dil
            if off == 0:
                xs = x3
            elif off > 0:
                xs = jnp.concatenate(
                    [x3[:, off:, :], jnp.zeros((H, off, cin), bf16)], axis=1)
            else:
                xs = jnp.concatenate(
                    [jnp.zeros((H, -off, cin), bf16), x3[:, :W + off, :]], axis=1)
            xs = jnp.concatenate([zrow, xs, zrow], axis=0)        # (H+2dil, W, Cin)
            for dy in range(3):
                patch = xs[dy * dil:dy * dil + H]                 # cheap H slice
                acc_ref[...] += jnp.dot(patch.reshape(HW, cin), w_ref_[dy, dx],
                                        preferred_element_type=f32)

    # ---- reduce_low_dsc: 1x1 conv == channel matmul (bf16 MXU, f32 acc) -----
    wd = cold_ref.shape[1]
    low_dsc = jnp.dot(dsc_ref[0], wred_ref[...],
                      preferred_element_type=f32) + bred_ref[...]   # (H*Wd, 24)
    low_dsc3 = low_dsc.reshape(H, wd, low_dsc.shape[-1]).astype(bf16)

    # ---- column-interpolation (the full-resolution half of the bilinear) ----
    low_dsc_up = upsample_w(low_dsc3, cold_ref)                   # (HW, 24)  f32
    mid_up = upsample_w(mid_ref[0], colm_ref)                     # (HW, 32)  f32
    high_up = upsample_w(high_ref[0], colh_ref)                   # (HW, 256) f32

    # ---- distance-gated low-level features (f32 VPU / EUP work) ------------
    low = low_ref[0]
    d = low_dsc_up - low
    low_g = jnp.log(1.0 + d * d) * beta_ref[...] * low

    # ---- conv1 (312 -> 256, dilation 2); BN1 scale folded into weights.
    #      mid+low channels merged into one K=56 operand (halves small-K MXU
    #      passes); high keeps its own clean K=256 path. ----------------------
    ml = jnp.concatenate([mid_up, low_g], axis=-1).astype(bf16)   # (HW, 56)
    acc_ref[...] = jnp.zeros_like(acc_ref)
    conv3x3_acc(high_up.astype(bf16), w1h_ref, 2)
    conv3x3_acc(ml, w1ml_ref, 2)
    a1 = jnp.maximum(acc_ref[...] + c1_ref[...], 0.0).astype(bf16)

    # ---- conv2 (256 -> 256, dilation 1); BN2 scale folded into weights ------
    acc_ref[...] = jnp.zeros_like(acc_ref)
    conv3x3_acc(a1, w2_ref, 1)
    a2 = jnp.maximum(acc_ref[...] + c2_ref[...], 0.0).astype(bf16)

    # ---- class conv (1x1): channel-major, lane-dense (nc, H*W) output -------
    cls = lax.dot_general(wclst_ref[...], a2,
                          dimension_numbers=(((1,), (1,)), ((), ())),
                          preferred_element_type=f32)
    out_ref[0] = cls + bcls_ref[...]


# ----------------------------------------------------------------------------
# BlockSpec helpers
# ----------------------------------------------------------------------------
def _batched_spec(shape):
    n_rest = len(shape) - 1
    return pl.BlockSpec((1,) + tuple(shape[1:]),
                        lambda i, _n=n_rest: (i,) + (0,) * _n)


def _const_spec(shape):
    ndim = len(shape)
    return pl.BlockSpec(tuple(shape), lambda i, _n=ndim: (0,) * _n)


def _pick_vmem_limit():
    # Per-generation VMEM budget: leave headroom on 64-MiB parts (v7x), use
    # most of the 128-MiB parts (v5e/v6e).
    try:
        cap = int(pltpu.get_tpu_info().vmem_capacity_bytes)
    except Exception:
        cap = 128 * 1024 * 1024
    return int(max(32 * 1024 * 1024,
                   min(cap - 24 * 1024 * 1024, 100 * 1024 * 1024)))


# ----------------------------------------------------------------------------
# 1-D bilinear (align_corners=True) interpolation matrix.
# ----------------------------------------------------------------------------
def _interp_matrix(n_out, n_in):
    if n_in == 1:
        return jnp.ones((n_out, 1), jnp.float32)
    if n_out == 1:
        return jnp.zeros((1, n_in), jnp.float32).at[0, 0].set(1.0)
    pos = jnp.arange(n_out, dtype=jnp.float32) * ((n_in - 1) / (n_out - 1))
    lo = jnp.clip(jnp.floor(pos).astype(jnp.int32), 0, n_in - 2)
    frac = pos - lo.astype(jnp.float32)
    rows = jnp.arange(n_out)
    m = jnp.zeros((n_out, n_in), jnp.float32)
    m = m.at[rows, lo].add(1.0 - frac)
    m = m.at[rows, lo + 1].add(frac)
    return m


def _fold_bn(params, name, eps=1e-5):
    s = params[name + "_gamma"] * lax.rsqrt(params[name + "_var"] + eps)
    c = params[name + "_beta"] - params[name + "_mean"] * s
    return s, c


# ----------------------------------------------------------------------------
# Parameter construction (kaiming conv weights, identity BN, beta_low = 1.0,
# matching Decoder._init_weight).
# ----------------------------------------------------------------------------
def init_params(key, num_classes):
    ks = jax.random.split(key, 6)

    def kaiming(k, shape, fan_in):
        return jax.random.normal(k, shape, jnp.float32) * np.sqrt(2.0 / fan_in)

    p = {
        "w_red": kaiming(ks[0], (256, 24), 256),                # 1x1: (Cin, Cout)
        "b_red": 0.05 * jax.random.normal(ks[1], (24,), jnp.float32),
        "beta": jnp.ones((24,), jnp.float32),                   # beta_low init 1.0
        "w1": kaiming(ks[2], (3, 3, 312, 256), 3 * 3 * 312),    # HWIO, dilation-2 conv
        "w2": kaiming(ks[3], (3, 3, 256, 256), 3 * 3 * 256),    # HWIO
        "w_cls": kaiming(ks[4], (256, num_classes), 256),       # 1x1: (Cin, Cout)
        "b_cls": 0.05 * jax.random.normal(ks[5], (num_classes,), jnp.float32),
    }
    for name in ("bn1", "bn2"):                                  # inference-mode BN
        p[name + "_gamma"] = jnp.ones((256,), jnp.float32)
        p[name + "_beta"] = jnp.zeros((256,), jnp.float32)
        p[name + "_mean"] = jnp.zeros((256,), jnp.float32)
        p[name + "_var"] = jnp.ones((256,), jnp.float32)
    return p


# ----------------------------------------------------------------------------
# Forward pass (NCHW in / NCHW out) — single fused pallas_call.
# ----------------------------------------------------------------------------
@jax.jit
def decoder_forward(params, dsc, low_level_feat, middle_level_feat, high_level_feat):
    n, c_low, H, W = low_level_feat.shape
    HW = H * W
    nc = params["w_cls"].shape[1]
    c_high = high_level_feat.shape[1]
    bf16 = jnp.bfloat16

    def nhwc(t):
        return jnp.transpose(t, (0, 2, 3, 1))

    def row_interp(t_nhwc):
        # Row (H-axis) half of the separable align_corners bilinear, applied
        # on the LOW-RES maps (tiny matmul; keeps the kernel free of
        # lane-changing reshapes).  The column half runs in the kernel.
        r = _interp_matrix(H, t_nhwc.shape[1])
        return jnp.einsum("gh,nhwc->ngwc", r, t_nhwc)

    # Row-interp commutes with the 1x1 channel reduction, so dsc is
    # row-interpolated here and reduced inside the kernel.
    dsc_r = row_interp(nhwc(dsc))                               # (N, H, Wd, 256)
    wd = dsc_r.shape[2]
    dsc_r = dsc_r.reshape(n, H * wd, dsc.shape[1]).astype(bf16)
    mid_r = row_interp(nhwc(middle_level_feat)).astype(bf16)    # (N, H, Wm, 32)
    high_r = row_interp(nhwc(high_level_feat)).astype(bf16)     # (N, H, Wh, 256)
    low_r = nhwc(low_level_feat).reshape(n, HW, c_low)          # (N, HW, 24) f32

    # KB-scale column interpolation matrices (bf16 MXU operands).
    cold = _interp_matrix(W, dsc.shape[3]).astype(bf16)
    colm = _interp_matrix(W, middle_level_feat.shape[3]).astype(bf16)
    colh = _interp_matrix(W, high_level_feat.shape[3]).astype(bf16)

    s1, c1 = _fold_bn(params, "bn1")
    s2, c2 = _fold_bn(params, "bn2")

    # Fold BN scales into the conv weights, split conv1 by input-channel group
    # ([high | mid+low]) and ship all MXU weights in bf16.
    w1s = params["w1"] * s1
    w1h = w1s[:, :, :c_high, :].astype(bf16)                    # (3,3,256,256)
    w1ml = w1s[:, :, c_high:, :].astype(bf16)                   # (3,3, 56,256)
    w2s = (params["w2"] * s2).astype(bf16)
    cout = params["w2"].shape[-1]

    inputs = (
        dsc_r, low_r, mid_r, high_r,
        cold, colm, colh,
        params["w_red"].astype(bf16), params["b_red"].reshape(1, -1),
        params["beta"].reshape(1, -1),
        w1h, w1ml, c1.reshape(1, -1),
        w2s, c2.reshape(1, -1),
        jnp.transpose(params["w_cls"]).astype(bf16), params["b_cls"].reshape(-1, 1),
    )
    in_specs = ([_batched_spec(a.shape) for a in inputs[:4]]
                + [_const_spec(a.shape) for a in inputs[4:]])

    kernel = functools.partial(_decoder_kernel, H=H, W=W)

    out = pl.pallas_call(
        kernel,
        out_shape=jax.ShapeDtypeStruct((n, nc, HW), jnp.float32),
        grid=(n,),
        in_specs=in_specs,
        out_specs=_batched_spec((n, nc, HW)),
        scratch_shapes=[pltpu.VMEM((HW, cout), jnp.float32)],
        compiler_params=pltpu.CompilerParams(
            dimension_semantics=("parallel",),
            vmem_limit_bytes=_pick_vmem_limit()),
    )(*inputs)

    # Channel-major kernel output: only a (free) reshape to NCHW is needed.
    return out.reshape(n, nc, H, W)


# ----------------------------------------------------------------------------
# Pure-JAX reference (independent bilinear / lax.conv path) for self-check.
# ----------------------------------------------------------------------------
def _bilinear_ac_nhwc(x, out_h, out_w):
    n, h, w, c = x.shape

    def axis_weights(n_out, n_in):
        if n_out == 1 or n_in == 1:
            pos = jnp.zeros((n_out,), jnp.float32)
        else:
            pos = jnp.arange(n_out, dtype=jnp.float32) * ((n_in - 1) / (n_out - 1))
        lo = jnp.clip(jnp.floor(pos).astype(jnp.int32), 0, max(n_in - 2, 0))
        hi = jnp.minimum(lo + 1, n_in - 1)
        return lo, hi, pos - lo.astype(jnp.float32)

    y0, y1, fy = axis_weights(out_h, h)
    x0, x1, fx = axis_weights(out_w, w)
    top, bot = x[:, y0, :, :], x[:, y1, :, :]
    rows = top * (1.0 - fy)[None, :, None, None] + bot * fy[None, :, None, None]
    left, right = rows[:, :, x0, :], rows[:, :, x1, :]
    return left * (1.0 - fx)[None, None, :, None] + right * fx[None, None, :, None]


def decoder_ref(params, dsc, low, mid, high):
    nhwc = lambda t: jnp.transpose(t, (0, 2, 3, 1))
    H, W = low.shape[2], low.shape[3]
    dsc_h, low_h, mid_h, high_h = nhwc(dsc), nhwc(low), nhwc(mid), nhwc(high)

    low_dsc = jnp.einsum("nhwc,cd->nhwd", dsc_h, params["w_red"]) + params["b_red"]
    low_dsc = _bilinear_ac_nhwc(low_dsc, H, W)
    gate = jnp.log(1.0 + jnp.square(low_dsc - low_h))
    low_g = gate * params["beta"] * low_h

    high_up = _bilinear_ac_nhwc(high_h, H, W)
    mid_up = _bilinear_ac_nhwc(mid_h, H, W)
    ff = jnp.concatenate([high_up, mid_up, low_g], axis=-1)

    s1, c1 = _fold_bn(params, "bn1")
    s2, c2 = _fold_bn(params, "bn2")
    x = lax.conv_general_dilated(ff, params["w1"], (1, 1), ((2, 2), (2, 2)),
                                 rhs_dilation=(2, 2),
                                 dimension_numbers=("NHWC", "HWIO", "NHWC"))
    x = jnp.maximum(x * s1 + c1, 0.0)
    x = lax.conv_general_dilated(x, params["w2"], (1, 1), ((1, 1), (1, 1)),
                                 dimension_numbers=("NHWC", "HWIO", "NHWC"))
    x = jnp.maximum(x * s2 + c2, 0.0)
    x = jnp.einsum("nhwc,cd->nhwd", x, params["w_cls"]) + params["b_cls"]
    return jnp.transpose(x, (0, 3, 1, 2))


if __name__ == "__main__":
    key = jax.random.PRNGKey(0)
    kp, k1, k2, k3, k4 = jax.random.split(key, 5)

    N, NUM_CLASSES = 2, 8
    H = W = 16
    params = init_params(kp, NUM_CLASSES)
    # Channel split matching last_conv's 312 input channels: 256 + 32 + 24.
    dsc = jax.random.normal(k1, (N, 256, 8, 8), jnp.float32)
    low = jax.random.normal(k2, (N, 24, H, W), jnp.float32)
    mid = jax.random.normal(k3, (N, 32, 8, 8), jnp.float32)
    high = jax.random.normal(k4, (N, 256, 4, 4), jnp.float32)

    out = jax.block_until_ready(decoder_forward(params, dsc, low, mid, high))
    assert out.shape == (N, NUM_CLASSES, H, W)

    ref = jax.block_until_ready(decoder_ref(params, dsc, low, mid, high))
    # bf16 MXU operands (f32 accumulation) => loosened tolerances vs f32 ref.
    np.testing.assert_allclose(np.asarray(out), np.asarray(ref),
                               rtol=5e-2, atol=5e-2)

    print("KERNEL_OK")
</pallas_src>

<mosaic_0001>
module attributes {stable_mosaic.version = 11 : i64} {
  func.func private @main(%arg0: i32) attributes {dimension_semantics = [#tpu.dimension_semantics<core_parallel>], iteration_bounds = array<i64: 2>, tpu.core_type = #tpu.core_type<sc_scalar_subcore>, window_params = []} {
    return
  }
}

module attributes {stable_mosaic.version = 11 : i64} {
  func.func private @main(%arg0: i32) attributes {dimension_semantics = [#tpu.dimension_semantics<core_parallel>], iteration_bounds = array<i64: 2>, tpu.core_type = #tpu.core_type<sc_scalar_subcore>, window_params = []} {
    return
  }
}

module attributes {stable_mosaic.version = 11 : i64} {
  func.func @_decoder_kernel(%arg0: i32, %arg1: memref<1x128x256xbf16, #tpu.memory_space<vmem>>, %arg2: memref<1x256x24xf32, #tpu.memory_space<vmem>>, %arg3: memref<1x16x8x32xbf16, #tpu.memory_space<vmem>>, %arg4: memref<1x16x4x256xbf16, #tpu.memory_space<vmem>>, %arg5: memref<16x8xbf16, #tpu.memory_space<vmem>>, %arg6: memref<16x8xbf16, #tpu.memory_space<vmem>>, %arg7: memref<16x4xbf16, #tpu.memory_space<vmem>>, %arg8: memref<256x24xbf16, #tpu.memory_space<vmem>>, %arg9: memref<1x24xf32, #tpu.memory_space<vmem>>, %arg10: memref<1x24xf32, #tpu.memory_space<vmem>>, %arg11: memref<3x3x256x256xbf16, #tpu.memory_space<vmem>>, %arg12: memref<3x3x56x256xbf16, #tpu.memory_space<vmem>>, %arg13: memref<1x256xf32, #tpu.memory_space<vmem>>, %arg14: memref<3x3x256x256xbf16, #tpu.memory_space<vmem>>, %arg15: memref<1x256xf32, #tpu.memory_space<vmem>>, %arg16: memref<8x256xbf16, #tpu.memory_space<vmem>>, %arg17: memref<8x1xf32, #tpu.memory_space<vmem>>, %arg18: memref<1x8x256xf32, #tpu.memory_space<vmem>>, %arg19: memref<256x256xf32, #tpu.memory_space<vmem>>) attributes {dimension_semantics = [#tpu.dimension_semantics<parallel>], iteration_bounds = array<i64: 2>, scalar_prefetch = 0 : i64, scratch_operands = 1 : i64, tpu.core_type = #tpu.core_type<tc>, window_params = [{transform_indices = @transform_0, window_bounds = array<i64: 1, 128, 256>}, {transform_indices = @transform_1, window_bounds = array<i64: 1, 256, 24>}, {transform_indices = @transform_2, window_bounds = array<i64: 1, 16, 8, 32>}, {transform_indices = @transform_3, window_bounds = array<i64: 1, 16, 4, 256>}, {pipeline_mode = #tpu.pipeline_mode<synchronous>, transform_indices = @transform_4, window_bounds = array<i64: 16, 8>}, {pipeline_mode = #tpu.pipeline_mode<synchronous>, transform_indices = @transform_5, window_bounds = array<i64: 16, 8>}, {pipeline_mode = #tpu.pipeline_mode<synchronous>, transform_indices = @transform_6, window_bounds = array<i64: 16, 4>}, {pipeline_mode = #tpu.pipeline_mode<synchronous>, transform_indices = @transform_7, window_bounds = array<i64: 256, 24>}, {pipeline_mode = #tpu.pipeline_mode<synchronous>, transform_indices = @transform_8, window_bounds = array<i64: 1, 24>}, {pipeline_mode = #tpu.pipeline_mode<synchronous>, transform_indices = @transform_9, window_bounds = array<i64: 1, 24>}, {pipeline_mode = #tpu.pipeline_mode<synchronous>, transform_indices = @transform_10, window_bounds = array<i64: 3, 3, 256, 256>}, {pipeline_mode = #tpu.pipeline_mode<synchronous>, transform_indices = @transform_11, window_bounds = array<i64: 3, 3, 56, 256>}, {pipeline_mode = #tpu.pipeline_mode<synchronous>, transform_indices = @transform_12, window_bounds = array<i64: 1, 256>}, {pipeline_mode = #tpu.pipeline_mode<synchronous>, transform_indices = @transform_13, window_bounds = array<i64: 3, 3, 256, 256>}, {pipeline_mode = #tpu.pipeline_mode<synchronous>, transform_indices = @transform_14, window_bounds = array<i64: 1, 256>}, {pipeline_mode = #tpu.pipeline_mode<synchronous>, transform_indices = @transform_15, window_bounds = array<i64: 8, 256>}, {pipeline_mode = #tpu.pipeline_mode<synchronous>, transform_indices = @transform_16, window_bounds = array<i64: 8, 1>}, {transform_indices = @transform_17, window_bounds = array<i64: 1, 8, 256>}]} {
    %c0 = arith.constant 0 : index
    %c0_0 = arith.constant 0 : index
    %c0_1 = arith.constant 0 : index
    %0 = vector.load %arg1[%c0, %c0_0, %c0_1] : memref<1x128x256xbf16, #tpu.memory_space<vmem>>, vector<1x128x256xbf16>
    %1 = vector.shape_cast %0 : vector<1x128x256xbf16> to vector<128x256xbf16>
    %c0_2 = arith.constant 0 : index
    %c0_3 = arith.constant 0 : index
    %2 = vector.load %arg8[%c0_2, %c0_3] : memref<256x24xbf16, #tpu.memory_space<vmem>>, vector<256x24xbf16>
    %cst = arith.constant dense<0.000000e+00> : vector<128x24xf32>
    %3 = tpu.matmul %1, %2, %cst {dimension_numbers = #tpu.dot_dimension_numbers<[1], [0], [0], [1], [0, 0, 1, 1], [], []>} : vector<128x256xbf16>, vector<256x24xbf16>, vector<128x24xf32> -> vector<128x24xf32>
    %c0_4 = arith.constant 0 : index
    %c0_5 = arith.constant 0 : index
    %4 = vector.load %arg9[%c0_4, %c0_5] : memref<1x24xf32, #tpu.memory_space<vmem>>, vector<1x24xf32>
    %5 = vector.broadcast %4 : vector<1x24xf32> to vector<128x24xf32>
    %6 = arith.addf %3, %5 : vector<128x24xf32>
    %7 = vector.shape_cast %6 : vector<128x24xf32> to vector<16x8x24xf32>
    %8 = arith.truncf %7 : vector<16x8x24xf32> to vector<16x8x24xbf16>
    %c0_6 = arith.constant 0 : index
    %c0_7 = arith.constant 0 : index
    %9 = vector.load %arg5[%c0_6, %c0_7] : memref<16x8xbf16, #tpu.memory_space<vmem>>, vector<16x8xbf16>
    %10 = vector.shape_cast %9 : vector<16x8xbf16> to vector<1x16x8xbf16>
    %11 = vector.broadcast %10 : vector<1x16x8xbf16> to vector<16x16x8xbf16>
    %cst_8 = arith.constant dense<0.000000e+00> : vector<16x16x24xf32>
    %12 = tpu.matmul %11, %8, %cst_8 {dimension_numbers = #tpu.dot_dimension_numbers<[2], [1], [1], [2], [0, 0, 0, 1, 1, 2], [0], [0]>} : vector<16x16x8xbf16>, vector<16x8x24xbf16>, vector<16x16x24xf32> -> vector<16x16x24xf32>
    %13 = vector.shape_cast %12 : vector<16x16x24xf32> to vector<256x24xf32>
    %c0_9 = arith.constant 0 : index
    %c0_10 = arith.constant 0 : index
    %c0_11 = arith.constant 0 : index
    %c0_12 = arith.constant 0 : index
    %14 = vector.load %arg3[%c0_9, %c0_10, %c0_11, %c0_12] : memref<1x16x8x32xbf16, #tpu.memory_space<vmem>>, vector<1x16x8x32xbf16>
    %15 = vector.shape_cast %14 : vector<1x16x8x32xbf16> to vector<16x8x32xbf16>
    %c0_13 = arith.constant 0 : index
    %c0_14 = arith.constant 0 : index
    %16 = vector.load %arg6[%c0_13, %c0_14] : memref<16x8xbf16, #tpu.memory_space<vmem>>, vector<16x8xbf16>
    %17 = vector.shape_cast %16 : vector<16x8xbf16> to vector<1x16x8xbf16>
    %18 = vector.broadcast %17 : vector<1x16x8xbf16> to vector<16x16x8xbf16>
    %cst_15 = arith.constant dense<0.000000e+00> : vector<16x16x32xf32>
    %19 = tpu.matmul %18, %15, %cst_15 {dimension_numbers = #tpu.dot_dimension_numbers<[2], [1], [1], [2], [0, 0, 0, 1, 1, 2], [0], [0]>} : vector<16x16x8xbf16>, vector<16x8x32xbf16>, vector<16x16x32xf32> -> vector<16x16x32xf32>
    %20 = vector.shape_cast %19 : vector<16x16x32xf32> to vector<256x32xf32>
    %c0_16 = arith.constant 0 : index
    %c0_17 = arith.constant 0 : index
    %c0_18 = arith.constant 0 : index
    %c0_19 = arith.constant 0 : index
    %21 = vector.load %arg4[%c0_16, %c0_17, %c0_18, %c0_19] : memref<1x16x4x256xbf16, #tpu.memory_space<vmem>>, vector<1x16x4x256xbf16>
    %22 = vector.shape_cast %21 : vector<1x16x4x256xbf16> to vector<16x4x256xbf16>
    %c0_20 = arith.constant 0 : index
    %c0_21 = arith.constant 0 : index
    %23 = vector.load %arg7[%c0_20, %c0_21] : memref<16x4xbf16, #tpu.memory_space<vmem>>, vector<16x4xbf16>
    %24 = vector.shape_cast %23 : vector<16x4xbf16> to vector<1x16x4xbf16>
    %25 = vector.broadcast %24 : vector<1x16x4xbf16> to vector<16x16x4xbf16>
    %cst_22 = arith.constant dense<0.000000e+00> : vector<16x16x256xf32>
    %26 = tpu.matmul %25, %22, %cst_22 {dimension_numbers = #tpu.dot_dimension_numbers<[2], [1], [1], [2], [0, 0, 0, 1, 1, 2], [0], [0]>} : vector<16x16x4xbf16>, vector<16x4x256xbf16>, vector<16x16x256xf32> -> vector<16x16x256xf32>
    %27 = vector.shape_cast %26 : vector<16x16x256xf32> to vector<256x256xf32>
    %c0_23 = arith.constant 0 : index
    %c0_24 = arith.constant 0 : index
    %c0_25 = arith.constant 0 : index
    %28 = vector.load %arg2[%c0_23, %c0_24, %c0_25] : memref<1x256x24xf32, #tpu.memory_space<vmem>>, vector<1x256x24xf32>
    %29 = vector.shape_cast %28 : vector<1x256x24xf32> to vector<256x24xf32>
    %30 = arith.subf %13, %29 : vector<256x24xf32>
    %31 = arith.mulf %30, %30 : vector<256x24xf32>
    %cst_26 = arith.constant 1.000000e+00 : f32
    %32 = vector.broadcast %cst_26 : f32 to vector<256x24xf32>
    %33 = arith.addf %32, %31 : vector<256x24xf32>
    %34 = math.log %33 : vector<256x24xf32>
    %c0_27 = arith.constant 0 : index
    %c0_28 = arith.constant 0 : index
    %35 = vector.load %arg10[%c0_27, %c0_28] : memref<1x24xf32, #tpu.memory_space<vmem>>, vector<1x24xf32>
    %36 = vector.broadcast %35 : vector<1x24xf32> to vector<256x24xf32>
    %37 = arith.mulf %34, %36 : vector<256x24xf32>
    %38 = arith.mulf %37, %29 : vector<256x24xf32>
    %39 = tpu.concatenate %20, %38 in 1 : vector<256x32xf32>, vector<256x24xf32> -> vector<256x56xf32>
    %40 = arith.truncf %39 : vector<256x56xf32> to vector<256x56xbf16>
    %cst_29 = arith.constant 0.000000e+00 : f32
    %41 = vector.broadcast %cst_29 : f32 to vector<256x256xf32>
    %c0_30 = arith.constant 0 : index
    %c0_31 = arith.constant 0 : index
    %42 = vector.load %arg19[%c0_30, %c0_31] : memref<256x256xf32, #tpu.memory_space<vmem>>, vector<256x256xf32>
    tpu.vector_store %arg19[%c0_30, %c0_31], %41 {strides = array<i32>} : memref<256x256xf32, #tpu.memory_space<vmem>>, vector<256x256xf32>,
    %43 = arith.truncf %27 : vector<256x256xf32> to vector<256x256xbf16>
    %44 = vector.shape_cast %43 : vector<256x256xbf16> to vector<16x16x256xbf16>
    %cst_32 = arith.constant 0.000000e+00 : bf16
    %45 = vector.broadcast %cst_32 : bf16 to vector<2x16x256xbf16>
    %cst_33 = arith.constant 0.000000e+00 : bf16
    %46 = vector.broadcast %cst_33 : bf16 to vector<16x2x256xbf16>
    %47 = vector.extract_strided_slice %44 {offsets = [0, 0, 0], sizes = [16, 14, 256], strides = [1, 1, 1]} : vector<16x16x256xbf16> to vector<16x14x256xbf16>
    %48 = tpu.concatenate %46, %47 in 1 : vector<16x2x256xbf16>, vector<16x14x256xbf16> -> vector<16x16x256xbf16>
    %49 = tpu.concatenate %45, %48, %45 in 0 : vector<2x16x256xbf16>, vector<16x16x256xbf16>, vector<2x16x256xbf16> -> vector<20x16x256xbf16>
    %50 = vector.extract_strided_slice %49 {offsets = [0, 0, 0], sizes = [16, 16, 256], strides = [1, 1, 1]} : vector<20x16x256xbf16> to vector<16x16x256xbf16>
    %c0_34 = arith.constant 0 : index
    %c0_35 = arith.constant 0 : index
    %51 = vector.load %arg19[%c0_34, %c0_35] : memref<256x256xf32, #tpu.memory_space<vmem>>, vector<256x256xf32>
    %52 = vector.shape_cast %50 : vector<16x16x256xbf16> to vector<256x256xbf16>
    %c0_36 = arith.constant 0 : index
    %c0_37 = arith.constant 0 : index
    %c0_38 = arith.constant 0 : index
    %c0_39 = arith.constant 0 : index
    %53 = vector.load %arg11[%c0_36, %c0_37, %c0_38, %c0_39] : memref<3x3x256x256xbf16, #tpu.memory_space<vmem>>, vector<1x1x256x256xbf16>
    %54 = vector.shape_cast %53 : vector<1x1x256x256xbf16> to vector<256x256xbf16>
    %cst_40 = arith.constant dense<0.000000e+00> : vector<256x256xf32>
    %55 = tpu.matmul %52, %54, %cst_40 {dimension_numbers = #tpu.dot_dimension_numbers<[1], [0], [0], [1], [0, 0, 1, 1], [], []>} : vector<256x256xbf16>, vector<256x256xbf16>, vector<256x256xf32> -> vector<256x256xf32>
    %56 = arith.addf %51, %55 : vector<256x256xf32>
    %c0_41 = arith.constant 0 : index
    %c0_42 = arith.constant 0 : index
    %57 = vector.load %arg19[%c0_41, %c0_42] : memref<256x256xf32, #tpu.memory_space<vmem>>, vector<256x256xf32>
    tpu.vector_store %arg19[%c0_41, %c0_42], %56 {strides = array<i32>} : memref<256x256xf32, #tpu.memory_space<vmem>>, vector<256x256xf32>,
    %58 = vector.extract_strided_slice %49 {offsets = [2, 0, 0], sizes = [16, 16, 256], strides = [1, 1, 1]} : vector<20x16x256xbf16> to vector<16x16x256xbf16>
    %c0_43 = arith.constant 0 : index
    %c0_44 = arith.constant 0 : index
    %59 = vector.load %arg19[%c0_43, %c0_44] : memref<256x256xf32, #tpu.memory_space<vmem>>, vector<256x256xf32>
    %60 = vector.shape_cast %58 : vector<16x16x256xbf16> to vector<256x256xbf16>
    %c1 = arith.constant 1 : index
    %c0_45 = arith.constant 0 : index
    %c0_46 = arith.constant 0 : index
    %c0_47 = arith.constant 0 : index
    %61 = vector.load %arg11[%c1, %c0_45, %c0_46, %c0_47] : memref<3x3x256x256xbf16, #tpu.memory_space<vmem>>, vector<1x1x256x256xbf16>
    %62 = vector.shape_cast %61 : vector<1x1x256x256xbf16> to vector<256x256xbf16>
    %cst_48 = arith.constant dense<0.000000e+00> : vector<256x256xf32>
    %63 = tpu.matmul %60, %62, %cst_48 {dimension_numbers = #tpu.dot_dimension_numbers<[1], [0], [0], [1], [0, 0, 1, 1], [], []>} : vector<256x256xbf16>, vector<256x256xbf16>, vector<256x256xf32> -> vector<256x256xf32>
    %64 = arith.addf %59, %63 : vector<256x256xf32>
    %c0_49 = arith.constant 0 : index
    %c0_50 = arith.constant 0 : index
    %65 = vector.load %arg19[%c0_49, %c0_50] : memref<256x256xf32, #tpu.memory_space<vmem>>, vector<256x256xf32>
    tpu.vector_store %arg19[%c0_49, %c0_50], %64 {strides = array<i32>} : memref<256x256xf32, #tpu.memory_space<vmem>>, vector<256x256xf32>,
    %66 = vector.extract_strided_slice %49 {offsets = [4, 0, 0], sizes = [16, 16, 256], strides = [1, 1, 1]} : vector<20x16x256xbf16> to vector<16x16x256xbf16>
    %c0_51 = arith.constant 0 : index
    %c0_52 = arith.constant 0 : index
    %67 = vector.load %arg19[%c0_51, %c0_52] : memref<256x256xf32, #tpu.memory_space<vmem>>, vector<256x256xf32>
    %68 = vector.shape_cast %66 : vector<16x16x256xbf16> to vector<256x256xbf16>
    %c2 = arith.constant 2 : index
    %c0_53 = arith.constant 0 : index
    %c0_54 = arith.constant 0 : index
    %c0_55 = arith.constant 0 : index
    %69 = vector.load %arg11[%c2, %c0_53, %c0_54, %c0_55] : memref<3x3x256x256xbf16, #tpu.memory_space<vmem>>, vector<1x1x256x256xbf16>
    %70 = vector.shape_cast %69 : vector<1x1x256x256xbf16> to vector<256x256xbf16>
    %cst_56 = arith.constant dense<0.000000e+00> : vector<256x256xf32>
    %71 = tpu.matmul %68, %70, %cst_56 {dimension_numbers = #tpu.dot_dimension_numbers<[1], [0], [0], [1], [0, 0, 1, 1], [], []>} : vector<256x256xbf16>, vector<256x256xbf16>, vector<256x256xf32> -> vector<256x256xf32>
    %72 = arith.addf %67, %71 : vector<256x256xf32>
    %c0_57 = arith.constant 0 : index
    %c0_58 = arith.constant 0 : index
    %73 = vector.load %arg19[%c0_57, %c0_58] : memref<256x256xf32, #tpu.memory_space<vmem>>, vector<256x256xf32>
    tpu.vector_store %arg19[%c0_57, %c0_58], %72 {strides = array<i32>} : memref<256x256xf32, #tpu.memory_space<vmem>>, vector<256x256xf32>,
    %74 = tpu.concatenate %45, %44, %45 in 0 : vector<2x16x256xbf16>, vector<16x16x256xbf16>, vector<2x16x256xbf16> -> vector<20x16x256xbf16>
    %75 = vector.extract_strided_slice %74 {offsets = [0, 0, 0], sizes = [16, 16, 256], strides = [1, 1, 1]} : vector<20x16x256xbf16> to vector<16x16x256xbf16>
    %c0_59 = arith.constant 0 : index
    %c0_60 = arith.constant 0 : index
    %76 = vector.load %arg19[%c0_59, %c0_60] : memref<256x256xf32, #tpu.memory_space<vmem>>, vector<256x256xf32>
    %77 = vector.shape_cast %75 : vector<16x16x256xbf16> to vector<256x256xbf16>
    %c0_61 = arith.constant 0 : index
    %c1_62 = arith.constant 1 : index
    %c0_63 = arith.constant 0 : index
    %c0_64 = arith.constant 0 : index
    %78 = vector.load %arg11[%c0_61, %c1_62, %c0_63, %c0_64] : memref<3x3x256x256xbf16, #tpu.memory_space<vmem>>, vector<1x1x256x256xbf16>
    %79 = vector.shape_cast %78 : vector<1x1x256x256xbf16> to vector<256x256xbf16>
    %cst_65 = arith.constant dense<0.000000e+00> : vector<256x256xf32>
    %80 = tpu.matmul %77, %79, %cst_65 {dimension_numbers = #tpu.dot_dimension_numbers<[1], [0], [0], [1], [0, 0, 1, 1], [], []>} : vector<256x256xbf16>, vector<256x256xbf16>, vector<256x256xf32> -> vector<256x256xf32>
    %81 = arith.addf %76, %80 : vector<256x256xf32>
    %c0_66 = arith.constant 0 : index
    %c0_67 = arith.constant 0 : index
    %82 = vector.load %arg19[%c0_66, %c0_67] : memref<256x256xf32, #tpu.memory_space<vmem>>, vector<256x256xf32>
    tpu.vector_store %arg19[%c0_66, %c0_67], %81 {strides = array<i32>} : memref<256x256xf32, #tpu.memory_space<vmem>>, vector<256x256xf32>,
    %83 = vector.extract_strided_slice %74 {offsets = [2, 0, 0], sizes = [16, 16, 256], strides = [1, 1, 1]} : vector<20x16x256xbf16> to vector<16x16x256xbf16>
    %c0_68 = arith.constant 0 : index
    %c0_69 = arith.constant 0 : index
    %84 = vector.load %arg19[%c0_68, %c0_69] : memref<256x256xf32, #tpu.memory_space<vmem>>, vector<256x256xf32>
    %85 = vector.shape_cast %83 : vector<16x16x256xbf16> to vector<256x256xbf16>
    %c1_70 = arith.constant 1 : index
    %c1_71 = arith.constant 1 : index
    %c0_72 = arith.constant 0 : index
    %c0_73 = arith.constant 0 : index
    %86 = vector.load %arg11[%c1_70, %c1_71, %c0_72, %c0_73] : memref<3x3x256x256xbf16, #tpu.memory_space<vmem>>, vector<1x1x256x256xbf16>
    %87 = vector.shape_cast %86 : vector<1x1x256x256xbf16> to vector<256x256xbf16>
    %cst_74 = arith.constant dense<0.000000e+00> : vector<256x256xf32>
    %88 = tpu.matmul %85, %87, %cst_74 {dimension_numbers = #tpu.dot_dimension_numbers<[1], [0], [0], [1], [0, 0, 1, 1], [], []>} : vector<256x256xbf16>, vector<256x256xbf16>, vector<256x256xf32> -> vector<256x256xf32>
    %89 = arith.addf %84, %88 : vector<256x256xf32>
    %c0_75 = arith.constant 0 : index
    %c0_76 = arith.constant 0 : index
    %90 = vector.load %arg19[%c0_75, %c0_76] : memref<256x256xf32, #tpu.memory_space<vmem>>, vector<256x256xf32>
    tpu.vector_store %arg19[%c0_75, %c0_76], %89 {strides = array<i32>} : memref<256x256xf32, #tpu.memory_space<vmem>>, vector<256x256xf32>,
    %91 = vector.extract_strided_slice %74 {offsets = [4, 0, 0], sizes = [16, 16, 256], strides = [1, 1, 1]} : vector<20x16x256xbf16> to vector<16x16x256xbf16>
    %c0_77 = arith.constant 0 : index
    %c0_78 = arith.constant 0 : index
    %92 = vector.load %arg19[%c0_77, %c0_78] : memref<256x256xf32, #tpu.memory_space<vmem>>, vector<256x256xf32>
    %93 = vector.shape_cast %91 : vector<16x16x256xbf16> to vector<256x256xbf16>
    %c2_79 = arith.constant 2 : index
    %c1_80 = arith.constant 1 : index
    %c0_81 = arith.constant 0 : index
    %c0_82 = arith.constant 0 : index
    %94 = vector.load %arg11[%c2_79, %c1_80, %c0_81, %c0_82] : memref<3x3x256x256xbf16, #tpu.memory_space<vmem>>, vector<1x1x256x256xbf16>
    %95 = vector.shape_cast %94 : vector<1x1x256x256xbf16> to vector<256x256xbf16>
    %cst_83 = arith.constant dense<0.000000e+00> : vector<256x256xf32>
    %96 = tpu.matmul %93, %95, %cst_83 {dimension_numbers = #tpu.dot_dimension_numbers<[1], [0], [0], [1], [0, 0, 1, 1], [], []>} : vector<256x256xbf16>, vector<256x256xbf16>, vector<256x256xf32> -> vector<256x256xf32>
    %97 = arith.addf %92, %96 : vector<256x256xf32>
    %c0_84 = arith.constant 0 : index
    %c0_85 = arith.constant 0 : index
    %98 = vector.load %arg19[%c0_84, %c0_85] : memref<256x256xf32, #tpu.memory_space<vmem>>, vector<256x256xf32>
    tpu.vector_store %arg19[%c0_84, %c0_85], %97 {strides = array<i32>} : memref<256x256xf32, #tpu.memory_space<vmem>>, vector<256x256xf32>,
    %99 = vector.extract_strided_slice %44 {offsets = [0, 2, 0], sizes = [16, 14, 256], strides = [1, 1, 1]} : vector<16x16x256xbf16> to vector<16x14x256xbf16>
    %cst_86 = arith.constant 0.000000e+00 : bf16
    %100 = vector.broadcast %cst_86 : bf16 to vector<16x2x256xbf16>
    %101 = tpu.concatenate %99, %100 in 1 : vector<16x14x256xbf16>, vector<16x2x256xbf16> -> vector<16x16x256xbf16>
    %102 = tpu.concatenate %45, %101, %45 in 0 : vector<2x16x256xbf16>, vector<16x16x256xbf16>, vector<2x16x256xbf16> -> vector<20x16x256xbf16>
    %103 = vector.extract_strided_slice %102 {offsets = [0, 0, 0], sizes = [16, 16, 256], strides = [1, 1, 1]} : vector<20x16x256xbf16> to vector<16x16x256xbf16>
    %c0_87 = arith.constant 0 : index
    %c0_88 = arith.constant 0 : index
    %104 = vector.load %arg19[%c0_87, %c0_88] : memref<256x256xf32, #tpu.memory_space<vmem>>, vector<256x256xf32>
    %105 = vector.shape_cast %103 : vector<16x16x256xbf16> to vector<256x256xbf16>
    %c0_89 = arith.constant 0 : index
    %c2_90 = arith.constant 2 : index
    %c0_91 = arith.constant 0 : index
    %c0_92 = arith.constant 0 : index
    %106 = vector.load %arg11[%c0_89, %c2_90, %c0_91, %c0_92] : memref<3x3x256x256xbf16, #tpu.memory_space<vmem>>, vector<1x1x256x256xbf16>
    %107 = vector.shape_cast %106 : vector<1x1x256x256xbf16> to vector<256x256xbf16>
    %cst_93 = arith.constant dense<0.000000e+00> : vector<256x256xf32>
    %108 = tpu.matmul %105, %107, %cst_93 {dimension_numbers = #tpu.dot_dimension_numbers<[1], [0], [0], [1], [0, 0, 1, 1], [], []>} : vector<256x256xbf16>, vector<256x256xbf16>, vector<256x256xf32> -> vector<256x256xf32>
    %109 = arith.addf %104, %108 : vector<256x256xf32>
    %c0_94 = arith.constant 0 : index
    %c0_95 = arith.constant 0 : index
    %110 = vector.load %arg19[%c0_94, %c0_95] : memref<256x256xf32, #tpu.memory_space<vmem>>, vector<256x256xf32>
    tpu.vector_store %arg19[%c0_94, %c0_95], %109 {strides = array<i32>} : memref<256x256xf32, #tpu.memory_space<vmem>>, vector<256x256xf32>,
    %111 = vector.extract_strided_slice %102 {offsets = [2, 0, 0], sizes = [16, 16, 256], strides = [1, 1, 1]} : vector<20x16x256xbf16> to vector<16x16x256xbf16>
    %c0_96 = arith.constant 0 : index
    %c0_97 = arith.constant 0 : index
    %112 = vector.load %arg19[%c0_96, %c0_97] : memref<256x256xf32, #tpu.memory_space<vmem>>, vector<256x256xf32>
    %113 = vector.shape_cast %111 : vector<16x16x256xbf16> to vector<256x256xbf16>
    %c1_98 = arith.constant 1 : index
    %c2_99 = arith.constant 2 : index
    %c0_100 = arith.constant 0 : index
    %c0_101 = arith.constant 0 : index
    %114 = vector.load %arg11[%c1_98, %c2_99, %c0_100, %c0_101] : memref<3x3x256x256xbf16, #tpu.memory_space<vmem>>, vector<1x1x256x256xbf16>
    %115 = vector.shape_cast %114 : vector<1x1x256x256xbf16> to vector<256x256xbf16>
    %cst_102 = arith.constant dense<0.000000e+00> : vector<256x256xf32>
    %116 = tpu.matmul %113, %115, %cst_102 {dimension_numbers = #tpu.dot_dimension_numbers<[1], [0], [0], [1], [0, 0, 1, 1], [], []>} : vector<256x256xbf16>, vector<256x256xbf16>, vector<256x256xf32> -> vector<256x256xf32>
    %117 = arith.addf %112, %116 : vector<256x256xf32>
    %c0_103 = arith.constant 0 : index
    %c0_104 = arith.constant 0 : index
    %118 = vector.load %arg19[%c0_103, %c0_104] : memref<256x256xf32, #tpu.memory_space<vmem>>, vector<256x256xf32>
    tpu.vector_store %arg19[%c0_103, %c0_104], %117 {strides = array<i32>} : memref<256x256xf32, #tpu.memory_space<vmem>>, vector<256x256xf32>,
    %119 = vector.extract_strided_slice %102 {offsets = [4, 0, 0], sizes = [16, 16, 256], strides = [1, 1, 1]} : vector<20x16x256xbf16> to vector<16x16x256xbf16>
    %c0_105 = arith.constant 0 : index
    %c0_106 = arith.constant 0 : index
    %120 = vector.load %arg19[%c0_105, %c0_106] : memref<256x256xf32, #tpu.memory_space<vmem>>, vector<256x256xf32>
    %121 = vector.shape_cast %119 : vector<16x16x256xbf16> to vector<256x256xbf16>
    %c2_107 = arith.constant 2 : index
    %c2_108 = arith.constant 2 : index
    %c0_109 = arith.constant 0 : index
    %c0_110 = arith.constant 0 : index
    %122 = vector.load %arg11[%c2_107, %c2_108, %c0_109, %c0_110] : memref<3x3x256x256xbf16, #tpu.memory_space<vmem>>, vector<1x1x256x256xbf16>
    %123 = vector.shape_cast %122 : vector<1x1x256x256xbf16> to vector<256x256xbf16>
    %cst_111 = arith.constant dense<0.000000e+00> : vector<256x256xf32>
    %124 = tpu.matmul %121, %123, %cst_111 {dimension_numbers = #tpu.dot_dimension_numbers<[1], [0], [0], [1], [0, 0, 1, 1], [], []>} : vector<256x256xbf16>, vector<256x256xbf16>, vector<256x256xf32> -> vector<256x256xf32>
    %125 = arith.addf %120, %124 : vector<256x256xf32>
    %c0_112 = arith.constant 0 : index
    %c0_113 = arith.constant 0 : index
    %126 = vector.load %arg19[%c0_112, %c0_113] : memref<256x256xf32, #tpu.memory_space<vmem>>, vector<256x256xf32>
    tpu.vector_store %arg19[%c0_112, %c0_113], %125 {strides = array<i32>} : memref<256x256xf32, #tpu.memory_space<vmem>>, vector<256x256xf32>,
    %127 = vector.shape_cast %40 : vector<256x56xbf16> to vector<16x16x56xbf16>
    %cst_114 = arith.constant 0.000000e+00 : bf16
    %128 = vector.broadcast %cst_114 : bf16 to vector<2x16x56xbf16>
    %cst_115 = arith.constant 0.000000e+00 : bf16
    %129 = vector.broadcast %cst_115 : bf16 to vector<16x2x56xbf16>
    %130 = vector.extract_strided_slice %127 {offsets = [0, 0, 0], sizes = [16, 14, 56], strides = [1, 1, 1]} : vector<16x16x56xbf16> to vector<16x14x56xbf16>
    %131 = tpu.concatenate %129, %130 in 1 : vector<16x2x56xbf16>, vector<16x14x56xbf16> -> vector<16x16x56xbf16>
    %132 = tpu.concatenate %128, %131, %128 in 0 : vector<2x16x56xbf16>, vector<16x16x56xbf16>, vector<2x16x56xbf16> -> vector<20x16x56xbf16>
    %133 = vector.extract_strided_slice %132 {offsets = [0, 0, 0], sizes = [16, 16, 56], strides = [1, 1, 1]} : vector<20x16x56xbf16> to vector<16x16x56xbf16>
    %c0_116 = arith.constant 0 : index
    %c0_117 = arith.constant 0 : index
    %134 = vector.load %arg19[%c0_116, %c0_117] : memref<256x256xf32, #tpu.memory_space<vmem>>, vector<256x256xf32>
    %135 = vector.shape_cast %133 : vector<16x16x56xbf16> to vector<256x56xbf16>
    %c0_118 = arith.constant 0 : index
    %c0_119 = arith.constant 0 : index
    %c0_120 = arith.constant 0 : index
    %c0_121 = arith.constant 0 : index
    %136 = vector.load %arg12[%c0_118, %c0_119, %c0_120, %c0_121] : memref<3x3x56x256xbf16, #tpu.memory_space<vmem>>, vector<1x1x56x256xbf16>
    %137 = vector.shape_cast %136 : vector<1x1x56x256xbf16> to vector<56x256xbf16>
    %cst_122 = arith.constant dense<0.000000e+00> : vector<256x256xf32>
    %138 = tpu.matmul %135, %137, %cst_122 {dimension_numbers = #tpu.dot_dimension_numbers<[1], [0], [0], [1], [0, 0, 1, 1], [], []>} : vector<256x56xbf16>, vector<56x256xbf16>, vector<256x256xf32> -> vector<256x256xf32>
    %139 = arith.addf %134, %138 : vector<256x256xf32>
    %c0_123 = arith.constant 0 : index
    %c0_124 = arith.constant 0 : index
    %140 = vector.load %arg19[%c0_123, %c0_124] : memref<256x256xf32, #tpu.memory_space<vmem>>, vector<256x256xf32>
    tpu.vector_store %arg19[%c0_123, %c0_124], %139 {strides = array<i32>} : memref<256x256xf32, #tpu.memory_space<vmem>>, vector<256x256xf32>,
    %141 = vector.extract_strided_slice %132 {offsets = [2, 0, 0], sizes = [16, 16, 56], strides = [1, 1, 1]} : vector<20x16x56xbf16> to vector<16x16x56xbf16>
    %c0_125 = arith.constant 0 : index
    %c0_126 = arith.constant 0 : index
    %142 = vector.load %arg19[%c0_125, %c0_126] : memref<256x256xf32, #tpu.memory_space<vmem>>, vector<256x256xf32>
    %143 = vector.shape_cast %141 : vector<16x16x56xbf16> to vector<256x56xbf16>
    %c1_127 = arith.constant 1 : index
    %c0_128 = arith.constant 0 : index
    %c0_129 = arith.constant 0 : index
    %c0_130 = arith.constant 0 : index
    %144 = vector.load %arg12[%c1_127, %c0_128, %c0_129, %c0_130] : memref<3x3x56x256xbf16, #tpu.memory_space<vmem>>, vector<1x1x56x256xbf16>
    %145 = vector.shape_cast %144 : vector<1x1x56x256xbf16> to vector<56x256xbf16>
    %cst_131 = arith.constant dense<0.000000e+00> : vector<256x256xf32>
    %146 = tpu.matmul %143, %145, %cst_131 {dimension_numbers = #tpu.dot_dimension_numbers<[1], [0], [0], [1], [0, 0, 1, 1], [], []>} : vector<256x56xbf16>, vector<56x256xbf16>, vector<256x256xf32> -> vector<256x256xf32>
    %147 = arith.addf %142, %146 : vector<256x256xf32>
    %c0_132 = arith.constant 0 : index
    %c0_133 = arith.constant 0 : index
    %148 = vector.load %arg19[%c0_132, %c0_133] : memref<256x256xf32, #tpu.memory_space<vmem>>, vector<256x256xf32>
    tpu.vector_store %arg19[%c0_132, %c0_133], %147 {strides = array<i32>} : memref<256x256xf32, #tpu.memory_space<vmem>>, vector<256x256xf32>,
    %149 = vector.extract_strided_slice %132 {offsets = [4, 0, 0], sizes = [16, 16, 56], strides = [1, 1, 1]} : vector<20x16x56xbf16> to vector<16x16x56xbf16>
    %c0_134 = arith.constant 0 : index
    %c0_135 = arith.constant 0 : index
    %150 = vector.load %arg19[%c0_134, %c0_135] : memref<256x256xf32, #tpu.memory_space<vmem>>, vector<256x256xf32>
    %151 = vector.shape_cast %149 : vector<16x16x56xbf16> to vector<256x56xbf16>
    %c2_136 = arith.constant 2 : index
    %c0_137 = arith.constant 0 : index
    %c0_138 = arith.constant 0 : index
    %c0_139 = arith.constant 0 : index
    %152 = vector.load %arg12[%c2_136, %c0_137, %c0_138, %c0_139] : memref<3x3x56x256xbf16, #tpu.memory_space<vmem>>, vector<1x1x56x256xbf16>
    %153 = vector.shape_cast %152 : vector<1x1x56x256xbf16> to vector<56x256xbf16>
    %cst_140 = arith.constant dense<0.000000e+00> : vector<256x256xf32>
    %154 = tpu.matmul %151, %153, %cst_140 {dimension_numbers = #tpu.dot_dimension_numbers<[1], [0], [0], [1], [0, 0, 1, 1], [], []>} : vector<256x56xbf16>, vector<56x256xbf16>, vector<256x256xf32> -> vector<256x256xf32>
    %155 = arith.addf %150, %154 : vector<256x256xf32>
    %c0_141 = arith.constant 0 : index
    %c0_142 = arith.constant 0 : index
    %156 = vector.load %arg19[%c0_141, %c0_142] : memref<256x256xf32, #tpu.memory_space<vmem>>, vector<256x256xf32>
    tpu.vector_store %arg19[%c0_141, %c0_142], %155 {strides = array<i32>} : memref<256x256xf32, #tpu.memory_space<vmem>>, vector<256x256xf32>,
    %157 = tpu.concatenate %128, %127, %128 in 0 : vector<2x16x56xbf16>, vector<16x16x56xbf16>, vector<2x16x56xbf16> -> vector<20x16x56xbf16>
    %158 = vector.extract_strided_slice %157 {offsets = [0, 0, 0], sizes = [16, 16, 56], strides = [1, 1, 1]} : vector<20x16x56xbf16> to vector<16x16x56xbf16>
    %c0_143 = arith.constant 0 : index
    %c0_144 = arith.constant 0 : index
    %159 = vector.load %arg19[%c0_143, %c0_144] : memref<256x256xf32, #tpu.memory_space<vmem>>, vector<256x256xf32>
    %160 = vector.shape_cast %158 : vector<16x16x56xbf16> to vector<256x56xbf16>
    %c0_145 = arith.constant 0 : index
    %c1_146 = arith.constant 1 : index
    %c0_147 = arith.constant 0 : index
    %c0_148 = arith.constant 0 : index
    %161 = vector.load %arg12[%c0_145, %c1_146, %c0_147, %c0_148] : memref<3x3x56x256xbf16, #tpu.memory_space<vmem>>, vector<1x1x56x256xbf16>
    %162 = vector.shape_cast %161 : vector<1x1x56x256xbf16> to vector<56x256xbf16>
    %cst_149 = arith.constant dense<0.000000e+00> : vector<256x256xf32>
    %163 = tpu.matmul %160, %162, %cst_149 {dimension_numbers = #tpu.dot_dimension_numbers<[1], [0], [0], [1], [0, 0, 1, 1], [], []>} : vector<256x56xbf16>, vector<56x256xbf16>, vector<256x256xf32> -> vector<256x256xf32>
    %164 = arith.addf %159, %163 : vector<256x256xf32>
    %c0_150 = arith.constant 0 : index
    %c0_151 = arith.constant 0 : index
    %165 = vector.load %arg19[%c0_150, %c0_151] : memref<256x256xf32, #tpu.memory_space<vmem>>, vector<256x256xf32>
    tpu.vector_store %arg19[%c0_150, %c0_151], %164 {strides = array<i32>} : memref<256x256xf32, #tpu.memory_space<vmem>>, vector<256x256xf32>,
    %166 = vector.extract_strided_slice %157 {offsets = [2, 0, 0], sizes = [16, 16, 56], strides = [1, 1, 1]} : vector<20x16x56xbf16> to vector<16x16x56xbf16>
    %c0_152 = arith.constant 0 : index
    %c0_153 = arith.constant 0 : index
    %167 = vector.load %arg19[%c0_152, %c0_153] : memref<256x256xf32, #tpu.memory_space<vmem>>, vector<256x256xf32>
    %168 = vector.shape_cast %166 : vector<16x16x56xbf16> to vector<256x56xbf16>
    %c1_154 = arith.constant 1 : index
    %c1_155 = arith.constant 1 : index
    %c0_156 = arith.constant 0 : index
    %c0_157 = arith.constant 0 : index
    %169 = vector.load %arg12[%c1_154, %c1_155, %c0_156, %c0_157] : memref<3x3x56x256xbf16, #tpu.memory_space<vmem>>, vector<1x1x56x256xbf16>
    %170 = vector.shape_cast %169 : vector<1x1x56x256xbf16> to vector<56x256xbf16>
    %cst_158 = arith.constant dense<0.000000e+00> : vector<256x256xf32>
    %171 = tpu.matmul %168, %170, %cst_158 {dimension_numbers = #tpu.dot_dimension_numbers<[1], [0], [0], [1], [0, 0, 1, 1], [], []>} : vector<256x56xbf16>, vector<56x256xbf16>, vector<256x256xf32> -> vector<256x256xf32>
    %172 = arith.addf %167, %171 : vector<256x256xf32>
    %c0_159 = arith.constant 0 : index
    %c0_160 = arith.constant 0 : index
    %173 = vector.load %arg19[%c0_159, %c0_160] : memref<256x256xf32, #tpu.memory_space<vmem>>, vector<256x256xf32>
    tpu.vector_store %arg19[%c0_159, %c0_160], %172 {strides = array<i32>} : memref<256x256xf32, #tpu.memory_space<vmem>>, vector<256x256xf32>,
    %174 = vector.extract_strided_slice %157 {offsets = [4, 0, 0], sizes = [16, 16, 56], strides = [1, 1, 1]} : vector<20x16x56xbf16> to vector<16x16x56xbf16>
    %c0_161 = arith.constant 0 : index
    %c0_162 = arith.constant 0 : index
    %175 = vector.load %arg19[%c0_161, %c0_162] : memref<256x256xf32, #tpu.memory_space<vmem>>, vector<256x256xf32>
    %176 = vector.shape_cast %174 : vector<16x16x56xbf16> to vector<256x56xbf16>
    %c2_163 = arith.constant 2 : index
    %c1_164 = arith.constant 1 : index
    %c0_165 = arith.constant 0 : index
    %c0_166 = arith.constant 0 : index
    %177 = vector.load %arg12[%c2_163, %c1_164, %c0_165, %c0_166] : memref<3x3x56x256xbf16, #tpu.memory_space<vmem>>, vector<1x1x56x256xbf16>
    %178 = vector.shape_cast %177 : vector<1x1x56x256xbf16> to vector<56x256xbf16>
    %cst_167 = arith.constant dense<0.000000e+00> : vector<256x256xf32>
    %179 = tpu.matmul %176, %178, %cst_167 {dimension_numbers = #tpu.dot_dimension_numbers<[1], [0], [0], [1], [0, 0, 1, 1], [], []>} : vector<256x56xbf16>, vector<56x256xbf16>, vector<256x256xf32> -> vector<256x256xf32>
    %180 = arith.addf %175, %179 : vector<256x256xf32>
    %c0_168 = arith.constant 0 : index
    %c0_169 = arith.constant 0 : index
    %181 = vector.load %arg19[%c0_168, %c0_169] : memref<256x256xf32, #tpu.memory_space<vmem>>, vector<256x256xf32>
    tpu.vector_store %arg19[%c0_168, %c0_169], %180 {strides = array<i32>} : memref<256x256xf32, #tpu.memory_space<vmem>>, vector<256x256xf32>,
    %182 = vector.extract_strided_slice %127 {offsets = [0, 2, 0], sizes = [16, 14, 56], strides = [1, 1, 1]} : vector<16x16x56xbf16> to vector<16x14x56xbf16>
    %cst_170 = arith.constant 0.000000e+00 : bf16
    %183 = vector.broadcast %cst_170 : bf16 to vector<16x2x56xbf16>
    %184 = tpu.concatenate %182, %183 in 1 : vector<16x14x56xbf16>, vector<16x2x56xbf16> -> vector<16x16x56xbf16>
    %185 = tpu.concatenate %128, %184, %128 in 0 : vector<2x16x56xbf16>, vector<16x16x56xbf16>, vector<2x16x56xbf16> -> vector<20x16x56xbf16>
    %186 = vector.extract_strided_slice %185 {offsets = [0, 0, 0], sizes = [16, 16, 56], strides = [1, 1, 1]} : vector<20x16x56xbf16> to vector<16x16x56xbf16>
    %c0_171 = arith.constant 0 : index
    %c0_172 = arith.constant 0 : index
    %187 = vector.load %arg19[%c0_171, %c0_172] : memref<256x256xf32, #tpu.memory_space<vmem>>, vector<256x256xf32>
    %188 = vector.shape_cast %186 : vector<16x16x56xbf16> to vector<256x56xbf16>
    %c0_173 = arith.constant 0 : index
    %c2_174 = arith.constant 2 : index
    %c0_175 = arith.constant 0 : index
    %c0_176 = arith.constant 0 : index
    %189 = vector.load %arg12[%c0_173, %c2_174, %c0_175, %c0_176] : memref<3x3x56x256xbf16, #tpu.memory_space<vmem>>, vector<1x1x56x256xbf16>
    %190 = vector.shape_cast %189 : vector<1x1x56x256xbf16> to vector<56x256xbf16>
    %cst_177 = arith.constant dense<0.000000e+00> : vector<256x256xf32>
    %191 = tpu.matmul %188, %190, %cst_177 {dimension_numbers = #tpu.dot_dimension_numbers<[1], [0], [0], [1], [0, 0, 1, 1], [], []>} : vector<256x56xbf16>, vector<56x256xbf16>, vector<256x256xf32> -> vector<256x256xf32>
    %192 = arith.addf %187, %191 : vector<256x256xf32>
    %c0_178 = arith.constant 0 : index
    %c0_179 = arith.constant 0 : index
    %193 = vector.load %arg19[%c0_178, %c0_179] : memref<256x256xf32, #tpu.memory_space<vmem>>, vector<256x256xf32>
    tpu.vector_store %arg19[%c0_178, %c0_179], %192 {strides = array<i32>} : memref<256x256xf32, #tpu.memory_space<vmem>>, vector<256x256xf32>,
    %194 = vector.extract_strided_slice %185 {offsets = [2, 0, 0], sizes = [16, 16, 56], strides = [1, 1, 1]} : vector<20x16x56xbf16> to vector<16x16x56xbf16>
    %c0_180 = arith.constant 0 : index
    %c0_181 = arith.constant 0 : index
    %195 = vector.load %arg19[%c0_180, %c0_181] : memref<256x256xf32, #tpu.memory_space<vmem>>, vector<256x256xf32>
    %196 = vector.shape_cast %194 : vector<16x16x56xbf16> to vector<256x56xbf16>
    %c1_182 = arith.constant 1 : index
    %c2_183 = arith.constant 2 : index
    %c0_184 = arith.constant 0 : index
    %c0_185 = arith.constant 0 : index
    %197 = vector.load %arg12[%c1_182, %c2_183, %c0_184, %c0_185] : memref<3x3x56x256xbf16, #tpu.memory_space<vmem>>, vector<1x1x56x256xbf16>
    %198 = vector.shape_cast %197 : vector<1x1x56x256xbf16> to vector<56x256xbf16>
    %cst_186 = arith.constant dense<0.000000e+00> : vector<256x256xf32>
    %199 = tpu.matmul %196, %198, %cst_186 {dimension_numbers = #tpu.dot_dimension_numbers<[1], [0], [0], [1], [0, 0, 1, 1], [], []>} : vector<256x56xbf16>, vector<56x256xbf16>, vector<256x256xf32> -> vector<256x256xf32>
    %200 = arith.addf %195, %199 : vector<256x256xf32>
    %c0_187 = arith.constant 0 : index
    %c0_188 = arith.constant 0 : index
    %201 = vector.load %arg19[%c0_187, %c0_188] : memref<256x256xf32, #tpu.memory_space<vmem>>, vector<256x256xf32>
    tpu.vector_store %arg19[%c0_187, %c0_188], %200 {strides = array<i32>} : memref<256x256xf32, #tpu.memory_space<vmem>>, vector<256x256xf32>,
    %202 = vector.extract_strided_slice %185 {offsets = [4, 0, 0], sizes = [16, 16, 56], strides = [1, 1, 1]} : vector<20x16x56xbf16> to vector<16x16x56xbf16>
    %c0_189 = arith.constant 0 : index
    %c0_190 = arith.constant 0 : index
    %203 = vector.load %arg19[%c0_189, %c0_190] : memref<256x256xf32, #tpu.memory_space<vmem>>, vector<256x256xf32>
    %204 = vector.shape_cast %202 : vector<16x16x56xbf16> to vector<256x56xbf16>
    %c2_191 = arith.constant 2 : index
    %c2_192 = arith.constant 2 : index
    %c0_193 = arith.constant 0 : index
    %c0_194 = arith.constant 0 : index
    %205 = vector.load %arg12[%c2_191, %c2_192, %c0_193, %c0_194] : memref<3x3x56x256xbf16, #tpu.memory_space<vmem>>, vector<1x1x56x256xbf16>
    %206 = vector.shape_cast %205 : vector<1x1x56x256xbf16> to vector<56x256xbf16>
    %cst_195 = arith.constant dense<0.000000e+00> : vector<256x256xf32>
    %207 = tpu.matmul %204, %206, %cst_195 {dimension_numbers = #tpu.dot_dimension_numbers<[1], [0], [0], [1], [0, 0, 1, 1], [], []>} : vector<256x56xbf16>, vector<56x256xbf16>, vector<256x256xf32> -> vector<256x256xf32>
    %208 = arith.addf %203, %207 : vector<256x256xf32>
    %c0_196 = arith.constant 0 : index
    %c0_197 = arith.constant 0 : index
    %209 = vector.load %arg19[%c0_196, %c0_197] : memref<256x256xf32, #tpu.memory_space<vmem>>, vector<256x256xf32>
    tpu.vector_store %arg19[%c0_196, %c0_197], %208 {strides = array<i32>} : memref<256x256xf32, #tpu.memory_space<vmem>>, vector<256x256xf32>,
    %c0_198 = arith.constant 0 : index
    %c0_199 = arith.constant 0 : index
    %210 = vector.load %arg19[%c0_198, %c0_199] : memref<256x256xf32, #tpu.memory_space<vmem>>, vector<256x256xf32>
    %c0_200 = arith.constant 0 : index
    %c0_201 = arith.constant 0 : index
    %211 = vector.load %arg13[%c0_200, %c0_201] : memref<1x256xf32, #tpu.memory_space<vmem>>, vector<1x256xf32>
    %212 = vector.broadcast %211 : vector<1x256xf32> to vector<256x256xf32>
    %213 = arith.addf %210, %212 : vector<256x256xf32>
    %cst_202 = arith.constant 0.000000e+00 : f32
    %214 = vector.broadcast %cst_202 : f32 to vector<256x256xf32>
    %215 = arith.maximumf %213, %214 : vector<256x256xf32>
    %216 = arith.truncf %215 : vector<256x256xf32> to vector<256x256xbf16>
    %cst_203 = arith.constant 0.000000e+00 : f32
    %217 = vector.broadcast %cst_203 : f32 to vector<256x256xf32>
    %c0_204 = arith.constant 0 : index
    %c0_205 = arith.constant 0 : index
    %218 = vector.load %arg19[%c0_204, %c0_205] : memref<256x256xf32, #tpu.memory_space<vmem>>, vector<256x256xf32>
    tpu.vector_store %arg19[%c0_204, %c0_205], %217 {strides = array<i32>} : memref<256x256xf32, #tpu.memory_space<vmem>>, vector<256x256xf32>,
    %219 = vector.shape_cast %216 : vector<256x256xbf16> to vector<16x16x256xbf16>
    %cst_206 = arith.constant 0.000000e+00 : bf16
    %220 = vector.broadcast %cst_206 : bf16 to vector<1x16x256xbf16>
    %cst_207 = arith.constant 0.000000e+00 : bf16
    %221 = vector.broadcast %cst_207 : bf16 to vector<16x1x256xbf16>
    %222 = vector.extract_strided_slice %219 {offsets = [0, 0, 0], sizes = [16, 15, 256], strides = [1, 1, 1]} : vector<16x16x256xbf16> to vector<16x15x256xbf16>
    %223 = tpu.concatenate %221, %222 in 1 : vector<16x1x256xbf16>, vector<16x15x256xbf16> -> vector<16x16x256xbf16>
    %224 = tpu.concatenate %220, %223, %220 in 0 : vector<1x16x256xbf16>, vector<16x16x256xbf16>, vector<1x16x256xbf16> -> vector<18x16x256xbf16>
    %225 = vector.extract_strided_slice %224 {offsets = [0, 0, 0], sizes = [16, 16, 256], strides = [1, 1, 1]} : vector<18x16x256xbf16> to vector<16x16x256xbf16>
    %c0_208 = arith.constant 0 : index
    %c0_209 = arith.constant 0 : index
    %226 = vector.load %arg19[%c0_208, %c0_209] : memref<256x256xf32, #tpu.memory_space<vmem>>, vector<256x256xf32>
    %227 = vector.shape_cast %225 : vector<16x16x256xbf16> to vector<256x256xbf16>
    %c0_210 = arith.constant 0 : index
    %c0_211 = arith.constant 0 : index
    %c0_212 = arith.constant 0 : index
    %c0_213 = arith.constant 0 : index
    %228 = vector.load %arg14[%c0_210, %c0_211, %c0_212, %c0_213] : memref<3x3x256x256xbf16, #tpu.memory_space<vmem>>, vector<1x1x256x256xbf16>
    %229 = vector.shape_cast %228 : vector<1x1x256x256xbf16> to vector<256x256xbf16>
    %cst_214 = arith.constant dense<0.000000e+00> : vector<256x256xf32>
    %230 = tpu.matmul %227, %229, %cst_214 {dimension_numbers = #tpu.dot_dimension_numbers<[1], [0], [0], [1], [0, 0, 1, 1], [], []>} : vector<256x256xbf16>, vector<256x256xbf16>, vector<256x256xf32> -> vector<256x256xf32>
    %231 = arith.addf %226, %230 : vector<256x256xf32>
    %c0_215 = arith.constant 0 : index
    %c0_216 = arith.constant 0 : index
    %232 = vector.load %arg19[%c0_215, %c0_216] : memref<256x256xf32, #tpu.memory_space<vmem>>, vector<256x256xf32>
    tpu.vector_store %arg19[%c0_215, %c0_216], %231 {strides = array<i32>} : memref<256x256xf32, #tpu.memory_space<vmem>>, vector<256x256xf32>,
    %233 = vector.extract_strided_slice %224 {offsets = [1, 0, 0], sizes = [16, 16, 256], strides = [1, 1, 1]} : vector<18x16x256xbf16> to vector<16x16x256xbf16>
    %c0_217 = arith.constant 0 : index
    %c0_218 = arith.constant 0 : index
    %234 = vector.load %arg19[%c0_217, %c0_218] : memref<256x256xf32, #tpu.memory_space<vmem>>, vector<256x256xf32>
    %235 = vector.shape_cast %233 : vector<16x16x256xbf16> to vector<256x256xbf16>
    %c1_219 = arith.constant 1 : index
    %c0_220 = arith.constant 0 : index
    %c0_221 = arith.constant 0 : index
    %c0_222 = arith.constant 0 : index
    %236 = vector.load %arg14[%c1_219, %c0_220, %c0_221, %c0_222] : memref<3x3x256x256xbf16, #tpu.memory_space<vmem>>, vector<1x1x256x256xbf16>
    %237 = vector.shape_cast %236 : vector<1x1x256x256xbf16> to vector<256x256xbf16>
    %cst_223 = arith.constant dense<0.000000e+00> : vector<256x256xf32>
    %238 = tpu.matmul %235, %237, %cst_223 {dimension_numbers = #tpu.dot_dimension_numbers<[1], [0], [0], [1], [0, 0, 1, 1], [], []>} : vector<256x256xbf16>, vector<256x256xbf16>, vector<256x256xf32> -> vector<256x256xf32>
    %239 = arith.addf %234, %238 : vector<256x256xf32>
    %c0_224 = arith.constant 0 : index
    %c0_225 = arith.constant 0 : index
    %240 = vector.load %arg19[%c0_224, %c0_225] : memref<256x256xf32, #tpu.memory_space<vmem>>, vector<256x256xf32>
    tpu.vector_store %arg19[%c0_224, %c0_225], %239 {strides = array<i32>} : memref<256x256xf32, #tpu.memory_space<vmem>>, vector<256x256xf32>,
    %241 = vector.extract_strided_slice %224 {offsets = [2, 0, 0], sizes = [16, 16, 256], strides = [1, 1, 1]} : vector<18x16x256xbf16> to vector<16x16x256xbf16>
    %c0_226 = arith.constant 0 : index
    %c0_227 = arith.constant 0 : index
    %242 = vector.load %arg19[%c0_226, %c0_227] : memref<256x256xf32, #tpu.memory_space<vmem>>, vector<256x256xf32>
    %243 = vector.shape_cast %241 : vector<16x16x256xbf16> to vector<256x256xbf16>
    %c2_228 = arith.constant 2 : index
    %c0_229 = arith.constant 0 : index
    %c0_230 = arith.constant 0 : index
    %c0_231 = arith.constant 0 : index
    %244 = vector.load %arg14[%c2_228, %c0_229, %c0_230, %c0_231] : memref<3x3x256x256xbf16, #tpu.memory_space<vmem>>, vector<1x1x256x256xbf16>
    %245 = vector.shape_cast %244 : vector<1x1x256x256xbf16> to vector<256x256xbf16>
    %cst_232 = arith.constant dense<0.000000e+00> : vector<256x256xf32>
    %246 = tpu.matmul %243, %245, %cst_232 {dimension_numbers = #tpu.dot_dimension_numbers<[1], [0], [0], [1], [0, 0, 1, 1], [], []>} : vector<256x256xbf16>, vector<256x256xbf16>, vector<256x256xf32> -> vector<256x256xf32>
    %247 = arith.addf %242, %246 : vector<256x256xf32>
    %c0_233 = arith.constant 0 : index
    %c0_234 = arith.constant 0 : index
    %248 = vector.load %arg19[%c0_233, %c0_234] : memref<256x256xf32, #tpu.memory_space<vmem>>, vector<256x256xf32>
    tpu.vector_store %arg19[%c0_233, %c0_234], %247 {strides = array<i32>} : memref<256x256xf32, #tpu.memory_space<vmem>>, vector<256x256xf32>,
    %249 = tpu.concatenate %220, %219, %220 in 0 : vector<1x16x256xbf16>, vector<16x16x256xbf16>, vector<1x16x256xbf16> -> vector<18x16x256xbf16>
    %250 = vector.extract_strided_slice %249 {offsets = [0, 0, 0], sizes = [16, 16, 256], strides = [1, 1, 1]} : vector<18x16x256xbf16> to vector<16x16x256xbf16>
    %c0_235 = arith.constant 0 : index
    %c0_236 = arith.constant 0 : index
    %251 = vector.load %arg19[%c0_235, %c0_236] : memref<256x256xf32, #tpu.memory_space<vmem>>, vector<256x256xf32>
    %252 = vector.shape_cast %250 : vector<16x16x256xbf16> to vector<256x256xbf16>
    %c0_237 = arith.constant 0 : index
    %c1_238 = arith.constant 1 : index
    %c0_239 = arith.constant 0 : index
    %c0_240 = arith.constant 0 : index
    %253 = vector.load %arg14[%c0_237, %c1_238, %c0_239, %c0_240] : memref<3x3x256x256xbf16, #tpu.memory_space<vmem>>, vector<1x1x256x256xbf16>
    %254 = vector.shape_cast %253 : vector<1x1x256x256xbf16> to vector<256x256xbf16>
    %cst_241 = arith.constant dense<0.000000e+00> : vector<256x256xf32>
    %255 = tpu.matmul %252, %254, %cst_241 {dimension_numbers = #tpu.dot_dimension_numbers<[1], [0], [0], [1], [0, 0, 1, 1], [], []>} : vector<256x256xbf16>, vector<256x256xbf16>, vector<256x256xf32> -> vector<256x256xf32>
    %256 = arith.addf %251, %255 : vector<256x256xf32>
    %c0_242 = arith.constant 0 : index
    %c0_243 = arith.constant 0 : index
    %257 = vector.load %arg19[%c0_242, %c0_243] : memref<256x256xf32, #tpu.memory_space<vmem>>, vector<256x256xf32>
    tpu.vector_store %arg19[%c0_242, %c0_243], %256 {strides = array<i32>} : memref<256x256xf32, #tpu.memory_space<vmem>>, vector<256x256xf32>,
    %258 = vector.extract_strided_slice %249 {offsets = [1, 0, 0], sizes = [16, 16, 256], strides = [1, 1, 1]} : vector<18x16x256xbf16> to vector<16x16x256xbf16>
    %c0_244 = arith.constant 0 : index
    %c0_245 = arith.constant 0 : index
    %259 = vector.load %arg19[%c0_244, %c0_245] : memref<256x256xf32, #tpu.memory_space<vmem>>, vector<256x256xf32>
    %260 = vector.shape_cast %258 : vector<16x16x256xbf16> to vector<256x256xbf16>
    %c1_246 = arith.constant 1 : index
    %c1_247 = arith.constant 1 : index
    %c0_248 = arith.constant 0 : index
    %c0_249 = arith.constant 0 : index
    %261 = vector.load %arg14[%c1_246, %c1_247, %c0_248, %c0_249] : memref<3x3x256x256xbf16, #tpu.memory_space<vmem>>, vector<1x1x256x256xbf16>
    %262 = vector.shape_cast %261 : vector<1x1x256x256xbf16> to vector<256x256xbf16>
    %cst_250 = arith.constant dense<0.000000e+00> : vector<256x256xf32>
    %263 = tpu.matmul %260, %262, %cst_250 {dimension_numbers = #tpu.dot_dimension_numbers<[1], [0], [0], [1], [0, 0, 1, 1], [], []>} : vector<256x256xbf16>, vector<256x256xbf16>, vector<256x256xf32> -> vector<256x256xf32>
    %264 = arith.addf %259, %263 : vector<256x256xf32>
    %c0_251 = arith.constant 0 : index
    %c0_252 = arith.constant 0 : index
    %265 = vector.load %arg19[%c0_251, %c0_252] : memref<256x256xf32, #tpu.memory_space<vmem>>, vector<256x256xf32>
    tpu.vector_store %arg19[%c0_251, %c0_252], %264 {strides = array<i32>} : memref<256x256xf32, #tpu.memory_space<vmem>>, vector<256x256xf32>,
    %266 = vector.extract_strided_slice %249 {offsets = [2, 0, 0], sizes = [16, 16, 256], strides = [1, 1, 1]} : vector<18x16x256xbf16> to vector<16x16x256xbf16>
    %c0_253 = arith.constant 0 : index
    %c0_254 = arith.constant 0 : index
    %267 = vector.load %arg19[%c0_253, %c0_254] : memref<256x256xf32, #tpu.memory_space<vmem>>, vector<256x256xf32>
    %268 = vector.shape_cast %266 : vector<16x16x256xbf16> to vector<256x256xbf16>
    %c2_255 = arith.constant 2 : index
    %c1_256 = arith.constant 1 : index
    %c0_257 = arith.constant 0 : index
    %c0_258 = arith.constant 0 : index
    %269 = vector.load %arg14[%c2_255, %c1_256, %c0_257, %c0_258] : memref<3x3x256x256xbf16, #tpu.memory_space<vmem>>, vector<1x1x256x256xbf16>
    %270 = vector.shape_cast %269 : vector<1x1x256x256xbf16> to vector<256x256xbf16>
    %cst_259 = arith.constant dense<0.000000e+00> : vector<256x256xf32>
    %271 = tpu.matmul %268, %270, %cst_259 {dimension_numbers = #tpu.dot_dimension_numbers<[1], [0], [0], [1], [0, 0, 1, 1], [], []>} : vector<256x256xbf16>, vector<256x256xbf16>, vector<256x256xf32> -> vector<256x256xf32>
    %272 = arith.addf %267, %271 : vector<256x256xf32>
    %c0_260 = arith.constant 0 : index
    %c0_261 = arith.constant 0 : index
    %273 = vector.load %arg19[%c0_260, %c0_261] : memref<256x256xf32, #tpu.memory_space<vmem>>, vector<256x256xf32>
    tpu.vector_store %arg19[%c0_260, %c0_261], %272 {strides = array<i32>} : memref<256x256xf32, #tpu.memory_space<vmem>>, vector<256x256xf32>,
    %274 = vector.extract_strided_slice %219 {offsets = [0, 1, 0], sizes = [16, 15, 256], strides = [1, 1, 1]} : vector<16x16x256xbf16> to vector<16x15x256xbf16>
    %cst_262 = arith.constant 0.000000e+00 : bf16
    %275 = vector.broadcast %cst_262 : bf16 to vector<16x1x256xbf16>
    %276 = tpu.concatenate %274, %275 in 1 : vector<16x15x256xbf16>, vector<16x1x256xbf16> -> vector<16x16x256xbf16>
    %277 = tpu.concatenate %220, %276, %220 in 0 : vector<1x16x256xbf16>, vector<16x16x256xbf16>, vector<1x16x256xbf16> -> vector<18x16x256xbf16>
    %278 = vector.extract_strided_slice %277 {offsets = [0, 0, 0], sizes = [16, 16, 256], strides = [1, 1, 1]} : vector<18x16x256xbf16> to vector<16x16x256xbf16>
    %c0_263 = arith.constant 0 : index
    %c0_264 = arith.constant 0 : index
    %279 = vector.load %arg19[%c0_263, %c0_264] : memref<256x256xf32, #tpu.memory_space<vmem>>, vector<256x256xf32>
    %280 = vector.shape_cast %278 : vector<16x16x256xbf16> to vector<256x256xbf16>
    %c0_265 = arith.constant 0 : index
    %c2_266 = arith.constant 2 : index
    %c0_267 = arith.constant 0 : index
    %c0_268 = arith.constant 0 : index
    %281 = vector.load %arg14[%c0_265, %c2_266, %c0_267, %c0_268] : memref<3x3x256x256xbf16, #tpu.memory_space<vmem>>, vector<1x1x256x256xbf16>
    %282 = vector.shape_cast %281 : vector<1x1x256x256xbf16> to vector<256x256xbf16>
    %cst_269 = arith.constant dense<0.000000e+00> : vector<256x256xf32>
    %283 = tpu.matmul %280, %282, %cst_269 {dimension_numbers = #tpu.dot_dimension_numbers<[1], [0], [0], [1], [0, 0, 1, 1], [], []>} : vector<256x256xbf16>, vector<256x256xbf16>, vector<256x256xf32> -> vector<256x256xf32>
    %284 = arith.addf %279, %283 : vector<256x256xf32>
    %c0_270 = arith.constant 0 : index
    %c0_271 = arith.constant 0 : index
    %285 = vector.load %arg19[%c0_270, %c0_271] : memref<256x256xf32, #tpu.memory_space<vmem>>, vector<256x256xf32>
    tpu.vector_store %arg19[%c0_270, %c0_271], %284 {strides = array<i32>} : memref<256x256xf32, #tpu.memory_space<vmem>>, vector<256x256xf32>,
    %286 = vector.extract_strided_slice %277 {offsets = [1, 0, 0], sizes = [16, 16, 256], strides = [1, 1, 1]} : vector<18x16x256xbf16> to vector<16x16x256xbf16>
    %c0_272 = arith.constant 0 : index
    %c0_273 = arith.constant 0 : index
    %287 = vector.load %arg19[%c0_272, %c0_273] : memref<256x256xf32, #tpu.memory_space<vmem>>, vector<256x256xf32>
    %288 = vector.shape_cast %286 : vector<16x16x256xbf16> to vector<256x256xbf16>
    %c1_274 = arith.constant 1 : index
    %c2_275 = arith.constant 2 : index
    %c0_276 = arith.constant 0 : index
    %c0_277 = arith.constant 0 : index
    %289 = vector.load %arg14[%c1_274, %c2_275, %c0_276, %c0_277] : memref<3x3x256x256xbf16, #tpu.memory_space<vmem>>, vector<1x1x256x256xbf16>
    %290 = vector.shape_cast %289 : vector<1x1x256x256xbf16> to vector<256x256xbf16>
    %cst_278 = arith.constant dense<0.000000e+00> : vector<256x256xf32>
    %291 = tpu.matmul %288, %290, %cst_278 {dimension_numbers = #tpu.dot_dimension_numbers<[1], [0], [0], [1], [0, 0, 1, 1], [], []>} : vector<256x256xbf16>, vector<256x256xbf16>, vector<256x256xf32> -> vector<256x256xf32>
    %292 = arith.addf %287, %291 : vector<256x256xf32>
    %c0_279 = arith.constant 0 : index
    %c0_280 = arith.constant 0 : index
    %293 = vector.load %arg19[%c0_279, %c0_280] : memref<256x256xf32, #tpu.memory_space<vmem>>, vector<256x256xf32>
    tpu.vector_store %arg19[%c0_279, %c0_280], %292 {strides = array<i32>} : memref<256x256xf32, #tpu.memory_space<vmem>>, vector<256x256xf32>,
    %294 = vector.extract_strided_slice %277 {offsets = [2, 0, 0], sizes = [16, 16, 256], strides = [1, 1, 1]} : vector<18x16x256xbf16> to vector<16x16x256xbf16>
    %c0_281 = arith.constant 0 : index
    %c0_282 = arith.constant 0 : index
    %295 = vector.load %arg19[%c0_281, %c0_282] : memref<256x256xf32, #tpu.memory_space<vmem>>, vector<256x256xf32>
    %296 = vector.shape_cast %294 : vector<16x16x256xbf16> to vector<256x256xbf16>
    %c2_283 = arith.constant 2 : index
    %c2_284 = arith.constant 2 : index
    %c0_285 = arith.constant 0 : index
    %c0_286 = arith.constant 0 : index
    %297 = vector.load %arg14[%c2_283, %c2_284, %c0_285, %c0_286] : memref<3x3x256x256xbf16, #tpu.memory_space<vmem>>, vector<1x1x256x256xbf16>
    %298 = vector.shape_cast %297 : vector<1x1x256x256xbf16> to vector<256x256xbf16>
    %cst_287 = arith.constant dense<0.000000e+00> : vector<256x256xf32>
    %299 = tpu.matmul %296, %298, %cst_287 {dimension_numbers = #tpu.dot_dimension_numbers<[1], [0], [0], [1], [0, 0, 1, 1], [], []>} : vector<256x256xbf16>, vector<256x256xbf16>, vector<256x256xf32> -> vector<256x256xf32>
    %300 = arith.addf %295, %299 : vector<256x256xf32>
    %c0_288 = arith.constant 0 : index
    %c0_289 = arith.constant 0 : index
    %301 = vector.load %arg19[%c0_288, %c0_289] : memref<256x256xf32, #tpu.memory_space<vmem>>, vector<256x256xf32>
    tpu.vector_store %arg19[%c0_288, %c0_289], %300 {strides = array<i32>} : memref<256x256xf32, #tpu.memory_space<vmem>>, vector<256x256xf32>,
    %c0_290 = arith.constant 0 : index
    %c0_291 = arith.constant 0 : index
    %302 = vector.load %arg19[%c0_290, %c0_291] : memref<256x256xf32, #tpu.memory_space<vmem>>, vector<256x256xf32>
    %c0_292 = arith.constant 0 : index
    %c0_293 = arith.constant 0 : index
    %303 = vector.load %arg15[%c0_292, %c0_293] : memref<1x256xf32, #tpu.memory_space<vmem>>, vector<1x256xf32>
    %304 = vector.broadcast %303 : vector<1x256xf32> to vector<256x256xf32>
    %305 = arith.addf %302, %304 : vector<256x256xf32>
    %cst_294 = arith.constant 0.000000e+00 : f32
    %306 = vector.broadcast %cst_294 : f32 to vector<256x256xf32>
    %307 = arith.maximumf %305, %306 : vector<256x256xf32>
    %308 = arith.truncf %307 : vector<256x256xf32> to vector<256x256xbf16>
    %c0_295 = arith.constant 0 : index
    %c0_296 = arith.constant 0 : index
    %309 = vector.load %arg16[%c0_295, %c0_296] : memref<8x256xbf16, #tpu.memory_space<vmem>>, vector<8x256xbf16>
    %cst_297 = arith.constant dense<0.000000e+00> : vector<8x256xf32>
    %310 = tpu.matmul %309, %308, %cst_297 {dimension_numbers = #tpu.dot_dimension_numbers<[1], [1], [0], [0], [0, 0, 1, 0], [], []>} : vector<8x256xbf16>, vector<256x256xbf16>, vector<8x256xf32> -> vector<8x256xf32>
    %c0_298 = arith.constant 0 : index
    %c0_299 = arith.constant 0 : index
    %311 = vector.load %arg17[%c0_298, %c0_299] : memref<8x1xf32, #tpu.memory_space<vmem>>, vector<8x1xf32>
    %312 = vector.broadcast %311 : vector<8x1xf32> to vector<8x256xf32>
    %313 = arith.addf %310, %312 : vector<8x256xf32>
    %c0_300 = arith.constant 0 : index
    %c0_301 = arith.constant 0 : index
    %c0_302 = arith.constant 0 : index
    %314 = vector.load %arg18[%c0_300, %c0_301, %c0_302] : memref<1x8x256xf32, #tpu.memory_space<vmem>>, vector<1x8x256xf32>
    %315 = vector.shape_cast %314 : vector<1x8x256xf32> to vector<8x256xf32>
    %316 = vector.shape_cast %313 : vector<8x256xf32> to vector<1x8x256xf32>
    tpu.vector_store %arg18[%c0_300, %c0_301, %c0_302], %316 {strides = array<i32>} : memref<1x8x256xf32, #tpu.memory_space<vmem>>, vector<1x8x256xf32>,
    return
  }
  func.func @transform_0(%arg0: i32) -> (i32, i32, i32) {
    %c0_i32 = arith.constant 0 : i32
    %c0_i32_0 = arith.constant 0 : i32
    %c0_i32_1 = arith.constant 0 : i32
    return %arg0, %c0_i32, %c0_i32_0 : i32, i32, i32
  }
  func.func @transform_1(%arg0: i32) -> (i32, i32, i32) {
    %c0_i32 = arith.constant 0 : i32
    %c0_i32_0 = arith.constant 0 : i32
    %c0_i32_1 = arith.constant 0 : i32
    return %arg0, %c0_i32, %c0_i32_0 : i32, i32, i32
  }
  func.func @transform_2(%arg0: i32) -> (i32, i32, i32, i32) {
    %c0_i32 = arith.constant 0 : i32
    %c0_i32_0 = arith.constant 0 : i32
    %c0_i32_1 = arith.constant 0 : i32
    %c0_i32_2 = arith.constant 0 : i32
    return %arg0, %c0_i32, %c0_i32_0, %c0_i32_1 : i32, i32, i32, i32
  }
  func.func @transform_3(%arg0: i32) -> (i32, i32, i32, i32) {
    %c0_i32 = arith.constant 0 : i32
    %c0_i32_0 = arith.constant 0 : i32
    %c0_i32_1 = arith.constant 0 : i32
    %c0_i32_2 = arith.constant 0 : i32
    return %arg0, %c0_i32, %c0_i32_0, %c0_i32_1 : i32, i32, i32, i32
  }
  func.func @transform_4(%arg0: i32) -> (i32, i32) {
    %c0_i32 = arith.constant 0 : i32
    %c0_i32_0 = arith.constant 0 : i32
    %c0_i32_1 = arith.constant 0 : i32
    return %c0_i32, %c0_i32_0 : i32, i32
  }
  func.func @transform_5(%arg0: i32) -> (i32, i32) {
    %c0_i32 = arith.constant 0 : i32
    %c0_i32_0 = arith.constant 0 : i32
    %c0_i32_1 = arith.constant 0 : i32
    return %c0_i32, %c0_i32_0 : i32, i32
  }
  func.func @transform_6(%arg0: i32) -> (i32, i32) {
    %c0_i32 = arith.constant 0 : i32
    %c0_i32_0 = arith.constant 0 : i32
    %c0_i32_1 = arith.constant 0 : i32
    return %c0_i32, %c0_i32_0 : i32, i32
  }
  func.func @transform_7(%arg0: i32) -> (i32, i32) {
    %c0_i32 = arith.constant 0 : i32
    %c0_i32_0 = arith.constant 0 : i32
    %c0_i32_1 = arith.constant 0 : i32
    return %c0_i32, %c0_i32_0 : i32, i32
  }
  func.func @transform_8(%arg0: i32) -> (i32, i32) {
    %c0_i32 = arith.constant 0 : i32
    %c0_i32_0 = arith.constant 0 : i32
    %c0_i32_1 = arith.constant 0 : i32
    return %c0_i32, %c0_i32_0 : i32, i32
  }
  func.func @transform_9(%arg0: i32) -> (i32, i32) {
    %c0_i32 = arith.constant 0 : i32
    %c0_i32_0 = arith.constant 0 : i32
    %c0_i32_1 = arith.constant 0 : i32
    return %c0_i32, %c0_i32_0 : i32, i32
  }
  func.func @transform_10(%arg0: i32) -> (i32, i32, i32, i32) {
    %c0_i32 = arith.constant 0 : i32
    %c0_i32_0 = arith.constant 0 : i32
    %c0_i32_1 = arith.constant 0 : i32
    %c0_i32_2 = arith.constant 0 : i32
    %c0_i32_3 = arith.constant 0 : i32
    return %c0_i32, %c0_i32_0, %c0_i32_1, %c0_i32_2 : i32, i32, i32, i32
  }
  func.func @transform_11(%arg0: i32) -> (i32, i32, i32, i32) {
    %c0_i32 = arith.constant 0 : i32
    %c0_i32_0 = arith.constant 0 : i32
    %c0_i32_1 = arith.constant 0 : i32
    %c0_i32_2 = arith.constant 0 : i32
    %c0_i32_3 = arith.constant 0 : i32
    return %c0_i32, %c0_i32_0, %c0_i32_1, %c0_i32_2 : i32, i32, i32, i32
  }
  func.func @transform_12(%arg0: i32) -> (i32, i32) {
    %c0_i32 = arith.constant 0 : i32
    %c0_i32_0 = arith.constant 0 : i32
    %c0_i32_1 = arith.constant 0 : i32
    return %c0_i32, %c0_i32_0 : i32, i32
  }
  func.func @transform_13(%arg0: i32) -> (i32, i32, i32, i32) {
    %c0_i32 = arith.constant 0 : i32
    %c0_i32_0 = arith.constant 0 : i32
    %c0_i32_1 = arith.constant 0 : i32
    %c0_i32_2 = arith.constant 0 : i32
    %c0_i32_3 = arith.constant 0 : i32
    return %c0_i32, %c0_i32_0, %c0_i32_1, %c0_i32_2 : i32, i32, i32, i32
  }
  func.func @transform_14(%arg0: i32) -> (i32, i32) {
    %c0_i32 = arith.constant 0 : i32
    %c0_i32_0 = arith.constant 0 : i32
    %c0_i32_1 = arith.constant 0 : i32
    return %c0_i32, %c0_i32_0 : i32, i32
  }
  func.func @transform_15(%arg0: i32) -> (i32, i32) {
    %c0_i32 = arith.constant 0 : i32
    %c0_i32_0 = arith.constant 0 : i32
    %c0_i32_1 = arith.constant 0 : i32
    return %c0_i32, %c0_i32_0 : i32, i32
  }
  func.func @transform_16(%arg0: i32) -> (i32, i32) {
    %c0_i32 = arith.constant 0 : i32
    %c0_i32_0 = arith.constant 0 : i32
    %c0_i32_1 = arith.constant 0 : i32
    return %c0_i32, %c0_i32_0 : i32, i32
  }
  func.func @transform_17(%arg0: i32) -> (i32, i32, i32) {
    %c0_i32 = arith.constant 0 : i32
    %c0_i32_0 = arith.constant 0 : i32
    %c0_i32_1 = arith.constant 0 : i32
    return %arg0, %c0_i32, %c0_i32_0 : i32, i32, i32
  }
}

</mosaic_0001>

<bundles_post_ra>
// kernel: decoder_forward.1
= control target key start
LH: loop header
LB: loop body
LE: loop exit
PB: predicated region body
PF: predicated region fallthrough
CT: control target
= control target key end

     0   :  { %s29429_s0 = inlined_call_operand.hbm [shape: bf16[2,128,256], index: 0, kind: input, shape index: {}]   ;;  %s29430_s1 = inlined_call_operand.hbm [shape: f32[2,256,24], index: 1, kind: input, shape index: {}]   ;;  %s29431_s2 = inlined_call_operand.hbm [shape: bf16[2,16,8,32], index: 2, kind: input, shape index: {}]   ;;  %s29432_s3 = inlined_call_operand.hbm [shape: bf16[2,16,4,256], index: 3, kind: input, shape index: {}]   ;;  %s29433_s4 = inlined_call_operand.hbm [shape: bf16[16,8], index: 4, kind: input, shape index: {}, may-alias: {4,5}]   ;;  %s29434_s5 = inlined_call_operand.hbm [shape: bf16[16,8], index: 5, kind: input, shape index: {}, may-alias: {4,5}]   ;;  %s29435_s6 = inlined_call_operand.hbm [shape: bf16[16,4], index: 6, kind: input, shape index: {}]   ;;  %s29436_s7 = inlined_call_operand.hbm [shape: bf16[256,24], index: 7, kind: input, shape index: {}]   ;;  %s29437_s8 = inlined_call_operand.hbm [shape: f32[1,24], index: 8, kind: input, shape index: {}]   ;;  %s29438_s9 = inlined_call_operand.hbm [shape: f32[1,24], index: 9, kind: input, shape index: {}]   ;;  %s29439_s10 = inlined_call_operand.hbm [shape: bf16[3,3,256,256], index: 10, kind: input, shape index: {}]   ;;  %s29440_s11 = inlined_call_operand.hbm [shape: bf16[3,3,56,256], index: 11, kind: input, shape index: {}]   ;;  %s29441_s12 = inlined_call_operand.hbm [shape: f32[1,256], index: 12, kind: input, shape index: {}]   ;;  %s29442_s13 = inlined_call_operand.hbm [shape: bf16[3,3,256,256], index: 13, kind: input, shape index: {}]   ;;  %s29443_s14 = inlined_call_operand.hbm [shape: f32[1,256], index: 14, kind: input, shape index: {}]   ;;  %s29444_s15 = inlined_call_operand.hbm [shape: bf16[8,256], index: 15, kind: input, shape index: {}]   ;;  %s29445_s16 = inlined_call_operand.hbm [shape: f32[8,1], index: 16, kind: input, shape index: {}]   ;;  %s29446_s17 = inlined_call_operand.hbm [shape: f32[2,8,256], index: 17, kind: output, shape index: {}]  }
   0x1   :  { %29576 = sst [smem:[#allocation99_spill]] %s29429_s0 }
   0x2   :  { %29577 = sst [smem:[#allocation100_spill]] %s29430_s1 }
   0x3   :  { %29578 = sst [smem:[#allocation101_spill]] %s29431_s2 }
   0x4   :  { %29579 = sst [smem:[#allocation102_spill]] %s29432_s3 }
   0x5   :  { %29580 = sst [smem:[#allocation103_spill]] %s29433_s4 }
   0x6   :  { %29581 = sst [smem:[#allocation104_spill]] %s29434_s5 }
   0x7   :  { %29582 = sst [smem:[#allocation105_spill]] %s29435_s6 }
   0x8   :  { %29583 = sst [smem:[#allocation106_spill]] %s29436_s7 }
   0x9   :  { %29584 = sst [smem:[#allocation107_spill]] %s29437_s8 }
   0xa   :  { %29585 = sst [smem:[#allocation108_spill]] %s29438_s9 }
   0xb   :  { %29586 = sst [smem:[#allocation109_spill]] %s29439_s10 }
   0xc   :  { %29587 = sst [smem:[#allocation110_spill]] %s29440_s11 }
   0xd   :  { %29588 = sst [smem:[#allocation111_spill]] %s29441_s12 }
   0xe   :  { %29589 = sst [smem:[#allocation112_spill]] %s29442_s13 }
   0xf   :  { %29590 = sst [smem:[#allocation113_spill]] %s29443_s14 }
  0x10   :  { %29591 = sst [smem:[#allocation114_spill]] %s29444_s15 }
  0x11   :  { %29592 = sst [smem:[#allocation115_spill]] %s29445_s16 }
  0x12   :  { %29593 = sst [smem:[#allocation116_spill]] %s29446_s17 }
  0x13   :  { %22 = vsyncpa [#allocation4], 0 }
  0x14   :  { %24 = vsyncpa [#allocation4 + $0x1], 0 }
  0x15   :  { %25 = vsyncpa [#allocation7], 0 }
  0x16   :  { %27 = vsyncpa [#allocation7 + $0x1], 0 }
  0x17   :  { %28 = vsyncpa [#allocation10], 0 }
  0x18   :  { %30 = vsyncpa [#allocation10 + $0x1], 0 }
  0x19   :  { %31 = vsyncpa [#allocation13], 0 }
  0x1a   :  { %32 = vsyncpa [#allocation16], 0 }
  0x1b   :  { %33 = vsyncpa [#allocation19], 0 }
  0x1c   :  { %34 = vsyncpa [#allocation22], 0 }
  0x1d   :  { %35 = vsyncpa [#allocation25], 0 }
  0x1e   :  { %36 = vsyncpa [#allocation28], 0 }
  0x1f   :  { %37 = vsyncpa [#allocation5], 0 }
  0x20   :  { %39 = vsyncpa [#allocation5 + $0x1], 0  ;;  %s25527_s24 = smov 0   ;;  %s25529_s25 = smov 0  }
  0x21   :  { %s25531_s26 = smov 0   ;;  %s25533_s27 = smov 0  }
  0x22 LB: > { %29594 = sst [smem:[#allocation42_spill]] %s25405_s26  ;;  %s25411_s28 = smov [#allocation11]   ;;  %s25409_s27 = sphi %s25533_s27, %s29911_s27   ;;  %s25405_s26 = sphi %s25531_s26, %s29913_s26   ;;  %s25401_s25 = sphi %s25529_s25, %s29915_s25   ;;  %s25397_s24 = sphi %s25527_s24, %s29914_s24  }
  0x23   : > { %s465_s29 = sshll.u32 %s25411_s28, 4  ;;  %s25548_s0 = sadd.s32 4294967295, %s25409_s27   ;;  %s25553_s29 = int_to_ptr.vmem [resolvable:$true] %s465_s29 }
  0x24   : > { %p20258_p0 = scmp.ge.s32.totalorder %s25409_s27, 1  ;;  %p29456_p1 = scmp.eq.s32.totalorder %s25548_s0, 0 }
  0x25   : > { %p453_p2 = scmp.lt.s32.totalorder %s25409_s27, 3  ;;  %s25412_s18 = smov [#allocation12]  }
  0x26   : > { %s478_s19 = sshll.u32 %s25412_s18, 4  ;;  %s25413_s20 = smov [#allocation15]   ;;  %s25568_s19 = int_to_ptr.vmem [resolvable:$true] %s478_s19 }
  0x27   : > { %p25555_p3 = pnand %p20258_p0, %p453_p2  ;;  %s504_s21 = sshll.u32 %s25413_s20, 4  ;;  %s25570_s21 = int_to_ptr.vmem [resolvable:$true] %s504_s21 }
  0x28   : > { %s29598_s4 = sld [smem:[#allocation103_spill]] }
  0x29   : > { %s29595_s30 = scalar_select %p25555_p3, 1, 0 }
  0x2a   : > { %p23500_p5 = pneg %p25555_p3 }
  0x2b   : > { %29596 = sst [smem:[#allocation43_spill]] %s29595_s30 }
  0x2c   : > { %p25564_p6 = pnand %p23500_p5, %p29456_p1 }
  0x2e   : > { %s29597_s1 = scalar_select %p25564_p6, 1, 0 }
  0x2f   : > { %s24823_s28 = scalar_lea.hbm %s29598_s4, 128  ;;  %p25580_p8 = pneg %p25564_p6 }
  0x30   : > { %p24824_p7 = scmp.ne.s32.totalorder %s29598_s4, %s24823_s28  ;;  %p24830_p11 = scmp.lt.u32.totalorder %s24823_s28, %s29598_s4 }
  0x31   : > { %s29599_s18 = scalar_select %p25580_p8, 1, 0 }
  0x32   : > { %p24826_p9 = pnand %p25580_p8, %p24824_p7 }
  0x34   : > { %p24827_p10 = pneg %p24826_p9 }
  0x36   : > { %p24832_p12 = pnand %p24830_p11, %p24827_p10 }
  0x38   : > { %24835 = shalt.err (!%p24832_p12)
}
  0x39   : > { %s24836_s17 = scalar_lea.vmem %s25553_s29, 128  ;;  %p24844_p5 = scmp.lt.s32.totalorder %s25553_s29, %s25553_s29 }
  0x3a   : > { %p24837_p13 = scmp.ne.s32.totalorder %s25553_s29, %s24836_s17  ;;  %p24845_p4 = scmp.lt.s32.totalorder %s24836_s17, %s24836_s17 }
  0x3c   : > { %p24839_p0 = pnand %p24837_p13, %p25580_p8  ;;  %p24846_p7 = por %p24845_p4, %p24844_p5 }
  0x3e   : > { %p24840_p2 = pneg %p24839_p0 }
  0x40   : > { %p24847_p9 = pnand %p24846_p7, %p24840_p2 }
  0x42   : > { %24850 = shalt.err (!%p24847_p9)
}
  0x43   : > { %s29458_s30 = smov 64   ;;  %s29460_s3 = smov 4  }
  0x44   : > { %23503 = dma.hbm_to_vmem [thread:$0]  (!%p25564_p6), %s29598_s4, 128, %s25553_s29, [#allocation10], %s29458_s30, %s29458_s30, %s29460_s3  }
  0x45   : > { %s29600_s5 = sld [smem:[#allocation104_spill]] }
  0x4b   : > { %s24851_s17 = scalar_lea.hbm %s29600_s5, 128 }
  0x4c   : > { %p24852_p4 = scmp.ne.s32.totalorder %s29600_s5, %s24851_s17  ;;  %p24858_p12 = scmp.lt.u32.totalorder %s24851_s17, %s29600_s5 }
  0x4e   : > { %p24854_p10 = pnand %p24852_p4, %p25580_p8 }
  0x50   : > { %p24855_p11 = pneg %p24854_p10 }
  0x52   : > { %p24860_p13 = pnand %p24858_p12, %p24855_p11 }
  0x54   : > { %24863 = shalt.err (!%p24860_p13)
}
  0x55   : > { %s24864_s29 = scalar_lea.vmem %s25568_s19, 128  ;;  %p24872_p7 = scmp.lt.s32.totalorder %s25568_s19, %s25568_s19 }
  0x56   : > { %p24865_p0 = scmp.ne.s32.totalorder %s25568_s19, %s24864_s29  ;;  %p24873_p9 = scmp.lt.s32.totalorder %s24864_s29, %s24864_s29 }
  0x58   : > { %p24867_p2 = pnand %p24865_p0, %p25580_p8  ;;  %p24874_p4 = por %p24873_p9, %p24872_p7 }
  0x5a   : > { %p24868_p5 = pneg %p24867_p2 }
  0x5c   : > { %p24875_p10 = pnand %p24874_p4, %p24868_p5 }
  0x5e   : > { %24878 = shalt.err (!%p24875_p10)
}
  0x5f   : > { %23506 = dma.hbm_to_vmem [thread:$0]  (!%p25564_p6), %s29600_s5, 128, %s25568_s19, [#allocation13], %s29458_s30, %s29458_s30, %s29460_s3  }
  0x60   : > { %s29601_s7 = sld [smem:[#allocation106_spill]] }
  0x66   : > { %s24879_s22 = scalar_lea.hbm %s29601_s7, 2048 }
  0x67   : > { %p24880_p11 = scmp.ne.s32.totalorder %s29601_s7, %s24879_s22  ;;  %p24886_p0 = scmp.lt.u32.totalorder %s24879_s22, %s29601_s7 }
  0x69   : > { %p24882_p12 = pnand %p24880_p11, %p25580_p8 }
  0x6b   : > { %p24883_p13 = pneg %p24882_p12 }
  0x6d   : > { %p24888_p2 = pnand %p24886_p0, %p24883_p13 }
  0x6f   : > { %24891 = shalt.err (!%p24888_p2)
}
  0x70   : > { %s24892_s19 = scalar_lea.vmem %s25570_s21, 2048  ;;  %p24900_p4 = scmp.lt.s32.totalorder %s25570_s21, %s25570_s21 }
  0x71   : > { %p24893_p5 = scmp.ne.s32.totalorder %s25570_s21, %s24892_s19  ;;  %p24901_p10 = scmp.lt.s32.totalorder %s24892_s19, %s24892_s19 }
  0x73   : > { %p24895_p7 = pnand %p24893_p5, %p25580_p8  ;;  %p24902_p11 = por %p24901_p10, %p24900_p4 }
  0x75   : > { %p24896_p9 = pneg %p24895_p7 }
  0x77   : > { %p24903_p12 = pnand %p24902_p11, %p24896_p9 }
  0x79   : > { %24906 = shalt.err (!%p24903_p12)
}
  0x7a   : > { %23512 = dma.hbm_to_vmem [thread:$0]  (!%p25564_p6), %s29601_s7, 2048, %s25570_s21, [#allocation16], %s29458_s30, %s29458_s30, %s29460_s3  }
  0x7b   : > { %s25416_s12 = smov [#allocation18]   ;;  %s29602_s9 = sld [smem:[#allocation108_spill]] }
  0x7c   : > { %s529_s14 = sshll.u32 %s25416_s12, 4  ;;  %s530_s14 = int_to_ptr.vmem [resolvable:$true] %s529_s14 }
  0x81   : > { %s24907_s23 = scalar_lea.hbm %s29602_s9, 16 }
  0x82   : > { %p24908_p13 = scmp.ne.s32.totalorder %s29602_s9, %s24907_s23  ;;  %p24914_p5 = scmp.lt.u32.totalorder %s24907_s23, %s29602_s9 }
  0x84   : > { %p24910_p0 = pnand %p24908_p13, %p25580_p8 }
  0x86   : > { %p24911_p2 = pneg %p24910_p0 }
  0x88   : > { %p24916_p7 = pnand %p24914_p5, %p24911_p2 }
  0x8a   : > { %24919 = shalt.err (!%p24916_p7)
}
  0x8b   : > { %s24920_s21 = scalar_lea.vmem %s530_s14, 16  ;;  %s24927_s29 = scalar_lea.vmem %s530_s14, 32 }
  0x8c   : > { %p24921_p9 = scmp.ne.s32.totalorder %s530_s14, %s24920_s21  ;;  %p24928_p11 = scmp.lt.s32.totalorder %s530_s14, %s530_s14 }
  0x8d   : > { %p24929_p12 = scmp.lt.s32.totalorder %s24927_s29, %s24920_s21 }
  0x8e   : > { %p24923_p4 = pnand %p24921_p9, %p25580_p8 }
  0x8f   : > { %p24930_p1 = por %p24929_p12, %p24928_p11 }
  0x90   : > { %p24924_p10 = pneg %p24923_p4 }
  0x92   : > { %p24931_p3 = pnand %p24930_p1, %p24924_p10 }
  0x94   : > { %24934 = shalt.err (!%p24931_p3)
}
  0x95   : > { %23518 = dma.hbm_to_vmem [thread:$0]  (!%p25564_p6), %s29602_s9, 16, %s530_s14, [#allocation19]  }
  0x96   : > { %s25417_s16 = smov [#allocation21]   ;;  %s25418_s23 = smov [#allocation24]  }
  0x97   : > { %s552_s22 = sshll.u32 %s25417_s16, 4  ;;  %s576_s28 = sshll.u32 %s25418_s23, 4  ;;  %s553_s22 = int_to_ptr.vmem [resolvable:$true] %s552_s22  ;;  %s25674_s28 = int_to_ptr.vmem [resolvable:$true] %s576_s28 }
  0x98   : > { %s29603_s11 = sld [smem:[#allocation110_spill]] }
  0x9e   : > { %s24935_s19 = scalar_lea.hbm %s29603_s11, 8064 }
  0x9f   : > { %p24936_p1 = scmp.ne.s32.totalorder %s29603_s11, %s24935_s19  ;;  %p24942_p0 = scmp.lt.u32.totalorder %s24935_s19, %s29603_s11 }
  0xa1   : > { %p24938_p3 = pnand %p24936_p1, %p25580_p8 }
  0xa3   : > { %p24939_p13 = pneg %p24938_p3 }
  0xa5   : > { %p24944_p2 = pnand %p24942_p0, %p24939_p13 }
  0xa7   : > { %24947 = shalt.err (!%p24944_p2)
}
  0xa8   : > { %s24948_s12 = scalar_lea.vmem %s553_s22, 8064  ;;  %p24956_p4 = scmp.lt.s32.totalorder %s553_s22, %s553_s22 }
  0xa9   : > { %p24949_p5 = scmp.ne.s32.totalorder %s553_s22, %s24948_s12  ;;  %p24957_p10 = scmp.lt.s32.totalorder %s24948_s12, %s24948_s12 }
  0xab   : > { %p24951_p7 = pnand %p24949_p5, %p25580_p8  ;;  %p24958_p11 = por %p24957_p10, %p24956_p4 }
  0xad   : > { %p24952_p9 = pneg %p24951_p7 }
  0xaf   : > { %p24959_p12 = pnand %p24958_p11, %p24952_p9 }
  0xb1   : > { %24962 = shalt.err (!%p24959_p12)
}
  0xb2   : > { %s29462_s16 = smov 128   ;;  %s29464_s23 = smov 8  }
  0xb3   : > { %23524 = dma.hbm_to_vmem [thread:$0]  (!%p25564_p6), %s29603_s11, 8064, %s553_s22, [#allocation22], %s29462_s16, %s29462_s16, %s29464_s23  }
  0xb4   : > { %s29604_s13 = sld [smem:[#allocation112_spill]] }
  0xba   : > { %s24963_s29 = scalar_lea.hbm %s29604_s13, 36864 }
  0xbb   : > { %p24964_p1 = scmp.ne.s32.totalorder %s29604_s13, %s24963_s29  ;;  %p24970_p0 = scmp.lt.u32.totalorder %s24963_s29, %s29604_s13 }
  0xbd   : > { %p24966_p3 = pnand %p24964_p1, %p25580_p8 }
  0xbf   : > { %p24967_p13 = pneg %p24966_p3 }
  0xc1   : > { %p24972_p2 = pnand %p24970_p0, %p24967_p13 }
  0xc3   : > { %24975 = shalt.err (!%p24972_p2)
}
  0xc4   : > { %s24976_s22 = scalar_lea.vmem %s25674_s28, 36864  ;;  %p24984_p4 = scmp.lt.s32.totalorder %s25674_s28, %s25674_s28 }
  0xc5   : > { %p24977_p5 = scmp.ne.s32.totalorder %s25674_s28, %s24976_s22  ;;  %p24985_p10 = scmp.lt.s32.totalorder %s24976_s22, %s24976_s22 }
  0xc7   : > { %p24979_p7 = pnand %p24977_p5, %p25580_p8  ;;  %p24986_p11 = por %p24985_p10, %p24984_p4 }
  0xc9   : > { %p24980_p9 = pneg %p24979_p7 }
  0xcb   : > { %p24987_p12 = pnand %p24986_p11, %p24980_p9 }
  0xcd   : > { %24990 = shalt.err (!%p24987_p12)
}
  0xce   : > { %23530 = dma.hbm_to_vmem [thread:$0]  (!%p25564_p6), %s29604_s13, 36864, %s25674_s28, [#allocation25], %s29462_s16, %s29462_s16, %s29464_s23  }
  0xcf   : > { %s25421_s17 = smov [#allocation27]   ;;  %s29605_s15 = sld [smem:[#allocation114_spill]] }
  0xd0   : > { %s601_s19 = sshll.u32 %s25421_s17, 4  ;;  %s602_s19 = int_to_ptr.vmem [resolvable:$true] %s601_s19 }
  0xd5   : > { %s24991_s2 = scalar_lea.hbm %s29605_s15, 128 }
  0xd6   : > { %p24992_p1 = scmp.ne.s32.totalorder %s29605_s15, %s24991_s2  ;;  %p24998_p0 = scmp.lt.u32.totalorder %s24991_s2, %s29605_s15 }
  0xd8   : > { %p24994_p3 = pnand %p24992_p1, %p25580_p8 }
  0xda   : > { %p24995_p13 = pneg %p24994_p3 }
  0xdc   : > { %p25000_p2 = pnand %p24998_p0, %p24995_p13 }
  0xde   : > { %25003 = shalt.err (!%p25000_p2)
}
  0xdf   : > { %s25004_s28 = scalar_lea.vmem %s602_s19, 128  ;;  %p25012_p4 = scmp.lt.s32.totalorder %s602_s19, %s602_s19 }
  0xe0   : > { %p25005_p5 = scmp.ne.s32.totalorder %s602_s19, %s25004_s28  ;;  %p25013_p10 = scmp.lt.s32.totalorder %s25004_s28, %s25004_s28 }
  0xe2   : > { %p25007_p7 = pnand %p25005_p5, %p25580_p8  ;;  %p25014_p11 = por %p25013_p10, %p25012_p4 }
  0xe4   : > { %p25008_p9 = pneg %p25007_p7 }
  0xe6   : > { %p25015_p12 = pnand %p25014_p11, %p25008_p9 }
  0xe8   : > { %25018 = shalt.err (!%p25015_p12)
}
  0xe9   : > { %23536 = dma.hbm_to_vmem [thread:$0]  (!%p25564_p6), %s29605_s15, 128, %s602_s19, [#allocation28]  }
  0xea   : > { %s20257_s3 = sadd.s32 4294967294, %s25409_s27   ;;  %s25743_s17 = sadd.s32 1, %s25409_s27  }
  0xeb   : > { %29606 = sst [smem:[#allocation44_spill]] %s25743_s17  ;;  %s52_s21 = sadd.s32 1, %s25405_s26 }
  0xec   : > { %s49_s29 = ssub.s32 %s25409_s27, %s25743_s17  ;;  %p59_p1 = scmp.ne.s32.totalorder %s25405_s26, %s25401_s25 }
  0xed   : > { %p50_p3 = scmp.eq.s32.totalorder %s49_s29, 0  ;;  %p60_p13 = scmp.eq.s32.totalorder %s25409_s27, 0 }
  0xee   : > { %p65_p0 = scmp.ne.s32.totalorder %s25401_s25, %s25397_s24  ;;  %p440_p2 = scmp.eq.s32.totalorder %s25548_s0, 1 }
  0xef   : > { %s25755_s2 = scalar_select %p50_p3, %s25405_s26, %s52_s21  }
  0xf0   : > { %p61_p5 = por %p60_p13, %p59_p1  ;;  %p29608_p7 = scmp.eq.s32.totalorder %s25548_s0, 0 }
  0xf1   : > { %29607 = sst [smem:[#allocation45_spill]] %s25755_s2  ;;  %p25763_p4 = por %p440_p2, %p59_p1 }
  0xf2   : > { %p25759_p9 = por %p29608_p7, %p65_p0  ;;  %p446_p10 = scmp.eq.s32.totalorder %s20257_s3, 1 }
  0xf3   : > { %s29610_s14 = scalar_select %p25763_p4, 1, 0 }
  0xf4   : > { %s29609_s19 = scalar_select %p25759_p9, 1, 0 }
  0xf5   : > { %p23570_p11 = scmp.lt.s32.totalorder %s25409_s27, 2  ;;  %s25769_s12 = sand.u32 1, %s25405_s26  }
  0xf6   : > { %p25771_p12 = por %p446_p10, %p65_p0  ;;  %s29467_s28 = sand.u32 1, %s25409_s27  }
  0xf7   : > { %p25776_p3 = pnand %p23570_p11, %p61_p5  ;;  %s20276_s20 = sshll.u32 %s25769_s12, 8 }
  0xf8   : > { %s29611_s22 = scalar_select %p25771_p12, 1, 0 }
  0xf9   : > { %s29612_s30 = scalar_select %p25776_p3, 1, 0 }
  0xfa   : > { %s21482_s21 = sshll.u32 %s25409_s27, 12  ;;  %s29613_s23 = sld [smem:[#allocation100_spill]] }
  0xfb   : > { %s648_s4 = scalar_lea.vmem [#allocation6], %s20276_s20  ;;  %s25791_s7 = scalar_lea.sflag [#allocation7], %s29467_s28 }
  0xfc   : > { %s655_s5 = sshll.u32 %s648_s4, 4  ;;  %p25797_p13 = pneg %p25776_p3  ;;  %s25787_s5 = int_to_ptr.vmem [resolvable:$true] %s655_s5 }
  0xfe   : > { %s29614_s11 = scalar_select %p25797_p13, 1, 0 }
 0x100   : > { %s25785_s3 = scalar_lea.hbm %s29613_s23, %s21482_s21  ;;  %s25024_s4 = scalar_lea.hbm %s29613_s23, 8192 }
 0x101   : > { %s25019_s9 = scalar_lea.hbm %s25785_s3, 4096  ;;  %p25025_p5 = scmp.lt.u32.totalorder %s25785_s3, %s29613_s23 }
 0x102   : > { %p25020_p1 = scmp.ne.s32.totalorder %s25785_s3, %s25019_s9  ;;  %p25026_p7 = scmp.lt.u32.totalorder %s25024_s4, %s25019_s9 }
 0x103   : > { %p25028_p11 = scmp.lt.u32.totalorder %s25019_s9, %s25785_s3 }
 0x104   : > { %p25022_p0 = pnand %p25797_p13, %p25020_p1  ;;  %p25027_p10 = por %p25026_p7, %p25025_p5 }
 0x106   : > { %p25023_p2 = pneg %p25022_p0  ;;  %p25029_p12 = por %p25028_p11, %p25027_p10 }
 0x108   : > { %p25030_p4 = pnand %p25029_p12, %p25023_p2 }
 0x10a   : > { %25033 = shalt.err (!%p25030_p4)
}
 0x10b   : > { %s25034_s28 = scalar_lea.vmem %s25787_s5, 4096  ;;  %s25422_s16 = smov [#allocation6]  }
 0x10c   : > { %p25035_p1 = scmp.ne.s32.totalorder %s25787_s5, %s25034_s28  ;;  %s25039_s21 = sshll.u32 %s25422_s16, 4  ;;  %s25040_s21 = int_to_ptr.vmem [resolvable:$false] %s25039_s21 }
 0x10d   : > { %s25041_s20 = scalar_lea.vmem %s25040_s21, 8192  ;;  %p25042_p6 = scmp.lt.s32.totalorder %s25787_s5, %s25040_s21 }
 0x10e   : > { %p25037_p0 = pnand %p25035_p1, %p25797_p13  ;;  %p25043_p8 = scmp.lt.s32.totalorder %s25041_s20, %s25034_s28 }
 0x110   : > { %p25038_p9 = pneg %p25037_p0  ;;  %p25044_p5 = por %p25043_p8, %p25042_p6 }
 0x112   : > { %p25045_p7 = pnand %p25044_p5, %p25038_p9 }
 0x114   : > { %25048 = shalt.err (!%p25045_p7)
}
 0x115   : > { %s29615_s9 = smov 8   ;;  %s29616_s4 = smov 128  }
 0x116   : > { %23546 = dma.hbm_to_vmem [thread:$0]  (!%p25776_p3), %s25785_s3, 4096, %s25787_s5, %s25791_s7, %s29616_s4, %s29616_s4, %s29615_s9  }
 0x117   : > { %s25423_s29 = smov [#allocation14]   ;;  %s25424_s16 = smov [#allocation17]  }
 0x118   : > { %s491_s13 = sshll.u32 %s25423_s29, 4  ;;  %s518_s15 = sshll.u32 %s25424_s16, 4  ;;  %s492_s13 = int_to_ptr.vmem [resolvable:$true] %s491_s13  ;;  %s25824_s15 = int_to_ptr.vmem [resolvable:$true] %s518_s15 }
 0x119   : > { %s29617_s6 = sld [smem:[#allocation105_spill]]  ;;  %p29618_p8 = scmp.ne.s32.totalorder %s29599_s18, 0 }
 0x11f   : > { %s25049_s20 = scalar_lea.hbm %s29617_s6, 128 }
 0x120   : > { %p25050_p6 = scmp.ne.s32.totalorder %s29617_s6, %s25049_s20  ;;  %p25056_p12 = scmp.lt.u32.totalorder %s25049_s20, %s29617_s6 }
 0x122   : > { %p25052_p9 = pnand %p25050_p6, %p29618_p8 }
 0x124   : > { %p25053_p4 = pneg %p25052_p9 }
 0x126   : > { %p25058_p2 = pnand %p25056_p12, %p25053_p4 }
 0x128   : > { %25061 = shalt.err (!%p25058_p2)
}
 0x129   : > { %s25062_s3 = scalar_lea.vmem %s492_s13, 128  ;;  %p25070_p0 = scmp.lt.s32.totalorder %s492_s13, %s492_s13 }
 0x12a   : > { %p25063_p10 = scmp.ne.s32.totalorder %s492_s13, %s25062_s3  ;;  %p25071_p5 = scmp.lt.s32.totalorder %s25062_s3, %s25062_s3 }
 0x12c   : > { %p25065_p11 = pnand %p25063_p10, %p29618_p8  ;;  %p25072_p7 = por %p25071_p5, %p25070_p0 }
 0x12e   : > { %p25066_p1 = pneg %p25065_p11 }
 0x130   : > { %p25073_p3 = pnand %p25072_p7, %p25066_p1 }
 0x132   : > { %25076 = shalt.err (!%p25073_p3)
}
 0x133   : > { %p29619_p6 = scmp.ne.s32.totalorder %s29597_s1, 0  ;;  %s29620_s23 = smov 4  }
 0x134   : > { %s29621_s2 = smov 64   ;;  %s29622_s8 = sld [smem:[#allocation107_spill]] }
 0x135   : > { %23509 = dma.hbm_to_vmem [thread:$0]  (!%p29619_p6), %s29617_s6, 128, %s492_s13, [#allocation13], %s29621_s2, %s29621_s2, %s29620_s23  }
 0x13a   : > { %s25077_s21 = scalar_lea.hbm %s29622_s8, 16 }
 0x13b   : > { %p25078_p9 = scmp.ne.s32.totalorder %s29622_s8, %s25077_s21  ;;  %p25084_p12 = scmp.lt.u32.totalorder %s25077_s21, %s29622_s8 }
 0x13d   : > { %p25080_p3 = pnand %p25078_p9, %p29618_p8 }
 0x13f   : > { %p25081_p4 = pneg %p25080_p3 }
 0x141   : > { %p25086_p2 = pnand %p25084_p12, %p25081_p4 }
 0x143   : > { %25089 = shalt.err (!%p25086_p2)
}
 0x144   : > { %s25090_s13 = scalar_lea.vmem %s25824_s15, 16  ;;  %s25097_s26 = scalar_lea.vmem %s25824_s15, 32 }
 0x145   : > { %p25091_p10 = scmp.ne.s32.totalorder %s25824_s15, %s25090_s13  ;;  %p25098_p0 = scmp.lt.s32.totalorder %s25824_s15, %s25824_s15 }
 0x146   : > { %p25099_p5 = scmp.lt.s32.totalorder %s25097_s26, %s25090_s13 }
 0x147   : > { %p25093_p11 = pnand %p25091_p10, %p29618_p8 }
 0x148   : > { %p25100_p7 = por %p25099_p5, %p25098_p0 }
 0x149   : > { %p25094_p1 = pneg %p25093_p11 }
 0x14b   : > { %p25101_p9 = pnand %p25100_p7, %p25094_p1 }
 0x14d   : > { %25104 = shalt.err (!%p25101_p9)
}
 0x14e   : > { %23515 = dma.hbm_to_vmem [thread:$0]  (!%p29619_p6), %s29622_s8, 16, %s25824_s15, [#allocation16]  }
 0x14f   : > { %s25425_s16 = smov [#allocation20]   ;;  %s25426_s21 = smov [#allocation23]  }
 0x150   : > { %s539_s28 = sshll.u32 %s25425_s16, 4  ;;  %s566_s20 = sshll.u32 %s25426_s21, 4  ;;  %s540_s28 = int_to_ptr.vmem [resolvable:$true] %s539_s28  ;;  %s25871_s20 = int_to_ptr.vmem [resolvable:$true] %s566_s20 }
 0x151   : > { %s29623_s10 = sld [smem:[#allocation109_spill]] }
 0x157   : > { %s25105_s13 = scalar_lea.hbm %s29623_s10, 36864 }
 0x158   : > { %p25106_p3 = scmp.ne.s32.totalorder %s29623_s10, %s25105_s13  ;;  %p25112_p2 = scmp.lt.u32.totalorder %s25105_s13, %s29623_s10 }
 0x15a   : > { %p25108_p4 = pnand %p25106_p3, %p29618_p8 }
 0x15c   : > { %p25109_p12 = pneg %p25108_p4 }
 0x15e   : > { %p25114_p10 = pnand %p25112_p2, %p25109_p12 }
 0x160   : > { %25117 = shalt.err (!%p25114_p10)
}
 0x161   : > { %s25118_s29 = scalar_lea.vmem %s540_s28, 36864  ;;  %p25126_p5 = scmp.lt.s32.totalorder %s540_s28, %s540_s28 }
 0x162   : > { %p25119_p11 = scmp.ne.s32.totalorder %s540_s28, %s25118_s29  ;;  %p25127_p7 = scmp.lt.s32.totalorder %s25118_s29, %s25118_s29 }
 0x164   : > { %p25121_p1 = pnand %p25119_p11, %p29618_p8  ;;  %p25128_p9 = por %p25127_p7, %p25126_p5 }
 0x166   : > { %p25122_p0 = pneg %p25121_p1 }
 0x168   : > { %p25129_p13 = pnand %p25128_p9, %p25122_p0 }
 0x16a   : > { %25132 = shalt.err (!%p25129_p13)
}
 0x16b   : > { %23521 = dma.hbm_to_vmem [thread:$0]  (!%p29619_p6), %s29623_s10, 36864, %s540_s28, [#allocation19], %s29616_s4, %s29616_s4, %s29615_s9  }
 0x16c   : > { %s29624_s3 = sld [smem:[#allocation111_spill]] }
 0x172   : > { %s25133_s13 = scalar_lea.hbm %s29624_s3, 32 }
 0x173   : > { %p25134_p3 = scmp.ne.s32.totalorder %s29624_s3, %s25133_s13  ;;  %p25140_p12 = scmp.lt.u32.totalorder %s25133_s13, %s29624_s3 }
 0x175   : > { %p25136_p13 = pnand %p25134_p3, %p29618_p8 }
 0x177   : > { %p25137_p4 = pneg %p25136_p13 }
 0x179   : > { %p25142_p2 = pnand %p25140_p12, %p25137_p4 }
 0x17b   : > { %25145 = shalt.err (!%p25142_p2)
}
 0x17c   : > { %s25146_s28 = scalar_lea.vmem %s25871_s20, 32  ;;  %p25154_p0 = scmp.lt.s32.totalorder %s25871_s20, %s25871_s20 }
 0x17d   : > { %p25147_p10 = scmp.ne.s32.totalorder %s25871_s20, %s25146_s28  ;;  %p25155_p5 = scmp.lt.s32.totalorder %s25146_s28, %s25146_s28 }
 0x17f   : > { %p25149_p11 = pnand %p25147_p10, %p29618_p8  ;;  %p25156_p7 = por %p25155_p5, %p25154_p0 }
 0x181   : > { %p25150_p1 = pneg %p25149_p11 }
 0x183   : > { %p25157_p9 = pnand %p25156_p7, %p25150_p1 }
 0x185   : > { %25160 = shalt.err (!%p25157_p9)
}
 0x186   : > { %23527 = dma.hbm_to_vmem [thread:$0]  (!%p29619_p6), %s29624_s3, 32, %s25871_s20, [#allocation22]  }
 0x187   : > { %s25427_s21 = smov [#allocation26]   ;;  %s25428_s13 = smov [#allocation29]  }
 0x188   : > { %s590_s5 = sshll.u32 %s25427_s21, 4  ;;  %s612_s26 = sshll.u32 %s25428_s13, 4  ;;  %s591_s5 = int_to_ptr.vmem [resolvable:$true] %s590_s5  ;;  %s25917_s26 = int_to_ptr.vmem [resolvable:$true] %s612_s26 }
 0x189   : > { %s29625_s29 = sld [smem:[#allocation113_spill]] }
 0x18f   : > { %s25161_s28 = scalar_lea.hbm %s29625_s29, 32 }
 0x190   : > { %p25162_p3 = scmp.ne.s32.totalorder %s29625_s29, %s25161_s28  ;;  %p25168_p12 = scmp.lt.u32.totalorder %s25161_s28, %s29625_s29 }
 0x192   : > { %p25164_p13 = pnand %p25162_p3, %p29618_p8 }
 0x194   : > { %p25165_p4 = pneg %p25164_p13 }
 0x196   : > { %p25170_p2 = pnand %p25168_p12, %p25165_p4 }
 0x198   : > { %25173 = shalt.err (!%p25170_p2)
}
 0x199   : > { %s25174_s16 = scalar_lea.vmem %s591_s5, 32  ;;  %p25182_p0 = scmp.lt.s32.totalorder %s591_s5, %s591_s5 }
 0x19a   : > { %p25175_p10 = scmp.ne.s32.totalorder %s591_s5, %s25174_s16  ;;  %p25183_p5 = scmp.lt.s32.totalorder %s25174_s16, %s25174_s16 }
 0x19c   : > { %p25177_p11 = pnand %p25175_p10, %p29618_p8  ;;  %p25184_p7 = por %p25183_p5, %p25182_p0 }
 0x19e   : > { %p25178_p1 = pneg %p25177_p11 }
 0x1a0   : > { %p25185_p9 = pnand %p25184_p7, %p25178_p1 }
 0x1a2   : > { %25188 = shalt.err (!%p25185_p9)
}
 0x1a3   : > { %23533 = dma.hbm_to_vmem [thread:$0]  (!%p29619_p6), %s29625_s29, 32, %s591_s5, [#allocation25]  }
 0x1a4   : > { %s29626_s17 = sld [smem:[#allocation115_spill]] }
 0x1aa   : > { %s25189_s15 = scalar_lea.hbm %s29626_s17, 128 }
 0x1ab   : > { %p25190_p3 = scmp.ne.s32.totalorder %s29626_s17, %s25189_s15  ;;  %p25196_p12 = scmp.lt.u32.totalorder %s25189_s15, %s29626_s17 }
 0x1ad   : > { %p25192_p13 = pnand %p25190_p3, %p29618_p8 }
 0x1af   : > { %p25193_p4 = pneg %p25192_p13 }
 0x1b1   : > { %p25198_p2 = pnand %p25196_p12, %p25193_p4 }
 0x1b3   : > { %25201 = shalt.err (!%p25198_p2)
}
 0x1b4   : > { %s25202_s5 = scalar_lea.vmem %s25917_s26, 128  ;;  %p25210_p0 = scmp.lt.s32.totalorder %s25917_s26, %s25917_s26 }
 0x1b5   : > { %p25203_p10 = scmp.ne.s32.totalorder %s25917_s26, %s25202_s5  ;;  %p25211_p5 = scmp.lt.s32.totalorder %s25202_s5, %s25202_s5 }
 0x1b7   : > { %p25205_p11 = pnand %p25203_p10, %p29618_p8  ;;  %p25212_p7 = por %p25211_p5, %p25210_p0 }
 0x1b9   : > { %p25206_p1 = pneg %p25205_p11 }
 0x1bb   : > { %p25213_p9 = pnand %p25212_p7, %p25206_p1 }
 0x1bd   : > { %25216 = shalt.err (!%p25213_p9)
}
 0x1be   : > { %23539 = dma.hbm_to_vmem [thread:$0]  (!%p29619_p6), %s29626_s17, 128, %s25917_s26, [#allocation28]  }
 0x1bf   : > { %s20273_s18 = sshll.u32 %s25769_s12, 7  ;;  %s21481_s21 = sshll.u32 %s25409_s27, 11 }
 0x1c0   : > { %s29627_s28 = sld [smem:[#allocation99_spill]]  ;;  %s627_s1 = scalar_lea.vmem [#allocation3], %s20273_s18 }
 0x1c1   : > { %s634_s20 = sshll.u32 %s627_s1, 4  ;;  %s20279_s16 = sshll.u32 %s25769_s12, 6  ;;  %s25967_s20 = int_to_ptr.vmem [resolvable:$true] %s634_s20 }
 0x1c2   : > { %s624_s5 = scalar_lea.sflag [#allocation4], %s25769_s12  ;;  %p29628_p6 = scmp.ne.s32.totalorder %s29614_s11, 0 }
 0x1c6   : > { %s25965_s6 = scalar_lea.hbm %s29627_s28, %s21481_s21  ;;  %s25222_s21 = scalar_lea.hbm %s29627_s28, 4096 }
 0x1c7   : > { %s25217_s8 = scalar_lea.hbm %s25965_s6, 2048  ;;  %p25223_p4 = scmp.lt.u32.totalorder %s25965_s6, %s29627_s28 }
 0x1c8   : > { %p25218_p8 = scmp.ne.s32.totalorder %s25965_s6, %s25217_s8  ;;  %p25224_p12 = scmp.lt.u32.totalorder %s25222_s21, %s25217_s8 }
 0x1c9   : > { %p25226_p10 = scmp.lt.u32.totalorder %s25217_s8, %s25965_s6 }
 0x1ca   : > { %p25220_p3 = pnand %p25218_p8, %p29628_p6  ;;  %p25225_p2 = por %p25224_p12, %p25223_p4 }
 0x1cc   : > { %p25221_p13 = pneg %p25220_p3  ;;  %p25227_p11 = por %p25226_p10, %p25225_p2 }
 0x1ce   : > { %p25228_p1 = pnand %p25227_p11, %p25221_p13 }
 0x1d0   : > { %25231 = shalt.err (!%p25228_p1)
}
 0x1d1   : > { %s25232_s18 = scalar_lea.vmem %s25967_s20, 2048  ;;  %s25429_s1 = smov [#allocation3]  }
 0x1d2   : > { %p25233_p0 = scmp.ne.s32.totalorder %s25967_s20, %s25232_s18  ;;  %s25237_s26 = sshll.u32 %s25429_s1, 4  ;;  %s25238_s26 = int_to_ptr.vmem [resolvable:$false] %s25237_s26 }
 0x1d3   : > { %s25239_s10 = scalar_lea.vmem %s25238_s26, 4096  ;;  %p25240_p9 = scmp.lt.s32.totalorder %s25967_s20, %s25238_s26 }
 0x1d4   : > { %p25235_p5 = pnand %p25233_p0, %p29628_p6  ;;  %p25241_p8 = scmp.lt.s32.totalorder %s25239_s10, %s25232_s18 }
 0x1d6   : > { %p25236_p7 = pneg %p25235_p5  ;;  %p25242_p3 = por %p25241_p8, %p25240_p9 }
 0x1d8   : > { %p25243_p4 = pnand %p25242_p3, %p25236_p7 }
 0x1da   : > { %25246 = shalt.err (!%p25243_p4)
}
 0x1db   : > { %p29629_p13 = scmp.ne.s32.totalorder %s29612_s30, 0  ;;  %s21483_s8 = sshll.u32 %s25409_s27, 10 }
 0x1dc   : > { %s29630_s15 = sld [smem:[#allocation101_spill]]  ;;  %s669_s1 = scalar_lea.vmem [#allocation8], %s20279_s16 }
 0x1dd   : > { %23543 = dma.hbm_to_vmem [thread:$0]  (!%p29629_p13), %s25965_s6, 2048, %s25967_s20, %s624_s5, %s29616_s4, %s29616_s4, %s29615_s9  }
 0x1de   : > { %s676_s26 = sshll.u32 %s669_s1, 4  ;;  %s26007_s26 = int_to_ptr.vmem [resolvable:$true] %s676_s26 }
 0x1e2   : > { %s26003_s18 = scalar_lea.hbm %s29630_s15, %s21483_s8  ;;  %s25252_s6 = scalar_lea.hbm %s29630_s15, 2048 }
 0x1e3   : > { %s25247_s10 = scalar_lea.hbm %s26003_s18, 1024  ;;  %p25253_p11 = scmp.lt.u32.totalorder %s26003_s18, %s29630_s15 }
 0x1e4   : > { %p25248_p12 = scmp.ne.s32.totalorder %s26003_s18, %s25247_s10  ;;  %p25254_p1 = scmp.lt.u32.totalorder %s25252_s6, %s25247_s10 }
 0x1e5   : > { %p25256_p5 = scmp.lt.u32.totalorder %s25247_s10, %s26003_s18 }
 0x1e6   : > { %p25250_p2 = pnand %p25248_p12, %p29628_p6  ;;  %p25255_p0 = por %p25254_p1, %p25253_p11 }
 0x1e8   : > { %p25251_p10 = pneg %p25250_p2  ;;  %p25257_p7 = por %p25256_p5, %p25255_p0 }
 0x1ea   : > { %p25258_p9 = pnand %p25257_p7, %p25251_p10 }
 0x1ec   : > { %25261 = shalt.err (!%p25258_p9)
}
 0x1ed   : > { %s25262_s21 = scalar_lea.vmem %s26007_s26, 1024  ;;  %s25430_s13 = smov [#allocation8]  }
 0x1ee   : > { %p25263_p8 = scmp.ne.s32.totalorder %s26007_s26, %s25262_s21  ;;  %s25267_s1 = sshll.u32 %s25430_s13, 4  ;;  %s25268_s1 = int_to_ptr.vmem [resolvable:$false] %s25267_s1 }
 0x1ef   : > { %s25269_s9 = scalar_lea.vmem %s25268_s1, 2048  ;;  %p25270_p12 = scmp.lt.s32.totalorder %s26007_s26, %s25268_s1 }
 0x1f0   : > { %p25265_p3 = pnand %p25263_p8, %p29628_p6  ;;  %p25271_p2 = scmp.lt.s32.totalorder %s25269_s9, %s25262_s21 }
 0x1f2   : > { %p25266_p4 = pneg %p25265_p3  ;;  %p25272_p11 = por %p25271_p2, %p25270_p12 }
 0x1f4   : > { %p25273_p1 = pnand %p25272_p11, %p25266_p4 }
 0x1f6   : > { %25276 = shalt.err (!%p25273_p1)
}
 0x1f7   : > { %23549 = dma.hbm_to_vmem [thread:$0]  (!%p29629_p13), %s26003_s18, 1024, %s26007_s26, %s25791_s7, %s29621_s2, %s29621_s2, %s29620_s23  }
 0x1f8   : > { %s29631_s6 = sld [smem:[#allocation102_spill]]  ;;  %s690_s5 = scalar_lea.vmem [#allocation9], %s20279_s16 }
 0x1f9   : > { %s697_s21 = sshll.u32 %s690_s5, 4  ;;  %s29632_s13 = sand.u32 1, %s25409_s27   ;;  %s26043_s21 = int_to_ptr.vmem [resolvable:$true] %s697_s21 }
 0x1fa   : > { %s26047_s1 = scalar_lea.sflag [#allocation10], %s29632_s13 }
 0x1fe   : > { %s26039_s20 = scalar_lea.hbm %s29631_s6, %s21483_s8  ;;  %s25282_s12 = scalar_lea.hbm %s29631_s6, 2048 }
 0x1ff   : > { %s25277_s9 = scalar_lea.hbm %s26039_s20, 1024  ;;  %p25283_p7 = scmp.lt.u32.totalorder %s26039_s20, %s29631_s6 }
 0x200   : > { %p25278_p10 = scmp.ne.s32.totalorder %s26039_s20, %s25277_s9  ;;  %p25284_p9 = scmp.lt.u32.totalorder %s25282_s12, %s25277_s9 }
 0x201   : > { %p25286_p3 = scmp.lt.u32.totalorder %s25277_s9, %s26039_s20 }
 0x202   : > { %p25280_p0 = pnand %p25278_p10, %p29628_p6  ;;  %p25285_p8 = por %p25284_p9, %p25283_p7 }
 0x204   : > { %p25281_p5 = pneg %p25280_p0  ;;  %p25287_p4 = por %p25286_p3, %p25285_p8 }
 0x206   : > { %p25288_p12 = pnand %p25287_p4, %p25281_p5 }
 0x208   : > { %25291 = shalt.err (!%p25288_p12)
}
 0x209   : > { %s25292_s16 = scalar_lea.vmem %s26043_s21, 1024  ;;  %s25431_s10 = smov [#allocation9]  }
 0x20a   : > { %p25293_p2 = scmp.ne.s32.totalorder %s26043_s21, %s25292_s16  ;;  %s25297_s4 = sshll.u32 %s25431_s10, 4  ;;  %s25298_s4 = int_to_ptr.vmem [resolvable:$false] %s25297_s4 }
 0x20b   : > { %s25299_s5 = scalar_lea.vmem %s25298_s4, 2048  ;;  %p25300_p10 = scmp.lt.s32.totalorder %s26043_s21, %s25298_s4 }
 0x20c   : > { %p25295_p11 = pnand %p25293_p2, %p29628_p6  ;;  %p25301_p0 = scmp.lt.s32.totalorder %s25299_s5, %s25292_s16 }
 0x20e   : > { %p25296_p1 = pneg %p25295_p11  ;;  %p25302_p7 = por %p25301_p0, %p25300_p10 }
 0x210   : > { %p25303_p9 = pnand %p25302_p7, %p25296_p1 }
 0x212   : > { %25306 = shalt.err (!%p25303_p9)
}
 0x213   : > { %23552 = dma.hbm_to_vmem [thread:$0]  (!%p29629_p13), %s26039_s20, 1024, %s26043_s21, %s26047_s1, %s29621_s2, %s29621_s2, %s29620_s23  }
 0x214   : > { %s29633_s11 = sld [smem:[#allocation43_spill]] }
 0x21a   : > { %p29634_p6 = scmp.ne.s32.totalorder %s29633_s11, 0 }
 0x21c   : > { %709 = sbr.rel (%p29634_p6) target bundleno = 4641 (0x1221), region = 88 }
 0x223   : > { %s26077_s13 = sand.u32 1, %s25401_s25   ;;  %p29635_p5 = scmp.ne.s32.totalorder %s29609_s19, 0 }
 0x224   : > { %s20286_s9 = sshll.u32 %s26077_s13, 7  ;;  %s712_s7 = scalar_lea.sflag [#allocation4], %s26077_s13 }
 0x225   : > { %s26081_s8 = scalar_lea.vmem [#allocation3], %s20286_s9 }
 0x226   : > { %25352 = dma.done.wait (%p29635_p5), %s712_s7, 2048  }
 0x227   : > { %25354 = vsyncadd (%p29635_p5), %s712_s7, 4294965248  ;;  %s720_s30 = sand.u32 1, %s25548_s0   ;;  %s20287_s23 = sshll.u32 %s26077_s13, 8 }
 0x228   : > { %s721_s2 = scalar_lea.sflag [#allocation7], %s720_s30  ;;  %s26089_s20 = scalar_lea.vmem [#allocation6], %s20287_s23 }
 0x229   : > { %25356 = dma.done.wait (%p29635_p5), %s721_s2, 5120  }
 0x22a   : > { %25358 = vsyncadd (%p29635_p5), %s721_s2, 4294962176  ;;  %s20288_s21 = sshll.u32 %s26077_s13, 6  ;;  %s739_s12 = scalar_lea.sflag [#allocation10], %s720_s30 }
 0x22b   : > { %s26096_s1 = scalar_lea.vmem [#allocation8], %s20288_s21  ;;  %s26098_s18 = scalar_lea.vmem [#allocation9], %s20288_s21 }
 0x22c   : > { %25360 = dma.done.wait (%p29635_p5), %s739_s12, 1024  }
 0x22d   : > { %25362 = vsyncadd (%p29635_p5), %s739_s12, 4294966272  ;;  %p29636_p13 = scmp.eq.s32.totalorder %s25548_s0, 0 }
 0x22f   : > { %25364 = dma.done.wait (%p29636_p13), [#allocation10], 128   ;;  %p29637_p8 = pmov %p29636_p13 }
 0x231   : > { %25366 = vsyncadd (%p29637_p8), [#allocation10], 4294967168  ;;  %p29638_p3 = pmov %p29637_p8 }
 0x233   : > { %25368 = dma.done.wait (%p29638_p3), [#allocation13], 256   ;;  %p29639_p4 = pmov %p29638_p3 }
 0x234   : > { %p29640_p12 = pmov %p29638_p3 }
 0x235   : > { %25370 = vsyncadd (%p29639_p4), [#allocation13], 4294967040 }
 0x236   : > { %25372 = dma.done.wait (%p29640_p12), [#allocation16], 2064   ;;  %p29641_p2 = pmov %p29638_p3 }
 0x238   : > { %25374 = vsyncadd (%p29641_p2), [#allocation16], 4294965232  ;;  %p29642_p11 = pmov %p29641_p2 }
 0x239   : > { %p29643_p1 = pmov %p29641_p2 }
 0x23a   : > { %25376 = dma.done.wait (%p29642_p11), [#allocation19], 36880  }
 0x23b   : > { %25378 = vsyncadd (%p29643_p1), [#allocation19], 4294930416  ;;  %p29644_p10 = pmov %p29643_p1 }
 0x23c   : > { %p29645_p0 = pmov %p29643_p1 }
 0x23d   : > { %25380 = dma.done.wait (%p29644_p10), [#allocation22], 8096  }
 0x23e   : > { %25382 = vsyncadd (%p29645_p0), [#allocation22], 4294959200  ;;  %p29646_p7 = pmov %p29645_p0 }
 0x23f   : > { %p29647_p9 = pmov %p29645_p0 }
 0x240   : > { %25384 = dma.done.wait (%p29646_p7), [#allocation25], 36896  }
 0x241   : > { %25386 = vsyncadd (%p29647_p9), [#allocation25], 4294930400  ;;  %p29648_p6 = pmov %p29645_p0 }
 0x242   : > { %p29649_p5 = pmov %p29645_p0 }
 0x243   : > { %25388 = dma.done.wait (%p29648_p6), [#allocation28], 256  }
 0x244   : > { %25390 = vsyncadd (%p29649_p5), [#allocation28], 4294967040  ;;  %v23719_v0 = vld [vmem:[#allocation15 + $0x40] sm:$0xff]   ;;  %v23721_v2 = vld [vmem:[#allocation15 + $0x48] sm:$0xff]   ;;  %v25432_v32 = vmov 0.0   ;;  %vm25433_vm0 = vmmov 0  }
 0x245   : > { %v23720_v1 = vld [vmem:[#allocation15] sm:$0xff]   ;;  %21486 = vmatprep.subr.bf16.mxu0 %v23719_v0  ;;  %v23722_v3 = vld [vmem:[#allocation15 + $0x8] sm:$0xff]   ;;  %v23723_v4 = vld [vmem:[#allocation15 + $0x50] sm:$0xff]   ;;  %21620 = vmatprep.subr.bf16.mxu1 %v25432_v32  ;;  %vm1216_vm1 = vcmask 1043456   ;;  %vm1212_vm2 = vcmask 64512   ;;  %vm2687_vm3 = vcmask 1041408  }
 0x246   : > { %21487 = vmatpush3.bf16.msra.mxu0 %v23720_v1  ;;  %v23724_v5 = vld [vmem:[#allocation15 + $0x10] sm:$0xff]   ;;  %v23725_v6 = vld [vmem:[#allocation15 + $0x58] sm:$0xff]   ;;  %v23727_v8 = vld [vmem:[#allocation15 + $0x60] sm:$0xff]   ;;  %21622 = vmatprep.mubr.msk.bf16.mxu1 %vm25433_vm0, %v25432_v32  ;;  %vm2683_vm4 = vcmask 31744   ;;  %s25435_s19 = smov 32   ;;  %vm4207_vm5 = vcmask 1040384  }
 0x247   : > { %21488 = vmatprep.subr.bf16.mxu0 %v23721_v2  ;;  %v23726_v7 = vld [vmem:[#allocation15 + $0x18] sm:$0xff]   ;;  %v23728_v9 = vld [vmem:[#allocation15 + $0x20] sm:$0xff]   ;;  %v23729_v10 = vld [vmem:[#allocation15 + $0x68] sm:$0xff]   ;;  %vm3998_vm7 = vcmask 261120   ;;  %vm7804_vm8 = vcmask 1046528   ;;  %vm9805_vm9 = vcmask 457728  }
 0x248   : > { %v23737_v11 = vld [vmem:[%s26081_s8 + $0x4] ss:$8 sps:$4 sm:$0xff]   ;;  %v23733_v15 = vld [vmem:[#allocation15 + $0x78] sm:$0xff]   ;;  %v23735_v17 = vld [vmem:[%s26081_s8] ss:$8 sps:$4 sm:$0xff]   ;;  %vm17921_vm12 = vcmask 1047552  }
 0x249   : > { %v23730_v12 = vld [vmem:[#allocation15 + $0x28] sm:$0xff]   ;;  %1124 = vmatprep.mubr.bf16.mxu0 %v23737_v11  ;;  %v23731_v13 = vld [vmem:[#allocation15 + $0x70] sm:$0xff]   ;;  %v23734_v16 = vld [vmem:[#allocation15 + $0x38] sm:$0xff]   ;;  %vm14324_vm10 = vsmask.f32 256  ;;  %s20303_s26 = sshll.u32 %s26077_s13, 4 }
 0x24a   : > { %21489 = vmatpush3.bf16.msra.mxu0 %v23722_v3  ;;  %v23732_v14 = vld [vmem:[#allocation15 + $0x30] sm:$0xff]   ;;  %v23738_v18 = vld [vmem:[%s26081_s8 + $0x14] ss:$8 sps:$4 sm:$0xff]   ;;  %v23740_v19 = vld [vmem:[%s26081_s8 + $0x10] ss:$8 sps:$4 sm:$0xff]   ;;  %s21485_s16 = sshll.u32 %s25548_s0, 8 }
 0x24b   : > { %21490 = vmatprep.subr.bf16.mxu0 %v23723_v4  ;;  %v23741_v20 = vld [vmem:[%s26081_s8 + $0x24] ss:$8 sps:$4 sm:$0xff]   ;;  %v23743_v21 = vld [vmem:[%s26081_s8 + $0x20] ss:$8 sps:$4 sm:$0xff]   ;;  %v23744_v22 = vld [vmem:[%s26081_s8 + $0x34] ss:$8 sps:$4 sm:$0xff]  }
 0x24c   : > { %v23746_v23 = vld [vmem:[%s26081_s8 + $0x30] ss:$8 sps:$4 sm:$0xff]   ;;  %v23747_v24 = vld [vmem:[%s26081_s8 + $0x44] ss:$8 sps:$4 sm:$0xff]   ;;  %v23749_v25 = vld [vmem:[%s26081_s8 + $0x40] ss:$8 sps:$4 sm:$0xff]  }
 0x24d   : > { %v23750_v26 = vld [vmem:[%s26081_s8 + $0x54] ss:$8 sps:$4 sm:$0xff]   ;;  %v23752_v27 = vld [vmem:[%s26081_s8 + $0x50] ss:$8 sps:$4 sm:$0xff]   ;;  %v23753_v28 = vld [vmem:[%s26081_s8 + $0x64] ss:$8 sps:$4 sm:$0xff]  }
 0x24e   : > { %21491 = vmatpush3.bf16.msra.mxu0 %v23724_v5  ;;  %v23755_v29 = vld [vmem:[%s26081_s8 + $0x60] ss:$8 sps:$4 sm:$0xff]   ;;  %v23756_v30 = vld [vmem:[%s26081_s8 + $0x74] ss:$8 sps:$4 sm:$0xff]   ;;  %v23758_v31 = vld [vmem:[%s26081_s8 + $0x70] ss:$8 sps:$4 sm:$0xff]  }
 0x24f   : > { %21492 = vmatprep.subr.bf16.mxu0 %v23725_v6  ;;  %v26154_v34 = vld [vmem:[#allocation17] ss:$0 sm:$0xff]  ;;  %v26159_v46 = vld [vmem:[#allocation11] sm:$0xff]   ;;  %vm26778_vm6 = vmneg %vm4207_vm5  ;;  %vm17922_vm13 = vsmask.f32 7424  ;;  %s859_s10 = scalar_lea.vmem [#allocation30], %s20303_s26 }
 0x250   : > { %vm28416_vm11 = vmand %vm4207_vm5, %vm14324_vm10  ;;  %s19998_s4 = sshll.u32 %s859_s10, 4  ;;  %s29907_s9 = sld [smem:[#allocation116_spill]]  ;;  %s29387_s4 = int_to_ptr.vmem [resolvable:$true] %s19998_s4 }
 0x251   : > { %vm29051_vm14 = vmand %vm17921_vm12, %vm17922_vm13  ;;  %s19984_s0 = scalar_lea.sflag [#allocation5], %s26077_s13  ;;  %s25307_s8 = scalar_lea.vmem %s29387_s4, 256 }
 0x252   : > { %21493 = vmatpush3.bf16.msra.mxu0 %v23726_v7  ;;  %p25308_p13 = scmp.ne.s32.totalorder %s29387_s4, %s25307_s8  ;;  %p29908_p8 = scmp.ne.s32.totalorder %s29610_s14, 0 }
 0x253   : > { %21494 = vmatprep.subr.bf16.mxu0 %v23727_v8  ;;  %s25436_s30 = smov [#allocation30]  }
 0x254   : > { %p25309_p3 = pnand %p25308_p13, %p29908_p8  ;;  %s25311_s23 = sshll.u32 %s25436_s30, 4  ;;  %s25312_s23 = int_to_ptr.vmem [resolvable:$false] %s25311_s23 }
 0x255   : > { %s25313_s2 = scalar_lea.vmem %s25312_s23, 512  ;;  %p25314_p12 = scmp.lt.s32.totalorder %s29387_s4, %s25312_s23 }
 0x256   : > { %21495 = vmatpush3.bf16.msra.mxu0 %v23728_v9  ;;  %s29385_s7 = scalar_lea.hbm %s29907_s9, %s21485_s16  ;;  %p25310_p4 = pneg %p25309_p3 }
 0x257   : > { %21496 = vmatprep.subr.bf16.mxu0 %v23729_v10  ;;  %p25315_p2 = scmp.lt.s32.totalorder %s25313_s2, %s25307_s8 }
 0x259   : > { %p25316_p11 = por %p25315_p2, %p25314_p12 }
 0x25a   : > { %21497 = vmatpush3.bf16.msra.mxu0 %v23730_v12 }
 0x25b   : > { %21498 = vmatprep.subr.bf16.mxu0 %v23731_v13  ;;  %p25317_p1 = pnand %p25316_p11, %p25310_p4 }
 0x25e   : > { %21499 = vmatpush3.bf16.msra.mxu0 %v23732_v14 }
 0x25f   : > { %21500 = vmatprep.subr.bf16.mxu0 %v23733_v15 }
 0x262   : > { %21501 = vmatpush3.bf16.msra.mxu0 %v23734_v16 }
 0x263   : > { %21614 = vmatprep.subr.bf16.mxu0 %v25432_v32 }
 0x265   : > { %1125 = vmatmul.mubr.bf16.vlgmr.msra.gmra.mrb[0].mxu0 %v23735_v17 }
 0x266   : > { %1132 = vmatprep.mubr.bf16.mxu0 %v23738_v18 }
 0x26d   : > { %1133 = vmatmul.mubr.bf16.gmra.mrb[4].mxu0 %v23740_v19 }
 0x26e   : > { %1140 = vmatprep.mubr.bf16.mxu0 %v23741_v20 }
 0x275   : > { %1141 = vmatmul.mubr.bf16.gmra.mrb[8].mxu0 %v23743_v21 }
 0x276   : > { %1148 = vmatprep.mubr.bf16.mxu0 %v23744_v22  ;;  %v29481_v22 = vmov 0  }
 0x277   : > { %23718 = vset.pattern.permute.xlu0 %v29481_v22 }
 0x27d   : > { %1149 = vmatmul.mubr.bf16.gmra.mrb[12].mxu0 %v23746_v23 }
 0x27e   : > { %1156 = vmatprep.mubr.bf16.mxu0 %v23747_v24 }
 0x285   : > { %1157 = vmatmul.mubr.bf16.gmra.mrb[16].mxu0 %v23749_v25 }
 0x286   : > { %1164 = vmatprep.mubr.bf16.mxu0 %v23750_v26 }
 0x28d   : > { %1165 = vmatmul.mubr.bf16.gmra.mrb[20].mxu0 %v23752_v27 }
 0x28e   : > { %1172 = vmatprep.mubr.bf16.mxu0 %v23753_v28 }
 0x295   : > { %1173 = vmatmul.mubr.bf16.gmra.mrb[24].mxu0 %v23755_v29 }
 0x296   : > { %1180 = vmatprep.mubr.bf16.mxu0 %v23756_v30 }
 0x29d   : > { %1181 = vmatmul.mubr.bf16.gmra.mrb[28].mxu0 %v23758_v31 }
 0x29e   : > { %21616 = vmatprep.mubr.msk.bf16.mxu0 %vm25433_vm0, %v25432_v32 }
 0x338   : > { %v21502_v33 = vpop.f32.mrb[0].mxu0 }
 0x339   : > { %v21503_v35 = vpop.f32.mrb[1].mxu0 }
 0x33a   : > { %v21504_v36 = vadd.f32 %v21503_v35, %v21502_v33  ;;  %v21505_v37 = vpop.f32.mrb[2].mxu0 }
 0x33b   : > { %v21506_v38 = vpop.f32.mrb[3].mxu0 }
 0x33c   : > { %v1127_v39 = vadd.f32 %v21504_v36, %v26154_v34  ;;  %v21507_v40 = vadd.f32 %v21506_v38, %v21505_v37 }
 0x33e   : > { %v1189_v41 = vpack.c.bf16 %v1127_v39, %v1127_v39  ;;  %v1130_v42 = vadd.f32 %v21507_v40, %v26154_v34 }
 0x340   : > { %v21508_v43 = vpop.f32.mrb[4].mxu0  ;;  %v1218_v44 = vsel %vm1216_vm1, %v1189_v41, 0  ;;  %v1190_v45 = vpack.c.bf16 %v1130_v42, %v1130_v42 }
 0x341   : > { %v21509_v47 = vpop.f32.mrb[5].mxu0  ;;  %21615 = vmatpush3.bf16.msra.mxu0 %v1218_v44 }
 0x342   : > { %v21510_v48 = vadd.f32 %v21509_v47, %v21508_v43  ;;  %v21511_v49 = vpop.f32.mrb[6].mxu0  ;;  %v1262_v50 = vsel %vm1216_vm1, %v1190_v45, 0  ;;  %21686 = vmatprep.subr.bf16.mxu0 %v25432_v32 }
 0x343   : > { %v21512_v51 = vpop.f32.mrb[7].mxu0  ;;  %21621 = vmatpush3.bf16.msra.mxu1 %v1262_v50 }
 0x344   : > { %v1135_v52 = vadd.f32 %v21510_v48, %v26154_v34  ;;  %v21513_v53 = vadd.f32 %v21512_v51, %v21511_v49  ;;  %21617 = vmatmul.mubr.msk.bf16.vlgmr.msra.gmra.mrb[32].mxu0 %vm1212_vm2, %v26159_v46  ;;  %21626 = vmatprep.subr.bf16.mxu1 %v25432_v32 }
 0x345   : > { %21688 = vmatprep.mubr.msk.bf16.mxu0 %vm25433_vm0, %v25432_v32 }
 0x346   : > { %v1191_v54 = vpack.c.bf16 %v1135_v52, %v1135_v52  ;;  %v1138_v55 = vadd.f32 %v21513_v53, %v26154_v34  ;;  %21623 = vmatmul.mubr.msk.bf16.vlgmr.msra.gmra.mrb[0].mxu1 %vm1212_vm2, %v26159_v46 }
 0x347   : > { %21628 = vmatprep.mubr.msk.bf16.mxu1 %vm25433_vm0, %v25432_v32 }
 0x348   : > { %v1306_v56 = vsel %vm1216_vm1, %v1191_v54, 0  ;;  %v21514_v57 = vpop.f32.mrb[8].mxu0  ;;  %v1192_v59 = vpack.c.bf16 %v1138_v55, %v1138_v55 }
 0x349   : > { %21627 = vmatpush3.bf16.msra.mxu1 %v1306_v56  ;;  %v21515_v58 = vpop.f32.mrb[9].mxu0 }
 0x34a   : > { %21632 = vmatprep.subr.bf16.mxu1 %v25432_v32  ;;  %v21516_v60 = vadd.f32 %v21515_v58, %v21514_v57  ;;  %v21517_v61 = vpop.f32.mrb[10].mxu0  ;;  %v1350_v1 = vsel %vm1216_vm1, %v1192_v59, 0 }
 0x34b   : > { %v21518_v62 = vpop.f32.mrb[11].mxu0 }
 0x34c   : > { %v1143_v63 = vadd.f32 %v21516_v60, %v26154_v34  ;;  %v21519_v0 = vadd.f32 %v21518_v62, %v21517_v61  ;;  %v1921_v60 = vld [vmem:[%s26096_s1] sm:$0xf] }
 0x34e   : > { %21629 = vmatmul.mubr.msk.bf16.vlgmr.msra.gmra.mrb[4].mxu1 %vm1212_vm2, %v26159_v46  ;;  %v1193_v2 = vpack.c.bf16 %v1143_v63, %v1143_v63  ;;  %v1146_v10 = vadd.f32 %v21519_v0, %v26154_v34  ;;  %v1948_v63 = vsel %vm1216_vm1, %v1921_v60, 0  ;;  %v1923_v0 = vld [vmem:[%s26096_s1 + $0x8] sm:$0xf] }
 0x34f   : > { %21633 = vmatpush3.bf16.msra.mxu1 %v1350_v1  ;;  %21634 = vmatprep.mubr.msk.bf16.mxu1 %vm25433_vm0, %v25432_v32 }
 0x350   : > { %21638 = vmatprep.subr.bf16.mxu1 %v25432_v32  ;;  %v21520_v3 = vpop.f32.mrb[12].mxu0  ;;  %v1394_v8 = vsel %vm1216_vm1, %v1193_v2, 0  ;;  %v1194_v13 = vpack.c.bf16 %v1146_v10, %v1146_v10  ;;  %v26257_v2 = vld [vmem:[#allocation12] sm:$0xff]  }
 0x351   : > { %v21521_v4 = vpop.f32.mrb[13].mxu0 }
 0x352   : > { %v21522_v5 = vadd.f32 %v21521_v4, %v21520_v3  ;;  %v21523_v6 = vpop.f32.mrb[14].mxu0  ;;  %v1438_v19 = vsel %vm1216_vm1, %v1194_v13, 0  ;;  %v2036_v3 = vsel %vm1216_vm1, %v1923_v0, 0  ;;  %v1929_v13 = vld [vmem:[%s26096_s1 + $0x20] sm:$0xf] }
 0x353   : > { %v21524_v7 = vpop.f32.mrb[15].mxu0 }
 0x354   : > { %v21525_v9 = vadd.f32 %v21524_v7, %v21523_v6  ;;  %v1151_v17 = vadd.f32 %v21522_v5, %v26154_v34  ;;  %v1925_v5 = vld [vmem:[%s26096_s1 + $0x10] sm:$0xf] }
 0x355   : > { %v2124_v7 = vsel %vm1216_vm1, %v1925_v5, 0 }
 0x356   : > { %21635 = vmatmul.mubr.msk.bf16.vlgmr.msra.gmra.mrb[8].mxu1 %vm1212_vm2, %v26159_v46  ;;  %v1195_v20 = vpack.c.bf16 %v1151_v17, %v1151_v17  ;;  %v1154_v30 = vadd.f32 %v21525_v9, %v26154_v34  ;;  %v1927_v9 = vld [vmem:[%s26096_s1 + $0x18] sm:$0xf]  ;;  %v1931_v17 = vld [vmem:[%s26096_s1 + $0x28] sm:$0xf] }
 0x357   : > { %21639 = vmatpush3.bf16.msra.mxu1 %v1394_v8  ;;  %21640 = vmatprep.mubr.msk.bf16.mxu1 %vm25433_vm0, %v25432_v32 }
 0x358   : > { %21644 = vmatprep.subr.bf16.mxu1 %v25432_v32  ;;  %v21526_v11 = vpop.f32.mrb[16].mxu0  ;;  %v1482_v27 = vsel %vm1216_vm1, %v1195_v20, 0  ;;  %v1196_v36 = vpack.c.bf16 %v1154_v30, %v1154_v30 }
 0x359   : > { %v21527_v12 = vpop.f32.mrb[17].mxu0 }
 0x35a   : > { %v21528_v14 = vadd.f32 %v21527_v12, %v21526_v11  ;;  %v21529_v15 = vpop.f32.mrb[18].mxu0  ;;  %v1526_v43 = vsel %vm1216_vm1, %v1196_v36, 0  ;;  %v2212_v11 = vsel %vm1216_vm1, %v1927_v9, 0 }
 0x35b   : > { %v21530_v16 = vpop.f32.mrb[19].mxu0  ;;  %v20414_v9 = vld.sshfl [vmem:[%s26098_s18 + $0x38] sm:$0x33 pattern:$0x76325410] }
 0x35c   : > { %v21531_v18 = vadd.f32 %v21530_v16, %v21529_v15  ;;  %v1159_v40 = vadd.f32 %v21528_v14, %v26154_v34  ;;  %v2300_v15 = vsel %vm1216_vm1, %v1929_v13, 0  ;;  %v23776_v13 = vld [vmem:[#allocation20 + $0x404] ss:$8 sps:$4 sm:$0xff]  }
 0x35e   : > { %21641 = vmatmul.mubr.msk.bf16.vlgmr.msra.gmra.mrb[12].mxu1 %vm1212_vm2, %v26159_v46  ;;  %v1197_v47 = vpack.c.bf16 %v1159_v40, %v1159_v40  ;;  %v1162_v57 = vadd.f32 %v21531_v18, %v26154_v34  ;;  %v1922_v18 = vld [vmem:[%s26096_s1 + $0x4] sm:$0xf] }
 0x35f   : > { %21645 = vmatpush3.bf16.msra.mxu1 %v1438_v19  ;;  %21646 = vmatprep.mubr.msk.bf16.mxu1 %vm25433_vm0, %v25432_v32  ;;  %v2388_v19 = vsel %vm1216_vm1, %v1931_v17, 0  ;;  %v1992_v20 = vsel %vm1216_vm1, %v1922_v18, 0  ;;  %v1930_v40 = vld [vmem:[%s26096_s1 + $0x24] sm:$0xf]  ;;  %v23782_v17 = vld [vmem:[#allocation20 + $0x414] ss:$8 sps:$4 sm:$0xff]  }
 0x360   : > { %21650 = vmatprep.subr.bf16.mxu1 %v25432_v32  ;;  %v21532_v21 = vpop.f32.mrb[20].mxu0  ;;  %v1570_v54 = vsel %vm1216_vm1, %v1197_v47, 0  ;;  %v1198_v62 = vpack.c.bf16 %v1162_v57, %v1162_v57  ;;  %v20375_v57 = vld.sshfl [vmem:[%s26098_s18 + $0x4] sm:$0x33 pattern:$0x76325410] }
 0x361   : > { %v21533_v23 = vpop.f32.mrb[21].mxu0  ;;  %v23780_v18 = vld [vmem:[#allocation20 + $0x410] ss:$8 sps:$4 sm:$0xff]  }
 0x362   : > { %v21534_v24 = vadd.f32 %v21533_v23, %v21532_v21  ;;  %v21535_v25 = vpop.f32.mrb[22].mxu0  ;;  %v1933_v21 = vld [vmem:[%s26096_s1 + $0x30] sm:$0xf]  ;;  %v1924_v23 = vld [vmem:[%s26096_s1 + $0xc] sm:$0xf] }
 0x363   : > { %v21536_v26 = vpop.f32.mrb[23].mxu0 }
 0x364   : > { %v26200_v28 = vadd.f32 %v21534_v24, %v26154_v34  ;;  %v21537_v29 = vadd.f32 %v21536_v26, %v21535_v25  ;;  %v2476_v24 = vsel %vm1216_vm1, %v1933_v21, 0  ;;  %v2080_v25 = vsel %vm1216_vm1, %v1924_v23, 0  ;;  %v20372_v26 = vld.sshfl [vmem:[%s26098_s18] sm:$0x33 pattern:$0x76325410] }
 0x366   : > { %21647 = vmatmul.mubr.msk.bf16.vlgmr.msra.gmra.mrb[16].mxu1 %vm1212_vm2, %v26159_v46  ;;  %v26206_v31 = vadd.f32 %v21537_v29, %v26154_v34  ;;  %v1199_v1 = vpack.c.bf16 %v26200_v28, %v26200_v28  ;;  %v2682_v29 = vcombine.high %v20372_v26, %v20372_v26 }
 0x367   : > { %21651 = vmatpush3.bf16.msra.mxu1 %v1482_v27  ;;  %21652 = vmatprep.mubr.msk.bf16.mxu1 %vm25433_vm0, %v25432_v32  ;;  %v1926_v27 = vld [vmem:[%s26096_s1 + $0x14] sm:$0xf] }
 0x368   : > { %21656 = vmatprep.subr.bf16.mxu1 %v25432_v32  ;;  %v21538_v33 = vpop.f32.mrb[24].mxu0  ;;  %v1658_v4 = vsel %vm1216_vm1, %v1199_v1, 0  ;;  %v1200_v6 = vpack.c.bf16 %v26206_v31, %v26206_v31  ;;  %v2168_v30 = vsel %vm1216_vm1, %v1926_v27, 0  ;;  %v2747_v1 = vsel %vm2687_vm3, %v20375_v57, 0  ;;  %v23800_v27 = vld [vmem:[#allocation20 + $0x444] ss:$8 sps:$4 sm:$0xff]  }
 0x369   : > { %v21539_v35 = vpop.f32.mrb[25].mxu0  ;;  %v20378_v31 = vld.sshfl [vmem:[%s26098_s18 + $0x8] sm:$0x33 pattern:$0x76325410] }
 0x36a   : > { %v21540_v37 = vadd.f32 %v21539_v35, %v21538_v33  ;;  %v21541_v38 = vpop.f32.mrb[26].mxu0  ;;  %v1702_v8 = vsel %vm1216_vm1, %v1200_v6, 0  ;;  %v1928_v33 = vld [vmem:[%s26096_s1 + $0x1c] sm:$0xf]  ;;  %v2689_v35 = vsel %vm2687_vm3, %v20372_v26, 0  ;;  %v2803_v36 = vcombine.high %v20378_v31, %v20378_v31 }
 0x36b   : > { %v21542_v39 = vpop.f32.mrb[27].mxu0  ;;  %v20411_v26 = vld.sshfl [vmem:[%s26098_s18 + $0x34] sm:$0x33 pattern:$0x76325410] }
 0x36c   : > { %v1175_v41 = vadd.f32 %v21540_v37, %v26154_v34  ;;  %v21543_v42 = vadd.f32 %v21542_v39, %v21541_v38  ;;  %v2256_v37 = vsel %vm1216_vm1, %v1928_v33, 0  ;;  %v20384_v38 = vld.sshfl [vmem:[%s26098_s18 + $0x10] sm:$0x33 pattern:$0x76325410] }
 0x36d   : > { %v26373_v39 = vld [vmem:[#allocation14] sm:$0xff]   ;;  %v2921_v47 = vsel %vm2687_vm3, %v20384_v38, 0 }
 0x36e   : > { %21653 = vmatmul.mubr.msk.bf16.vlgmr.msra.gmra.mrb[20].mxu1 %vm1212_vm2, %v26159_v46  ;;  %v1201_v44 = vpack.c.bf16 %v1175_v41, %v1175_v41  ;;  %v26217_v45 = vadd.f32 %v21543_v42, %v26154_v34  ;;  %v2805_v41 = vsel %vm2687_vm3, %v20378_v31, 0  ;;  %v2919_v42 = vcombine.high %v20384_v38, %v20384_v38  ;;  %v23806_v31 = vld [vmem:[#allocation20 + $0x454] ss:$8 sps:$4 sm:$0xff]   ;;  %v23804_v33 = vld [vmem:[#allocation20 + $0x450] ss:$8 sps:$4 sm:$0xff]  }
 0x36f   : > { %21657 = vmatpush3.bf16.msra.mxu1 %v1526_v43  ;;  %21658 = vmatprep.mubr.msk.bf16.mxu1 %vm25433_vm0, %v25432_v32  ;;  %v2344_v43 = vsel %vm1216_vm1, %v1930_v40, 0  ;;  %v23810_v40 = vld [vmem:[#allocation20 + $0x460] ss:$8 sps:$4 sm:$0xff]  }
 0x370   : > { %21662 = vmatprep.subr.bf16.mxu1 %v25432_v32  ;;  %v21544_v48 = vpop.f32.mrb[28].mxu0  ;;  %v1746_v49 = vsel %vm1216_vm1, %v1201_v44, 0  ;;  %v1202_v10 = vpack.c.bf16 %v26217_v45, %v26217_v45  ;;  %v20390_v44 = vld.sshfl [vmem:[%s26098_s18 + $0x18] sm:$0x33 pattern:$0x76325410] }
 0x371   : > { %v21545_v50 = vpop.f32.mrb[29].mxu0  ;;  %21687 = vmatpush3.bf16.msra.mxu0 %v1746_v49  ;;  %v1932_v45 = vld [vmem:[%s26096_s1 + $0x2c] sm:$0xf] }
 0x372   : > { %v21546_v51 = vadd.f32 %v21545_v50, %v21544_v48  ;;  %v21547_v52 = vpop.f32.mrb[30].mxu0  ;;  %21698 = vmatprep.subr.bf16.mxu0 %v25432_v32  ;;  %v1790_v12 = vsel %vm1216_vm1, %v1202_v10, 0  ;;  %v3035_v48 = vcombine.high %v20390_v44, %v20390_v44  ;;  %v2432_v49 = vsel %vm1216_vm1, %v1932_v45, 0  ;;  %v23818_v45 = vld [vmem:[#allocation20 + $0x474] ss:$8 sps:$4 sm:$0xff]  }
 0x373   : > { %v21548_v53 = vpop.f32.mrb[31].mxu0  ;;  %v20396_v50 = vld.sshfl [vmem:[%s26098_s18 + $0x20] sm:$0x33 pattern:$0x76325410]  ;;  %v3499_v10 = vcombine.high %v20414_v9, %v20414_v9 }
 0x374   : > { %v1183_v55 = vadd.f32 %v21546_v51, %v26154_v34  ;;  %21689 = vmatmul.mubr.msk.bf16.vlgmr.msra.gmra.mrb[36].mxu0 %vm1212_vm2, %v26159_v46  ;;  %v21549_v56 = vadd.f32 %v21548_v53, %v21547_v52  ;;  %v1934_v51 = vld [vmem:[%s26096_s1 + $0x34] sm:$0xf]  ;;  %v3037_v52 = vsel %vm2687_vm3, %v20390_v44, 0  ;;  %v3151_v53 = vcombine.high %v20396_v50, %v20396_v50 }
 0x375   : > { %21700 = vmatprep.mubr.msk.bf16.mxu0 %vm25433_vm0, %v25432_v32  ;;  %v26492_v44 = vld [vmem:[%s26089_s20 + $0x10] sm:$0xff] }
 0x376   : > { %21659 = vmatmul.mubr.msk.bf16.vlgmr.msra.gmra.mrb[24].mxu1 %vm1212_vm2, %v26159_v46  ;;  %v1203_v58 = vpack.c.bf16 %v1183_v55, %v1183_v55  ;;  %v26234_v59 = vadd.f32 %v21549_v56, %v26154_v34  ;;  %v1614_v34 = vsel %vm1216_vm1, %v1198_v62, 0  ;;  %v20402_v55 = vld.sshfl [vmem:[%s26098_s18 + $0x28] sm:$0x33 pattern:$0x76325410] }
 0x377   : > { %21663 = vmatpush3.bf16.msra.mxu1 %v1570_v54  ;;  %21664 = vmatprep.mubr.msk.bf16.mxu1 %vm25433_vm0, %v25432_v32  ;;  %v2520_v54 = vsel %vm1216_vm1, %v1934_v51, 0  ;;  %v1936_v56 = vld [vmem:[%s26096_s1 + $0x3c] sm:$0xf] }
 0x378   : > { %21668 = vmatprep.subr.bf16.mxu1 %v25432_v32  ;;  %v1834_v61 = vsel %vm1216_vm1, %v1203_v58, 0  ;;  %v1204_v14 = vpack.c.bf16 %v26234_v59, %v26234_v59  ;;  %v3153_v58 = vsel %vm2687_vm3, %v20396_v50, 0  ;;  %v3267_v59 = vcombine.high %v20402_v55, %v20402_v55  ;;  %v20408_v62 = vld.sshfl [vmem:[%s26098_s18 + $0x30] sm:$0x33 pattern:$0x76325410] }
 0x379   : > { %21699 = vmatpush3.bf16.msra.mxu0 %v1834_v61  ;;  %v2608_v60 = vsel %vm1216_vm1, %v1936_v56, 0  ;;  %v2745_v61 = vcombine.high %v20375_v57, %v20375_v57  ;;  %v3383_v0 = vcombine.high %v20408_v62, %v20408_v62 }
 0x37a   : > { %21710 = vmatprep.subr.bf16.mxu0 %v25432_v32  ;;  %v1878_v16 = vsel %vm1216_vm1, %v1204_v14, 0 }
 0x37c   : > { %21701 = vmatmul.mubr.msk.bf16.vlgmr.msra.gmra.mrb[40].mxu0 %vm1212_vm2, %v26159_v46 }
 0x37d   : > { %21711 = vmatpush3.bf16.msra.mxu0 %v1948_v63  ;;  %21712 = vmatprep.mubr.msk.bf16.mxu0 %vm25433_vm0, %v25432_v32  ;;  %v20381_v63 = vld.sshfl [vmem:[%s26098_s18 + $0xc] sm:$0x33 pattern:$0x76325410] }
 0x37e   : > { %21665 = vmatmul.mubr.msk.bf16.vlgmr.msra.gmra.mrb[28].mxu1 %vm1212_vm2, %v26159_v46  ;;  %21722 = vmatprep.subr.bf16.mxu0 %v25432_v32  ;;  %v2863_v5 = vsel %vm2687_vm3, %v20381_v63, 0 }
 0x37f   : > { %21669 = vmatpush3.bf16.msra.mxu1 %v1614_v34  ;;  %21670 = vmatprep.mubr.msk.bf16.mxu1 %vm25433_vm0, %v25432_v32  ;;  %v3269_v34 = vsel %vm2687_vm3, %v20402_v55, 0 }
 0x380   : > { %21674 = vmatprep.subr.bf16.mxu1 %v25432_v32 }
 0x384   : > { %21713 = vmatmul.mubr.msk.bf16.vlgmr.msra.gmra.mrb[44].mxu0 %vm1212_vm2, %v26257_v2 }
 0x385   : > { %21723 = vmatpush3.bf16.msra.mxu0 %v2036_v3  ;;  %21724 = vmatprep.mubr.msk.bf16.mxu0 %vm25433_vm0, %v25432_v32  ;;  %v2861_v3 = vcombine.high %v20381_v63, %v20381_v63 }
 0x386   : > { %21671 = vmatmul.mubr.msk.bf16.vlgmr.msra.gmra.mrb[32].mxu1 %vm1212_vm2, %v26159_v46  ;;  %21734 = vmatprep.subr.bf16.mxu0 %v25432_v32 }
 0x387   : > { %21675 = vmatpush3.bf16.msra.mxu1 %v1658_v4  ;;  %21676 = vmatprep.mubr.msk.bf16.mxu1 %vm25433_vm0, %v25432_v32  ;;  %v3385_v4 = vsel %vm2687_vm3, %v20408_v62, 0 }
 0x388   : > { %21680 = vmatprep.subr.bf16.mxu1 %v25432_v32 }
 0x38c   : > { %21725 = vmatmul.mubr.msk.bf16.vlgmr.msra.gmra.mrb[48].mxu0 %vm1212_vm2, %v26257_v2 }
 0x38d   : > { %21735 = vmatpush3.bf16.msra.mxu0 %v2124_v7  ;;  %21736 = vmatprep.mubr.msk.bf16.mxu0 %vm25433_vm0, %v25432_v32 }
 0x38e   : > { %21677 = vmatmul.mubr.msk.bf16.vlgmr.msra.gmra.mrb[36].mxu1 %vm1212_vm2, %v26159_v46  ;;  %21746 = vmatprep.subr.bf16.mxu0 %v25432_v32 }
 0x38f   : > { %21681 = vmatpush3.bf16.msra.mxu1 %v1702_v8  ;;  %21682 = vmatprep.mubr.msk.bf16.mxu1 %vm25433_vm0, %v25432_v32 }
 0x390   : > { %21692 = vmatprep.subr.bf16.mxu1 %v25432_v32 }
 0x394   : > { %21737 = vmatmul.mubr.msk.bf16.vlgmr.msra.gmra.mrb[52].mxu0 %vm1212_vm2, %v26257_v2 }
 0x395   : > { %21747 = vmatpush3.bf16.msra.mxu0 %v2212_v11  ;;  %21748 = vmatprep.mubr.msk.bf16.mxu0 %vm25433_vm0, %v25432_v32  ;;  %v20399_v11 = vld.sshfl [vmem:[%s26098_s18 + $0x24] sm:$0x33 pattern:$0x76325410] }
 0x396   : > { %21683 = vmatmul.mubr.msk.bf16.vlgmr.msra.gmra.mrb[40].mxu1 %vm1212_vm2, %v26159_v46  ;;  %21758 = vmatprep.subr.bf16.mxu0 %v25432_v32  ;;  %v3211_v21 = vsel %vm2687_vm3, %v20399_v11, 0 }
 0x397   : > { %21693 = vmatpush3.bf16.msra.mxu1 %v1790_v12  ;;  %21694 = vmatprep.mubr.msk.bf16.mxu1 %vm25433_vm0, %v25432_v32  ;;  %v3501_v12 = vsel %vm2687_vm3, %v20414_v9, 0 }
 0x398   : > { %21704 = vmatprep.subr.bf16.mxu1 %v25432_v32 }
 0x39c   : > { %21749 = vmatmul.mubr.msk.bf16.vlgmr.msra.gmra.mrb[56].mxu0 %vm1212_vm2, %v26257_v2 }
 0x39d   : > { %21759 = vmatpush3.bf16.msra.mxu0 %v2300_v15  ;;  %21760 = vmatprep.mubr.msk.bf16.mxu0 %vm25433_vm0, %v25432_v32  ;;  %v3209_v15 = vcombine.high %v20399_v11, %v20399_v11 }
 0x39e   : > { %21695 = vmatmul.mubr.msk.bf16.vlgmr.msra.gmra.mrb[44].mxu1 %vm1212_vm2, %v26159_v46  ;;  %21770 = vmatprep.subr.bf16.mxu0 %v25432_v32 }
 0x39f   : > { %21705 = vmatpush3.bf16.msra.mxu1 %v1878_v16  ;;  %21706 = vmatprep.mubr.msk.bf16.mxu1 %vm25433_vm0, %v25432_v32  ;;  %v23774_v16 = vld [vmem:[#allocation20 + $0x400] ss:$8 sps:$4 sm:$0xff]  }
 0x3a0   : > { %21716 = vmatprep.subr.bf16.mxu1 %v25432_v32 }
 0x3a4   : > { %21761 = vmatmul.mubr.msk.bf16.vlgmr.msra.gmra.mrb[60].mxu0 %vm1212_vm2, %v26257_v2 }
 0x3a5   : > { %21771 = vmatpush3.bf16.msra.mxu0 %v2388_v19  ;;  %21772 = vmatprep.mubr.msk.bf16.mxu0 %vm25433_vm0, %v25432_v32  ;;  %v20405_v19 = vld.sshfl [vmem:[%s26098_s18 + $0x2c] sm:$0x33 pattern:$0x76325410] }
 0x3a6   : > { %21707 = vmatmul.mubr.msk.bf16.vlgmr.msra.gmra.mrb[48].mxu1 %vm1212_vm2, %v26159_v46  ;;  %21782 = vmatprep.subr.bf16.mxu0 %v25432_v32  ;;  %v1935_v46 = vld [vmem:[%s26096_s1 + $0x38] sm:$0xf]  ;;  %v3325_v23 = vcombine.high %v20405_v19, %v20405_v19 }
 0x3a7   : > { %21717 = vmatpush3.bf16.msra.mxu1 %v1992_v20  ;;  %21718 = vmatprep.mubr.msk.bf16.mxu1 %vm25433_vm0, %v25432_v32  ;;  %v2564_v28 = vsel %vm1216_vm1, %v1935_v46, 0  ;;  %v23788_v20 = vld [vmem:[#allocation20 + $0x424] ss:$8 sps:$4 sm:$0xff]   ;;  %v23792_v46 = vld [vmem:[#allocation20 + $0x430] ss:$8 sps:$4 sm:$0xff]  }
 0x3a8   : > { %21728 = vmatprep.subr.bf16.mxu1 %v25432_v32 }
 0x3ac   : > { %21773 = vmatmul.mubr.msk.bf16.vlgmr.msra.gmra.mrb[64].mxu0 %vm1212_vm2, %v26257_v2 }
 0x3ad   : > { %21783 = vmatpush3.bf16.msra.mxu0 %v2476_v24  ;;  %21784 = vmatprep.mubr.msk.bf16.mxu0 %vm25433_vm0, %v25432_v32  ;;  %v23786_v24 = vld [vmem:[#allocation20 + $0x420] ss:$8 sps:$4 sm:$0xff]  }
 0x3ae   : > { %21719 = vmatmul.mubr.msk.bf16.vlgmr.msra.gmra.mrb[52].mxu1 %vm1212_vm2, %v26257_v2  ;;  %21794 = vmatprep.subr.bf16.mxu0 %v25432_v32 }
 0x3af   : > { %21729 = vmatpush3.bf16.msra.mxu1 %v2080_v25  ;;  %21730 = vmatprep.mubr.msk.bf16.mxu1 %vm25433_vm0, %v25432_v32  ;;  %v23794_v25 = vld [vmem:[#allocation20 + $0x434] ss:$8 sps:$4 sm:$0xff]  }
 0x3b0   : > { %21740 = vmatprep.subr.bf16.mxu1 %v25432_v32 }
 0x3b4   : > { %21785 = vmatmul.mubr.msk.bf16.vlgmr.msra.gmra.mrb[68].mxu0 %vm1212_vm2, %v26257_v2 }
 0x3b5   : > { %21795 = vmatpush3.bf16.msra.mxu0 %v2564_v28  ;;  %21796 = vmatprep.mubr.msk.bf16.mxu0 %vm25433_vm0, %v25432_v32  ;;  %v3327_v28 = vsel %vm2687_vm3, %v20405_v19, 0  ;;  %v23767_v19 = vld [vmem:[#allocation20 + $0x14] ss:$8 sps:$4 sm:$0xff]  }
 0x3b6   : > { %21731 = vmatmul.mubr.msk.bf16.vlgmr.msra.gmra.mrb[56].mxu1 %vm1212_vm2, %v26257_v2  ;;  %20373 = vmatprep.subr.msk.bf16.mxu0 %vm2687_vm3, %v2682_v29  ;;  %v3441_v29 = vcombine.high %v20411_v26, %v20411_v26 }
 0x3b7   : > { %21741 = vmatpush3.bf16.msra.mxu1 %v2168_v30  ;;  %21742 = vmatprep.mubr.msk.bf16.mxu1 %vm25433_vm0, %v25432_v32  ;;  %v23798_v30 = vld [vmem:[#allocation20 + $0x440] ss:$8 sps:$4 sm:$0xff]  }
 0x3b8   : > { %21752 = vmatprep.subr.bf16.mxu1 %v25432_v32 }
 0x3bc   : > { %21797 = vmatmul.mubr.msk.bf16.vlgmr.msra.gmra.mrb[72].mxu0 %vm1212_vm2, %v26257_v2 }
 0x3bd   : > { %2695 = vmatpush1.bf16.msra.mxu0 %v2689_v35  ;;  %2726 = vmatprep.mubr.bf16.mxu0 %v29481_v22  ;;  %v20417_v35 = vld.sshfl [vmem:[%s26098_s18 + $0x3c] sm:$0x33 pattern:$0x76325410] }
 0x3be   : > { %21743 = vmatmul.mubr.msk.bf16.vlgmr.msra.gmra.mrb[60].mxu1 %vm1212_vm2, %v26257_v2  ;;  %20379 = vmatprep.subr.msk.bf16.mxu0 %vm2687_vm3, %v2803_v36  ;;  %v23812_v36 = vld [vmem:[#allocation20 + $0x464] ss:$8 sps:$4 sm:$0xff]   ;;  %v3557_v38 = vcombine.high %v20417_v35, %v20417_v35 }
 0x3bf   : > { %21753 = vmatpush3.bf16.msra.mxu1 %v2256_v37  ;;  %21754 = vmatprep.mubr.msk.bf16.mxu1 %vm25433_vm0, %v25432_v32  ;;  %v3443_v37 = vsel %vm2687_vm3, %v20411_v26, 0  ;;  %v23842_v26 = vld [vmem:[#allocation20 + $0x4b4] ss:$8 sps:$4 sm:$0xff]  }
 0x3c0   : > { %21764 = vmatprep.subr.bf16.mxu1 %v25432_v32 }
 0x3c4   : > { %20374 = vmatmul.mubr.msk.bf16.vlgmr.msra.gmra.mrb[76].mxu0 %vm2683_vm4, %v26373_v39 }
 0x3c5   : > { %2811 = vmatpush1.bf16.msra.mxu0 %v2805_v41  ;;  %2842 = vmatprep.mubr.bf16.mxu0 %v29481_v22  ;;  %v26484_v41 = vld [vmem:[%s26089_s20] sm:$0xff] }
 0x3c6   : > { %21755 = vmatmul.mubr.msk.bf16.vlgmr.msra.gmra.mrb[64].mxu1 %vm1212_vm2, %v26257_v2  ;;  %20385 = vmatprep.subr.msk.bf16.mxu0 %vm2687_vm3, %v2919_v42 }
 0x3c7   : > { %21765 = vmatpush3.bf16.msra.mxu1 %v2344_v43  ;;  %21766 = vmatprep.mubr.msk.bf16.mxu1 %vm25433_vm0, %v25432_v32  ;;  %v26489_v43 = vld [vmem:[%s26089_s20 + $0x8] sm:$0xff] }
 0x3c8   : > { %21776 = vmatprep.subr.bf16.mxu1 %v25432_v32 }
 0x3cc   : > { %20380 = vmatmul.mubr.msk.bf16.vlgmr.msra.gmra.mrb[80].mxu0 %vm2683_vm4, %v26373_v39 }
 0x3cd   : > { %2927 = vmatpush1.bf16.msra.mxu0 %v2921_v47  ;;  %2958 = vmatprep.mubr.bf16.mxu0 %v29481_v22 }
 0x3ce   : > { %21767 = vmatmul.mubr.msk.bf16.vlgmr.msra.gmra.mrb[68].mxu1 %vm1212_vm2, %v26257_v2  ;;  %20391 = vmatprep.subr.msk.bf16.mxu0 %vm2687_vm3, %v3035_v48 }
 0x3cf   : > { %21777 = vmatpush3.bf16.msra.mxu1 %v2432_v49  ;;  %21778 = vmatprep.mubr.msk.bf16.mxu1 %vm25433_vm0, %v25432_v32  ;;  %v23816_v49 = vld [vmem:[#allocation20 + $0x470] ss:$8 sps:$4 sm:$0xff]  }
 0x3d0   : > { %21788 = vmatprep.subr.bf16.mxu1 %v25432_v32 }
 0x3d4   : > { %20386 = vmatmul.mubr.msk.bf16.vlgmr.msra.gmra.mrb[84].mxu0 %vm2683_vm4, %v26373_v39 }
 0x3d5   : > { %3043 = vmatpush1.bf16.msra.mxu0 %v3037_v52  ;;  %3074 = vmatprep.mubr.bf16.mxu0 %v29481_v22  ;;  %v26498_v52 = vld [vmem:[%s26089_s20 + $0x18] sm:$0xff] }
 0x3d6   : > { %21779 = vmatmul.mubr.msk.bf16.vlgmr.msra.gmra.mrb[72].mxu1 %vm1212_vm2, %v26257_v2  ;;  %20397 = vmatprep.subr.msk.bf16.mxu0 %vm2687_vm3, %v3151_v53 }
 0x3d7   : > { %21789 = vmatpush3.bf16.msra.mxu1 %v2520_v54  ;;  %21790 = vmatprep.mubr.msk.bf16.mxu1 %vm25433_vm0, %v25432_v32 }
 0x3d8   : > { %21800 = vmatprep.subr.bf16.mxu1 %v25432_v32 }
 0x3dc   : > { %20392 = vmatmul.mubr.msk.bf16.vlgmr.msra.gmra.mrb[88].mxu0 %vm2683_vm4, %v26373_v39 }
 0x3dd   : > { %3159 = vmatpush1.bf16.msra.mxu0 %v3153_v58  ;;  %3190 = vmatprep.mubr.bf16.mxu0 %v29481_v22 }
 0x3de   : > { %21791 = vmatmul.mubr.msk.bf16.vlgmr.msra.gmra.mrb[76].mxu1 %vm1212_vm2, %v26257_v2  ;;  %20403 = vmatprep.subr.msk.bf16.mxu0 %vm2687_vm3, %v3267_v59  ;;  %v3559_v59 = vsel %vm2687_vm3, %v20417_v35, 0  ;;  %v26524_v35 = vld [vmem:[%s26089_s20 + $0x38] sm:$0xff] }
 0x3df   : > { %21801 = vmatpush3.bf16.msra.mxu1 %v2608_v60  ;;  %21802 = vmatprep.mubr.msk.bf16.mxu1 %vm25433_vm0, %v25432_v32  ;;  %v20387_v32 = vld.sshfl [vmem:[%s26098_s18 + $0x14] sm:$0x33 pattern:$0x76325410]  ;;  %v23824_v60 = vld [vmem:[#allocation20 + $0x484] ss:$8 sps:$4 sm:$0xff]  }
 0x3e0   : > { %20376 = vmatprep.subr.msk.bf16.mxu1 %vm2687_vm3, %v2745_v61  ;;  %v2977_v6 = vcombine.high %v20387_v32, %v20387_v32  ;;  %v2979_v7 = vsel %vm2687_vm3, %v20387_v32, 0 }
 0x3e4   : > { %20398 = vmatmul.mubr.msk.bf16.vlgmr.msra.gmra.mrb[92].mxu0 %vm2683_vm4, %v26373_v39 }
 0x3e5   : > { %3275 = vmatpush1.bf16.msra.mxu0 %v3269_v34  ;;  %3306 = vmatprep.mubr.bf16.mxu0 %v29481_v22 }
 0x3e6   : > { %21803 = vmatmul.mubr.msk.bf16.vlgmr.msra.gmra.mrb[80].mxu1 %vm1212_vm2, %v26257_v2  ;;  %20409 = vmatprep.subr.msk.bf16.mxu0 %vm2687_vm3, %v3383_v0  ;;  %v20393_v2 = vld.sshfl [vmem:[%s26098_s18 + $0x1c] sm:$0x33 pattern:$0x76325410] }
 0x3e7   : > { %2753 = vmatpush1.bf16.msra.mxu1 %v2747_v1  ;;  %2784 = vmatprep.mubr.bf16.mxu1 %v29481_v22  ;;  %v3093_v8 = vcombine.high %v20393_v2, %v20393_v2  ;;  %v3095_v14 = vsel %vm2687_vm3, %v20393_v2, 0  ;;  %v23764_v1 = vld [vmem:[#allocation20 + $0x4] ss:$8 sps:$4 sm:$0xff]   ;;  %v23830_v2 = vld [vmem:[#allocation20 + $0x494] ss:$8 sps:$4 sm:$0xff]  }
 0x3e8   : > { %20382 = vmatprep.subr.msk.bf16.mxu1 %vm2687_vm3, %v2861_v3  ;;  %v23822_v3 = vld [vmem:[#allocation20 + $0x480] ss:$8 sps:$4 sm:$0xff]  }
 0x3ec   : > { %20404 = vmatmul.mubr.msk.bf16.vlgmr.msra.gmra.mrb[96].mxu0 %vm2683_vm4, %v26373_v39 }
 0x3ed   : > { %3391 = vmatpush1.bf16.msra.mxu0 %v3385_v4  ;;  %3422 = vmatprep.mubr.bf16.mxu0 %v29481_v22 }
 0x3ee   : > { %20377 = vmatmul.mubr.msk.bf16.vlgmr.msra.gmra.mrb[84].mxu1 %vm2683_vm4, %v26373_v39  ;;  %20415 = vmatprep.subr.msk.bf16.mxu0 %vm2687_vm3, %v3499_v10  ;;  %v26511_v10 = vld [vmem:[%s26089_s20 + $0x28] sm:$0xff] }
 0x3ef   : > { %2869 = vmatpush1.bf16.msra.mxu1 %v2863_v5  ;;  %2900 = vmatprep.mubr.bf16.mxu1 %v29481_v22 }
 0x3f0   : > { %20388 = vmatprep.subr.msk.bf16.mxu1 %vm2687_vm3, %v2977_v6  ;;  %v26507_v6 = vld [vmem:[%s26089_s20 + $0x20] sm:$0xff] }
 0x3f4   : > { %20410 = vmatmul.mubr.msk.bf16.vlgmr.msra.gmra.mrb[100].mxu0 %vm2683_vm4, %v26373_v39 }
 0x3f5   : > { %3538 = vmatprep.mubr.bf16.mxu0 %v29481_v22  ;;  %3507 = vmatpush1.bf16.msra.mxu0 %v3501_v12 }
 0x3f6   : > { %20383 = vmatmul.mubr.msk.bf16.vlgmr.msra.gmra.mrb[88].mxu1 %vm2683_vm4, %v26373_v39  ;;  %6873 = vmatprep.subr.bf16.mxu0 %v23776_v13 }
 0x3f7   : > { %2985 = vmatpush1.bf16.msra.mxu1 %v2979_v7  ;;  %3016 = vmatprep.mubr.bf16.mxu1 %v29481_v22 }
 0x3f8   : > { %20394 = vmatprep.subr.msk.bf16.mxu1 %vm2687_vm3, %v3093_v8  ;;  %v23828_v8 = vld [vmem:[#allocation20 + $0x490] ss:$8 sps:$4 sm:$0xff]  }
 0x3fc   : > { %20416 = vmatmul.mubr.msk.bf16.vlgmr.msra.gmra.mrb[104].mxu0 %vm2683_vm4, %v26373_v39 }
 0x3fd   : > { %6874 = vmatpush1.bf16.msra.mxu0 %v23774_v16 }
 0x3fe   : > { %20389 = vmatmul.mubr.msk.bf16.vlgmr.msra.gmra.mrb[92].mxu1 %vm2683_vm4, %v26373_v39  ;;  %6875 = vmatprep.subr.bf16.mxu0 %v23782_v17 }
 0x3ff   : > { %3101 = vmatpush1.bf16.msra.mxu1 %v3095_v14  ;;  %3132 = vmatprep.mubr.bf16.mxu1 %v29481_v22  ;;  %v23762_v14 = vld [vmem:[#allocation20] ss:$8 sps:$4 sm:$0xff]  }
 0x400   : > { %20400 = vmatprep.subr.msk.bf16.mxu1 %vm2687_vm3, %v3209_v15  ;;  %v23836_v15 = vld [vmem:[#allocation20 + $0x4a4] ss:$8 sps:$4 sm:$0xff]  }
 0x401   : > { %6876 = vmatpush1.bf16.msra.mxu0 %v23780_v18 }
 0x402   : > { %6877 = vmatprep.subr.bf16.mxu0 %v23788_v20  ;;  %v23834_v20 = vld [vmem:[#allocation20 + $0x4a0] ss:$8 sps:$4 sm:$0xff]  }
 0x405   : > { %6878 = vmatpush1.bf16.msra.mxu0 %v23786_v24 }
 0x406   : > { %20395 = vmatmul.mubr.msk.bf16.vlgmr.msra.gmra.mrb[96].mxu1 %vm2683_vm4, %v26373_v39  ;;  %6879 = vmatprep.subr.bf16.mxu0 %v23794_v25  ;;  %v26520_v25 = vld [vmem:[%s26089_s20 + $0x30] sm:$0xff] }
 0x407   : > { %3217 = vmatpush1.bf16.msra.mxu1 %v3211_v21  ;;  %3248 = vmatprep.mubr.bf16.mxu1 %v29481_v22  ;;  %v26515_v21 = vld [vmem:[#allocation18] ss:$0 sm:$0xff] }
 0x408   : > { %20406 = vmatprep.subr.msk.bf16.mxu1 %vm2687_vm3, %v3325_v23 }
 0x409   : > { %6880 = vmatpush1.bf16.msra.mxu0 %v23792_v46  ;;  %v23765_v46 = vld [vmem:[#allocation20 + $0x10] ss:$8 sps:$4 sm:$0xff]  }
 0x40a   : > { %6881 = vmatprep.subr.bf16.mxu0 %v23800_v27 }
 0x40d   : > { %6882 = vmatpush1.bf16.msra.mxu0 %v23798_v30  ;;  %v23840_v30 = vld [vmem:[#allocation20 + $0x4b0] ss:$8 sps:$4 sm:$0xff]  }
 0x40e   : > { %20401 = vmatmul.mubr.msk.bf16.vlgmr.msra.gmra.mrb[100].mxu1 %vm2683_vm4, %v26373_v39  ;;  %6883 = vmatprep.subr.bf16.mxu0 %v23806_v31 }
 0x40f   : > { %3333 = vmatpush1.bf16.msra.mxu1 %v3327_v28  ;;  %3364 = vmatprep.mubr.bf16.mxu1 %v29481_v22 }
 0x410   : > { %20412 = vmatprep.subr.msk.bf16.mxu1 %vm2687_vm3, %v3441_v29  ;;  %v23770_v29 = vld [vmem:[#allocation20 + $0x24] ss:$8 sps:$4 sm:$0xff]  }
 0x411   : > { %6884 = vmatpush1.bf16.msra.mxu0 %v23804_v33 }
 0x412   : > { %6885 = vmatprep.subr.bf16.mxu0 %v23812_v36 }
 0x415   : > { %6886 = vmatpush1.bf16.msra.mxu0 %v23810_v40  ;;  %v23773_v40 = vld [vmem:[#allocation20 + $0x34] ss:$8 sps:$4 sm:$0xff]  }
 0x416   : > { %20407 = vmatmul.mubr.msk.bf16.vlgmr.msra.gmra.mrb[104].mxu1 %vm2683_vm4, %v26373_v39  ;;  %6887 = vmatprep.subr.bf16.mxu0 %v23818_v45 }
 0x417   : > { %v1254_v42 = vpop.f32.mrb[32].mxu0  ;;  %3449 = vmatpush1.bf16.msra.mxu1 %v3443_v37  ;;  %3480 = vmatprep.mubr.bf16.mxu1 %v29481_v22 }
 0x418   : > { %v3639_v47 = vsub.f32 %v1254_v42, %v26484_v41  ;;  %v21618_v48 = vpop.f32.mrb[33].mxu0  ;;  %20418 = vmatprep.subr.msk.bf16.mxu1 %vm2687_vm3, %v3557_v38  ;;  %v23768_v38 = vld [vmem:[#allocation20 + $0x20] ss:$8 sps:$4 sm:$0xff]  }
 0x419   : > { %v1257_v50 = vpop.f32.mrb[34].mxu0  ;;  %v1298_v51 = vpop.f32.mrb[0].mxu1  ;;  %6888 = vmatpush1.bf16.msra.mxu0 %v23816_v49  ;;  %v23848_v49 = vld [vmem:[#allocation20 + $0x4c4] ss:$8 sps:$4 sm:$0xff]  }
 0x41a   : > { %v3671_v53 = vmul.f32 %v3639_v47, %v3639_v47  ;;  %v3640_v54 = vsub.f32 %v1257_v50, %v26489_v43  ;;  %v3641_v55 = vsub.f32 %v1298_v51, %v26492_v44  ;;  %v21624_v56 = vpop.f32.mrb[1].mxu1  ;;  %v21619_v57 = vpop.f32.mrb[35].mxu0  ;;  %6889 = vmatprep.subr.bf16.mxu0 %v23824_v60 }
 0x41b   : > { %v1301_v58 = vpop.f32.mrb[2].mxu1  ;;  %v23846_v56 = vld [vmem:[#allocation20 + $0x4c0] ss:$8 sps:$4 sm:$0xff]  }
 0x41c   : > { %v3703_v61 = vadd.f32 1.0, %v3671_v53  ;;  %v3672_v62 = vmul.f32 %v3640_v54, %v3640_v54  ;;  %v3673_v63 = vmul.f32 %v3641_v55, %v3641_v55  ;;  %v3642_v34 = vsub.f32 %v1301_v58, %v26498_v52  ;;  %v21625_v0 = vpop.f32.mrb[3].mxu1 }
 0x41d   : > { %6890 = vmatpush1.bf16.msra.mxu0 %v23822_v3  ;;  %v26535_v0 = vld [vmem:[%s26089_s20 + $0x40] sm:$0xff]  ;;  %v23851_v3 = vld [vmem:[#allocation20 + $0x4d4] ss:$8 sps:$4 sm:$0xff]  }
 0x41e   : > { %24727 = vlog2.f32 %v3703_v61  ;;  %v3704_v32 = vadd.f32 1.0, %v3672_v62  ;;  %v3705_v4 = vadd.f32 1.0, %v3673_v63  ;;  %v3674_v5 = vmul.f32 %v3642_v34, %v3642_v34  ;;  %20413 = vmatmul.mubr.msk.bf16.vlgmr.msra.gmra.mrb[108].mxu1 %vm2683_vm4, %v26373_v39  ;;  %6891 = vmatprep.subr.bf16.mxu0 %v23830_v2 }
 0x41f   : > { %3565 = vmatpush1.bf16.msra.mxu1 %v3559_v59  ;;  %3596 = vmatprep.mubr.bf16.mxu1 %v29481_v22 }
 0x420   : > { %24729 = vlog2.f32 %v3704_v32  ;;  %v3706_v7 = vadd.f32 1.0, %v3674_v5  ;;  %4561 = vmatprep.subr.bf16.mxu1 %v23764_v1  ;;  %v23771_v1 = vld [vmem:[#allocation20 + $0x30] ss:$8 sps:$4 sm:$0xff]   ;;  %v23779_v32 = vld [vmem:[#allocation20 + $0x44] ss:$8 sps:$4 sm:$0xff]  }
 0x421   : > { %24731 = vlog2.f32 %v3705_v4  ;;  %v1342_v9 = vpop.f32.mrb[4].mxu1  ;;  %6892 = vmatpush1.bf16.msra.mxu0 %v23828_v8  ;;  %v23849_v4 = vld [vmem:[#allocation20 + $0x4d0] ss:$8 sps:$4 sm:$0xff]  }
 0x422   : > { %24733 = vlog2.f32 %v3706_v7  ;;  %v3643_v11 = vsub.f32 %v1342_v9, %v26507_v6  ;;  %v21630_v12 = vpop.f32.mrb[5].mxu1  ;;  %6893 = vmatprep.subr.bf16.mxu0 %v23836_v15  ;;  %v26540_v8 = vld [vmem:[%s26089_s20 + $0x48] sm:$0xff] }
 0x423   : > { %v1345_v13 = vpop.f32.mrb[6].mxu1 }
 0x424   : > { %v3675_v16 = vmul.f32 %v3643_v11, %v3643_v11  ;;  %v3644_v17 = vsub.f32 %v1345_v13, %v26511_v10  ;;  %v21631_v18 = vpop.f32.mrb[7].mxu1  ;;  %v23777_v13 = vld [vmem:[#allocation20 + $0x40] ss:$8 sps:$4 sm:$0xff]  }
 0x425   : > { %6894 = vmatpush1.bf16.msra.mxu0 %v23834_v20  ;;  %v23785_v20 = vld [vmem:[#allocation20 + $0x54] ss:$8 sps:$4 sm:$0xff]  }
 0x426   : > { %v3707_v23 = vadd.f32 1.0, %v3675_v16  ;;  %v3676_v24 = vmul.f32 %v3644_v17, %v3644_v17  ;;  %20419 = vmatmul.mubr.msk.bf16.vlgmr.msra.gmra.mrb[112].mxu1 %vm2683_vm4, %v26373_v39  ;;  %6895 = vmatprep.subr.bf16.mxu0 %v23842_v26 }
 0x427   : > { %4562 = vmatpush1.bf16.msra.mxu1 %v23762_v14  ;;  %4593 = vmatprep.mubr.bf16.mxu1 %v29481_v22 }
 0x428   : > { %v24728_v27 = vpop.eup %24727  ;;  %24735 = vlog2.f32 %v3707_v23  ;;  %v3708_v28 = vadd.f32 1.0, %v3676_v24  ;;  %4563 = vmatprep.subr.bf16.mxu1 %v23767_v19  ;;  %v23852_v23 = vld [vmem:[#allocation20 + $0x4e0] ss:$8 sps:$4 sm:$0xff]  }
 0x429   : > { %v3736_v31 = vmul.f32 0.6931472, %v24728_v27  ;;  %v1386_v33 = vpop.f32.mrb[8].mxu1  ;;  %6896 = vmatpush1.bf16.msra.mxu0 %v23840_v30  ;;  %v23783_v30 = vld [vmem:[#allocation20 + $0x50] ss:$8 sps:$4 sm:$0xff]  }
 0x42a   : > { %v24730_v39 = vpop.eup %24729  ;;  %24737 = vlog2.f32 %v3708_v28  ;;  %v3645_v36 = vsub.f32 %v1386_v33, %v26520_v25  ;;  %v21636_v37 = vpop.f32.mrb[9].mxu1  ;;  %6897 = vmatprep.subr.bf16.mxu0 %v23848_v49 }
 0x42b   : > { %v24732_v42 = vpop.eup %24731  ;;  %v3806_v45 = vmul.f32 %v26515_v21, %v3736_v31  ;;  %v3738_v47 = vmul.f32 0.6931472, %v24730_v39  ;;  %v1389_v48 = vpop.f32.mrb[10].mxu1  ;;  %4564 = vmatpush1.bf16.msra.mxu1 %v23765_v46  ;;  %v23857_v31 = vld [vmem:[#allocation20 + $0x4f4] ss:$8 sps:$4 sm:$0xff]  }
 0x42c   : > { %v24734_v50 = vpop.eup %24733  ;;  %v3740_v51 = vmul.f32 0.6931472, %v24732_v42  ;;  %v3677_v53 = vmul.f32 %v3645_v36, %v3645_v36  ;;  %v3646_v54 = vsub.f32 %v1389_v48, %v26524_v35  ;;  %v21637_v55 = vpop.f32.mrb[11].mxu1  ;;  %4565 = vmatprep.subr.bf16.mxu1 %v23770_v29  ;;  %v26549_v29 = vld [vmem:[%s26089_s20 + $0x50] sm:$0xff]  ;;  %v23791_v39 = vld [vmem:[#allocation20 + $0x64] ss:$8 sps:$4 sm:$0xff]  }
 0x42d   : > { %v3838_v57 = vmul.f32 %v3806_v45, %v26484_v41  ;;  %v3807_v58 = vmul.f32 %v26515_v21, %v3738_v47  ;;  %v3742_v59 = vmul.f32 0.6931472, %v24734_v50  ;;  %6898 = vmatpush1.bf16.msra.mxu0 %v23846_v56  ;;  %v23855_v36 = vld [vmem:[#allocation20 + $0x4f0] ss:$8 sps:$4 sm:$0xff]   ;;  %v26554_v42 = vld [vmem:[%s26089_s20 + $0x58] sm:$0xff] }
 0x42e   : > { %v3808_v60 = vmul.f32 %v26515_v21, %v3740_v51  ;;  %v3709_v61 = vadd.f32 1.0, %v3677_v53  ;;  %v3678_v62 = vmul.f32 %v3646_v54, %v3646_v54  ;;  %6899 = vmatprep.subr.bf16.mxu0 %v23851_v3  ;;  %v23789_v53 = vld [vmem:[#allocation20 + $0x60] ss:$8 sps:$4 sm:$0xff]   ;;  %v23797_v56 = vld [vmem:[#allocation20 + $0x74] ss:$8 sps:$4 sm:$0xff]  }
 0x42f   : > { %v3839_v63 = vmul.f32 %v3807_v58, %v26489_v43  ;;  %v3809_v34 = vmul.f32 %v26515_v21, %v3742_v59  ;;  %4566 = vmatpush1.bf16.msra.mxu1 %v23768_v38  ;;  %v23803_v3 = vld [vmem:[#allocation20 + $0x84] ss:$8 sps:$4 sm:$0xff]  }
 0x430   : > { %24739 = vlog2.f32 %v3709_v61  ;;  %v3710_v41 = vadd.f32 1.0, %v3678_v62  ;;  %4567 = vmatprep.subr.bf16.mxu1 %v23773_v40  ;;  %v3840_v5 = vmul.f32 %v3808_v60, %v26492_v44  ;;  %v26562_v62 = vld [vmem:[%s26089_s20 + $0x60] sm:$0xff] }
 0x431   : > { %v3841_v2 = vmul.f32 %v3809_v34, %v26498_v52  ;;  %v1430_v7 = vpop.f32.mrb[12].mxu1  ;;  %v23638_v43 = vpack.i.bf16 %v3839_v63, %v3838_v57  ;;  %6900 = vmatpush1.bf16.msra.mxu0 %v23849_v4  ;;  %v23854_v52 = vld [vmem:[#allocation20 + $0x4e4] ss:$8 sps:$4 sm:$0xff]   ;;  %v23795_v63 = vld [vmem:[#allocation20 + $0x70] ss:$8 sps:$4 sm:$0xff]  }
 0x432   : > { %v24736_v9 = vpop.eup %24735  ;;  %24741 = vlog2.f32 %v3710_v41  ;;  %v3647_v11 = vsub.f32 %v1430_v7, %v26535_v0  ;;  %v21642_v12 = vpop.f32.mrb[13].mxu1  ;;  %6901 = vmatprep.subr.bf16.mxu0 %v23854_v52  ;;  %v23860_v34 = vld [vmem:[#allocation20 + $0x704] ss:$8 sps:$4 sm:$0xff]  }
 0x433   : > { %v3744_v14 = vmul.f32 0.6931472, %v24736_v9  ;;  %v1433_v15 = vpop.f32.mrb[14].mxu1  ;;  %23639 = vrot.lane.b32.xlu0 %v23638_v43, %s25435_s19  ;;  %v23643_v44 = vpack.i.bf16 %v3841_v2, %v3840_v5  ;;  %4568 = vmatpush1.bf16.msra.mxu1 %v23771_v1  ;;  %v26567_v5 = vld [vmem:[%s26089_s20 + $0x68] sm:$0xff] }
 0x434   : > { %v24738_v16 = vpop.eup %24737  ;;  %v3679_v17 = vmul.f32 %v3647_v11, %v3647_v11  ;;  %v3648_v18 = vsub.f32 %v1433_v15, %v26540_v8  ;;  %v21643_v19 = vpop.f32.mrb[15].mxu1  ;;  %4569 = vmatprep.subr.bf16.mxu1 %v23779_v32 }
 0x435   : > { %v3810_v24 = vmul.f32 %v26515_v21, %v3744_v14  ;;  %v3746_v46 = vmul.f32 0.6931472, %v24738_v16  ;;  %6902 = vmatpush1.bf16.msra.mxu0 %v23852_v23  ;;  %v26578_v23 = vld [vmem:[%s26089_s20 + $0x70] sm:$0xff] }
 0x436   : > { %v3711_v26 = vadd.f32 1.0, %v3679_v17  ;;  %v3680_v27 = vmul.f32 %v3648_v18, %v3648_v18  ;;  %6903 = vmatprep.subr.bf16.mxu0 %v23857_v31  ;;  %v26574_v17 = vld [vmem:[%s26089_s20 + $0xc0] sm:$0xff] }
 0x437   : > { %v3811_v28 = vmul.f32 %v26515_v21, %v3746_v46  ;;  %23644 = vrot.lane.b32.xlu0 %v23643_v44, %s25435_s19  ;;  %4570 = vmatpush1.bf16.msra.mxu1 %v23777_v13  ;;  %v3842_v37 = vmul.f32 %v3810_v24, %v26507_v6  ;;  %v23801_v13 = vld [vmem:[#allocation20 + $0x80] ss:$8 sps:$4 sm:$0xff]   ;;  %v23809_v44 = vld [vmem:[#allocation20 + $0x94] ss:$8 sps:$4 sm:$0xff]   ;;  %v26581_v46 = vld [vmem:[%s26089_s20 + $0xc8] sm:$0xff] }
 0x438   : > { %24743 = vlog2.f32 %v3711_v26  ;;  %v3712_v33 = vadd.f32 1.0, %v3680_v27  ;;  %4571 = vmatprep.subr.bf16.mxu1 %v23785_v20  ;;  %v23807_v26 = vld [vmem:[#allocation20 + $0x90] ss:$8 sps:$4 sm:$0xff]   ;;  %v23815_v31 = vld [vmem:[#allocation20 + $0xa4] ss:$8 sps:$4 sm:$0xff]  }
 0x439   : > { %v3843_v38 = vmul.f32 %v3811_v28, %v26511_v10  ;;  %v1474_v40 = vpop.f32.mrb[16].mxu1  ;;  %6904 = vmatpush1.bf16.msra.mxu0 %v23855_v36 }
 0x43a   : > { %v24740_v45 = vpop.eup %24739  ;;  %24745 = vlog2.f32 %v3712_v33  ;;  %v3649_v47 = vsub.f32 %v1474_v40, %v26549_v29  ;;  %v21648_v48 = vpop.f32.mrb[17].mxu1  ;;  %7451 = vmatprep.subr.bf16.mxu0 %v23860_v34 }
 0x43b   : > { %v3748_v49 = vmul.f32 0.6931472, %v24740_v45  ;;  %v1477_v50 = vpop.f32.mrb[18].mxu1  ;;  %v23648_v51 = vpack.i.bf16 %v3843_v38, %v3842_v37  ;;  %4572 = vmatpush1.bf16.msra.mxu1 %v23783_v30  ;;  %v26587_v37 = vld [vmem:[%s26089_s20 + $0x78] sm:$0xff] }
 0x43c   : > { %v24742_v54 = vpop.eup %24741  ;;  %v3681_v6 = vmul.f32 %v3649_v47, %v3649_v47  ;;  %v3650_v10 = vsub.f32 %v1477_v50, %v26554_v42  ;;  %v21649_v55 = vpop.f32.mrb[19].mxu1  ;;  %4573 = vmatprep.subr.bf16.mxu1 %v23791_v39 }
 0x43d   : > { %v3812_v57 = vmul.f32 %v26515_v21, %v3748_v49  ;;  %v3750_v58 = vmul.f32 0.6931472, %v24742_v54  ;;  %23649 = vrot.lane.b32.xlu1 %v23648_v51, %s25435_s19 }
 0x43e   : > { %v3713_v59 = vadd.f32 1.0, %v3681_v6  ;;  %v3682_v60 = vmul.f32 %v3650_v10, %v3650_v10 }
 0x43f   : > { %v3813_v61 = vmul.f32 %v26515_v21, %v3750_v58  ;;  %4574 = vmatpush1.bf16.msra.mxu1 %v23789_v53  ;;  %v3844_v41 = vmul.f32 %v3812_v57, %v26520_v25  ;;  %v23821_v58 = vld [vmem:[#allocation20 + $0xb4] ss:$8 sps:$4 sm:$0xff]  }
 0x440   : > { %24747 = vlog2.f32 %v3713_v59  ;;  %v3714_v1 = vadd.f32 1.0, %v3682_v60  ;;  %4575 = vmatprep.subr.bf16.mxu1 %v23797_v56 }
 0x441   : > { %v3845_v32 = vmul.f32 %v3813_v61, %v26524_v35  ;;  %v1518_v4 = vpop.f32.mrb[20].mxu1  ;;  %v26595_v61 = vld [vmem:[%s26089_s20 + $0xe0] sm:$0xff] }
 0x442   : > { %v24744_v2 = vpop.eup %24743  ;;  %24749 = vlog2.f32 %v3714_v1  ;;  %v3651_v7 = vsub.f32 %v1518_v4, %v26562_v62  ;;  %v21654_v43 = vpop.f32.mrb[21].mxu1  ;;  %v26602_v4 = vld [vmem:[%s26089_s20 + $0xe8] sm:$0xff] }
 0x443   : > { %v3752_v9 = vmul.f32 0.6931472, %v24744_v2  ;;  %v1521_v11 = vpop.f32.mrb[22].mxu1  ;;  %v23653_v12 = vpack.i.bf16 %v3845_v32, %v3844_v41  ;;  %4576 = vmatpush1.bf16.msra.mxu1 %v23795_v63  ;;  %v26599_v41 = vld [vmem:[%s26089_s20 + $0x80] sm:$0xff]  ;;  %v23819_v2 = vld [vmem:[#allocation20 + $0xb0] ss:$8 sps:$4 sm:$0xff]  }
 0x444   : > { %v24746_v25 = vpop.eup %24745  ;;  %v3683_v14 = vmul.f32 %v3651_v7, %v3651_v7  ;;  %v3652_v35 = vsub.f32 %v1521_v11, %v26567_v5  ;;  %v21655_v15 = vpop.f32.mrb[23].mxu1  ;;  %4577 = vmatprep.subr.bf16.mxu1 %v23803_v3  ;;  %v23827_v11 = vld [vmem:[#allocation20 + $0xc4] ss:$8 sps:$4 sm:$0xff]  }
 0x445   : > { %v3814_v52 = vmul.f32 %v26515_v21, %v3752_v9  ;;  %v3754_v16 = vmul.f32 0.6931472, %v24746_v25  ;;  %23654 = vrot.lane.b32.xlu1 %v23653_v12, %s25435_s19 }
 0x446   : > { %v3715_v18 = vadd.f32 1.0, %v3683_v14  ;;  %v3684_v19 = vmul.f32 %v3652_v35, %v3652_v35  ;;  %v26608_v14 = vld [vmem:[%s26089_s20 + $0x88] sm:$0xff] }
 0x447   : > { %v3815_v20 = vmul.f32 %v26515_v21, %v3754_v16  ;;  %v1782_v24 = vpop.f32.mrb[36].mxu0  ;;  %4578 = vmatpush1.bf16.msra.mxu1 %v23801_v13  ;;  %v3846_v33 = vmul.f32 %v3814_v52, %v26535_v0  ;;  %v23813_v0 = vld [vmem:[#allocation20 + $0xa0] ss:$8 sps:$4 sm:$0xff]  }
 0x448   : > { %24751 = vlog2.f32 %v3715_v18  ;;  %v3716_v27 = vadd.f32 1.0, %v3684_v19  ;;  %v3663_v28 = vsub.f32 %v1782_v24, %v26574_v17  ;;  %v21690_v30 = vpop.f32.mrb[37].mxu0  ;;  %4579 = vmatprep.subr.bf16.mxu1 %v23809_v44 }
 0x449   : > { %v3847_v39 = vmul.f32 %v3815_v20, %v26540_v8  ;;  %v1562_v36 = vpop.f32.mrb[24].mxu1  ;;  %v1785_v38 = vpop.f32.mrb[38].mxu0 }
 0x44a   : > { %v24748_v40 = vpop.eup %24747  ;;  %24753 = vlog2.f32 %v3716_v27  ;;  %v3653_v45 = vsub.f32 %v1562_v36, %v26578_v23  ;;  %v21660_v47 = vpop.f32.mrb[25].mxu1  ;;  %v3695_v48 = vmul.f32 %v3663_v28, %v3663_v28  ;;  %v3664_v49 = vsub.f32 %v1785_v38, %v26581_v46 }
 0x44b   : > { %v21691_v50 = vpop.f32.mrb[39].mxu0  ;;  %v3756_v51 = vmul.f32 0.6931472, %v24748_v40  ;;  %v1565_v53 = vpop.f32.mrb[26].mxu1  ;;  %v23658_v54 = vpack.i.bf16 %v3847_v39, %v3846_v33  ;;  %4580 = vmatpush1.bf16.msra.mxu1 %v23807_v26  ;;  %v23833_v39 = vld [vmem:[#allocation20 + $0xd4] ss:$8 sps:$4 sm:$0xff]  }
 0x44c   : > { %v24750_v8 = vpop.eup %24749  ;;  %v3685_v6 = vmul.f32 %v3653_v45, %v3653_v45  ;;  %v3654_v10 = vsub.f32 %v1565_v53, %v26587_v37  ;;  %v21661_v55 = vpop.f32.mrb[27].mxu1  ;;  %v3727_v56 = vadd.f32 1.0, %v3695_v48  ;;  %v3696_v57 = vmul.f32 %v3664_v49, %v3664_v49  ;;  %4581 = vmatprep.subr.bf16.mxu1 %v23815_v31  ;;  %v26617_v49 = vld [vmem:[%s26089_s20 + $0x90] sm:$0xff] }
 0x44d   : > { %v3816_v59 = vmul.f32 %v26515_v21, %v3756_v51  ;;  %v3758_v60 = vmul.f32 0.6931472, %v24750_v8  ;;  %23659 = vrot.lane.b32.xlu0 %v23658_v54, %s25435_s19  ;;  %v23831_v51 = vld [vmem:[#allocation20 + $0xd0] ss:$8 sps:$4 sm:$0xff]   ;;  %v23839_v8 = vld [vmem:[#allocation20 + $0xe4] ss:$8 sps:$4 sm:$0xff]  }
 0x44e   : > { %v3717_v63 = vadd.f32 1.0, %v3685_v6  ;;  %v3686_v34 = vmul.f32 %v3654_v10, %v3654_v10  ;;  %24755 = vlog2.f32 %v3727_v56  ;;  %v3728_v1 = vadd.f32 1.0, %v3696_v57  ;;  %v26624_v56 = vld [vmem:[%s26089_s20 + $0x98] sm:$0xff] }
 0x44f   : > { %v3817_v3 = vmul.f32 %v26515_v21, %v3758_v60  ;;  %v1870_v32 = vpop.f32.mrb[40].mxu0  ;;  %4582 = vmatpush1.bf16.msra.mxu1 %v23813_v0  ;;  %v3848_v12 = vmul.f32 %v3816_v59, %v26549_v29  ;;  %v23825_v29 = vld [vmem:[#allocation20 + $0xc0] ss:$8 sps:$4 sm:$0xff]  }
 0x450   : > { %24757 = vlog2.f32 %v3717_v63  ;;  %v3718_v7 = vadd.f32 1.0, %v3686_v34  ;;  %v3667_v43 = vsub.f32 %v1870_v32, %v26595_v61  ;;  %v21702_v9 = vpop.f32.mrb[41].mxu0  ;;  %4583 = vmatprep.subr.bf16.mxu1 %v23821_v58 }
 0x451   : > { %v3849_v13 = vmul.f32 %v3817_v3, %v26554_v42  ;;  %v1606_v25 = vpop.f32.mrb[28].mxu1  ;;  %24759 = vlog2.f32 %v3728_v1  ;;  %v1873_v35 = vpop.f32.mrb[42].mxu0 }
 0x452   : > { %v24752_v15 = vpop.eup %24751  ;;  %24761 = vlog2.f32 %v3718_v7  ;;  %v3655_v44 = vsub.f32 %v1606_v25, %v26599_v41  ;;  %v21666_v52 = vpop.f32.mrb[29].mxu1  ;;  %v3699_v16 = vmul.f32 %v3667_v43, %v3667_v43  ;;  %v3668_v18 = vsub.f32 %v1873_v35, %v26602_v4 }
 0x453   : > { %v21703_v19 = vpop.f32.mrb[43].mxu0  ;;  %v3760_v20 = vmul.f32 0.6931472, %v24752_v15  ;;  %v1609_v24 = vpop.f32.mrb[30].mxu1  ;;  %v23663_v26 = vpack.i.bf16 %v3849_v13, %v3848_v12  ;;  %4584 = vmatpush1.bf16.msra.mxu1 %v23819_v2  ;;  %v23845_v13 = vld [vmem:[#allocation20 + $0xf4] ss:$8 sps:$4 sm:$0xff]  }
 0x454   : > { %v24754_v42 = vpop.eup %24753  ;;  %v3687_v27 = vmul.f32 %v3655_v44, %v3655_v44  ;;  %v3656_v28 = vsub.f32 %v1609_v24, %v26608_v14  ;;  %v21667_v30 = vpop.f32.mrb[31].mxu1  ;;  %v3731_v31 = vadd.f32 1.0, %v3699_v16  ;;  %v3700_v33 = vmul.f32 %v3668_v18, %v3668_v18  ;;  %4585 = vmatprep.subr.bf16.mxu1 %v23827_v11  ;;  %v26639_v19 = vld [vmem:[%s26089_s20 + $0xa0] sm:$0xff]  ;;  %v23843_v24 = vld [vmem:[#allocation20 + $0xf0] ss:$8 sps:$4 sm:$0xff]  }
 0x455   : > { %v3818_v36 = vmul.f32 %v26515_v21, %v3760_v20  ;;  %v3762_v38 = vmul.f32 0.6931472, %v24754_v42  ;;  %23664 = vrot.lane.b32.xlu1 %v23663_v26, %s25435_s19 }
 0x456   : > { %v3719_v40 = vadd.f32 1.0, %v3687_v27  ;;  %v3688_v45 = vmul.f32 %v3656_v28, %v3656_v28  ;;  %24763 = vlog2.f32 %v3731_v31  ;;  %v3732_v47 = vadd.f32 1.0, %v3700_v33  ;;  %v26649_v31 = vld [vmem:[%s26089_s20 + $0xa8] sm:$0xff] }
 0x457   : > { %v3819_v48 = vmul.f32 %v26515_v21, %v3762_v38  ;;  %v26619_v50 = vpop.f32.mrb[44].mxu0  ;;  %4586 = vmatpush1.bf16.msra.mxu1 %v23825_v29  ;;  %v3850_v6 = vmul.f32 %v3818_v36, %v26562_v62 }
 0x458   : > { %v24756_v53 = vpop.eup %24755  ;;  %24765 = vlog2.f32 %v3719_v40  ;;  %v3720_v54 = vadd.f32 1.0, %v3688_v45  ;;  %v21714_v0 = vpop.f32.mrb[45].mxu0  ;;  %4587 = vmatprep.subr.bf16.mxu1 %v23833_v39 }
 0x459   : > { %v3851_v10 = vmul.f32 %v3819_v48, %v26567_v5  ;;  %v1650_v55 = vpop.f32.mrb[32].mxu1  ;;  %v3784_v57 = vmul.f32 0.6931472, %v24756_v53  ;;  %24767 = vlog2.f32 %v3732_v47  ;;  %v26626_v58 = vpop.f32.mrb[46].mxu0  ;;  %v23837_v5 = vld [vmem:[#allocation20 + $0xe0] ss:$8 sps:$4 sm:$0xff]  }
 0x45a   : > { %v24758_v59 = vpop.eup %24757  ;;  %24769 = vlog2.f32 %v3720_v54  ;;  %v3657_v60 = vsub.f32 %v1650_v55, %v26617_v49  ;;  %v21672_v63 = vpop.f32.mrb[33].mxu1 }
 0x45b   : > { %v21715_v34 = vpop.f32.mrb[47].mxu0  ;;  %v24760_v1 = vpop.eup %24759  ;;  %v3764_v3 = vmul.f32 0.6931472, %v24758_v59  ;;  %v23668_v2 = vpack.i.bf16 %v3851_v10, %v3850_v6  ;;  %v3830_v62 = vmul.f32 %v26515_v21, %v3784_v57  ;;  %4588 = vmatpush1.bf16.msra.mxu1 %v23831_v51 }
 0x45c   : > { %v1653_v32 = vpop.f32.mrb[34].mxu1  ;;  %v24762_v7 = vpop.eup %24761  ;;  %v3689_v43 = vmul.f32 %v3657_v60, %v3657_v60  ;;  %v3786_v12 = vmul.f32 0.6931472, %v24760_v1  ;;  %4589 = vmatprep.subr.bf16.mxu1 %v23839_v8  ;;  %v26667_v1 = vld [vmem:[%s26089_s20 + $0xb0] sm:$0xff] }
 0x45d   : > { %v3658_v9 = vsub.f32 %v1653_v32, %v26624_v56  ;;  %v21673_v11 = vpop.f32.mrb[35].mxu1  ;;  %v3820_v25 = vmul.f32 %v26515_v21, %v3764_v3  ;;  %v3766_v35 = vmul.f32 0.6931472, %v24762_v7  ;;  %23669 = vrot.lane.b32.xlu0 %v23668_v2, %s25435_s19  ;;  %v26634_v52 = vmul.f32 %v3830_v62, %v26574_v17 }
 0x45e   : > { %v3721_v15 = vadd.f32 1.0, %v3689_v43  ;;  %v3831_v16 = vmul.f32 %v26515_v21, %v3786_v12  ;;  %v26678_v43 = vld [vmem:[%s26089_s20 + $0xb8] sm:$0xff] }
 0x45f   : > { %v3690_v44 = vmul.f32 %v3658_v9, %v3658_v9  ;;  %v3821_v18 = vmul.f32 %v26515_v21, %v3766_v35  ;;  %v26641_v20 = vpop.f32.mrb[48].mxu0  ;;  %4590 = vmatpush1.bf16.msra.mxu1 %v23837_v5  ;;  %v3852_v17 = vmul.f32 %v3820_v25, %v26578_v23 }
 0x460   : > { %v24764_v26 = vpop.eup %24763  ;;  %24771 = vlog2.f32 %v3721_v15  ;;  %v26644_v42 = vmul.f32 %v3831_v16, %v26581_v46  ;;  %v21726_v27 = vpop.f32.mrb[49].mxu0  ;;  %4591 = vmatprep.subr.bf16.mxu1 %v23845_v13 }
 0x461   : > { %v3722_v29 = vadd.f32 1.0, %v3690_v44  ;;  %v3853_v28 = vmul.f32 %v3821_v18, %v26587_v37  ;;  %v1694_v30 = vpop.f32.mrb[36].mxu1  ;;  %v3792_v33 = vmul.f32 0.6931472, %v24764_v26  ;;  %v26651_v39 = vpop.f32.mrb[50].mxu0 }
 0x462   : > { %v24766_v36 = vpop.eup %24765  ;;  %v3659_v38 = vsub.f32 %v1694_v30, %v26639_v19  ;;  %v21678_v40 = vpop.f32.mrb[37].mxu1  ;;  %v23698_v46 = vpack.i.bf16 %v26644_v42, %v26634_v52 }
 0x463   : > { %24773 = vlog2.f32 %v3722_v29  ;;  %v21727_v45 = vpop.f32.mrb[51].mxu0  ;;  %v24768_v47 = vpop.eup %24767  ;;  %v3768_v48 = vmul.f32 0.6931472, %v24766_v36  ;;  %v23673_v51 = vpack.i.bf16 %v3853_v28, %v3852_v17  ;;  %v3834_v37 = vmul.f32 %v26515_v21, %v3792_v33  ;;  %4592 = vmatpush1.bf16.msra.mxu1 %v23843_v24  ;;  %v26691_v28 = vld [vmem:[%s26089_s20 + $0xd0] sm:$0xff] }
 0x464   : > { %v1697_v23 = vpop.f32.mrb[38].mxu1  ;;  %v24770_v53 = vpop.eup %24769  ;;  %v3691_v54 = vmul.f32 %v3659_v38, %v3659_v38  ;;  %v3794_v6 = vmul.f32 0.6931472, %v24768_v47  ;;  %v26698_v47 = vld [vmem:[%s26089_s20 + $0xd8] sm:$0xff] }
 0x465   : > { %v3660_v0 = vsub.f32 %v1697_v23, %v26649_v31  ;;  %v21679_v8 = vpop.f32.mrb[39].mxu1  ;;  %v3822_v10 = vmul.f32 %v26515_v21, %v3768_v48  ;;  %v3770_v55 = vmul.f32 0.6931472, %v24770_v53  ;;  %23674 = vrot.lane.b32.xlu1 %v23673_v51, %s25435_s19  ;;  %v26661_v60 = vmul.f32 %v3834_v37, %v26595_v61  ;;  %v23899_v23 = vld [vmem:[#allocation20 + $0x304] ss:$8 sps:$4 sm:$0xff]  }
 0x466   : > { %v3723_v57 = vadd.f32 1.0, %v3691_v54  ;;  %v3835_v63 = vmul.f32 %v26515_v21, %v3794_v6  ;;  %4594 = vmatmul.mubr.bf16.vlgmr.msra.gmra.mrb[116].mxu1 %v29481_v22  ;;  %5139 = vmatprep.subr.bf16.mxu1 %v23899_v23 }
 0x467   : > { %v3692_v59 = vmul.f32 %v3660_v0, %v3660_v0  ;;  %v3823_v34 = vmul.f32 %v26515_v21, %v3770_v55  ;;  %v26669_v3 = vpop.f32.mrb[52].mxu0  ;;  %4603 = vmatprep.mubr.bf16.mxu1 %v29481_v22  ;;  %v3854_v61 = vmul.f32 %v3822_v10, %v26599_v41  ;;  %v23897_v0 = vld [vmem:[#allocation20 + $0x300] ss:$8 sps:$4 sm:$0xff]  }
 0x468   : > { %24775 = vlog2.f32 %v3723_v57  ;;  %v26673_v2 = vmul.f32 %v3835_v63, %v26602_v4  ;;  %v21738_v62 = vpop.f32.mrb[53].mxu0  ;;  %5140 = vmatpush1.bf16.msra.mxu1 %v23897_v0 }
 0x469   : > { %v3724_v32 = vadd.f32 1.0, %v3692_v59  ;;  %v3855_v5 = vmul.f32 %v3823_v34, %v26608_v14  ;;  %v1738_v7 = vpop.f32.mrb[40].mxu1  ;;  %v26680_v9 = vpop.f32.mrb[54].mxu0  ;;  %v23905_v34 = vld [vmem:[#allocation20 + $0x314] ss:$8 sps:$4 sm:$0xff]  }
 0x46a   : > { %v24772_v11 = vpop.eup %24771  ;;  %v3661_v12 = vsub.f32 %v1738_v7, %v26667_v1  ;;  %v21684_v13 = vpop.f32.mrb[41].mxu1  ;;  %v23708_v25 = vpack.i.bf16 %v26673_v2, %v26661_v60  ;;  %v26708_v7 = vld [vmem:[%s26089_s20 + $0xf0] sm:$0xff]  ;;  %5141 = vmatprep.subr.bf16.mxu1 %v23905_v34 }
 0x46b   : > { %24777 = vlog2.f32 %v3724_v32  ;;  %v21739_v4 = vpop.f32.mrb[55].mxu0  ;;  %v3772_v35 = vmul.f32 0.6931472, %v24772_v11  ;;  %v1741_v15 = vpop.f32.mrb[42].mxu1  ;;  %v23678_v41 = vpack.i.bf16 %v3855_v5, %v3854_v61  ;;  %v23903_v61 = vld [vmem:[#allocation20 + $0x310] ss:$8 sps:$4 sm:$0xff]  }
 0x46c   : > { %v3693_v14 = vmul.f32 %v3661_v12, %v3661_v12  ;;  %v3662_v16 = vsub.f32 %v1741_v15, %v26678_v43  ;;  %v21685_v18 = vpop.f32.mrb[43].mxu1  ;;  %5142 = vmatpush1.bf16.msra.mxu1 %v23903_v61 }
 0x46d   : > { %v24774_v44 = vpop.eup %24773  ;;  %v3824_v24 = vmul.f32 %v26515_v21, %v3772_v35  ;;  %23679 = vrot.lane.b32.xlu0 %v23678_v41, %s25435_s19  ;;  %v26715_v41 = vld [vmem:[%s26089_s20 + $0xf8] sm:$0xff] }
 0x46e   : > { %v3774_v26 = vmul.f32 0.6931472, %v24774_v44  ;;  %v3725_v29 = vadd.f32 1.0, %v3693_v14  ;;  %v3694_v27 = vmul.f32 %v3662_v16, %v3662_v16  ;;  %4604 = vmatmul.mubr.bf16.gmra.mrb[120].mxu1 %v29481_v22  ;;  %v23911_v14 = vld [vmem:[#allocation20 + $0x324] ss:$8 sps:$4 sm:$0xff]  }
 0x46f   : > { %v26693_v30 = vpop.f32.mrb[56].mxu0  ;;  %v3856_v38 = vmul.f32 %v3824_v24, %v26617_v49  ;;  %5143 = vmatprep.subr.bf16.mxu1 %v23911_v14 }
 0x470   : > { %v3825_v17 = vmul.f32 %v26515_v21, %v3774_v26  ;;  %24779 = vlog2.f32 %v3725_v29  ;;  %v3726_v33 = vadd.f32 1.0, %v3694_v27  ;;  %v21750_v36 = vpop.f32.mrb[57].mxu0  ;;  %v23909_v29 = vld [vmem:[#allocation20 + $0x320] ss:$8 sps:$4 sm:$0xff]  }
 0x471   : > { %v1826_v45 = vpop.f32.mrb[44].mxu1  ;;  %v26700_v48 = vpop.f32.mrb[58].mxu0  ;;  %5144 = vmatpush1.bf16.msra.mxu1 %v23909_v29 }
 0x472   : > { %v3857_v40 = vmul.f32 %v3825_v17, %v26624_v56  ;;  %v24776_v51 = vpop.eup %24775  ;;  %24781 = vlog2.f32 %v3726_v33  ;;  %v3665_v37 = vsub.f32 %v1826_v45, %v26691_v28  ;;  %v21696_v53 = vpop.f32.mrb[45].mxu1 }
 0x473   : > { %v21751_v54 = vpop.f32.mrb[59].mxu0  ;;  %v3776_v8 = vmul.f32 0.6931472, %v24776_v51  ;;  %v1829_v6 = vpop.f32.mrb[46].mxu1  ;;  %v23917_v51 = vld [vmem:[#allocation20 + $0x334] ss:$8 sps:$4 sm:$0xff]  }
 0x474   : > { %v23683_v10 = vpack.i.bf16 %v3857_v40, %v3856_v38  ;;  %v3697_v56 = vmul.f32 %v3665_v37, %v3665_v37  ;;  %v3666_v55 = vsub.f32 %v1829_v6, %v26698_v47  ;;  %v21697_v57 = vpop.f32.mrb[47].mxu1  ;;  %v23915_v40 = vld [vmem:[#allocation20 + $0x330] ss:$8 sps:$4 sm:$0xff]   ;;  %5145 = vmatprep.subr.bf16.mxu1 %v23917_v51 }
 0x475   : > { %v24778_v49 = vpop.eup %24777  ;;  %v3826_v59 = vmul.f32 %v26515_v21, %v3776_v8  ;;  %5146 = vmatpush1.bf16.msra.mxu1 %v23915_v40  ;;  %v23920_v57 = vld [vmem:[#allocation20 + $0x344] ss:$8 sps:$4 sm:$0xff]  }
 0x476   : > { %v3778_v63 = vmul.f32 0.6931472, %v24778_v49  ;;  %23684 = vrot.lane.b32.xlu1 %v23683_v10, %s25435_s19  ;;  %v3729_v32 = vadd.f32 1.0, %v3697_v56  ;;  %v3698_v62 = vmul.f32 %v3666_v55, %v3666_v55  ;;  %5147 = vmatprep.subr.bf16.mxu1 %v23920_v57 }
 0x477   : > { %v26710_v11 = vpop.f32.mrb[60].mxu0  ;;  %v3858_v4 = vmul.f32 %v3826_v59, %v26639_v19 }
 0x478   : > { %v3827_v5 = vmul.f32 %v26515_v21, %v3778_v63  ;;  %24783 = vlog2.f32 %v3729_v32  ;;  %v3730_v12 = vadd.f32 1.0, %v3698_v62  ;;  %v21762_v13 = vpop.f32.mrb[61].mxu0  ;;  %v23918_v32 = vld [vmem:[#allocation20 + $0x340] ss:$8 sps:$4 sm:$0xff]  }
 0x479   : > { %v1914_v15 = vpop.f32.mrb[48].mxu1  ;;  %v26717_v44 = vpop.f32.mrb[62].mxu0  ;;  %5148 = vmatpush1.bf16.msra.mxu1 %v23918_v32 }
 0x47a   : > { %v3859_v35 = vmul.f32 %v3827_v5, %v26649_v31  ;;  %v24780_v16 = vpop.eup %24779  ;;  %24785 = vlog2.f32 %v3730_v12  ;;  %v3669_v18 = vsub.f32 %v1914_v15, %v26708_v7  ;;  %v21708_v24 = vpop.f32.mrb[49].mxu1  ;;  %v23924_v12 = vld [vmem:[#allocation20 + $0x350] ss:$8 sps:$4 sm:$0xff]  }
 0x47b   : > { %v21763_v26 = vpop.f32.mrb[63].mxu0  ;;  %v3780_v27 = vmul.f32 0.6931472, %v24780_v16  ;;  %v1917_v17 = vpop.f32.mrb[50].mxu1  ;;  %v23929_v24 = vld [vmem:[#allocation20 + $0x364] ss:$8 sps:$4 sm:$0xff]  }
 0x47c   : > { %v23688_v33 = vpack.i.bf16 %v3859_v35, %v3858_v4  ;;  %v24782_v19 = vpop.eup %24781  ;;  %v3701_v36 = vmul.f32 %v3669_v18, %v3669_v18  ;;  %v3670_v31 = vsub.f32 %v1917_v17, %v26715_v41  ;;  %v21709_v38 = vpop.f32.mrb[51].mxu1 }
 0x47d   : > { %v3828_v45 = vmul.f32 %v26515_v21, %v3780_v27  ;;  %v3782_v23 = vmul.f32 0.6931472, %v24782_v19 }
 0x47e   : > { %23689 = vrot.lane.b32.xlu0 %v23688_v33, %s25435_s19  ;;  %v3733_v37 = vadd.f32 1.0, %v3701_v36  ;;  %v3702_v53 = vmul.f32 %v3670_v31, %v3670_v31  ;;  %v23935_v31 = vld [vmem:[#allocation20 + $0x374] ss:$8 sps:$4 sm:$0xff]  }
 0x47f   : > { %v3829_v54 = vmul.f32 %v26515_v21, %v3782_v23  ;;  %v26724_v0 = vpop.f32.mrb[64].mxu0  ;;  %v3860_v10 = vmul.f32 %v3828_v45, %v26667_v1 }
 0x480   : > { %24787 = vlog2.f32 %v3733_v37  ;;  %v3734_v8 = vadd.f32 1.0, %v3702_v53  ;;  %v21774_v6 = vpop.f32.mrb[65].mxu0 }
 0x481   : > { %v3861_v49 = vmul.f32 %v3829_v54, %v26678_v43  ;;  %v26728_v56 = vpop.f32.mrb[52].mxu1  ;;  %v26734_v55 = vpop.f32.mrb[66].mxu0  ;;  %v23938_v54 = vld [vmem:[#allocation20 + $0x384] ss:$8 sps:$4 sm:$0xff]  }
 0x482   : > { %23699 = vrot.lane.b32.xlu0 %v23698_v46, %s25435_s19  ;;  %v24784_v59 = vpop.eup %24783  ;;  %24789 = vlog2.f32 %v3734_v8  ;;  %v21720_v63 = vpop.f32.mrb[53].mxu1  ;;  %v23926_v46 = vld [vmem:[#allocation20 + $0x354] ss:$8 sps:$4 sm:$0xff]  }
 0x483   : > { %v21775_v34 = vpop.f32.mrb[67].mxu0  ;;  %v3788_v62 = vmul.f32 0.6931472, %v24784_v59  ;;  %v26736_v61 = vpop.f32.mrb[54].mxu1  ;;  %v23693_v1 = vpack.i.bf16 %v3861_v49, %v3860_v10  ;;  %5149 = vmatprep.subr.bf16.mxu1 %v23926_v46  ;;  %v23936_v10 = vld [vmem:[#allocation20 + $0x380] ss:$8 sps:$4 sm:$0xff]  }
 0x484   : > { %v24786_v43 = vpop.eup %24785  ;;  %v21721_v5 = vpop.f32.mrb[55].mxu1  ;;  %5150 = vmatpush1.bf16.msra.mxu1 %v23924_v12  ;;  %v23942_v59 = vld [vmem:[#allocation20 + $0x390] ss:$8 sps:$4 sm:$0xff]   ;;  %v23944_v63 = vld [vmem:[#allocation20 + $0x394] ss:$8 sps:$4 sm:$0xff]  }
 0x485   : > { %v3832_v52 = vmul.f32 %v26515_v21, %v3788_v62  ;;  %v3790_v42 = vmul.f32 0.6931472, %v24786_v43  ;;  %23694 = vrot.lane.b32.xlu1 %v23693_v1, %s25435_s19  ;;  %5151 = vmatprep.subr.bf16.mxu1 %v23929_v24  ;;  %v23947_v62 = vld [vmem:[#allocation20 + $0x3a4] ss:$8 sps:$4 sm:$0xff]   ;;  %v23945_v12 = vld [vmem:[#allocation20 + $0x3a0] ss:$8 sps:$4 sm:$0xff]  }
 0x486   : > { %23709 = vrot.lane.b32.xlu0 %v23708_v25, %s25435_s19  ;;  %v23927_v25 = vld [vmem:[#allocation20 + $0x360] ss:$8 sps:$4 sm:$0xff]   ;;  %v23953_v24 = vld [vmem:[#allocation20 + $0x3b4] ss:$8 sps:$4 sm:$0xff]  }
 0x487   : > { %v3833_v13 = vmul.f32 %v26515_v21, %v3790_v42  ;;  %v26745_v4 = vpop.f32.mrb[68].mxu0  ;;  %v3864_v15 = vmul.f32 %v3832_v52, %v26691_v28  ;;  %v23933_v28 = vld [vmem:[#allocation20 + $0x370] ss:$8 sps:$4 sm:$0xff]   ;;  %v23858_v46 = vld [vmem:[#allocation20 + $0x700] ss:$8 sps:$4 sm:$0xff]  }
 0x488   : > { %v21786_v35 = vpop.f32.mrb[69].mxu0  ;;  %5152 = vmatpush1.bf16.msra.mxu1 %v23927_v25 }
 0x489   : > { %v3865_v14 = vmul.f32 %v3833_v13, %v26698_v47  ;;  %v26749_v16 = vpop.f32.mrb[56].mxu1  ;;  %v26751_v18 = vpop.f32.mrb[70].mxu0  ;;  %5153 = vmatprep.subr.bf16.mxu1 %v23935_v31  ;;  %v24178_v35 = vld [vmem:[#allocation20 + $0x8a4] ss:$8 sps:$4 sm:$0xff]  }
 0x48a   : > { %v24788_v26 = vpop.eup %24787  ;;  %v21732_v60 = vpop.f32.mrb[57].mxu1 }
 0x48b   : > { %v21787_v2 = vpop.f32.mrb[71].mxu0  ;;  %v3796_v29 = vmul.f32 0.6931472, %v24788_v26  ;;  %v26753_v27 = vpop.f32.mrb[58].mxu1  ;;  %v23703_v17 = vpack.i.bf16 %v3865_v14, %v3864_v15  ;;  %v23863_v14 = vld [vmem:[#allocation20 + $0x714] ss:$8 sps:$4 sm:$0xff]  }
 0x48c   : > { %v24790_v33 = vpop.eup %24789  ;;  %v21733_v19 = vpop.f32.mrb[59].mxu1  ;;  %5154 = vmatpush1.bf16.msra.mxu1 %v23933_v28  ;;  %v23951_v60 = vld [vmem:[#allocation20 + $0x3b0] ss:$8 sps:$4 sm:$0xff]   ;;  %v23956_v28 = vld [vmem:[#allocation20 + $0x3c4] ss:$8 sps:$4 sm:$0xff]  }
 0x48d   : > { %v3836_v47 = vmul.f32 %v26515_v21, %v3796_v29  ;;  %v3798_v36 = vmul.f32 0.6931472, %v24790_v33  ;;  %23704 = vrot.lane.b32.xlu1 %v23703_v17, %s25435_s19  ;;  %5155 = vmatprep.subr.bf16.mxu1 %v23938_v54  ;;  %v23861_v2 = vld [vmem:[#allocation20 + $0x710] ss:$8 sps:$4 sm:$0xff]   ;;  %v23866_v29 = vld [vmem:[#allocation20 + $0x724] ss:$8 sps:$4 sm:$0xff]  }
 0x48f   : > { %v3837_v38 = vmul.f32 %v26515_v21, %v3798_v36  ;;  %v26758_v40 = vpop.f32.mrb[72].mxu0  ;;  %v3868_v23 = vmul.f32 %v3836_v47, %v26708_v7 }
 0x490   : > { %v21798_v45 = vpop.f32.mrb[73].mxu0  ;;  %5156 = vmatpush1.bf16.msra.mxu1 %v23936_v10 }
 0x491   : > { %v3869_v51 = vmul.f32 %v3837_v38, %v26715_v41  ;;  %v26762_v37 = vpop.f32.mrb[60].mxu1  ;;  %v26764_v53 = vpop.f32.mrb[74].mxu0  ;;  %5157 = vmatprep.subr.bf16.mxu1 %v23944_v63  ;;  %v23954_v38 = vld [vmem:[#allocation20 + $0x3c0] ss:$8 sps:$4 sm:$0xff]   ;;  %v23867_v63 = vld [vmem:[#allocation20 + $0x730] ss:$8 sps:$4 sm:$0xff]  }
 0x492   : > { %v21744_v8 = vpop.f32.mrb[61].mxu1  ;;  %v21799_v6 = vpop.f32.mrb[75].mxu0 }
 0x493   : > { %v26766_v49 = vpop.f32.mrb[62].mxu1  ;;  %v23713_v21 = vpack.i.bf16 %v3869_v51, %v3868_v23  ;;  %v23864_v23 = vld [vmem:[#allocation20 + $0x720] ss:$8 sps:$4 sm:$0xff]   ;;  %v23869_v8 = vld [vmem:[#allocation20 + $0x734] ss:$8 sps:$4 sm:$0xff]  }
 0x494   : > { %v21745_v57 = vpop.f32.mrb[63].mxu1  ;;  %5158 = vmatpush1.bf16.msra.mxu1 %v23942_v59  ;;  %v23962_v6 = vld [vmem:[#allocation20 + $0x3d4] ss:$8 sps:$4 sm:$0xff]  }
 0x495   : > { %23714 = vrot.lane.b32.xlu1 %v23713_v21, %s25435_s19  ;;  %5159 = vmatprep.subr.bf16.mxu1 %v23947_v62  ;;  %v23960_v21 = vld [vmem:[#allocation20 + $0x3d0] ss:$8 sps:$4 sm:$0xff]   ;;  %v23872_v62 = vld [vmem:[#allocation20 + $0x744] ss:$8 sps:$4 sm:$0xff]  }
 0x497   : > { %v2728_v7 = vpop.f32.mrb[76].mxu0 }
 0x498   : > { %v2730_v41 = vpop.f32.mrb[77].mxu0  ;;  %5160 = vmatpush1.bf16.msra.mxu1 %v23945_v12 }
 0x499   : > { %v26769_v34 = vpop.f32.mrb[64].mxu1  ;;  %v2732_v32 = vpop.f32.mrb[78].mxu0  ;;  %5161 = vmatprep.subr.bf16.mxu1 %v23953_v24 }
 0x49a   : > { %v21756_v1 = vpop.f32.mrb[65].mxu1  ;;  %v26771_v43 = vpack.c.bf16 %v2732_v32, %v2728_v7  ;;  %v2734_v5 = vpop.f32.mrb[79].mxu0 }
 0x49b   : > { %v26773_v52 = vpop.f32.mrb[66].mxu1  ;;  %v26775_v42 = vpack.c.bf16 %v2734_v5, %v2730_v41 }
 0x49c   : > { %v21757_v13 = vpop.f32.mrb[67].mxu1  ;;  %v29485_v15 = vrot.slane %v26771_v43, 7  ;;  %5162 = vmatpush1.bf16.msra.mxu1 %v23951_v60 }
 0x49d   : > { %6905 = vmatprep.mubr.bf16.mxu0 %v26775_v42  ;;  %v29486_v26 = vrot.slane %v26775_v42, 7  ;;  %5163 = vmatprep.subr.bf16.mxu1 %v23956_v28  ;;  %v23965_v13 = vld [vmem:[#allocation20 + $0x3e4] ss:$8 sps:$4 sm:$0xff]  }
 0x49e   : > { %6906 = vmatmul.mubr.bf16.vlgmr.msra.gmra.mrb[108].mxu0 %v26771_v43 }
 0x49f   : > { %20454 = vmatprep.mubr.msk.bf16.mxu1 %vm26778_vm6, %v29486_v26  ;;  %7452 = vmatpush1.bf16.msra.mxu0 %v23858_v46  ;;  %v2844_v25 = vpop.f32.mrb[80].mxu0 }
 0x4a0   : > { %20456 = vmatmul.mubr.msk.bf16.gmra.mrb[124].mxu1 %vm26778_vm6, %v29485_v15  ;;  %7453 = vmatprep.subr.bf16.mxu0 %v23863_v14  ;;  %v2846_v17 = vpop.f32.mrb[81].mxu0 }
 0x4a1   : > { %v26794_v33 = vpop.f32.mrb[68].mxu1  ;;  %v2848_v19 = vpop.f32.mrb[82].mxu0  ;;  %5164 = vmatpush1.bf16.msra.mxu1 %v23954_v38 }
 0x4a2   : > { %v21768_v47 = vpop.f32.mrb[69].mxu1  ;;  %v26796_v36 = vpack.c.bf16 %v2848_v19, %v2844_v25  ;;  %v2850_v31 = vpop.f32.mrb[83].mxu0  ;;  %5165 = vmatprep.subr.bf16.mxu1 %v23962_v6  ;;  %v23963_v25 = vld [vmem:[#allocation20 + $0x3e0] ss:$8 sps:$4 sm:$0xff]  }
 0x4a3   : > { %v26798_v45 = vpop.f32.mrb[70].mxu1  ;;  %7454 = vmatpush1.bf16.msra.mxu0 %v23861_v2  ;;  %v26800_v51 = vpack.c.bf16 %v2850_v31, %v2846_v17  ;;  %v23875_v31 = vld [vmem:[#allocation20 + $0x754] ss:$8 sps:$4 sm:$0xff]  }
 0x4a4   : > { %29652 = vst [vmem:[#allocation46_spill] sm:$0xff] %v26796_v36  ;;  %v21769_v54 = vpop.f32.mrb[71].mxu1  ;;  %7455 = vmatprep.subr.bf16.mxu0 %v23866_v29 }
 0x4a5   : > { %29653 = vst [vmem:[#allocation47_spill] sm:$0xff] %v26800_v51  ;;  %v23640_v10 = vpop.permute.xlu0 %23639  ;;  %5166 = vmatpush1.bf16.msra.mxu1 %v23960_v21 }
 0x4a6   : > { %v23642_v57 = vunpack.i.h.bf16 %v23640_v10  ;;  %v23641_v59 = vunpack.i.l.bf16 %v23640_v10  ;;  %5167 = vmatprep.subr.bf16.mxu1 %v23965_v13  ;;  %v23873_v10 = vld [vmem:[#allocation20 + $0x750] ss:$8 sps:$4 sm:$0xff]  }
 0x4a7   : > { %7456 = vmatpush1.bf16.msra.mxu0 %v23864_v23  ;;  %v2960_v7 = vpop.f32.mrb[84].mxu0  ;;  %v23971_v23 = vld [vmem:[#allocation20 + $0x3f4] ss:$8 sps:$4 sm:$0xff]  }
 0x4a8   : > { %v3999_v41 = vsel %vm3998_vm7, %v26619_v50, %v23641_v59  ;;  %v4000_v32 = vsel %vm3998_vm7, %v26626_v58, %v23642_v57  ;;  %7457 = vmatprep.subr.bf16.mxu0 %v23869_v8  ;;  %v2962_v1 = vpop.f32.mrb[85].mxu0  ;;  %v23870_v50 = vld [vmem:[#allocation20 + $0x740] ss:$8 sps:$4 sm:$0xff]   ;;  %v23969_v8 = vld [vmem:[#allocation20 + $0x3f0] ss:$8 sps:$4 sm:$0xff]  }
 0x4a9   : > { %v26806_v5 = vpack.c.bf16 %v4000_v32, %v3999_v41  ;;  %v26808_v12 = vpop.f32.mrb[72].mxu1  ;;  %v23645_v46 = vpop.permute.xlu0 %23644  ;;  %5168 = vmatpush1.bf16.msra.mxu1 %v23963_v25  ;;  %v23878_v59 = vld [vmem:[#allocation20 + $0x764] ss:$8 sps:$4 sm:$0xff]   ;;  %v23881_v25 = vld [vmem:[#allocation20 + $0x774] ss:$8 sps:$4 sm:$0xff]  }
 0x4aa   : > { %v23647_v14 = vunpack.i.h.bf16 %v23645_v46  ;;  %v23646_v24 = vunpack.i.l.bf16 %v23645_v46  ;;  %v21780_v60 = vpop.f32.mrb[73].mxu1  ;;  %v2964_v2 = vpop.f32.mrb[86].mxu0  ;;  %5169 = vmatprep.subr.bf16.mxu1 %v23971_v23 }
 0x4ab   : > { %29654 = vst [vmem:[#allocation48_spill] sm:$0xff] %v26806_v5  ;;  %v26810_v29 = vpop.f32.mrb[74].mxu1  ;;  %7458 = vmatpush1.bf16.msra.mxu0 %v23867_v63  ;;  %v26812_v58 = vpack.c.bf16 %v2964_v2, %v2960_v7  ;;  %v2966_v17 = vpop.f32.mrb[87].mxu0 }
 0x4ac   : > { %v4002_v19 = vsel %vm3998_vm7, %v26736_v61, %v23647_v14  ;;  %v4001_v28 = vsel %vm3998_vm7, %v26728_v56, %v23646_v24  ;;  %v21781_v47 = vpop.f32.mrb[75].mxu1  ;;  %7459 = vmatprep.subr.bf16.mxu0 %v23872_v62  ;;  %v26818_v38 = vpack.c.bf16 %v2966_v17, %v2962_v1  ;;  %v23876_v24 = vld [vmem:[#allocation20 + $0x760] ss:$8 sps:$4 sm:$0xff]  }
 0x4ad   : > { %29655 = vst [vmem:[#allocation49_spill] sm:$0xff] %v26812_v58  ;;  %v26820_v54 = vpack.c.bf16 %v4002_v19, %v4001_v28  ;;  %5170 = vmatpush1.bf16.msra.mxu1 %v23969_v8  ;;  %v23884_v28 = vld [vmem:[#allocation20 + $0x784] ss:$8 sps:$4 sm:$0xff]  }
 0x4ae   : > { %29656 = vst [vmem:[#allocation50_spill] sm:$0xff] %v26818_v38 }
 0x4af   : > { %29657 = vst [vmem:[#allocation51_spill] sm:$0xff] %v26820_v54  ;;  %v23650_v6 = vpop.permute.xlu1 %23649  ;;  %7460 = vmatpush1.bf16.msra.mxu0 %v23870_v50  ;;  %v3076_v21 = vpop.f32.mrb[88].mxu0 }
 0x4b0   : > { %v23652_v57 = vunpack.i.h.bf16 %v23650_v6  ;;  %v23651_v61 = vunpack.i.l.bf16 %v23650_v6  ;;  %7461 = vmatprep.subr.bf16.mxu0 %v23875_v31  ;;  %v3078_v56 = vpop.f32.mrb[89].mxu0 }
 0x4b1   : > { %v26822_v63 = vpop.f32.mrb[76].mxu1  ;;  %v3080_v7 = vpop.f32.mrb[90].mxu0 }
 0x4b2   : > { %v4003_v41 = vsel %vm3998_vm7, %v26641_v20, %v23651_v61  ;;  %v4004_v32 = vsel %vm3998_vm7, %v26651_v39, %v23652_v57  ;;  %v21792_v62 = vpop.f32.mrb[77].mxu1  ;;  %v26828_v1 = vpack.c.bf16 %v3080_v7, %v3076_v21  ;;  %v3082_v46 = vpop.f32.mrb[91].mxu0  ;;  %v23879_v20 = vld [vmem:[#allocation20 + $0x770] ss:$8 sps:$4 sm:$0xff]  }
 0x4b3   : > { %v26830_v13 = vpack.c.bf16 %v4004_v32, %v4003_v41  ;;  %v26832_v14 = vpop.f32.mrb[78].mxu1  ;;  %7462 = vmatpush1.bf16.msra.mxu0 %v23873_v10  ;;  %v26834_v60 = vpack.c.bf16 %v3082_v46, %v3078_v56  ;;  %v23882_v56 = vld [vmem:[#allocation20 + $0x780] ss:$8 sps:$4 sm:$0xff]   ;;  %v23887_v32 = vld [vmem:[#allocation20 + $0x794] ss:$8 sps:$4 sm:$0xff]  }
 0x4b4   : > { %v21793_v2 = vpop.f32.mrb[79].mxu1  ;;  %7463 = vmatprep.subr.bf16.mxu0 %v23878_v59 }
 0x4b5   : > { %29658 = vst [vmem:[#allocation52_spill] sm:$0xff] %v26830_v13  ;;  %v23890_v2 = vld [vmem:[#allocation20 + $0x7a4] ss:$8 sps:$4 sm:$0xff]  }
 0x4b7   : > { %v23655_v50 = vpop.permute.xlu1 %23654  ;;  %7464 = vmatpush1.bf16.msra.mxu0 %v23876_v24  ;;  %v3192_v17 = vpop.f32.mrb[92].mxu0 }
 0x4b8   : > { %v23657_v39 = vunpack.i.h.bf16 %v23655_v50  ;;  %v23656_v19 = vunpack.i.l.bf16 %v23655_v50  ;;  %7465 = vmatprep.subr.bf16.mxu0 %v23881_v25  ;;  %v3194_v47 = vpop.f32.mrb[93].mxu0 }
 0x4b9   : > { %v26836_v31 = vpop.f32.mrb[80].mxu1  ;;  %v3196_v23 = vpop.f32.mrb[94].mxu0 }
 0x4ba   : > { %v4005_v8 = vsel %vm3998_vm7, %v26749_v16, %v23656_v19  ;;  %v4006_v6 = vsel %vm3998_vm7, %v26753_v27, %v23657_v39  ;;  %v21804_v10 = vpop.f32.mrb[81].mxu1  ;;  %v26842_v21 = vpack.c.bf16 %v3196_v23, %v3192_v17  ;;  %v3198_v57 = vpop.f32.mrb[95].mxu0  ;;  %v23885_v16 = vld [vmem:[#allocation20 + $0x790] ss:$8 sps:$4 sm:$0xff]  }
 0x4bb   : > { %v26844_v61 = vpack.c.bf16 %v4006_v6, %v4005_v8  ;;  %v26846_v59 = vpop.f32.mrb[82].mxu1  ;;  %7466 = vmatpush1.bf16.msra.mxu0 %v23879_v20  ;;  %v26848_v7 = vpack.c.bf16 %v3198_v57, %v3194_v47  ;;  %v23888_v6 = vld [vmem:[#allocation20 + $0x7a0] ss:$8 sps:$4 sm:$0xff]  }
 0x4bc   : > { %29659 = vst [vmem:[#allocation53_spill] sm:$0xff] %v26842_v21  ;;  %v21805_v41 = vpop.f32.mrb[83].mxu1  ;;  %7467 = vmatprep.subr.bf16.mxu0 %v23884_v28 }
 0x4bd   : > { %29660 = vst [vmem:[#allocation54_spill] sm:$0xff] %v26844_v61  ;;  %29661 = vst [vmem:[#allocation55_spill] sm:$0xff] %v26848_v7  ;;  %v23893_v41 = vld [vmem:[#allocation20 + $0x7b4] ss:$8 sps:$4 sm:$0xff]  }
 0x4bf   : > { %v23660_v62 = vpop.permute.xlu0 %23659  ;;  %7468 = vmatpush1.bf16.msra.mxu0 %v23882_v56  ;;  %v3308_v46 = vpop.f32.mrb[96].mxu0 }
 0x4c0   : > { %v23662_v27 = vunpack.i.h.bf16 %v23660_v62  ;;  %v23661_v24 = vunpack.i.l.bf16 %v23660_v62  ;;  %7469 = vmatprep.subr.bf16.mxu0 %v23887_v32  ;;  %v3310_v25 = vpop.f32.mrb[97].mxu0  ;;  %v26867_v62 = vrot.slane %v26800_v51, 7 }
 0x4c1   : > { %v2786_v50 = vpop.f32.mrb[84].mxu1  ;;  %v3312_v17 = vpop.f32.mrb[98].mxu0 }
 0x4c2   : > { %v4007_v20 = vsel %vm3998_vm7, %v26669_v3, %v23661_v24  ;;  %v4008_v39 = vsel %vm3998_vm7, %v26680_v9, %v23662_v27  ;;  %v2788_v19 = vpop.f32.mrb[85].mxu1  ;;  %v26854_v28 = vpack.c.bf16 %v3312_v17, %v3308_v46  ;;  %v3314_v47 = vpop.f32.mrb[99].mxu0 }
 0x4c3   : > { %v26856_v23 = vpack.c.bf16 %v4008_v39, %v4007_v20  ;;  %v2790_v8 = vpop.f32.mrb[86].mxu1  ;;  %7470 = vmatpush1.bf16.msra.mxu0 %v23885_v16  ;;  %v26858_v10 = vpack.c.bf16 %v3314_v47, %v3310_v25  ;;  %v23891_v16 = vld [vmem:[#allocation20 + $0x7b0] ss:$8 sps:$4 sm:$0xff]   ;;  %v23896_v25 = vld [vmem:[#allocation20 + $0x7c4] ss:$8 sps:$4 sm:$0xff]  }
 0x4c4   : > { %v26860_v57 = vpack.c.bf16 %v2790_v8, %v2786_v50  ;;  %v2792_v56 = vpop.f32.mrb[87].mxu1  ;;  %7471 = vmatprep.subr.bf16.mxu0 %v23890_v2 }
 0x4c5   : > { %29662 = vst [vmem:[#allocation56_spill] sm:$0xff] %v26856_v23  ;;  %v26862_v3 = vpack.c.bf16 %v2792_v56, %v2788_v19 }
 0x4c6   : > { %v29483_v2 = vrot.slane %v26860_v57, 7 }
 0x4c7   : > { %v23665_v32 = vpop.permute.xlu1 %23664  ;;  %6915 = vmatprep.mubr.bf16.mxu0 %v26862_v3  ;;  %v29484_v9 = vrot.slane %v26862_v3, 7  ;;  %7472 = vmatpush1.bf16.msra.mxu0 %v23888_v6  ;;  %v3424_v46 = vpop.f32.mrb[100].mxu0 }
 0x4c8   : > { %v23667_v27 = vunpack.i.h.bf16 %v23665_v32  ;;  %v23666_v24 = vunpack.i.l.bf16 %v23665_v32  ;;  %6916 = vmatmul.mubr.bf16.gmra.mrb[112].mxu0 %v26860_v57  ;;  %7473 = vmatprep.subr.bf16.mxu0 %v23893_v41  ;;  %v3426_v50 = vpop.f32.mrb[101].mxu0 }
 0x4c9   : > { %20458 = vmatprep.mubr.msk.bf16.mxu1 %vm26778_vm6, %v29484_v9  ;;  %6925 = vmatprep.mubr.bf16.mxu0 %v26800_v51  ;;  %v2902_v17 = vpop.f32.mrb[88].mxu1  ;;  %v3428_v20 = vpop.f32.mrb[102].mxu0 }
 0x4ca   : > { %v4009_v39 = vsel %vm3998_vm7, %v26762_v37, %v23666_v24  ;;  %v4010_v19 = vsel %vm3998_vm7, %v26766_v49, %v23667_v27  ;;  %20460 = vmatmul.mubr.msk.bf16.gmra.mrb[128].mxu1 %vm26778_vm6, %v29483_v2  ;;  %v2904_v47 = vpop.f32.mrb[89].mxu1  ;;  %v26884_v8 = vpack.c.bf16 %v3428_v20, %v3424_v46  ;;  %v3430_v6 = vpop.f32.mrb[103].mxu0  ;;  %v23894_v37 = vld [vmem:[#allocation20 + $0x7c0] ss:$8 sps:$4 sm:$0xff]   ;;  %v23902_v24 = vld [vmem:[#allocation20 + $0x7d4] ss:$8 sps:$4 sm:$0xff]  }
 0x4cb   : > { %v26886_v56 = vpack.c.bf16 %v4010_v19, %v4009_v39  ;;  %20462 = vmatprep.mubr.msk.bf16.mxu1 %vm26778_vm6, %v26867_v62  ;;  %v2906_v41 = vpop.f32.mrb[90].mxu1  ;;  %7474 = vmatpush1.bf16.msra.mxu0 %v23891_v16  ;;  %v26891_v32 = vpack.c.bf16 %v3430_v6, %v3426_v50  ;;  %v23900_v39 = vld [vmem:[#allocation20 + $0x7d0] ss:$8 sps:$4 sm:$0xff]   ;;  %v26902_v16 = vrot.slane %v26796_v36, 7  ;;  %v23908_v50 = vld [vmem:[#allocation20 + $0x7e4] ss:$8 sps:$4 sm:$0xff]  }
 0x4cc   : > { %v26893_v49 = vpack.c.bf16 %v2906_v41, %v2902_v17  ;;  %v2908_v27 = vpop.f32.mrb[91].mxu1  ;;  %7475 = vmatprep.subr.bf16.mxu0 %v23896_v25 }
 0x4cd   : > { %29663 = vst [vmem:[#allocation57_spill] sm:$0xff] %v26886_v56  ;;  %v26895_v22 = vpack.c.bf16 %v2908_v27, %v2904_v47 }
 0x4ce   : > { %29664 = vst [vmem:[#allocation58_spill] sm:$0xff] %v26893_v49 }
 0x4cf   : > { %29665 = vst [vmem:[#allocation59_spill] sm:$0xff] %v26895_v22  ;;  %v23670_v46 = vpop.permute.xlu0 %23669  ;;  %v26898_v20 = vrot.slane %v26895_v22, 7  ;;  %7476 = vmatpush1.bf16.msra.mxu0 %v23894_v37  ;;  %v3540_v41 = vpop.f32.mrb[104].mxu0 }
 0x4d0   : > { %v23672_v19 = vunpack.i.h.bf16 %v23670_v46  ;;  %v23671_v2 = vunpack.i.l.bf16 %v23670_v46  ;;  %6926 = vmatmul.mubr.bf16.gmra.mrb[116].mxu0 %v26796_v36  ;;  %7477 = vmatprep.subr.bf16.mxu0 %v23902_v24  ;;  %v23906_v24 = vld [vmem:[#allocation20 + $0x7e0] ss:$8 sps:$4 sm:$0xff]   ;;  %v3542_v46 = vpop.f32.mrb[105].mxu0 }
 0x4d1   : > { %6935 = vmatprep.mubr.bf16.mxu0 %v26895_v22  ;;  %v3018_v25 = vpop.f32.mrb[92].mxu1 }
 0x4d2   : > { %v4011_v17 = vsel %vm3998_vm7, %v26693_v30, %v23671_v2  ;;  %v4012_v47 = vsel %vm3998_vm7, %v26700_v48, %v23672_v19  ;;  %20464 = vmatmul.mubr.msk.bf16.gmra.mrb[132].mxu1 %vm26778_vm6, %v26902_v16  ;;  %v3020_v6 = vpop.f32.mrb[93].mxu1  ;;  %v23914_v48 = vld [vmem:[#allocation20 + $0x7f4] ss:$8 sps:$4 sm:$0xff]   ;;  %v3544_v19 = vpop.f32.mrb[106].mxu0 }
 0x4d3   : > { %v26912_v37 = vpack.c.bf16 %v4012_v47, %v4011_v17  ;;  %20466 = vmatprep.mubr.msk.bf16.mxu1 %vm26778_vm6, %v26898_v20  ;;  %v3022_v27 = vpop.f32.mrb[94].mxu1  ;;  %7478 = vmatpush1.bf16.msra.mxu0 %v23900_v39  ;;  %v26921_v15 = vpack.c.bf16 %v3544_v19, %v3540_v41  ;;  %v3546_v17 = vpop.f32.mrb[107].mxu0  ;;  %v23912_v39 = vld [vmem:[#allocation20 + $0x7f0] ss:$8 sps:$4 sm:$0xff]  }
 0x4d4   : > { %v26917_v30 = vpack.c.bf16 %v3022_v27, %v3018_v25  ;;  %v3024_v2 = vpop.f32.mrb[95].mxu1  ;;  %7479 = vmatprep.subr.bf16.mxu0 %v23908_v50  ;;  %v26923_v47 = vpack.c.bf16 %v3546_v17, %v3542_v46  ;;  %v26930_v50 = vrot.slane %v26893_v49, 7 }
 0x4d5   : > { %29666 = vst [vmem:[#allocation60_spill] sm:$0xff] %v26912_v37  ;;  %v26919_v9 = vpack.c.bf16 %v3024_v2, %v3020_v6  ;;  %v26926_v37 = vrot.slane %v26818_v38, 7  ;;  %v23923_v6 = vld [vmem:[#allocation20 + $0x204] ss:$8 sps:$4 sm:$0xff]  }
 0x4d7   : > { %29667 = vst [vmem:[#allocation61_spill] sm:$0xff] %v26919_v9  ;;  %v23675_v26 = vpop.permute.xlu1 %23674  ;;  %7480 = vmatpush1.bf16.msra.mxu0 %v23906_v24 }
 0x4d8   : > { %v23677_v56 = vunpack.i.h.bf16 %v23675_v26  ;;  %v23676_v25 = vunpack.i.l.bf16 %v23675_v26  ;;  %6936 = vmatmul.mubr.bf16.gmra.mrb[120].mxu0 %v26893_v49  ;;  %7481 = vmatprep.subr.bf16.mxu0 %v23914_v48 }
 0x4d9   : > { %6945 = vmatprep.mubr.bf16.mxu0 %v26818_v38  ;;  %v3134_v41 = vpop.f32.mrb[96].mxu1 }
 0x4da   : > { %v4013_v27 = vsel %vm3998_vm7, %v26769_v34, %v23676_v25  ;;  %v4014_v46 = vsel %vm3998_vm7, %v26773_v52, %v23677_v56  ;;  %20468 = vmatmul.mubr.msk.bf16.gmra.mrb[136].mxu1 %vm26778_vm6, %v26930_v50  ;;  %v3136_v26 = vpop.f32.mrb[97].mxu1  ;;  %v26950_v56 = vrot.slane %v26919_v9, 7 }
 0x4db   : > { %v26940_v24 = vpack.c.bf16 %v4014_v46, %v4013_v27  ;;  %20470 = vmatprep.mubr.msk.bf16.mxu1 %vm26778_vm6, %v26926_v37  ;;  %v3138_v2 = vpop.f32.mrb[98].mxu1  ;;  %7482 = vmatpush1.bf16.msra.mxu0 %v23912_v39  ;;  %v26954_v27 = vrot.slane %v26812_v58, 7 }
 0x4dc   : > { %v26945_v48 = vpack.c.bf16 %v3138_v2, %v3134_v41  ;;  %v3140_v19 = vpop.f32.mrb[99].mxu1  ;;  %8158 = vmatprep.subr.bf16.mxu0 %v23923_v6 }
 0x4dd   : > { %29668 = vst [vmem:[#allocation62_spill] sm:$0xff] %v26940_v24  ;;  %v26947_v34 = vpack.c.bf16 %v3140_v19, %v3136_v26 }
 0x4df   : > { %v23680_v52 = vpop.permute.xlu0 %23679 }
 0x4e0   : > { %v23682_v17 = vunpack.i.h.bf16 %v23680_v52  ;;  %v23681_v25 = vunpack.i.l.bf16 %v23680_v52  ;;  %6946 = vmatmul.mubr.bf16.gmra.mrb[124].mxu0 %v26812_v58 }
 0x4e1   : > { %6955 = vmatprep.mubr.bf16.mxu0 %v26919_v9  ;;  %v3250_v39 = vpop.f32.mrb[100].mxu1 }
 0x4e2   : > { %v4015_v41 = vsel %vm3998_vm7, %v26710_v11, %v23681_v25  ;;  %v4016_v6 = vsel %vm3998_vm7, %v26717_v44, %v23682_v17  ;;  %20472 = vmatmul.mubr.msk.bf16.gmra.mrb[140].mxu1 %vm26778_vm6, %v26954_v27  ;;  %v3252_v46 = vpop.f32.mrb[101].mxu1  ;;  %v26974_v44 = vrot.slane %v26834_v60, 7 }
 0x4e3   : > { %v26964_v26 = vpack.c.bf16 %v4016_v6, %v4015_v41  ;;  %20474 = vmatprep.mubr.msk.bf16.mxu1 %vm26778_vm6, %v26950_v56  ;;  %v3254_v2 = vpop.f32.mrb[102].mxu1  ;;  %v26978_v41 = vrot.slane %v26917_v30, 7 }
 0x4e4   : > { %v26969_v19 = vpack.c.bf16 %v3254_v2, %v3250_v39  ;;  %v3256_v52 = vpop.f32.mrb[103].mxu1 }
 0x4e5   : > { %29669 = vst [vmem:[#allocation63_spill] sm:$0xff] %v26964_v26  ;;  %v26971_v24 = vpack.c.bf16 %v3256_v52, %v3252_v46 }
 0x4e7   : > { %29670 = vst [vmem:[#allocation64_spill] sm:$0xff] %v26971_v24 }
 0x4e8   : > { %v23685_v11 = vpop.permute.xlu1 %23684  ;;  %6956 = vmatmul.mubr.bf16.gmra.mrb[128].mxu0 %v26917_v30 }
 0x4e9   : > { %v23687_v17 = vunpack.i.h.bf16 %v23685_v11  ;;  %v23686_v25 = vunpack.i.l.bf16 %v23685_v11  ;;  %6965 = vmatprep.mubr.bf16.mxu0 %v26834_v60  ;;  %v3366_v6 = vpop.f32.mrb[104].mxu1 }
 0x4ea   : > { %20476 = vmatmul.mubr.msk.bf16.gmra.mrb[144].mxu1 %vm26778_vm6, %v26978_v41  ;;  %v3368_v2 = vpop.f32.mrb[105].mxu1 }
 0x4eb   : > { %v4017_v39 = vsel %vm3998_vm7, %v26794_v33, %v23686_v25  ;;  %v4018_v46 = vsel %vm3998_vm7, %v26798_v45, %v23687_v17  ;;  %20478 = vmatprep.mubr.msk.bf16.mxu1 %vm26778_vm6, %v26974_v44  ;;  %v3370_v11 = vpop.f32.mrb[106].mxu1  ;;  %v26998_v45 = vrot.slane %v26947_v34, 7 }
 0x4ec   : > { %v26988_v52 = vpack.c.bf16 %v4018_v46, %v4017_v39  ;;  %v26993_v26 = vpack.c.bf16 %v3370_v11, %v3366_v6  ;;  %v3372_v23 = vpop.f32.mrb[107].mxu1  ;;  %v27002_v39 = vrot.slane %v26828_v1, 7 }
 0x4ed   : > { %v26995_v61 = vpack.c.bf16 %v3372_v23, %v3368_v2  ;;  %29672 = vst [vmem:[#allocation66_spill] sm:$0xff] %v26998_v45 }
 0x4ee   : > { %29671 = vst [vmem:[#allocation65_spill] sm:$0xff] %v26988_v52  ;;  %29673 = vst [vmem:[#allocation67_spill] sm:$0xff] %v27002_v39  ;;  %v23998_v52 = vld [vmem:[#allocation20 + $0x604] ss:$8 sps:$4 sm:$0xff]  }
 0x4ef   : > { %5717 = vmatprep.subr.bf16.mxu1 %v23998_v52  ;;  %v27031_v52 = vrot.slane %v26848_v7, 7 }
 0x4f0   : > { %v23690_v33 = vpop.permute.xlu0 %23689  ;;  %6966 = vmatmul.mubr.bf16.gmra.mrb[132].mxu0 %v26828_v1 }
 0x4f1   : > { %v23692_v17 = vunpack.i.h.bf16 %v23690_v33  ;;  %v23691_v25 = vunpack.i.l.bf16 %v23690_v33  ;;  %6975 = vmatprep.mubr.bf16.mxu0 %v26947_v34  ;;  %v3482_v46 = vpop.f32.mrb[108].mxu1 }
 0x4f2   : > { %20480 = vmatmul.mubr.msk.bf16.gmra.mrb[148].mxu1 %vm26778_vm6, %v27002_v39  ;;  %v3484_v2 = vpop.f32.mrb[109].mxu1 }
 0x4f3   : > { %v4019_v6 = vsel %vm3998_vm7, %v26724_v0, %v23691_v25  ;;  %v4020_v23 = vsel %vm3998_vm7, %v26734_v55, %v23692_v17  ;;  %20482 = vmatprep.mubr.msk.bf16.mxu1 %vm26778_vm6, %v26998_v45  ;;  %v3486_v13 = vpop.f32.mrb[110].mxu1  ;;  %v27028_v45 = vrot.slane %v26945_v48, 7 }
 0x4f4   : > { %v27012_v11 = vpack.c.bf16 %v4020_v23, %v4019_v6  ;;  %v23700_v33 = vpop.permute.xlu0 %23699  ;;  %v27017_v0 = vpack.c.bf16 %v3486_v13, %v3482_v46  ;;  %v3488_v25 = vpop.f32.mrb[111].mxu1 }
 0x4f5   : > { %v23702_v54 = vunpack.i.h.bf16 %v23700_v33  ;;  %v23701_v5 = vunpack.i.l.bf16 %v23700_v33  ;;  %v27019_v55 = vpack.c.bf16 %v3488_v25, %v3484_v2 }
 0x4f6   : > { %29674 = vst [vmem:[#allocation68_spill] sm:$0xff] %v27012_v11 }
 0x4f7   : > { %v4023_v17 = vsel %vm3998_vm7, %v26745_v4, %v23701_v5  ;;  %v4024_v6 = vsel %vm3998_vm7, %v26751_v18, %v23702_v54  ;;  %v23695_v11 = vpop.permute.xlu1 %23694 }
 0x4f8   : > { %v27025_v23 = vpack.c.bf16 %v4024_v6, %v4023_v17  ;;  %v23710_v39 = vpop.permute.xlu0 %23709  ;;  %v23697_v13 = vunpack.i.h.bf16 %v23695_v11  ;;  %v23696_v46 = vunpack.i.l.bf16 %v23695_v11  ;;  %6976 = vmatmul.mubr.bf16.gmra.mrb[136].mxu0 %v26945_v48  ;;  %v23921_v6 = vld [vmem:[#allocation20 + $0x200] ss:$8 sps:$4 sm:$0xff]  }
 0x4f9   : > { %v23712_v2 = vunpack.i.h.bf16 %v23710_v39  ;;  %v23711_v33 = vunpack.i.l.bf16 %v23710_v39  ;;  %7483 = vmatprep.mubr.bf16.mxu0 %v26800_v51  ;;  %v3598_v4 = vpop.f32.mrb[112].mxu1 }
 0x4fa   : > { %29675 = vst [vmem:[#allocation69_spill] sm:$0xff] %v27025_v23  ;;  %v4021_v18 = vsel %vm3998_vm7, %v26808_v12, %v23696_v46  ;;  %v4022_v5 = vsel %vm3998_vm7, %v26810_v29, %v23697_v13  ;;  %20484 = vmatmul.mubr.msk.bf16.gmra.mrb[152].mxu1 %vm26778_vm6, %v27028_v45  ;;  %v3600_v39 = vpop.f32.mrb[113].mxu1  ;;  %v23932_v46 = vld [vmem:[#allocation20 + $0x214] ss:$8 sps:$4 sm:$0xff]   ;;  %v23996_v23 = vld [vmem:[#allocation20 + $0x600] ss:$8 sps:$4 sm:$0xff]  }
 0x4fb   : > { %v4027_v54 = vsel %vm3998_vm7, %v26758_v40, %v23711_v33  ;;  %v4028_v25 = vsel %vm3998_vm7, %v26764_v53, %v23712_v2  ;;  %v27046_v11 = vpack.c.bf16 %v4022_v5, %v4021_v18  ;;  %20486 = vmatprep.mubr.msk.bf16.mxu1 %vm26778_vm6, %v27031_v52  ;;  %v3602_v12 = vpop.f32.mrb[114].mxu1  ;;  %v27058_v53 = vrot.slane %v26842_v21, 7 }
 0x4fc   : > { %v27048_v17 = vpack.c.bf16 %v4028_v25, %v4027_v54  ;;  %v27053_v29 = vpack.c.bf16 %v3602_v12, %v3598_v4  ;;  %v3604_v40 = vpop.f32.mrb[115].mxu1  ;;  %v27061_v33 = vrot.slane %v26971_v24, 7  ;;  %v23930_v4 = vld [vmem:[#allocation20 + $0x210] ss:$8 sps:$4 sm:$0xff]  }
 0x4fd   : > { %29676 = vst [vmem:[#allocation70_spill] sm:$0xff] %v27046_v11  ;;  %v27055_v13 = vpack.c.bf16 %v3604_v40, %v3600_v39  ;;  %v23941_v39 = vld [vmem:[#allocation20 + $0x224] ss:$8 sps:$4 sm:$0xff]   ;;  %v23939_v40 = vld [vmem:[#allocation20 + $0x220] ss:$8 sps:$4 sm:$0xff]  }
 0x4fe   : > { %29677 = vst [vmem:[#allocation71_spill] sm:$0xff] %v27048_v17  ;;  %v23989_v17 = vld [vmem:[#allocation20 + $0x2b4] ss:$8 sps:$4 sm:$0xff]   ;;  %v23993_v11 = vld [vmem:[#allocation20 + $0x2d0] ss:$8 sps:$4 sm:$0xff]  }
 0x4ff   : > { %v23705_v2 = vpop.permute.xlu1 %23704 }
 0x500   : > { %v23707_v18 = vunpack.i.h.bf16 %v23705_v2  ;;  %v23706_v5 = vunpack.i.l.bf16 %v23705_v2  ;;  %7484 = vmatmul.mubr.bf16.vlgmr.msra.gmra.mrb[108].mxu0 %v26796_v36  ;;  %v27081_v2 = vrot.slane %v26858_v10, 7 }
 0x501   : > { %7493 = vmatprep.mubr.bf16.mxu0 %v26895_v22  ;;  %8159 = vmatpush1.bf16.msra.mxu0 %v23921_v6  ;;  %v27078_v6 = vrot.slane %v26969_v19, 7 }
 0x502   : > { %v4025_v54 = vsel %vm3998_vm7, %v26822_v63, %v23706_v5  ;;  %v4026_v25 = vsel %vm3998_vm7, %v26832_v14, %v23707_v18  ;;  %20488 = vmatmul.mubr.msk.bf16.gmra.mrb[156].mxu1 %vm26778_vm6, %v27058_v53  ;;  %8160 = vmatprep.subr.bf16.mxu0 %v23932_v46  ;;  %v23950_v63 = vld [vmem:[#allocation20 + $0x234] ss:$8 sps:$4 sm:$0xff]   ;;  %v23948_v5 = vld [vmem:[#allocation20 + $0x230] ss:$8 sps:$4 sm:$0xff]  }
 0x503   : > { %v27072_v12 = vpack.c.bf16 %v4026_v25, %v4025_v54  ;;  %20490 = vmatprep.mubr.msk.bf16.mxu1 %vm26778_vm6, %v27061_v33  ;;  %v23959_v25 = vld [vmem:[#allocation20 + $0x244] ss:$8 sps:$4 sm:$0xff]  }
 0x505   : > { %29678 = vst [vmem:[#allocation72_spill] sm:$0xff] %v27072_v12  ;;  %8161 = vmatpush1.bf16.msra.mxu0 %v23930_v4  ;;  %v23995_v12 = vld [vmem:[#allocation20 + $0x2d4] ss:$8 sps:$4 sm:$0xff]  }
 0x506   : > { %8162 = vmatprep.subr.bf16.mxu0 %v23941_v39 }
 0x507   : > { %v23715_v14 = vpop.permute.xlu1 %23714 }
 0x508   : > { %v23717_v18 = vunpack.i.h.bf16 %v23715_v14  ;;  %v23716_v46 = vunpack.i.l.bf16 %v23715_v14  ;;  %7494 = vmatmul.mubr.bf16.gmra.mrb[112].mxu0 %v26893_v49  ;;  %v27098_v14 = vrot.slane %v26854_v28, 7 }
 0x509   : > { %7503 = vmatprep.mubr.bf16.mxu0 %v26818_v38  ;;  %8163 = vmatpush1.bf16.msra.mxu0 %v23939_v40  ;;  %v23957_v40 = vld [vmem:[#allocation20 + $0x240] ss:$8 sps:$4 sm:$0xff]  }
 0x50a   : > { %v4029_v4 = vsel %vm3998_vm7, %v26836_v31, %v23716_v46  ;;  %v4030_v54 = vsel %vm3998_vm7, %v26846_v59, %v23717_v18  ;;  %20492 = vmatmul.mubr.msk.bf16.gmra.mrb[160].mxu1 %vm26778_vm6, %v27078_v6  ;;  %8164 = vmatprep.subr.bf16.mxu0 %v23950_v63  ;;  %v23968_v31 = vld [vmem:[#allocation20 + $0x254] ss:$8 sps:$4 sm:$0xff]   ;;  %v27101_v59 = vrot.slane %v26995_v61, 7  ;;  %v23966_v63 = vld [vmem:[#allocation20 + $0x250] ss:$8 sps:$4 sm:$0xff]  }
 0x50b   : > { %v27092_v39 = vpack.c.bf16 %v4030_v54, %v4029_v4  ;;  %20494 = vmatprep.mubr.msk.bf16.mxu1 %vm26778_vm6, %v27081_v2  ;;  %v23974_v18 = vld [vmem:[#allocation20 + $0x264] ss:$8 sps:$4 sm:$0xff]   ;;  %v23972_v46 = vld [vmem:[#allocation20 + $0x260] ss:$8 sps:$4 sm:$0xff]   ;;  %v23977_v4 = vld [vmem:[#allocation20 + $0x274] ss:$8 sps:$4 sm:$0xff]  }
 0x50c   : > { %v27115_v54 = vrot.slane %v26891_v32, 7 }
 0x50d   : > { %29679 = vst [vmem:[#allocation73_spill] sm:$0xff] %v27092_v39  ;;  %8165 = vmatpush1.bf16.msra.mxu0 %v23948_v5  ;;  %v27112_v5 = vrot.slane %v26993_v26, 7  ;;  %v27140_v39 = vrot.slane %v27017_v0, 7 }
 0x50e   : > { %8166 = vmatprep.subr.bf16.mxu0 %v23959_v25  ;;  %v23975_v25 = vld [vmem:[#allocation20 + $0x270] ss:$8 sps:$4 sm:$0xff]  }
 0x510   : > { %7504 = vmatmul.mubr.bf16.gmra.mrb[116].mxu0 %v26812_v58 }
 0x511   : > { %7513 = vmatprep.mubr.bf16.mxu0 %v26919_v9  ;;  %8167 = vmatpush1.bf16.msra.mxu0 %v23957_v40  ;;  %v23980_v40 = vld [vmem:[#allocation20 + $0x284] ss:$8 sps:$4 sm:$0xff]  }
 0x512   : > { %20496 = vmatmul.mubr.msk.bf16.gmra.mrb[164].mxu1 %vm26778_vm6, %v27098_v14  ;;  %8168 = vmatprep.subr.bf16.mxu0 %v23968_v31  ;;  %v23978_v31 = vld [vmem:[#allocation20 + $0x280] ss:$8 sps:$4 sm:$0xff]  }
 0x513   : > { %20498 = vmatprep.mubr.msk.bf16.mxu1 %vm26778_vm6, %v27101_v59 }
 0x515   : > { %8169 = vmatpush1.bf16.msra.mxu0 %v23966_v63  ;;  %v27126_v63 = vrot.slane %v26884_v8, 7 }
 0x516   : > { %8170 = vmatprep.subr.bf16.mxu0 %v23974_v18  ;;  %v23983_v18 = vld [vmem:[#allocation20 + $0x294] ss:$8 sps:$4 sm:$0xff]  }
 0x518   : > { %7514 = vmatmul.mubr.bf16.gmra.mrb[120].mxu0 %v26917_v30 }
 0x519   : > { %7523 = vmatprep.mubr.bf16.mxu0 %v26834_v60  ;;  %8171 = vmatpush1.bf16.msra.mxu0 %v23972_v46  ;;  %v27129_v46 = vrot.slane %v27019_v55, 7 }
 0x51a   : > { %20500 = vmatmul.mubr.msk.bf16.gmra.mrb[168].mxu1 %vm26778_vm6, %v27112_v5  ;;  %8172 = vmatprep.subr.bf16.mxu0 %v23977_v4  ;;  %v23981_v4 = vld [vmem:[#allocation20 + $0x290] ss:$8 sps:$4 sm:$0xff]  }
 0x51b   : > { %20502 = vmatprep.mubr.msk.bf16.mxu1 %vm26778_vm6, %v27115_v54 }
 0x51d   : > { %8173 = vmatpush1.bf16.msra.mxu0 %v23975_v25  ;;  %v23986_v25 = vld [vmem:[#allocation20 + $0x2a4] ss:$8 sps:$4 sm:$0xff]  }
 0x51e   : > { %8174 = vmatprep.subr.bf16.mxu0 %v23980_v40  ;;  %v23984_v40 = vld [vmem:[#allocation20 + $0x2a0] ss:$8 sps:$4 sm:$0xff]  }
 0x520   : > { %7524 = vmatmul.mubr.bf16.gmra.mrb[124].mxu0 %v26828_v1 }
 0x521   : > { %7533 = vmatprep.mubr.bf16.mxu0 %v26947_v34  ;;  %8175 = vmatpush1.bf16.msra.mxu0 %v23978_v31  ;;  %v23987_v31 = vld [vmem:[#allocation20 + $0x2b0] ss:$8 sps:$4 sm:$0xff]  }
 0x522   : > { %20504 = vmatmul.mubr.msk.bf16.gmra.mrb[172].mxu1 %vm26778_vm6, %v27126_v63  ;;  %8176 = vmatprep.subr.bf16.mxu0 %v23983_v18  ;;  %v23992_v18 = vld [vmem:[#allocation20 + $0x2c4] ss:$8 sps:$4 sm:$0xff]  }
 0x523   : > { %20506 = vmatprep.mubr.msk.bf16.mxu1 %vm26778_vm6, %v27129_v46 }
 0x525   : > { %8177 = vmatpush1.bf16.msra.mxu0 %v23981_v4  ;;  %v29680_v4 = vrot.slane %v26775_v42, 7 }
 0x526   : > { %8178 = vmatprep.subr.bf16.mxu0 %v23986_v25  ;;  %v23990_v25 = vld [vmem:[#allocation20 + $0x2c0] ss:$8 sps:$4 sm:$0xff]  }
 0x528   : > { %7534 = vmatmul.mubr.bf16.gmra.mrb[128].mxu0 %v26945_v48 }
 0x529   : > { %7543 = vmatprep.mubr.bf16.mxu0 %v26848_v7  ;;  %8179 = vmatpush1.bf16.msra.mxu0 %v23984_v40  ;;  %v24004_v40 = vld [vmem:[#allocation20 + $0x614] ss:$8 sps:$4 sm:$0xff]   ;;  %v24001_v7 = vld [vmem:[#allocation20 + $0x2e4] ss:$8 sps:$4 sm:$0xff]  }
 0x52a   : > { %20508 = vmatmul.mubr.msk.bf16.gmra.mrb[176].mxu1 %vm26778_vm6, %v27140_v39  ;;  %8180 = vmatprep.subr.bf16.mxu0 %v23989_v17  ;;  %v29681_v17 = vrot.slane %v26771_v43, 7 }
 0x52b   : > { %20542 = vmatprep.mubr.msk.bf16.mxu1 %vm26778_vm6, %v29680_v4  ;;  %v24007_v4 = vld [vmem:[#allocation20 + $0x624] ss:$8 sps:$4 sm:$0xff]  }
 0x52d   : > { %8181 = vmatpush1.bf16.msra.mxu0 %v23987_v31  ;;  %v29682_v31 = vrot.slane %v26862_v3, 7 }
 0x52e   : > { %8182 = vmatprep.subr.bf16.mxu0 %v23992_v18  ;;  %v24002_v18 = vld [vmem:[#allocation20 + $0x610] ss:$8 sps:$4 sm:$0xff]  }
 0x530   : > { %7544 = vmatmul.mubr.bf16.gmra.mrb[132].mxu0 %v26842_v21  ;;  %v24005_v21 = vld [vmem:[#allocation20 + $0x620] ss:$8 sps:$4 sm:$0xff]  }
 0x531   : > { %7553 = vmatprep.mubr.bf16.mxu0 %v26971_v24  ;;  %8183 = vmatpush1.bf16.msra.mxu0 %v23990_v25  ;;  %v23999_v24 = vld [vmem:[#allocation20 + $0x2e0] ss:$8 sps:$4 sm:$0xff]   ;;  %v24010_v25 = vld [vmem:[#allocation20 + $0x2f4] ss:$8 sps:$4 sm:$0xff]  }
 0x532   : > { %20544 = vmatmul.mubr.msk.bf16.vlgmr.msra.gmra.mrb[116].mxu1 %vm26778_vm6, %v29681_v17  ;;  %8184 = vmatprep.subr.bf16.mxu0 %v23995_v12  ;;  %v24013_v12 = vld [vmem:[#allocation20 + $0x634] ss:$8 sps:$4 sm:$0xff]   ;;  %v24008_v17 = vld [vmem:[#allocation20 + $0x2f0] ss:$8 sps:$4 sm:$0xff]  }
 0x533   : > { %20546 = vmatprep.mubr.msk.bf16.mxu1 %vm26778_vm6, %v29682_v31  ;;  %5718 = vmatpush1.bf16.msra.mxu1 %v23996_v23  ;;  %v29683_v31 = vrot.slane %v26860_v57, 7  ;;  %v24019_v23 = vld [vmem:[#allocation20 + $0x504] ss:$8 sps:$4 sm:$0xff]  }
 0x534   : > { %5719 = vmatprep.subr.bf16.mxu1 %v24004_v40  ;;  %v24022_v40 = vld [vmem:[#allocation20 + $0x654] ss:$8 sps:$4 sm:$0xff]  }
 0x535   : > { %8185 = vmatpush1.bf16.msra.mxu0 %v23993_v11  ;;  %v24016_v11 = vld [vmem:[#allocation20 + $0x644] ss:$8 sps:$4 sm:$0xff]  }
 0x536   : > { %8186 = vmatprep.subr.bf16.mxu0 %v24001_v7  ;;  %v24011_v7 = vld [vmem:[#allocation20 + $0x630] ss:$8 sps:$4 sm:$0xff]  }
 0x537   : > { %5720 = vmatpush1.bf16.msra.mxu1 %v24002_v18  ;;  %v24025_v18 = vld [vmem:[#allocation20 + $0x664] ss:$8 sps:$4 sm:$0xff]  }
 0x538   : > { %7554 = vmatmul.mubr.bf16.gmra.mrb[136].mxu0 %v26969_v19  ;;  %5721 = vmatprep.subr.bf16.mxu1 %v24007_v4  ;;  %v24023_v4 = vld [vmem:[#allocation20 + $0x660] ss:$8 sps:$4 sm:$0xff]  }
 0x539   : > { %7563 = vmatprep.mubr.bf16.mxu0 %v26858_v10  ;;  %8187 = vmatpush1.bf16.msra.mxu0 %v23999_v24  ;;  %v24014_v24 = vld [vmem:[#allocation20 + $0x640] ss:$8 sps:$4 sm:$0xff]  }
 0x53a   : > { %20548 = vmatmul.mubr.msk.bf16.gmra.mrb[120].mxu1 %vm26778_vm6, %v29683_v31  ;;  %8188 = vmatprep.subr.bf16.mxu0 %v24010_v25  ;;  %v24031_v25 = vld [vmem:[#allocation20 + $0x674] ss:$8 sps:$4 sm:$0xff]   ;;  %v24032_v31 = vld [vmem:[#allocation20 + $0x680] ss:$8 sps:$4 sm:$0xff]  }
 0x53b   : > { %20550 = vmatprep.mubr.msk.bf16.mxu1 %vm26778_vm6, %v26867_v62  ;;  %5722 = vmatpush1.bf16.msra.mxu1 %v24005_v21  ;;  %v24020_v21 = vld [vmem:[#allocation20 + $0x650] ss:$8 sps:$4 sm:$0xff]  }
 0x53c   : > { %5723 = vmatprep.subr.bf16.mxu1 %v24013_v12  ;;  %v24029_v12 = vld [vmem:[#allocation20 + $0x670] ss:$8 sps:$4 sm:$0xff]  }
 0x53d   : > { %8189 = vmatpush1.bf16.msra.mxu0 %v24008_v17  ;;  %v24034_v17 = vld [vmem:[#allocation20 + $0x684] ss:$8 sps:$4 sm:$0xff]  }
 0x53e   : > { %8736 = vmatprep.subr.bf16.mxu0 %v24019_v23  ;;  %v24040_v23 = vld [vmem:[#allocation20 + $0x694] ss:$8 sps:$4 sm:$0xff]  }
 0x53f   : > { %5724 = vmatpush1.bf16.msra.mxu1 %v24011_v7  ;;  %v24038_v7 = vld [vmem:[#allocation20 + $0x690] ss:$8 sps:$4 sm:$0xff]  }
 0x540   : > { %7564 = vmatmul.mubr.bf16.gmra.mrb[140].mxu0 %v26854_v28  ;;  %5725 = vmatprep.subr.bf16.mxu1 %v24016_v11  ;;  %v24043_v11 = vld [vmem:[#allocation20 + $0x6a4] ss:$8 sps:$4 sm:$0xff]  }
 0x541   : > { %7573 = vmatprep.mubr.bf16.mxu0 %v26995_v61 }
 0x542   : > { %20552 = vmatmul.mubr.msk.bf16.gmra.mrb[124].mxu1 %vm26778_vm6, %v26902_v16 }
 0x543   : > { %20554 = vmatprep.mubr.msk.bf16.mxu1 %vm26778_vm6, %v26898_v20  ;;  %5726 = vmatpush1.bf16.msra.mxu1 %v24014_v24  ;;  %v24041_v24 = vld [vmem:[#allocation20 + $0x6a0] ss:$8 sps:$4 sm:$0xff]  }
 0x544   : > { %5727 = vmatprep.subr.bf16.mxu1 %v24022_v40  ;;  %v24049_v40 = vld [vmem:[#allocation20 + $0x6b4] ss:$8 sps:$4 sm:$0xff]  }
 0x547   : > { %5728 = vmatpush1.bf16.msra.mxu1 %v24020_v21  ;;  %v24047_v21 = vld [vmem:[#allocation20 + $0x6b0] ss:$8 sps:$4 sm:$0xff]  }
 0x548   : > { %7574 = vmatmul.mubr.bf16.gmra.mrb[144].mxu0 %v26993_v26  ;;  %5729 = vmatprep.subr.bf16.mxu1 %v24025_v18  ;;  %v24052_v18 = vld [vmem:[#allocation20 + $0x6c4] ss:$8 sps:$4 sm:$0xff]  }
 0x549   : > { %7583 = vmatprep.mubr.bf16.mxu0 %v26891_v32 }
 0x54a   : > { %20556 = vmatmul.mubr.msk.bf16.gmra.mrb[128].mxu1 %vm26778_vm6, %v26930_v50 }
 0x54b   : > { %20558 = vmatprep.mubr.msk.bf16.mxu1 %vm26778_vm6, %v26926_v37  ;;  %5730 = vmatpush1.bf16.msra.mxu1 %v24023_v4  ;;  %v24050_v4 = vld [vmem:[#allocation20 + $0x6c0] ss:$8 sps:$4 sm:$0xff]  }
 0x54c   : > { %5731 = vmatprep.subr.bf16.mxu1 %v24031_v25  ;;  %v24058_v25 = vld [vmem:[#allocation20 + $0x6d4] ss:$8 sps:$4 sm:$0xff]  }
 0x54f   : > { %5732 = vmatpush1.bf16.msra.mxu1 %v24029_v12  ;;  %v29684_v12 = vld [vmem:[#allocation67_spill] sm:$0xff] }
 0x550   : > { %7584 = vmatmul.mubr.bf16.gmra.mrb[148].mxu0 %v26884_v8  ;;  %5733 = vmatprep.subr.bf16.mxu1 %v24034_v17  ;;  %v29685_v17 = vld [vmem:[#allocation66_spill] sm:$0xff] }
 0x551   : > { %7593 = vmatprep.mubr.bf16.mxu0 %v27019_v55 }
 0x552   : > { %20560 = vmatmul.mubr.msk.bf16.gmra.mrb[132].mxu1 %vm26778_vm6, %v26954_v27 }
 0x553   : > { %20562 = vmatprep.mubr.msk.bf16.mxu1 %vm26778_vm6, %v26950_v56  ;;  %5734 = vmatpush1.bf16.msra.mxu1 %v24032_v31  ;;  %v24056_v31 = vld [vmem:[#allocation20 + $0x6d0] ss:$8 sps:$4 sm:$0xff]  }
 0x554   : > { %5735 = vmatprep.subr.bf16.mxu1 %v24040_v23  ;;  %v24061_v23 = vld [vmem:[#allocation20 + $0x6e4] ss:$8 sps:$4 sm:$0xff]  }
 0x557   : > { %5736 = vmatpush1.bf16.msra.mxu1 %v24038_v7  ;;  %v24059_v7 = vld [vmem:[#allocation20 + $0x6e0] ss:$8 sps:$4 sm:$0xff]  }
 0x558   : > { %7594 = vmatmul.mubr.bf16.gmra.mrb[152].mxu0 %v27017_v0  ;;  %5737 = vmatprep.subr.bf16.mxu1 %v24043_v11  ;;  %v24067_v11 = vld [vmem:[#allocation20 + $0x6f4] ss:$8 sps:$4 sm:$0xff]  }
 0x559   : > { %7603 = vmatprep.mubr.bf16.mxu0 %v26923_v47 }
 0x55a   : > { %20564 = vmatmul.mubr.msk.bf16.gmra.mrb[136].mxu1 %vm26778_vm6, %v26978_v41 }
 0x55b   : > { %20566 = vmatprep.mubr.msk.bf16.mxu1 %vm26778_vm6, %v26974_v44  ;;  %5738 = vmatpush1.bf16.msra.mxu1 %v24041_v24  ;;  %v29686_v24 = vmov 0  }
 0x55c   : > { %5739 = vmatprep.subr.bf16.mxu1 %v24049_v40  ;;  %v24065_v40 = vld [vmem:[#allocation20 + $0x6f0] ss:$8 sps:$4 sm:$0xff]  }
 0x55f   : > { %5740 = vmatpush1.bf16.msra.mxu1 %v24047_v21  ;;  %v24094_v21 = vld [vmem:[#allocation20 + $0x104] ss:$8 sps:$4 sm:$0xff]  }
 0x560   : > { %7604 = vmatmul.mubr.bf16.gmra.mrb[156].mxu0 %v26921_v15  ;;  %5741 = vmatprep.subr.bf16.mxu1 %v24052_v18  ;;  %v24017_v18 = vld [vmem:[#allocation20 + $0x500] ss:$8 sps:$4 sm:$0xff]  }
 0x561   : > { %7613 = vmatprep.mubr.bf16.mxu0 %v27055_v13 }
 0x562   : > { %20568 = vmatmul.mubr.msk.bf16.gmra.mrb[140].mxu1 %vm26778_vm6, %v29684_v12 }
 0x563   : > { %20570 = vmatprep.mubr.msk.bf16.mxu1 %vm26778_vm6, %v29685_v17  ;;  %5742 = vmatpush1.bf16.msra.mxu1 %v24050_v4  ;;  %v24028_v4 = vld [vmem:[#allocation20 + $0x514] ss:$8 sps:$4 sm:$0xff]  }
 0x564   : > { %5743 = vmatprep.subr.bf16.mxu1 %v24058_v25  ;;  %v24026_v25 = vld [vmem:[#allocation20 + $0x510] ss:$8 sps:$4 sm:$0xff]  }
 0x567   : > { %5744 = vmatpush1.bf16.msra.mxu1 %v24056_v31  ;;  %v24037_v31 = vld [vmem:[#allocation20 + $0x524] ss:$8 sps:$4 sm:$0xff]  }
 0x568   : > { %7614 = vmatmul.mubr.bf16.gmra.mrb[160].mxu0 %v27053_v29  ;;  %5745 = vmatprep.subr.bf16.mxu1 %v24061_v23  ;;  %v24035_v23 = vld [vmem:[#allocation20 + $0x520] ss:$8 sps:$4 sm:$0xff]  }
 0x569   : > { %7623 = vmatprep.mubr.bf16.mxu0 %v29686_v24 }
 0x56a   : > { %20572 = vmatmul.mubr.msk.bf16.gmra.mrb[144].mxu1 %vm26778_vm6, %v27028_v45 }
 0x56b   : > { %20574 = vmatprep.mubr.msk.bf16.mxu1 %vm26778_vm6, %v27031_v52  ;;  %5746 = vmatpush1.bf16.msra.mxu1 %v24059_v7  ;;  %v24046_v7 = vld [vmem:[#allocation20 + $0x534] ss:$8 sps:$4 sm:$0xff]  }
 0x56c   : > { %5747 = vmatprep.subr.bf16.mxu1 %v24067_v11  ;;  %v29516_v11 = vrot.slane %v26775_v42, 1 }
 0x56f   : > { %5748 = vmatpush1.bf16.msra.mxu1 %v24065_v40  ;;  %v24044_v40 = vld [vmem:[#allocation20 + $0x530] ss:$8 sps:$4 sm:$0xff]  }
 0x570   : > { %7624 = vmatmul.mubr.bf16.gmra.mrb[164].mxu0 %v29686_v24  ;;  %6295 = vmatprep.subr.bf16.mxu1 %v24094_v21  ;;  %v24055_v21 = vld [vmem:[#allocation20 + $0x544] ss:$8 sps:$4 sm:$0xff]  }
 0x571   : > { %7633 = vmatprep.mubr.bf16.mxu0 %v29686_v24 }
 0x572   : > { %20576 = vmatmul.mubr.msk.bf16.gmra.mrb[148].mxu1 %vm26778_vm6, %v27058_v53 }
 0x573   : > { %20578 = vmatprep.mubr.msk.bf16.mxu1 %vm26778_vm6, %v27061_v33 }
 0x578   : > { %7634 = vmatmul.mubr.bf16.gmra.mrb[168].mxu0 %v29686_v24 }
 0x579   : > { %8190 = vmatprep.mubr.bf16.mxu0 %v29686_v24 }
 0x57a   : > { %20580 = vmatmul.mubr.msk.bf16.gmra.mrb[152].mxu1 %vm26778_vm6, %v27078_v6 }
 0x57b   : > { %20582 = vmatprep.mubr.msk.bf16.mxu1 %vm26778_vm6, %v27081_v2 }
 0x580   : > { %8191 = vmatmul.mubr.bf16.vlgmr.msra.gmra.mrb[108].mxu0 %v29686_v24 }
 0x581   : > { %8737 = vmatpush1.bf16.msra.mxu0 %v24017_v18  ;;  %8200 = vmatprep.mubr.bf16.mxu0 %v29686_v24  ;;  %v24053_v18 = vld [vmem:[#allocation20 + $0x540] ss:$8 sps:$4 sm:$0xff]  }
 0x582   : > { %20584 = vmatmul.mubr.msk.bf16.gmra.mrb[156].mxu1 %vm26778_vm6, %v27098_v14  ;;  %8738 = vmatprep.subr.bf16.mxu0 %v24028_v4  ;;  %v29513_v4 = vrot.slane %v26771_v43, 1 }
 0x583   : > { %20586 = vmatprep.mubr.msk.bf16.mxu1 %vm26778_vm6, %v27101_v59 }
 0x585   : > { %8739 = vmatpush1.bf16.msra.mxu0 %v24026_v25  ;;  %v24064_v25 = vld [vmem:[#allocation20 + $0x554] ss:$8 sps:$4 sm:$0xff]  }
 0x586   : > { %8740 = vmatprep.subr.bf16.mxu0 %v24037_v31  ;;  %v29514_v31 = vrot.slane %v26862_v3, 1 }
 0x588   : > { %8201 = vmatmul.mubr.bf16.gmra.mrb[112].mxu0 %v29686_v24 }
 0x589   : > { %20821 = vmatprep.mubr.msk.bf16.mxu0 %vm7804_vm8, %v29516_v11  ;;  %8741 = vmatpush1.bf16.msra.mxu0 %v24035_v23  ;;  %v24062_v23 = vld [vmem:[#allocation20 + $0x550] ss:$8 sps:$4 sm:$0xff]   ;;  %v24079_v11 = vld [vmem:[#allocation20 + $0x594] ss:$8 sps:$4 sm:$0xff]  }
 0x58a   : > { %20588 = vmatmul.mubr.msk.bf16.gmra.mrb[160].mxu1 %vm26778_vm6, %v27112_v5  ;;  %8742 = vmatprep.subr.bf16.mxu0 %v24046_v7  ;;  %v24070_v7 = vld [vmem:[#allocation20 + $0x564] ss:$8 sps:$4 sm:$0xff]  }
 0x58b   : > { %20590 = vmatprep.mubr.msk.bf16.mxu1 %vm26778_vm6, %v27115_v54 }
 0x58d   : > { %8743 = vmatpush1.bf16.msra.mxu0 %v24044_v40  ;;  %v24068_v40 = vld [vmem:[#allocation20 + $0x560] ss:$8 sps:$4 sm:$0xff]  }
 0x58e   : > { %8744 = vmatprep.subr.bf16.mxu0 %v24055_v21  ;;  %v29515_v21 = vrot.slane %v26860_v57, 1 }
 0x590   : > { %20822 = vmatmul.mubr.msk.bf16.gmra.mrb[116].mxu0 %vm7804_vm8, %v29513_v4  ;;  %v24073_v4 = vld [vmem:[#allocation20 + $0x574] ss:$8 sps:$4 sm:$0xff]  }
 0x591   : > { %20823 = vmatprep.mubr.msk.bf16.mxu0 %vm7804_vm8, %v29514_v31  ;;  %8745 = vmatpush1.bf16.msra.mxu0 %v24053_v18  ;;  %v27269_v31 = vrot.slane %v26800_v51, 1  ;;  %v29517_v18 = vrot.slane %v26923_v47, 7  ;;  %v27308_v51 = vrot.slane %v26818_v38, 1  ;;  %v24091_v38 = vld [vmem:[#allocation20 + $0x5d4] ss:$8 sps:$4 sm:$0xff]  }
 0x592   : > { %20592 = vmatmul.mubr.msk.bf16.gmra.mrb[164].mxu1 %vm26778_vm6, %v27126_v63  ;;  %8746 = vmatprep.subr.bf16.mxu0 %v24064_v25  ;;  %v24071_v25 = vld [vmem:[#allocation20 + $0x570] ss:$8 sps:$4 sm:$0xff]  }
 0x593   : > { %20594 = vmatprep.mubr.msk.bf16.mxu1 %vm26778_vm6, %v27129_v46 }
 0x595   : > { %8747 = vmatpush1.bf16.msra.mxu0 %v24062_v23  ;;  %v24076_v23 = vld [vmem:[#allocation20 + $0x584] ss:$8 sps:$4 sm:$0xff]  }
 0x596   : > { %8748 = vmatprep.subr.bf16.mxu0 %v24070_v7  ;;  %v24074_v7 = vld [vmem:[#allocation20 + $0x580] ss:$8 sps:$4 sm:$0xff]  }
 0x598   : > { %20824 = vmatmul.mubr.msk.bf16.gmra.mrb[120].mxu0 %vm7804_vm8, %v29515_v21  ;;  %v27285_v21 = vrot.slane %v26796_v36, 1  ;;  %v27305_v36 = vrot.slane %v26893_v49, 1  ;;  %v24092_v49 = vld [vmem:[#allocation20 + $0x100] ss:$8 sps:$4 sm:$0xff]  }
 0x599   : > { %20825 = vmatprep.mubr.msk.bf16.mxu0 %vm7804_vm8, %v27269_v31  ;;  %8749 = vmatpush1.bf16.msra.mxu0 %v24068_v40  ;;  %v27288_v40 = vrot.slane %v26895_v22, 1  ;;  %v24080_v22 = vld [vmem:[#allocation20 + $0x5a0] ss:$8 sps:$4 sm:$0xff]  }
 0x59a   : > { %20596 = vmatmul.mubr.msk.bf16.gmra.mrb[168].mxu1 %vm26778_vm6, %v27140_v39  ;;  %8750 = vmatprep.subr.bf16.mxu0 %v24073_v4  ;;  %v29522_v4 = vrot.slane %v26921_v15, 7 }
 0x59b   : > { %20598 = vmatprep.mubr.msk.bf16.mxu1 %vm26778_vm6, %v29517_v18  ;;  %v29521_v18 = vrot.slane %v27055_v13, 7 }
 0x59d   : > { %8751 = vmatpush1.bf16.msra.mxu0 %v24071_v25  ;;  %v24077_v25 = vld [vmem:[#allocation20 + $0x590] ss:$8 sps:$4 sm:$0xff]  }
 0x59e   : > { %8752 = vmatprep.subr.bf16.mxu0 %v24076_v23  ;;  %v24082_v23 = vld [vmem:[#allocation20 + $0x5a4] ss:$8 sps:$4 sm:$0xff]  }
 0x5a0   : > { %20826 = vmatmul.mubr.msk.bf16.gmra.mrb[124].mxu0 %vm7804_vm8, %v27285_v21 }
 0x5a1   : > { %20827 = vmatprep.mubr.msk.bf16.mxu0 %vm7804_vm8, %v27288_v40  ;;  %8753 = vmatpush1.bf16.msra.mxu0 %v24074_v7  ;;  %v24085_v7 = vld [vmem:[#allocation20 + $0x5b4] ss:$8 sps:$4 sm:$0xff]  }
 0x5a2   : > { %20600 = vmatmul.mubr.msk.bf16.gmra.mrb[172].mxu1 %vm26778_vm6, %v29522_v4  ;;  %8754 = vmatprep.subr.bf16.mxu0 %v24079_v11  ;;  %v29525_v11 = vrot.slane %v27053_v29, 7  ;;  %v27323_v4 = vrot.slane %v26812_v58, 1  ;;  %v27339_v58 = vrot.slane %v26917_v30, 1 }
 0x5a3   : > { %20602 = vmatprep.mubr.msk.bf16.mxu1 %vm26778_vm6, %v29521_v18  ;;  %v24083_v18 = vld [vmem:[#allocation20 + $0x5b0] ss:$8 sps:$4 sm:$0xff]  }
 0x5a5   : > { %8755 = vmatpush1.bf16.msra.mxu0 %v24077_v25  ;;  %v24088_v25 = vld [vmem:[#allocation20 + $0x5c4] ss:$8 sps:$4 sm:$0xff]  }
 0x5a6   : > { %8756 = vmatprep.subr.bf16.mxu0 %v24082_v23  ;;  %v24086_v23 = vld [vmem:[#allocation20 + $0x5c0] ss:$8 sps:$4 sm:$0xff]  }
 0x5a8   : > { %20828 = vmatmul.mubr.msk.bf16.gmra.mrb[128].mxu0 %vm7804_vm8, %v27305_v36 }
 0x5a9   : > { %20829 = vmatprep.mubr.msk.bf16.mxu0 %vm7804_vm8, %v27308_v51  ;;  %8757 = vmatpush1.bf16.msra.mxu0 %v24080_v22  ;;  %v27326_v22 = vrot.slane %v26919_v9, 1  ;;  %v24095_v9 = vld [vmem:[#allocation20 + $0x5e0] ss:$8 sps:$4 sm:$0xff]  }
 0x5aa   : > { %20604 = vmatmul.mubr.msk.bf16.gmra.mrb[176].mxu1 %vm26778_vm6, %v29525_v11  ;;  %8758 = vmatprep.subr.bf16.mxu0 %v24085_v7  ;;  %v24100_v7 = vld [vmem:[#allocation20 + $0x114] ss:$8 sps:$4 sm:$0xff]   ;;  %v24103_v11 = vld [vmem:[#allocation20 + $0x124] ss:$8 sps:$4 sm:$0xff]  }
 0x5ab   : > { %20638 = vmatprep.mubr.msk.bf16.mxu1 %vm26778_vm6, %v26867_v62  ;;  %29687 = vst [vmem:[#allocation67_spill] sm:$0xff] %v27326_v22  ;;  %v24089_v62 = vld [vmem:[#allocation20 + $0x5d0] ss:$8 sps:$4 sm:$0xff]  }
 0x5ad   : > { %8759 = vmatpush1.bf16.msra.mxu0 %v24083_v18  ;;  %v24097_v18 = vld [vmem:[#allocation20 + $0x5e4] ss:$8 sps:$4 sm:$0xff]  }
 0x5ae   : > { %8760 = vmatprep.subr.bf16.mxu0 %v24088_v25  ;;  %v24098_v25 = vld [vmem:[#allocation20 + $0x110] ss:$8 sps:$4 sm:$0xff]  }
 0x5b0   : > { %20830 = vmatmul.mubr.msk.bf16.gmra.mrb[132].mxu0 %vm7804_vm8, %v27323_v4 }
 0x5b1   : > { %20831 = vmatprep.mubr.msk.bf16.mxu0 %vm7804_vm8, %v27326_v22  ;;  %8761 = vmatpush1.bf16.msra.mxu0 %v24086_v23  ;;  %v24106_v23 = vld [vmem:[#allocation20 + $0x5f4] ss:$8 sps:$4 sm:$0xff]   ;;  %v27342_v22 = vrot.slane %v26834_v60, 1 }
 0x5b2   : > { %20640 = vmatmul.mubr.msk.bf16.vlgmr.msra.gmra.mrb[116].mxu1 %vm26778_vm6, %v26902_v16  ;;  %8762 = vmatprep.subr.bf16.mxu0 %v24091_v38  ;;  %v24101_v38 = vld [vmem:[#allocation20 + $0x120] ss:$8 sps:$4 sm:$0xff]   ;;  %v24115_v16 = vld [vmem:[#allocation20 + $0x804] ss:$8 sps:$4 sm:$0xff]  }
 0x5b3   : > { %20642 = vmatprep.mubr.msk.bf16.mxu1 %vm26778_vm6, %v26898_v20  ;;  %6296 = vmatpush1.bf16.msra.mxu1 %v24092_v49  ;;  %v24109_v49 = vld [vmem:[#allocation20 + $0x134] ss:$8 sps:$4 sm:$0xff]   ;;  %v24104_v20 = vld [vmem:[#allocation20 + $0x5f0] ss:$8 sps:$4 sm:$0xff]  }
 0x5b4   : > { %6297 = vmatprep.subr.bf16.mxu1 %v24100_v7  ;;  %v24107_v7 = vld [vmem:[#allocation20 + $0x130] ss:$8 sps:$4 sm:$0xff]  }
 0x5b5   : > { %8763 = vmatpush1.bf16.msra.mxu0 %v24089_v62  ;;  %v27355_v62 = vrot.slane %v26828_v1, 1 }
 0x5b6   : > { %8764 = vmatprep.subr.bf16.mxu0 %v24097_v18  ;;  %v24118_v18 = vld [vmem:[#allocation20 + $0x154] ss:$8 sps:$4 sm:$0xff]  }
 0x5b7   : > { %6298 = vmatpush1.bf16.msra.mxu1 %v24098_v25  ;;  %v24121_v25 = vld [vmem:[#allocation20 + $0x164] ss:$8 sps:$4 sm:$0xff]  }
 0x5b8   : > { %20832 = vmatmul.mubr.msk.bf16.gmra.mrb[136].mxu0 %vm7804_vm8, %v27339_v58  ;;  %6299 = vmatprep.subr.bf16.mxu1 %v24103_v11  ;;  %v24112_v11 = vld [vmem:[#allocation20 + $0x144] ss:$8 sps:$4 sm:$0xff]  }
 0x5b9   : > { %20833 = vmatprep.mubr.msk.bf16.mxu0 %vm7804_vm8, %v27342_v22  ;;  %8765 = vmatpush1.bf16.msra.mxu0 %v24095_v9  ;;  %v27358_v9 = vrot.slane %v26947_v34, 1 }
 0x5ba   : > { %20644 = vmatmul.mubr.msk.bf16.gmra.mrb[120].mxu1 %vm26778_vm6, %v26930_v50  ;;  %8766 = vmatprep.subr.bf16.mxu0 %v24106_v23  ;;  %v24110_v50 = vld [vmem:[#allocation20 + $0x140] ss:$8 sps:$4 sm:$0xff]   ;;  %v27371_v23 = vrot.slane %v26945_v48, 1 }
 0x5bb   : > { %20646 = vmatprep.mubr.msk.bf16.mxu1 %vm26778_vm6, %v26926_v37  ;;  %6300 = vmatpush1.bf16.msra.mxu1 %v24101_v38  ;;  %v24116_v37 = vld [vmem:[#allocation20 + $0x150] ss:$8 sps:$4 sm:$0xff]  }
 0x5bc   : > { %6301 = vmatprep.subr.bf16.mxu1 %v24109_v49  ;;  %v29688_v38 = vld [vmem:[#allocation55_spill] sm:$0xff] }
 0x5bd   : > { %8767 = vmatpush1.bf16.msra.mxu0 %v24104_v20  ;;  %v27374_v49 = vrot.slane %v29688_v38, 1  ;;  %v24119_v20 = vld [vmem:[#allocation20 + $0x160] ss:$8 sps:$4 sm:$0xff]  }
 0x5be   : > { %9314 = vmatprep.subr.bf16.mxu0 %v24115_v16  ;;  %v24130_v16 = vld [vmem:[#allocation20 + $0x184] ss:$8 sps:$4 sm:$0xff]  }
 0x5bf   : > { %6302 = vmatpush1.bf16.msra.mxu1 %v24107_v7  ;;  %v29689_v7 = vld [vmem:[#allocation53_spill] sm:$0xff] }
 0x5c0   : > { %20834 = vmatmul.mubr.msk.bf16.gmra.mrb[140].mxu0 %vm7804_vm8, %v27355_v62  ;;  %6303 = vmatprep.subr.bf16.mxu1 %v24112_v11  ;;  %v27387_v11 = vrot.slane %v29689_v7, 1 }
 0x5c1   : > { %20835 = vmatprep.mubr.msk.bf16.mxu0 %vm7804_vm8, %v27358_v9 }
 0x5c2   : > { %20648 = vmatmul.mubr.msk.bf16.gmra.mrb[124].mxu1 %vm26778_vm6, %v26954_v27  ;;  %v24127_v27 = vld [vmem:[#allocation20 + $0x174] ss:$8 sps:$4 sm:$0xff]  }
 0x5c3   : > { %20650 = vmatprep.mubr.msk.bf16.mxu1 %vm26778_vm6, %v26950_v56  ;;  %6304 = vmatpush1.bf16.msra.mxu1 %v24110_v50  ;;  %v24125_v56 = vld [vmem:[#allocation20 + $0x170] ss:$8 sps:$4 sm:$0xff]   ;;  %v29690_v50 = vld [vmem:[#allocation64_spill] sm:$0xff] }
 0x5c4   : > { %6305 = vmatprep.subr.bf16.mxu1 %v24118_v18  ;;  %v27390_v18 = vrot.slane %v29690_v50, 1 }
 0x5c7   : > { %6306 = vmatpush1.bf16.msra.mxu1 %v24116_v37  ;;  %v24128_v37 = vld [vmem:[#allocation20 + $0x180] ss:$8 sps:$4 sm:$0xff]  }
 0x5c8   : > { %20836 = vmatmul.mubr.msk.bf16.gmra.mrb[144].mxu0 %vm7804_vm8, %v27371_v23  ;;  %6307 = vmatprep.subr.bf16.mxu1 %v24121_v25  ;;  %v24139_v25 = vld [vmem:[#allocation20 + $0x1a4] ss:$8 sps:$4 sm:$0xff]  }
 0x5c9   : > { %20837 = vmatprep.mubr.msk.bf16.mxu0 %vm7804_vm8, %v27374_v49 }
 0x5ca   : > { %20652 = vmatmul.mubr.msk.bf16.gmra.mrb[128].mxu1 %vm26778_vm6, %v26978_v41  ;;  %v24136_v41 = vld [vmem:[#allocation20 + $0x194] ss:$8 sps:$4 sm:$0xff]  }
 0x5cb   : > { %20654 = vmatprep.mubr.msk.bf16.mxu1 %vm26778_vm6, %v26974_v44  ;;  %6308 = vmatpush1.bf16.msra.mxu1 %v24119_v20  ;;  %v24134_v44 = vld [vmem:[#allocation20 + $0x190] ss:$8 sps:$4 sm:$0xff]   ;;  %v27403_v20 = vrot.slane %v26969_v19, 1 }
 0x5cc   : > { %6309 = vmatprep.subr.bf16.mxu1 %v24127_v27  ;;  %v27406_v27 = vrot.slane %v26858_v10, 1 }
 0x5cf   : > { %6310 = vmatpush1.bf16.msra.mxu1 %v24125_v56  ;;  %v24137_v56 = vld [vmem:[#allocation20 + $0x1a0] ss:$8 sps:$4 sm:$0xff]  }
 0x5d0   : > { %20838 = vmatmul.mubr.msk.bf16.gmra.mrb[148].mxu0 %vm7804_vm8, %v27387_v11  ;;  %6311 = vmatprep.subr.bf16.mxu1 %v24130_v16  ;;  %v24148_v16 = vld [vmem:[#allocation20 + $0x1c4] ss:$8 sps:$4 sm:$0xff]  }
 0x5d1   : > { %20839 = vmatprep.mubr.msk.bf16.mxu0 %vm7804_vm8, %v27390_v18 }
 0x5d2   : > { %20656 = vmatmul.mubr.msk.bf16.gmra.mrb[132].mxu1 %vm26778_vm6, %v29684_v12  ;;  %v24145_v12 = vld [vmem:[#allocation20 + $0x1b4] ss:$8 sps:$4 sm:$0xff]  }
 0x5d3   : > { %20658 = vmatprep.mubr.msk.bf16.mxu1 %vm26778_vm6, %v29685_v17  ;;  %6312 = vmatpush1.bf16.msra.mxu1 %v24128_v37  ;;  %v24143_v17 = vld [vmem:[#allocation20 + $0x1b0] ss:$8 sps:$4 sm:$0xff]   ;;  %v27419_v37 = vrot.slane %v26854_v28, 1 }
 0x5d4   : > { %6313 = vmatprep.subr.bf16.mxu1 %v24136_v41  ;;  %v27422_v41 = vrot.slane %v26995_v61, 1 }
 0x5d7   : > { %6314 = vmatpush1.bf16.msra.mxu1 %v24134_v44  ;;  %v24146_v44 = vld [vmem:[#allocation20 + $0x1c0] ss:$8 sps:$4 sm:$0xff]  }
 0x5d8   : > { %20840 = vmatmul.mubr.msk.bf16.gmra.mrb[152].mxu0 %vm7804_vm8, %v27403_v20  ;;  %6315 = vmatprep.subr.bf16.mxu1 %v24139_v25  ;;  %v24157_v25 = vld [vmem:[#allocation20 + $0x1e4] ss:$8 sps:$4 sm:$0xff]  }
 0x5d9   : > { %20841 = vmatprep.mubr.msk.bf16.mxu0 %vm7804_vm8, %v27406_v27 }
 0x5da   : > { %20660 = vmatmul.mubr.msk.bf16.gmra.mrb[136].mxu1 %vm26778_vm6, %v27028_v45  ;;  %v24154_v45 = vld [vmem:[#allocation20 + $0x1d4] ss:$8 sps:$4 sm:$0xff]  }
 0x5db   : > { %20662 = vmatprep.mubr.msk.bf16.mxu1 %vm26778_vm6, %v27031_v52  ;;  %6316 = vmatpush1.bf16.msra.mxu1 %v24137_v56  ;;  %v24152_v52 = vld [vmem:[#allocation20 + $0x1d0] ss:$8 sps:$4 sm:$0xff]   ;;  %v27435_v56 = vrot.slane %v26993_v26, 1 }
 0x5dc   : > { %6317 = vmatprep.subr.bf16.mxu1 %v24145_v12  ;;  %v27438_v12 = vrot.slane %v26891_v32, 1 }
 0x5df   : > { %6318 = vmatpush1.bf16.msra.mxu1 %v24143_v17  ;;  %v24155_v17 = vld [vmem:[#allocation20 + $0x1e0] ss:$8 sps:$4 sm:$0xff]  }
 0x5e0   : > { %20842 = vmatmul.mubr.msk.bf16.gmra.mrb[156].mxu0 %vm7804_vm8, %v27419_v37  ;;  %6319 = vmatprep.subr.bf16.mxu1 %v24148_v16  ;;  %v27451_v16 = vrot.slane %v26884_v8, 1 }
 0x5e1   : > { %20843 = vmatprep.mubr.msk.bf16.mxu0 %vm7804_vm8, %v27422_v41 }
 0x5e2   : > { %20664 = vmatmul.mubr.msk.bf16.gmra.mrb[140].mxu1 %vm26778_vm6, %v27058_v53  ;;  %v24163_v53 = vld [vmem:[#allocation20 + $0x1f4] ss:$8 sps:$4 sm:$0xff]  }
 0x5e3   : > { %20666 = vmatprep.mubr.msk.bf16.mxu1 %vm26778_vm6, %v27061_v33  ;;  %6320 = vmatpush1.bf16.msra.mxu1 %v24146_v44  ;;  %v24161_v33 = vld [vmem:[#allocation20 + $0x1f0] ss:$8 sps:$4 sm:$0xff]   ;;  %v27454_v44 = vrot.slane %v27019_v55, 1 }
 0x5e4   : > { %6321 = vmatprep.subr.bf16.mxu1 %v24154_v45  ;;  %v24791_v45 = vld [vmem:[#allocation20 + $0x404] ss:$8 sps:$4 sm:$0xff]  }
 0x5e7   : > { %6322 = vmatpush1.bf16.msra.mxu1 %v24152_v52  ;;  %v29692_v52 = vrot.slane %v26771_v43, 1 }
 0x5e8   : > { %20844 = vmatmul.mubr.msk.bf16.gmra.mrb[160].mxu0 %vm7804_vm8, %v27435_v56  ;;  %6323 = vmatprep.subr.bf16.mxu1 %v24157_v25  ;;  %v29693_v25 = vrot.slane %v26862_v3, 1 }
 0x5e9   : > { %20845 = vmatprep.mubr.msk.bf16.mxu0 %vm7804_vm8, %v27438_v12 }
 0x5ea   : > { %20668 = vmatmul.mubr.msk.bf16.gmra.mrb[144].mxu1 %vm26778_vm6, %v27078_v6  ;;  %v27467_v6 = vrot.slane %v27017_v0, 1 }
 0x5eb   : > { %20670 = vmatprep.mubr.msk.bf16.mxu1 %vm26778_vm6, %v27081_v2  ;;  %6324 = vmatpush1.bf16.msra.mxu1 %v24155_v17  ;;  %v29691_v2 = vrot.slane %v26775_v42, 1  ;;  %v24122_v17 = vld [vmem:[#allocation20 + $0x810] ss:$8 sps:$4 sm:$0xff]  }
 0x5ec   : > { %6325 = vmatprep.subr.bf16.mxu1 %v24163_v53  ;;  %v24142_v53 = vld [vmem:[#allocation20 + $0x834] ss:$8 sps:$4 sm:$0xff]  }
 0x5ef   : > { %6326 = vmatpush1.bf16.msra.mxu1 %v24161_v33  ;;  %v29694_v33 = vrot.slane %v26860_v57, 1 }
 0x5f0   : > { %20846 = vmatmul.mubr.msk.bf16.gmra.mrb[164].mxu0 %vm7804_vm8, %v27451_v16  ;;  %21806 = vmatprep.subr.bf16.mxu1 %v24791_v45  ;;  %v24140_v45 = vld [vmem:[#allocation20 + $0x830] ss:$8 sps:$4 sm:$0xff]  }
 0x5f1   : > { %20847 = vmatprep.mubr.msk.bf16.mxu0 %vm7804_vm8, %v27454_v44 }
 0x5f2   : > { %20672 = vmatmul.mubr.msk.bf16.gmra.mrb[148].mxu1 %vm26778_vm6, %v27098_v14  ;;  %v24113_v14 = vld [vmem:[#allocation20 + $0x800] ss:$8 sps:$4 sm:$0xff]  }
 0x5f3   : > { %20674 = vmatprep.mubr.msk.bf16.mxu1 %vm26778_vm6, %v27101_v59  ;;  %v24124_v59 = vld [vmem:[#allocation20 + $0x814] ss:$8 sps:$4 sm:$0xff]  }
 0x5f8   : > { %20848 = vmatmul.mubr.msk.bf16.gmra.mrb[168].mxu0 %vm7804_vm8, %v27467_v6 }
 0x5f9   : > { %20881 = vmatprep.mubr.msk.bf16.mxu0 %vm7804_vm8, %v29691_v2  ;;  %v24149_v2 = vld [vmem:[#allocation20 + $0x840] ss:$8 sps:$4 sm:$0xff]  }
 0x5fa   : > { %20676 = vmatmul.mubr.msk.bf16.gmra.mrb[152].mxu1 %vm26778_vm6, %v27112_v5  ;;  %v24133_v5 = vld [vmem:[#allocation20 + $0x824] ss:$8 sps:$4 sm:$0xff]  }
 0x5fb   : > { %20678 = vmatprep.mubr.msk.bf16.mxu1 %vm26778_vm6, %v27115_v54  ;;  %v24131_v54 = vld [vmem:[#allocation20 + $0x820] ss:$8 sps:$4 sm:$0xff]  }
 0x600   : > { %20882 = vmatmul.mubr.msk.bf16.vlgmr.msra.gmra.mrb[108].mxu0 %vm7804_vm8, %v29692_v52  ;;  %v24166_v52 = vld [vmem:[#allocation20 + $0x864] ss:$8 sps:$4 sm:$0xff]  }
 0x601   : > { %20883 = vmatprep.mubr.msk.bf16.mxu0 %vm7804_vm8, %v29693_v25  ;;  %9315 = vmatpush1.bf16.msra.mxu0 %v24113_v14  ;;  %v24160_v14 = vld [vmem:[#allocation20 + $0x854] ss:$8 sps:$4 sm:$0xff]   ;;  %v29697_v25 = vrot.slane %v27055_v13, 7 }
 0x602   : > { %20680 = vmatmul.mubr.msk.bf16.gmra.mrb[156].mxu1 %vm26778_vm6, %v27126_v63  ;;  %9316 = vmatprep.subr.bf16.mxu0 %v24124_v59  ;;  %v24151_v63 = vld [vmem:[#allocation20 + $0x844] ss:$8 sps:$4 sm:$0xff]   ;;  %v24158_v59 = vld [vmem:[#allocation20 + $0x850] ss:$8 sps:$4 sm:$0xff]  }
 0x603   : > { %20682 = vmatprep.mubr.msk.bf16.mxu1 %vm26778_vm6, %v27129_v46  ;;  %v29695_v46 = vrot.slane %v26923_v47, 7 }
 0x605   : > { %9317 = vmatpush1.bf16.msra.mxu0 %v24122_v17  ;;  %v24164_v17 = vld [vmem:[#allocation20 + $0x860] ss:$8 sps:$4 sm:$0xff]  }
 0x606   : > { %9318 = vmatprep.subr.bf16.mxu0 %v24133_v5  ;;  %v24169_v5 = vld [vmem:[#allocation20 + $0x874] ss:$8 sps:$4 sm:$0xff]  }
 0x608   : > { %20884 = vmatmul.mubr.msk.bf16.gmra.mrb[112].mxu0 %vm7804_vm8, %v29694_v33  ;;  %v24172_v33 = vld [vmem:[#allocation20 + $0x884] ss:$8 sps:$4 sm:$0xff]  }
 0x609   : > { %20885 = vmatprep.mubr.msk.bf16.mxu0 %vm7804_vm8, %v27269_v31  ;;  %9319 = vmatpush1.bf16.msra.mxu0 %v24131_v54  ;;  %v24167_v54 = vld [vmem:[#allocation20 + $0x870] ss:$8 sps:$4 sm:$0xff]  }
 0x60a   : > { %20684 = vmatmul.mubr.msk.bf16.gmra.mrb[160].mxu1 %vm26778_vm6, %v27140_v39  ;;  %9320 = vmatprep.subr.bf16.mxu0 %v24142_v53  ;;  %v29696_v39 = vrot.slane %v26921_v15, 7  ;;  %v29698_v53 = vrot.slane %v27053_v29, 7 }
 0x60b   : > { %20686 = vmatprep.mubr.msk.bf16.mxu1 %vm26778_vm6, %v29695_v46  ;;  %v29699_v46 = vld [vmem:[#allocation67_spill] sm:$0xff] }
 0x60d   : > { %9321 = vmatpush1.bf16.msra.mxu0 %v24140_v45  ;;  %v24170_v45 = vld [vmem:[#allocation20 + $0x880] ss:$8 sps:$4 sm:$0xff]  }
 0x60e   : > { %9322 = vmatprep.subr.bf16.mxu0 %v24151_v63  ;;  %v24175_v63 = vld [vmem:[#allocation20 + $0x894] ss:$8 sps:$4 sm:$0xff]  }
 0x610   : > { %20886 = vmatmul.mubr.msk.bf16.gmra.mrb[116].mxu0 %vm7804_vm8, %v27285_v21 }
 0x611   : > { %20887 = vmatprep.mubr.msk.bf16.mxu0 %vm7804_vm8, %v27288_v40  ;;  %9323 = vmatpush1.bf16.msra.mxu0 %v24149_v2  ;;  %v24173_v2 = vld [vmem:[#allocation20 + $0x890] ss:$8 sps:$4 sm:$0xff]  }
 0x612   : > { %20688 = vmatmul.mubr.msk.bf16.gmra.mrb[164].mxu1 %vm26778_vm6, %v29696_v39  ;;  %9324 = vmatprep.subr.bf16.mxu0 %v24160_v14  ;;  %v24176_v14 = vld [vmem:[#allocation20 + $0x8a0] ss:$8 sps:$4 sm:$0xff]   ;;  %v24179_v39 = vld [vmem:[#allocation20 + $0x8b0] ss:$8 sps:$4 sm:$0xff]  }
 0x613   : > { %20690 = vmatprep.mubr.msk.bf16.mxu1 %vm26778_vm6, %v29697_v25  ;;  %v24182_v25 = vld [vmem:[#allocation20 + $0x8c0] ss:$8 sps:$4 sm:$0xff]  }
 0x615   : > { %9325 = vmatpush1.bf16.msra.mxu0 %v24158_v59  ;;  %v24181_v59 = vld [vmem:[#allocation20 + $0x8b4] ss:$8 sps:$4 sm:$0xff]  }
 0x616   : > { %9326 = vmatprep.subr.bf16.mxu0 %v24166_v52  ;;  %v24184_v52 = vld [vmem:[#allocation20 + $0x8c4] ss:$8 sps:$4 sm:$0xff]  }
 0x618   : > { %20888 = vmatmul.mubr.msk.bf16.gmra.mrb[120].mxu0 %vm7804_vm8, %v27305_v36 }
 0x619   : > { %20889 = vmatprep.mubr.msk.bf16.mxu0 %vm7804_vm8, %v27308_v51  ;;  %9327 = vmatpush1.bf16.msra.mxu0 %v24164_v17  ;;  %v24187_v17 = vld [vmem:[#allocation20 + $0x8d4] ss:$8 sps:$4 sm:$0xff]  }
 0x61a   : > { %20692 = vmatmul.mubr.msk.bf16.gmra.mrb[168].mxu1 %vm26778_vm6, %v29698_v53  ;;  %9328 = vmatprep.subr.bf16.mxu0 %v24169_v5  ;;  %v24185_v5 = vld [vmem:[#allocation20 + $0x8d0] ss:$8 sps:$4 sm:$0xff]   ;;  %v24792_v53 = vld [vmem:[#allocation20 + $0x400] ss:$8 sps:$4 sm:$0xff]  }
 0x61b   : > { %5889 = vmatprep.mubr.bf16.mxu1 %v29686_v24 }
 0x61d   : > { %9329 = vmatpush1.bf16.msra.mxu0 %v24167_v54  ;;  %v24190_v54 = vld [vmem:[#allocation20 + $0x8e4] ss:$8 sps:$4 sm:$0xff]  }
 0x61e   : > { %9330 = vmatprep.subr.bf16.mxu0 %v24172_v33  ;;  %v24793_v33 = vld [vmem:[#allocation20 + $0x414] ss:$8 sps:$4 sm:$0xff]  }
 0x620   : > { %20890 = vmatmul.mubr.msk.bf16.gmra.mrb[124].mxu0 %vm7804_vm8, %v27323_v4 }
 0x621   : > { %20891 = vmatprep.mubr.msk.bf16.mxu0 %vm7804_vm8, %v29699_v46  ;;  %9331 = vmatpush1.bf16.msra.mxu0 %v24170_v45  ;;  %v24188_v45 = vld [vmem:[#allocation20 + $0x8e0] ss:$8 sps:$4 sm:$0xff]  }
 0x622   : > { %5890 = vmatmul.mubr.bf16.gmra.mrb[172].mxu1 %v29686_v24  ;;  %9332 = vmatprep.subr.bf16.mxu0 %v24175_v63  ;;  %v24193_v63 = vld [vmem:[#allocation20 + $0x8f4] ss:$8 sps:$4 sm:$0xff]  }
 0x623   : > { %5899 = vmatprep.mubr.bf16.mxu1 %v29686_v24 }
 0x625   : > { %9333 = vmatpush1.bf16.msra.mxu0 %v24173_v2  ;;  %v24794_v2 = vld [vmem:[#allocation20 + $0x410] ss:$8 sps:$4 sm:$0xff]  }
 0x626   : > { %9334 = vmatprep.subr.bf16.mxu0 %v24178_v35  ;;  %v24795_v35 = vld [vmem:[#allocation20 + $0x424] ss:$8 sps:$4 sm:$0xff]  }
 0x628   : > { %20892 = vmatmul.mubr.msk.bf16.gmra.mrb[128].mxu0 %vm7804_vm8, %v27339_v58 }
 0x629   : > { %20893 = vmatprep.mubr.msk.bf16.mxu0 %vm7804_vm8, %v27342_v22  ;;  %9335 = vmatpush1.bf16.msra.mxu0 %v24176_v14  ;;  %v24191_v14 = vld [vmem:[#allocation20 + $0x8f0] ss:$8 sps:$4 sm:$0xff]  }
 0x62a   : > { %5900 = vmatmul.mubr.bf16.gmra.mrb[176].mxu1 %v29686_v24  ;;  %9336 = vmatprep.subr.bf16.mxu0 %v24181_v59  ;;  %v24196_v59 = vld [vmem:[#allocation21 + $0x4] ss:$8 sps:$4 sm:$0xff]  }
 0x62b   : > { %6327 = vmatprep.mubr.bf16.mxu1 %v29686_v24 }
 0x62d   : > { %9337 = vmatpush1.bf16.msra.mxu0 %v24179_v39  ;;  %v24796_v39 = vld [vmem:[#allocation20 + $0x420] ss:$8 sps:$4 sm:$0xff]  }
 0x62e   : > { %9338 = vmatprep.subr.bf16.mxu0 %v24184_v52  ;;  %v24797_v52 = vld [vmem:[#allocation20 + $0x434] ss:$8 sps:$4 sm:$0xff]  }
 0x630   : > { %20894 = vmatmul.mubr.msk.bf16.gmra.mrb[132].mxu0 %vm7804_vm8, %v27355_v62 }
 0x631   : > { %20895 = vmatprep.mubr.msk.bf16.mxu0 %vm7804_vm8, %v27358_v9  ;;  %9339 = vmatpush1.bf16.msra.mxu0 %v24182_v25  ;;  %v24798_v25 = vld [vmem:[#allocation20 + $0x430] ss:$8 sps:$4 sm:$0xff]  }
 0x632   : > { %6328 = vmatmul.mubr.bf16.vlgmr.msra.gmra.mrb[116].mxu1 %v29686_v24  ;;  %9340 = vmatprep.subr.bf16.mxu0 %v24187_v17  ;;  %v24799_v17 = vld [vmem:[#allocation20 + $0x444] ss:$8 sps:$4 sm:$0xff]  }
 0x633   : > { %6337 = vmatprep.mubr.bf16.mxu1 %v29686_v24  ;;  %21822 = vmatpush1.bf16.msra.mxu1 %v24792_v53  ;;  %v24803_v53 = vld [vmem:[#allocation20 + $0x464] ss:$8 sps:$4 sm:$0xff]  }
 0x634   : > { %21807 = vmatprep.subr.bf16.mxu1 %v24793_v33  ;;  %v29700_v33 = vld [vmem:[#allocation47_spill] sm:$0xff] }
 0x635   : > { %9341 = vmatpush1.bf16.msra.mxu0 %v24185_v5  ;;  %v24801_v5 = vld [vmem:[#allocation20 + $0x454] ss:$8 sps:$4 sm:$0xff]  }
 0x636   : > { %9342 = vmatprep.subr.bf16.mxu0 %v24190_v54  ;;  %v24802_v54 = vld [vmem:[#allocation20 + $0x450] ss:$8 sps:$4 sm:$0xff]  }
 0x637   : > { %21823 = vmatpush1.bf16.msra.mxu1 %v24794_v2  ;;  %v29701_v2 = vld [vmem:[#allocation46_spill] sm:$0xff] }
 0x638   : > { %20896 = vmatmul.mubr.msk.bf16.gmra.mrb[136].mxu0 %vm7804_vm8, %v27371_v23  ;;  %21808 = vmatprep.subr.bf16.mxu1 %v24795_v35  ;;  %v29702_v35 = vld [vmem:[#allocation59_spill] sm:$0xff] }
 0x639   : > { %20897 = vmatprep.mubr.msk.bf16.mxu0 %vm7804_vm8, %v27374_v49  ;;  %9343 = vmatpush1.bf16.msra.mxu0 %v24188_v45  ;;  %v24806_v45 = vld [vmem:[#allocation20 + $0x470] ss:$8 sps:$4 sm:$0xff]  }
 0x63a   : > { %6338 = vmatmul.mubr.bf16.gmra.mrb[120].mxu1 %v29686_v24  ;;  %9344 = vmatprep.subr.bf16.mxu0 %v24193_v63  ;;  %v24807_v63 = vld [vmem:[#allocation20 + $0x484] ss:$8 sps:$4 sm:$0xff]  }
 0x63b   : > { %6347 = vmatprep.mubr.bf16.mxu1 %v26775_v42  ;;  %21824 = vmatpush1.bf16.msra.mxu1 %v24796_v39  ;;  %v24800_v42 = vld [vmem:[#allocation20 + $0x440] ss:$8 sps:$4 sm:$0xff]   ;;  %v24811_v39 = vld [vmem:[#allocation20 + $0x4a4] ss:$8 sps:$4 sm:$0xff]  }
 0x63c   : > { %21809 = vmatprep.subr.bf16.mxu1 %v24797_v52  ;;  %v29703_v52 = vld [vmem:[#allocation58_spill] sm:$0xff] }
 0x63d   : > { %9345 = vmatpush1.bf16.msra.mxu0 %v24191_v14  ;;  %v24809_v14 = vld [vmem:[#allocation20 + $0x494] ss:$8 sps:$4 sm:$0xff]  }
 0x63e   : > { %9842 = vmatprep.subr.bf16.mxu0 %v24196_v59  ;;  %v24810_v59 = vld [vmem:[#allocation20 + $0x490] ss:$8 sps:$4 sm:$0xff]  }
 0x63f   : > { %21825 = vmatpush1.bf16.msra.mxu1 %v24798_v25  ;;  %v29704_v25 = vld [vmem:[#allocation50_spill] sm:$0xff] }
 0x640   : > { %20898 = vmatmul.mubr.msk.bf16.gmra.mrb[140].mxu0 %vm7804_vm8, %v27387_v11  ;;  %21810 = vmatprep.subr.bf16.mxu1 %v24799_v17  ;;  %v24812_v17 = vld [vmem:[#allocation20 + $0x4a0] ss:$8 sps:$4 sm:$0xff]  }
 0x641   : > { %20899 = vmatprep.mubr.msk.bf16.mxu0 %vm7804_vm8, %v27390_v18 }
 0x642   : > { %6348 = vmatmul.mubr.bf16.gmra.mrb[124].mxu1 %v26771_v43  ;;  %v24804_v43 = vld [vmem:[#allocation20 + $0x460] ss:$8 sps:$4 sm:$0xff]  }
 0x643   : > { %6357 = vmatprep.mubr.bf16.mxu1 %v26862_v3  ;;  %21826 = vmatpush1.bf16.msra.mxu1 %v24800_v42  ;;  %v24805_v3 = vld [vmem:[#allocation20 + $0x474] ss:$8 sps:$4 sm:$0xff]  }
 0x644   : > { %21811 = vmatprep.subr.bf16.mxu1 %v24801_v5  ;;  %v24813_v42 = vld [vmem:[#allocation20 + $0x4b4] ss:$8 sps:$4 sm:$0xff]   ;;  %v24814_v5 = vld [vmem:[#allocation20 + $0x4b0] ss:$8 sps:$4 sm:$0xff]  }
 0x647   : > { %21827 = vmatpush1.bf16.msra.mxu1 %v24802_v54  ;;  %v24815_v54 = vld [vmem:[#allocation20 + $0x4c4] ss:$8 sps:$4 sm:$0xff]  }
 0x648   : > { %20900 = vmatmul.mubr.msk.bf16.gmra.mrb[144].mxu0 %vm7804_vm8, %v27403_v20  ;;  %21812 = vmatprep.subr.bf16.mxu1 %v24803_v53  ;;  %v29705_v53 = vld [vmem:[#allocation49_spill] sm:$0xff] }
 0x649   : > { %20901 = vmatprep.mubr.msk.bf16.mxu0 %vm7804_vm8, %v27406_v27 }
 0x64a   : > { %6358 = vmatmul.mubr.bf16.gmra.mrb[128].mxu1 %v26860_v57  ;;  %v24808_v57 = vld [vmem:[#allocation20 + $0x480] ss:$8 sps:$4 sm:$0xff]  }
 0x64b   : > { %6367 = vmatprep.mubr.bf16.mxu1 %v29700_v33  ;;  %21828 = vmatpush1.bf16.msra.mxu1 %v24804_v43  ;;  %v29706_v33 = vld [vmem:[#allocation61_spill] sm:$0xff] }
 0x64c   : > { %21813 = vmatprep.subr.bf16.mxu1 %v24805_v3  ;;  %v24816_v43 = vld [vmem:[#allocation20 + $0x4c0] ss:$8 sps:$4 sm:$0xff]   ;;  %v24817_v3 = vld [vmem:[#allocation20 + $0x4d4] ss:$8 sps:$4 sm:$0xff]  }
 0x64f   : > { %21829 = vmatpush1.bf16.msra.mxu1 %v24806_v45  ;;  %v7801_v45 = vrot.slane %v26923_v47, 1 }
 0x650   : > { %20902 = vmatmul.mubr.msk.bf16.gmra.mrb[148].mxu0 %vm7804_vm8, %v27419_v37  ;;  %21814 = vmatprep.subr.bf16.mxu1 %v24807_v63  ;;  %v24818_v63 = vld [vmem:[#allocation20 + $0x4d0] ss:$8 sps:$4 sm:$0xff]  }
 0x651   : > { %20903 = vmatprep.mubr.msk.bf16.mxu0 %vm7804_vm8, %v27422_v41 }
 0x652   : > { %6368 = vmatmul.mubr.bf16.gmra.mrb[132].mxu1 %v29701_v2  ;;  %v24819_v2 = vld [vmem:[#allocation20 + $0x4e4] ss:$8 sps:$4 sm:$0xff]  }
 0x653   : > { %6377 = vmatprep.mubr.bf16.mxu1 %v29702_v35  ;;  %21830 = vmatpush1.bf16.msra.mxu1 %v24808_v57  ;;  %v24820_v35 = vld [vmem:[#allocation20 + $0x4e0] ss:$8 sps:$4 sm:$0xff]   ;;  %v24821_v57 = vld [vmem:[#allocation20 + $0x4f4] ss:$8 sps:$4 sm:$0xff]  }
 0x654   : > { %21815 = vmatprep.subr.bf16.mxu1 %v24809_v14  ;;  %v7800_v14 = vrot.slane %v26921_v15, 1 }
 0x657   : > { %21831 = vmatpush1.bf16.msra.mxu1 %v24810_v59  ;;  %v7803_v59 = vrot.slane %v27055_v13, 1 }
 0x658   : > { %20904 = vmatmul.mubr.msk.bf16.gmra.mrb[152].mxu0 %vm7804_vm8, %v27435_v56  ;;  %21816 = vmatprep.subr.bf16.mxu1 %v24811_v39  ;;  %v24822_v39 = vld [vmem:[#allocation20 + $0x4f0] ss:$8 sps:$4 sm:$0xff]  }
 0x659   : > { %20905 = vmatprep.mubr.msk.bf16.mxu0 %vm7804_vm8, %v27438_v12 }
 0x65a   : > { %6378 = vmatmul.mubr.bf16.gmra.mrb[136].mxu1 %v29703_v52  ;;  %v24199_v52 = vld [vmem:[#allocation21 + $0x14] ss:$8 sps:$4 sm:$0xff]  }
 0x65b   : > { %6387 = vmatprep.mubr.bf16.mxu1 %v29704_v25  ;;  %21832 = vmatpush1.bf16.msra.mxu1 %v24812_v17 }
 0x65c   : > { %21817 = vmatprep.subr.bf16.mxu1 %v24813_v42 }
 0x65f   : > { %21833 = vmatpush1.bf16.msra.mxu1 %v24814_v5 }
 0x660   : > { %20906 = vmatmul.mubr.msk.bf16.gmra.mrb[156].mxu0 %vm7804_vm8, %v27451_v16  ;;  %21818 = vmatprep.subr.bf16.mxu1 %v24815_v54 }
 0x661   : > { %20907 = vmatprep.mubr.msk.bf16.mxu0 %vm7804_vm8, %v27454_v44 }
 0x662   : > { %6388 = vmatmul.mubr.bf16.gmra.mrb[140].mxu1 %v29705_v53 }
 0x663   : > { %6397 = vmatprep.mubr.bf16.mxu1 %v29706_v33  ;;  %21834 = vmatpush1.bf16.msra.mxu1 %v24816_v43  ;;  %v29711_v43 = vld [vmem:[#allocation56_spill] sm:$0xff] }
 0x664   : > { %21819 = vmatprep.subr.bf16.mxu1 %v24817_v3  ;;  %v9655_v3 = vrot.slane %v29711_v43, 7 }
 0x667   : > { %21835 = vmatpush1.bf16.msra.mxu1 %v24818_v63 }
 0x668   : > { %20908 = vmatmul.mubr.msk.bf16.gmra.mrb[160].mxu0 %vm7804_vm8, %v27467_v6  ;;  %21820 = vmatprep.subr.bf16.mxu1 %v24819_v2 }
 0x669   : > { %20909 = vmatprep.mubr.msk.bf16.mxu0 %vm7804_vm8, %v7801_v45 }
 0x66a   : > { %6398 = vmatmul.mubr.bf16.gmra.mrb[144].mxu1 %v26917_v30  ;;  %v24194_v30 = vld [vmem:[#allocation21] ss:$8 sps:$4 sm:$0xff]  }
 0x66b   : > { %6407 = vmatprep.mubr.bf16.mxu1 %v26834_v60  ;;  %21836 = vmatpush1.bf16.msra.mxu1 %v24820_v35  ;;  %v7802_v60 = vrot.slane %v27053_v29, 1  ;;  %v27780_v35 = vsel %vm4207_vm5, 0, %v9655_v3 }
 0x66c   : > { %21821 = vmatprep.subr.bf16.mxu1 %v24821_v57 }
 0x66f   : > { %21837 = vmatpush1.bf16.msra.mxu1 %v24822_v39 }
 0x670   : > { %20910 = vmatmul.mubr.msk.bf16.gmra.mrb[164].mxu0 %vm7804_vm8, %v7800_v14 }
 0x671   : > { %20911 = vmatprep.mubr.msk.bf16.mxu0 %vm7804_vm8, %v7803_v59 }
 0x672   : > { %6408 = vmatmul.mubr.bf16.gmra.mrb[148].mxu1 %v26828_v1  ;;  %v24197_v1 = vld [vmem:[#allocation21 + $0x10] ss:$8 sps:$4 sm:$0xff]  }
 0x673   : > { %6417 = vmatprep.mubr.bf16.mxu1 %v26947_v34  ;;  %v24202_v34 = vld [vmem:[#allocation21 + $0x24] ss:$8 sps:$4 sm:$0xff]  }
 0x678   : > { %20912 = vmatmul.mubr.msk.bf16.gmra.mrb[168].mxu0 %vm7804_vm8, %v7802_v60 }
 0x679   : > { %20945 = vmatprep.mubr.msk.bf16.mxu0 %vm7804_vm8, %v27269_v31  ;;  %v9769_v31 = vld [vmem:[#allocation21 + $0x30] sm:$0xff] }
 0x67a   : > { %6418 = vmatmul.mubr.bf16.gmra.mrb[152].mxu1 %v26945_v48  ;;  %v24200_v48 = vld [vmem:[#allocation21 + $0x20] ss:$8 sps:$4 sm:$0xff]   ;;  %v20980_v25 = vcombine.high %v9769_v31, %v9769_v31  ;;  %v20979_v17 = vcombine.low %v9769_v31, %v9769_v31 }
 0x67b   : > { %6427 = vmatprep.mubr.bf16.mxu1 %v29688_v38 }
 0x680   : > { %20946 = vmatmul.mubr.msk.bf16.vlgmr.msra.gmra.mrb[108].mxu0 %vm7804_vm8, %v27285_v21  ;;  %v9837_v21 = vsel %vm1216_vm1, %v20979_v17, 0 }
 0x681   : > { %20947 = vmatprep.mubr.msk.bf16.mxu0 %vm7804_vm8, %v27288_v40  ;;  %9843 = vmatpush1.bf16.msra.mxu0 %v24194_v30  ;;  %v24207_v40 = vld [vmem:[#allocation21 + $0xac] ss:$8 sps:$4 sm:$0xff]  }
 0x682   : > { %6428 = vmatmul.mubr.bf16.gmra.mrb[156].mxu1 %v29689_v7  ;;  %9844 = vmatprep.subr.bf16.mxu0 %v24199_v52 }
 0x683   : > { %6437 = vmatprep.mubr.bf16.mxu1 %v29690_v50 }
 0x685   : > { %9845 = vmatpush1.bf16.msra.mxu0 %v24197_v1 }
 0x686   : > { %9846 = vmatprep.subr.bf16.mxu0 %v24202_v34  ;;  %v29718_v34 = vld [vmem:[#allocation60_spill] sm:$0xff] }
 0x687   : > { %v9657_v31 = vrot.slane %v29718_v34, 7 }
 0x688   : > { %20948 = vmatmul.mubr.msk.bf16.gmra.mrb[112].mxu0 %vm7804_vm8, %v27305_v36  ;;  %v24210_v36 = vld [vmem:[#allocation21 + $0xbc] ss:$8 sps:$4 sm:$0xff]  }
 0x689   : > { %20949 = vmatprep.mubr.msk.bf16.mxu0 %vm7804_vm8, %v27308_v51  ;;  %9847 = vmatpush1.bf16.msra.mxu0 %v24200_v48  ;;  %v24208_v51 = vld [vmem:[#allocation21 + $0xb8] ss:$8 sps:$4 sm:$0xff]  }
 0x68a   : > { %6438 = vmatmul.mubr.bf16.gmra.mrb[160].mxu1 %v26969_v19  ;;  %20981 = vmatprep.subr.msk.bf16.mxu0 %vm1216_vm1, %v20980_v25 }
 0x68b   : > { %6447 = vmatprep.mubr.bf16.mxu1 %v26858_v10 }
 0x68d   : > { %9849 = vmatpush1.bf16.msra.mxu0 %v9837_v21  ;;  %v27810_v21 = vsel %vm4207_vm5, 0, %v9657_v31 }
 0x68e   : > { %10280 = vmatprep.subr.bf16.mxu0 %v24207_v40 }
 0x690   : > { %20950 = vmatmul.mubr.msk.bf16.gmra.mrb[116].mxu0 %vm7804_vm8, %v27323_v4 }
 0x691   : > { %20951 = vmatprep.mubr.msk.bf16.mxu0 %vm7804_vm8, %v29699_v46 }
 0x692   : > { %6448 = vmatmul.mubr.bf16.gmra.mrb[164].mxu1 %v26854_v28 }
 0x693   : > { %6457 = vmatprep.mubr.bf16.mxu1 %v26995_v61 }
 0x698   : > { %20952 = vmatmul.mubr.msk.bf16.gmra.mrb[120].mxu0 %vm7804_vm8, %v27339_v58  ;;  %v24213_v58 = vld [vmem:[#allocation21 + $0xcc] ss:$8 sps:$4 sm:$0xff]  }
 0x699   : > { %20953 = vmatprep.mubr.msk.bf16.mxu0 %vm7804_vm8, %v27342_v22 }
 0x69a   : > { %6458 = vmatmul.mubr.bf16.gmra.mrb[168].mxu1 %v26993_v26 }
 0x69b   : > { %6467 = vmatprep.mubr.bf16.mxu1 %v26891_v32 }
 0x6a0   : > { %20954 = vmatmul.mubr.msk.bf16.gmra.mrb[124].mxu0 %vm7804_vm8, %v27355_v62 }
 0x6a1   : > { %20955 = vmatprep.mubr.msk.bf16.mxu0 %vm7804_vm8, %v27358_v9 }
 0x6a2   : > { %6468 = vmatmul.mubr.bf16.gmra.mrb[172].mxu1 %v26884_v8 }
 0x6a3   : > { %6477 = vmatprep.mubr.bf16.mxu1 %v27019_v55 }
 0x6a8   : > { %20956 = vmatmul.mubr.msk.bf16.gmra.mrb[128].mxu0 %vm7804_vm8, %v27371_v23 }
 0x6a9   : > { %20957 = vmatprep.mubr.msk.bf16.mxu0 %vm7804_vm8, %v27374_v49 }
 0x6aa   : > { %6478 = vmatmul.mubr.bf16.gmra.mrb[176].mxu1 %v27017_v0 }
 0x6ab   : > { %6985 = vmatprep.mubr.bf16.mxu1 %v29688_v38  ;;  %v29708_v38 = vld [vmem:[#allocation51_spill] sm:$0xff] }
 0x6ac   : > { %v9652_v49 = vrot.slane %v29708_v38, 7 }
 0x6b0   : > { %20958 = vmatmul.mubr.msk.bf16.gmra.mrb[132].mxu0 %vm7804_vm8, %v27387_v11 }
 0x6b1   : > { %20959 = vmatprep.mubr.msk.bf16.mxu0 %vm7804_vm8, %v27390_v18  ;;  %v27735_v18 = vsel %vm4207_vm5, 0, %v9652_v49 }
 0x6b2   : > { %6986 = vmatmul.mubr.bf16.vlgmr.msra.gmra.mrb[148].mxu1 %v29689_v7 }
 0x6b3   : > { %6995 = vmatprep.mubr.bf16.mxu1 %v29690_v50 }
 0x6b8   : > { %20960 = vmatmul.mubr.msk.bf16.gmra.mrb[136].mxu0 %vm7804_vm8, %v27403_v20 }
 0x6b9   : > { %20961 = vmatprep.mubr.msk.bf16.mxu0 %vm7804_vm8, %v27406_v27  ;;  %v29709_v27 = vld [vmem:[#allocation52_spill] sm:$0xff] }
 0x6ba   : > { %6996 = vmatmul.mubr.bf16.gmra.mrb[152].mxu1 %v26969_v19 }
 0x6bb   : > { %7005 = vmatprep.mubr.bf16.mxu1 %v26858_v10  ;;  %v24211_v10 = vld [vmem:[#allocation21 + $0xc8] ss:$8 sps:$4 sm:$0xff]  }
 0x6c0   : > { %20962 = vmatmul.mubr.msk.bf16.gmra.mrb[140].mxu0 %vm7804_vm8, %v27419_v37  ;;  %v9653_v37 = vrot.slane %v29709_v27, 7 }
 0x6c1   : > { %20963 = vmatprep.mubr.msk.bf16.mxu0 %vm7804_vm8, %v27422_v41 }
 0x6c2   : > { %7006 = vmatmul.mubr.bf16.gmra.mrb[156].mxu1 %v26854_v28 }
 0x6c3   : > { %7015 = vmatprep.mubr.bf16.mxu1 %v26995_v61  ;;  %v10234_v61 = vld [vmem:[#allocation21 + $0xd8] sm:$0xff] }
 0x6c8   : > { %20964 = vmatmul.mubr.msk.bf16.gmra.mrb[144].mxu0 %vm7804_vm8, %v27435_v56 }
 0x6c9   : > { %20965 = vmatprep.mubr.msk.bf16.mxu0 %vm7804_vm8, %v27438_v12 }
 0x6ca   : > { %7016 = vmatmul.mubr.bf16.gmra.mrb[160].mxu1 %v26993_v26 }
 0x6cb   : > { %7025 = vmatprep.mubr.bf16.mxu1 %v26891_v32  ;;  %v21003_v32 = vcombine.high %v10234_v61, %v10234_v61 }
 0x6d0   : > { %20966 = vmatmul.mubr.msk.bf16.gmra.mrb[148].mxu0 %vm7804_vm8, %v27451_v16  ;;  %v27750_v16 = vsel %vm4207_vm5, 0, %v9653_v37  ;;  %v29727_v37 = vld [vmem:[#allocation70_spill] sm:$0xff] }
 0x6d1   : > { %20967 = vmatprep.mubr.msk.bf16.mxu0 %vm7804_vm8, %v27454_v44 }
 0x6d2   : > { %7026 = vmatmul.mubr.bf16.gmra.mrb[164].mxu1 %v26884_v8 }
 0x6d3   : > { %7035 = vmatprep.mubr.bf16.mxu1 %v27019_v55  ;;  %v24218_v55 = vld [vmem:[#allocation21 + $0x154] ss:$8 sps:$4 sm:$0xff]  }
 0x6d8   : > { %20968 = vmatmul.mubr.msk.bf16.gmra.mrb[152].mxu0 %vm7804_vm8, %v27467_v6  ;;  %v29710_v6 = vld [vmem:[#allocation54_spill] sm:$0xff] }
 0x6d9   : > { %20969 = vmatprep.mubr.msk.bf16.mxu0 %vm7804_vm8, %v7801_v45  ;;  %v9654_v46 = vrot.slane %v29710_v6, 7 }
 0x6da   : > { %7036 = vmatmul.mubr.bf16.gmra.mrb[168].mxu1 %v27017_v0 }
 0x6db   : > { %7045 = vmatprep.mubr.bf16.mxu1 %v26923_v47  ;;  %v21002_v47 = vcombine.low %v10234_v61, %v10234_v61  ;;  %v27765_v53 = vsel %vm4207_vm5, 0, %v9654_v46  ;;  %v9662_v46 = vrot.slane %v29727_v37, 7 }
 0x6dd   : > { %v10275_v0 = vsel %vm1216_vm1, %v21002_v47, 0  ;;  %v27847_v3 = vsel %vm4207_vm5, 0, %v9662_v46  ;;  %v24216_v46 = vld [vmem:[#allocation21 + $0x150] ss:$8 sps:$4 sm:$0xff]  }
 0x6e0   : > { %20970 = vmatmul.mubr.msk.bf16.gmra.mrb[156].mxu0 %vm7804_vm8, %v7800_v14  ;;  %v29713_v14 = vld [vmem:[#allocation57_spill] sm:$0xff] }
 0x6e1   : > { %20971 = vmatprep.mubr.msk.bf16.mxu0 %vm7804_vm8, %v7803_v59  ;;  %v9656_v59 = vrot.slane %v29713_v14, 7 }
 0x6e2   : > { %7046 = vmatmul.mubr.bf16.gmra.mrb[172].mxu1 %v26921_v15  ;;  %v24205_v15 = vld [vmem:[#allocation21 + $0xa8] ss:$8 sps:$4 sm:$0xff]  }
 0x6e3   : > { %7055 = vmatprep.mubr.bf16.mxu1 %v27055_v13  ;;  %v27795_v52 = vsel %vm4207_vm5, 0, %v9656_v59  ;;  %v29728_v59 = vld [vmem:[#allocation69_spill] sm:$0xff] }
 0x6e4   : > { %v9663_v31 = vrot.slane %v29728_v59, 7 }
 0x6e8   : > { %20972 = vmatmul.mubr.msk.bf16.gmra.mrb[160].mxu0 %vm7804_vm8, %v7802_v60 }
 0x6e9   : > { %9486 = vmatprep.mubr.bf16.mxu0 %v29686_v24 }
 0x6ea   : > { %7056 = vmatmul.mubr.bf16.gmra.mrb[176].mxu1 %v27053_v29  ;;  %v29707_v29 = vld [vmem:[#allocation48_spill] sm:$0xff] }
 0x6eb   : > { %14646 = vmatprep.mubr.bf16.mxu1 %v29686_v24  ;;  %v9651_v13 = vrot.slane %v29707_v29, 7 }
 0x6ed   : > { %v27720_v9 = vsel %vm4207_vm5, 0, %v9651_v13 }
 0x6f0   : > { %9487 = vmatmul.mubr.bf16.gmra.mrb[164].mxu0 %v29686_v24 }
 0x6f1   : > { %9496 = vmatprep.mubr.bf16.mxu0 %v29686_v24 }
 0x6f8   : > { %9497 = vmatmul.mubr.bf16.gmra.mrb[168].mxu0 %v29686_v24 }
 0x6f9   : > { %9874 = vmatprep.mubr.bf16.mxu0 %v29686_v24 }
 0x700   : > { %9875 = vmatmul.mubr.bf16.vlgmr.msra.gmra.mrb[108].mxu0 %v29686_v24 }
 0x701   : > { %10281 = vmatpush1.bf16.msra.mxu0 %v24205_v15  ;;  %9884 = vmatprep.mubr.bf16.mxu0 %v29686_v24  ;;  %v29723_v15 = vld [vmem:[#allocation62_spill] sm:$0xff] }
 0x702   : > { %10282 = vmatprep.subr.bf16.mxu0 %v24210_v36  ;;  %v9658_v36 = vrot.slane %v29723_v15, 7 }
 0x705   : > { %v27700_v28 = vpop.f32.mrb[116].mxu1  ;;  %10283 = vmatpush1.bf16.msra.mxu0 %v24208_v51  ;;  %v27819_v51 = vsel %vm4207_vm5, 0, %v9658_v36  ;;  %v27854_v36 = vsel %vm4207_vm5, 0, %v9663_v31  ;;  %v24219_v31 = vld [vmem:[#allocation21 + $0x160] ss:$8 sps:$4 sm:$0xff]  }
 0x706   : > { %v27702_v8 = vpop.f32.mrb[117].mxu1  ;;  %10284 = vmatprep.subr.bf16.mxu0 %v24213_v58  ;;  %v29724_v58 = vld [vmem:[#allocation63_spill] sm:$0xff] }
 0x707   : > { %v27704_v26 = vpop.f32.mrb[118].mxu1  ;;  %v9659_v61 = vrot.slane %v29724_v58, 7 }
 0x708   : > { %v27706_v19 = vpop.f32.mrb[119].mxu1  ;;  %9885 = vmatmul.mubr.bf16.gmra.mrb[112].mxu0 %v29686_v24 }
 0x709   : > { %9894 = vmatprep.mubr.bf16.mxu0 %v29686_v24  ;;  %10285 = vmatpush1.bf16.msra.mxu0 %v24211_v10  ;;  %v27826_v10 = vsel %vm4207_vm5, 0, %v9659_v61  ;;  %v29729_v61 = vld [vmem:[#allocation72_spill] sm:$0xff] }
 0x70a   : > { %21004 = vmatprep.subr.msk.bf16.mxu0 %vm1216_vm1, %v21003_v32  ;;  %v29725_v32 = vld [vmem:[#allocation65_spill] sm:$0xff] }
 0x70b   : > { %v9660_v47 = vrot.slane %v29725_v32, 7 }
 0x70d   : > { %v27713_v4 = vpop.f32.mrb[120].mxu1  ;;  %10287 = vmatpush1.bf16.msra.mxu0 %v10275_v0  ;;  %v27833_v0 = vsel %vm4207_vm5, 0, %v9660_v47  ;;  %v9664_v47 = vrot.slane %v29729_v61, 7 }
 0x70e   : > { %v27715_v22 = vpop.f32.mrb[121].mxu1  ;;  %10714 = vmatprep.subr.bf16.mxu0 %v24218_v55  ;;  %v29726_v55 = vld [vmem:[#allocation68_spill] sm:$0xff] }
 0x70f   : > { %v27717_v62 = vpop.f32.mrb[122].mxu1  ;;  %v9661_v13 = vrot.slane %v29726_v55, 7 }
 0x710   : > { %v27722_v23 = vpop.f32.mrb[123].mxu1  ;;  %20982 = vmatmul.mubr.msk.bf16.gmra.mrb[116].mxu0 %vm9805_vm9, %v27720_v9 }
 0x711   : > { %9904 = vmatprep.mubr.bf16.mxu0 %v29686_v24  ;;  %v27840_v49 = vsel %vm4207_vm5, 0, %v9661_v13  ;;  %v27861_v13 = vsel %vm4207_vm5, 0, %v9664_v47  ;;  %v24222_v47 = vld [vmem:[#allocation21 + $0x170] ss:$8 sps:$4 sm:$0xff]  }
 0x715   : > { %v27728_v7 = vpop.f32.mrb[124].mxu1 }
 0x716   : > { %v27730_v11 = vpop.f32.mrb[125].mxu1 }
 0x717   : > { %v27732_v50 = vpop.f32.mrb[126].mxu1 }
 0x718   : > { %v27737_v20 = vpop.f32.mrb[127].mxu1  ;;  %20983 = vmatmul.mubr.msk.bf16.gmra.mrb[120].mxu0 %vm9805_vm9, %v27735_v18 }
 0x719   : > { %9914 = vmatprep.mubr.bf16.mxu0 %v29686_v24 }
 0x71d   : > { %v27743_v41 = vpop.f32.mrb[128].mxu1 }
 0x71e   : > { %v27745_v56 = vpop.f32.mrb[129].mxu1 }
 0x71f   : > { %v27747_v12 = vpop.f32.mrb[130].mxu1 }
 0x720   : > { %v27752_v44 = vpop.f32.mrb[131].mxu1  ;;  %20984 = vmatmul.mubr.msk.bf16.gmra.mrb[124].mxu0 %vm9805_vm9, %v27750_v16 }
 0x721   : > { %9924 = vmatprep.mubr.bf16.mxu0 %v29686_v24 }
 0x725   : > { %v27758_v42 = vpop.f32.mrb[132].mxu1 }
 0x726   : > { %v27760_v5 = vpop.f32.mrb[133].mxu1 }
 0x727   : > { %v27762_v54 = vpop.f32.mrb[134].mxu1 }
 0x728   : > { %v27767_v33 = vpop.f32.mrb[135].mxu1  ;;  %20985 = vmatmul.mubr.msk.bf16.gmra.mrb[128].mxu0 %vm9805_vm9, %v27765_v53 }
 0x729   : > { %9934 = vmatprep.mubr.bf16.mxu0 %v29686_v24 }
 0x72d   : > { %v27773_v45 = vpop.f32.mrb[136].mxu1 }
 0x72e   : > { %v27775_v63 = vpop.f32.mrb[137].mxu1 }
 0x72f   : > { %v27777_v2 = vpop.f32.mrb[138].mxu1 }
 0x730   : > { %v27782_v57 = vpop.f32.mrb[139].mxu1  ;;  %20986 = vmatmul.mubr.msk.bf16.gmra.mrb[132].mxu0 %vm9805_vm9, %v27780_v35 }
 0x731   : > { %29712 = vst [vmem:[#allocation66_spill] sm:$0xff] %v27782_v57  ;;  %9944 = vmatprep.mubr.bf16.mxu0 %v29686_v24 }
 0x735   : > { %v27788_v39 = vpop.f32.mrb[140].mxu1 }
 0x736   : > { %29714 = vst [vmem:[#allocation55_spill] sm:$0xff] %v27788_v39  ;;  %v27790_v60 = vpop.f32.mrb[141].mxu1 }
 0x737   : > { %29715 = vst [vmem:[#allocation53_spill] sm:$0xff] %v27790_v60  ;;  %v27792_v30 = vpop.f32.mrb[142].mxu1 }
 0x738   : > { %29716 = vst [vmem:[#allocation64_spill] sm:$0xff] %v27792_v30  ;;  %v27797_v1 = vpop.f32.mrb[143].mxu1  ;;  %20987 = vmatmul.mubr.msk.bf16.gmra.mrb[136].mxu0 %vm9805_vm9, %v27795_v52 }
 0x739   : > { %29717 = vst [vmem:[#allocation67_spill] sm:$0xff] %v27797_v1  ;;  %9954 = vmatprep.mubr.bf16.mxu0 %v29686_v24 }
 0x73d   : > { %v27803_v48 = vpop.f32.mrb[144].mxu1 }
 0x73e   : > { %29719 = vst [vmem:[#allocation47_spill] sm:$0xff] %v27803_v48  ;;  %v27805_v25 = vpop.f32.mrb[145].mxu1 }
 0x73f   : > { %29720 = vst [vmem:[#allocation46_spill] sm:$0xff] %v27805_v25  ;;  %v27807_v17 = vpop.f32.mrb[146].mxu1  ;;  %v10672_v25 = vld [vmem:[#allocation21 + $0x180] sm:$0xff] }
 0x740   : > { %29721 = vst [vmem:[#allocation59_spill] sm:$0xff] %v27807_v17  ;;  %v27812_v40 = vpop.f32.mrb[147].mxu1  ;;  %20988 = vmatmul.mubr.msk.bf16.gmra.mrb[140].mxu0 %vm9805_vm9, %v27810_v21  ;;  %v24224_v17 = vld [vmem:[#allocation21 + $0x174] ss:$8 sps:$4 sm:$0xff]   ;;  %v21028_v30 = vcombine.high %v10672_v25, %v10672_v25  ;;  %v21027_v60 = vcombine.low %v10672_v25, %v10672_v25 }
 0x741   : > { %29722 = vst [vmem:[#allocation58_spill] sm:$0xff] %v27812_v40  ;;  %9964 = vmatprep.mubr.bf16.mxu0 %v29686_v24  ;;  %v24221_v40 = vld [vmem:[#allocation21 + $0x164] ss:$8 sps:$4 sm:$0xff]  }
 0x748   : > { %20989 = vmatmul.mubr.msk.bf16.gmra.mrb[144].mxu0 %vm9805_vm9, %v27819_v51 }
 0x749   : > { %9974 = vmatprep.mubr.bf16.mxu0 %v29686_v24 }
 0x750   : > { %20990 = vmatmul.mubr.msk.bf16.gmra.mrb[148].mxu0 %vm9805_vm9, %v27826_v10 }
 0x751   : > { %9984 = vmatprep.mubr.bf16.mxu0 %v29686_v24 }
 0x758   : > { %20991 = vmatmul.mubr.msk.bf16.gmra.mrb[152].mxu0 %vm9805_vm9, %v27833_v0 }
 0x759   : > { %9994 = vmatprep.mubr.bf16.mxu0 %v29686_v24 }
 0x760   : > { %20992 = vmatmul.mubr.msk.bf16.gmra.mrb[156].mxu0 %vm9805_vm9, %v27840_v49 }
 0x761   : > { %10004 = vmatprep.mubr.bf16.mxu0 %v29686_v24 }
 0x768   : > { %20993 = vmatmul.mubr.msk.bf16.gmra.mrb[160].mxu0 %vm9805_vm9, %v27847_v3 }
 0x769   : > { %10014 = vmatprep.mubr.bf16.mxu0 %v29686_v24 }
 0x770   : > { %20994 = vmatmul.mubr.msk.bf16.gmra.mrb[164].mxu0 %vm9805_vm9, %v27854_v36 }
 0x771   : > { %10024 = vmatprep.mubr.bf16.mxu0 %v29686_v24 }
 0x778   : > { %20995 = vmatmul.mubr.msk.bf16.gmra.mrb[168].mxu0 %vm9805_vm9, %v27861_v13 }
 0x779   : > { %10312 = vmatprep.mubr.bf16.mxu0 %v29686_v24 }
 0x780   : > { %21005 = vmatmul.mubr.msk.bf16.vlgmr.msra.gmra.mrb[108].mxu0 %vm9805_vm9, %v27720_v9  ;;  %v10709_v9 = vsel %vm1216_vm1, %v21027_v60, 0 }
 0x781   : > { %10715 = vmatpush1.bf16.msra.mxu0 %v24216_v46  ;;  %10322 = vmatprep.mubr.bf16.mxu0 %v29686_v24 }
 0x782   : > { %10716 = vmatprep.subr.bf16.mxu0 %v24221_v40  ;;  %v24229_v40 = vld [vmem:[#allocation21 + $0x3c] ss:$8 sps:$4 sm:$0xff]  }
 0x785   : > { %v27869_v48 = vpop.f32.mrb[148].mxu1  ;;  %10717 = vmatpush1.bf16.msra.mxu0 %v24219_v31 }
 0x786   : > { %v27871_v1 = vpop.f32.mrb[149].mxu1  ;;  %10718 = vmatprep.subr.bf16.mxu0 %v24224_v17 }
 0x787   : > { %v27873_v39 = vpop.f32.mrb[150].mxu1 }
 0x788   : > { %29730 = vst [vmem:[#allocation50_spill] sm:$0xff] %v27873_v39  ;;  %v27875_v57 = vpop.f32.mrb[151].mxu1  ;;  %21006 = vmatmul.mubr.msk.bf16.gmra.mrb[112].mxu0 %vm9805_vm9, %v27735_v18 }
 0x789   : > { %29731 = vst [vmem:[#allocation49_spill] sm:$0xff] %v27875_v57  ;;  %10332 = vmatprep.mubr.bf16.mxu0 %v29686_v24  ;;  %10719 = vmatpush1.bf16.msra.mxu0 %v24222_v47  ;;  %v24233_v57 = vld [vmem:[#allocation21 + $0x58] ss:$8 sps:$4 sm:$0xff]  }
 0x78a   : > { %21029 = vmatprep.subr.msk.bf16.mxu0 %vm1216_vm1, %v21028_v30 }
 0x78d   : > { %v27882_v46 = vpop.f32.mrb[152].mxu1  ;;  %10721 = vmatpush1.bf16.msra.mxu0 %v10709_v9 }
 0x78e   : > { %29732 = vst [vmem:[#allocation61_spill] sm:$0xff] %v27882_v46  ;;  %v27884_v17 = vpop.f32.mrb[153].mxu1  ;;  %11190 = vmatprep.subr.bf16.mxu0 %v24229_v40  ;;  %v11106_v46 = vld [vmem:[#allocation21 + $0x68] sm:$0xff] }
 0x78f   : > { %29733 = vst [vmem:[#allocation48_spill] sm:$0xff] %v27884_v17  ;;  %v27886_v25 = vpop.f32.mrb[154].mxu1  ;;  %v24235_v17 = vld [vmem:[#allocation21 + $0x5c] ss:$8 sps:$4 sm:$0xff]   ;;  %v21050_v39 = vcombine.low %v11106_v46, %v11106_v46 }
 0x790   : > { %29734 = vst [vmem:[#allocation51_spill] sm:$0xff] %v27886_v25  ;;  %v27888_v31 = vpop.f32.mrb[155].mxu1  ;;  %21007 = vmatmul.mubr.msk.bf16.gmra.mrb[116].mxu0 %vm9805_vm9, %v27750_v16 }
 0x791   : > { %29735 = vst [vmem:[#allocation52_spill] sm:$0xff] %v27888_v31  ;;  %10342 = vmatprep.mubr.bf16.mxu0 %v29686_v24 }
 0x795   : > { %v27893_v18 = vpop.f32.mrb[156].mxu1 }
 0x796   : > { %29736 = vst [vmem:[#allocation54_spill] sm:$0xff] %v27893_v18  ;;  %v27895_v30 = vpop.f32.mrb[157].mxu1 }
 0x797   : > { %29737 = vst [vmem:[#allocation56_spill] sm:$0xff] %v27895_v30  ;;  %v27897_v60 = vpop.f32.mrb[158].mxu1 }
 0x798   : > { %29738 = vst [vmem:[#allocation57_spill] sm:$0xff] %v27897_v60  ;;  %v27899_v47 = vpop.f32.mrb[159].mxu1  ;;  %21008 = vmatmul.mubr.msk.bf16.gmra.mrb[120].mxu0 %vm9805_vm9, %v27765_v53 }
 0x799   : > { %29739 = vst [vmem:[#allocation60_spill] sm:$0xff] %v27899_v47  ;;  %10352 = vmatprep.mubr.bf16.mxu0 %v29686_v24 }
 0x79d   : > { %v27904_v9 = vpop.f32.mrb[160].mxu1 }
 0x79e   : > { %29740 = vst [vmem:[#allocation62_spill] sm:$0xff] %v27904_v9  ;;  %v27906_v40 = vpop.f32.mrb[161].mxu1 }
 0x79f   : > { %29741 = vst [vmem:[#allocation63_spill] sm:$0xff] %v27906_v40  ;;  %v27908_v31 = vpop.f32.mrb[162].mxu1 }
 0x7a0   : > { %29742 = vst [vmem:[#allocation65_spill] sm:$0xff] %v27908_v31  ;;  %v27910_v25 = vpop.f32.mrb[163].mxu1  ;;  %21009 = vmatmul.mubr.msk.bf16.gmra.mrb[124].mxu0 %vm9805_vm9, %v27780_v35 }
 0x7a1   : > { %29743 = vst [vmem:[#allocation68_spill] sm:$0xff] %v27910_v25  ;;  %10362 = vmatprep.mubr.bf16.mxu0 %v29686_v24 }
 0x7a5   : > { %v27915_v60 = vpop.f32.mrb[164].mxu1 }
 0x7a6   : > { %29744 = vst [vmem:[#allocation70_spill] sm:$0xff] %v27915_v60  ;;  %v27917_v47 = vpop.f32.mrb[165].mxu1 }
 0x7a7   : > { %29745 = vst [vmem:[#allocation69_spill] sm:$0xff] %v27917_v47  ;;  %v27919_v30 = vpop.f32.mrb[166].mxu1 }
 0x7a8   : > { %29746 = vst [vmem:[#allocation72_spill] sm:$0xff] %v27919_v30  ;;  %v27921_v18 = vpop.f32.mrb[167].mxu1  ;;  %21010 = vmatmul.mubr.msk.bf16.gmra.mrb[128].mxu0 %vm9805_vm9, %v27795_v52 }
 0x7a9   : > { %29747 = vst [vmem:[#allocation74_spill] sm:$0xff] %v27921_v18  ;;  %10372 = vmatprep.mubr.bf16.mxu0 %v29686_v24 }
 0x7ad   : > { %v27926_v31 = vpop.f32.mrb[168].mxu1 }
 0x7ae   : > { %29748 = vst [vmem:[#allocation75_spill] sm:$0xff] %v27926_v31  ;;  %v27928_v25 = vpop.f32.mrb[169].mxu1 }
 0x7af   : > { %29749 = vst [vmem:[#allocation76_spill] sm:$0xff] %v27928_v25  ;;  %v27930_v40 = vpop.f32.mrb[170].mxu1 }
 0x7b0   : > { %29750 = vst [vmem:[#allocation77_spill] sm:$0xff] %v27930_v40  ;;  %v27932_v9 = vpop.f32.mrb[171].mxu1  ;;  %21011 = vmatmul.mubr.msk.bf16.gmra.mrb[132].mxu0 %vm9805_vm9, %v27810_v21 }
 0x7b1   : > { %29751 = vst [vmem:[#allocation78_spill] sm:$0xff] %v27932_v9  ;;  %10382 = vmatprep.mubr.bf16.mxu0 %v29686_v24 }
 0x7b5   : > { %v27937_v30 = vpop.f32.mrb[172].mxu1 }
 0x7b6   : > { %29752 = vst [vmem:[#allocation79_spill] sm:$0xff] %v27937_v30  ;;  %v27939_v18 = vpop.f32.mrb[173].mxu1  ;;  %v24232_v30 = vld [vmem:[#allocation21 + $0x4c] ss:$8 sps:$4 sm:$0xff]  }
 0x7b7   : > { %29753 = vst [vmem:[#allocation80_spill] sm:$0xff] %v27939_v18  ;;  %v27941_v47 = vpop.f32.mrb[174].mxu1  ;;  %v24227_v18 = vld [vmem:[#allocation21 + $0x38] ss:$8 sps:$4 sm:$0xff]  }
 0x7b8   : > { %29754 = vst [vmem:[#allocation81_spill] sm:$0xff] %v27941_v47  ;;  %v27943_v60 = vpop.f32.mrb[175].mxu1  ;;  %21012 = vmatmul.mubr.msk.bf16.gmra.mrb[136].mxu0 %vm9805_vm9, %v27819_v51 }
 0x7b9   : > { %29755 = vst [vmem:[#allocation82_spill] sm:$0xff] %v27943_v60  ;;  %10392 = vmatprep.mubr.bf16.mxu0 %v29686_v24 }
 0x7bd   : > { %v27948_v40 = vpop.f32.mrb[176].mxu1 }
 0x7be   : > { %29756 = vst [vmem:[#allocation83_spill] sm:$0xff] %v27948_v40  ;;  %v27950_v9 = vpop.f32.mrb[177].mxu1  ;;  %v29761_v40 = vld [vmem:[#allocation73_spill] sm:$0xff] }
 0x7bf   : > { %29757 = vst [vmem:[#allocation84_spill] sm:$0xff] %v27950_v9  ;;  %v27952_v25 = vpop.f32.mrb[178].mxu1  ;;  %v9666_v60 = vrot.slane %v29761_v40, 7 }
 0x7c0   : > { %29758 = vst [vmem:[#allocation85_spill] sm:$0xff] %v27952_v25  ;;  %v27954_v31 = vpop.f32.mrb[179].mxu1  ;;  %21013 = vmatmul.mubr.msk.bf16.gmra.mrb[140].mxu0 %vm9805_vm9, %v27826_v10 }
 0x7c1   : > { %29759 = vst [vmem:[#allocation86_spill] sm:$0xff] %v27954_v31  ;;  %10402 = vmatprep.mubr.bf16.mxu0 %v29686_v24  ;;  %v29760_v31 = vld [vmem:[#allocation71_spill] sm:$0xff]  ;;  %v9698_v47 = vsel %vm4207_vm5, 0, %v9666_v60  ;;  %v21051_v60 = vcombine.high %v11106_v46, %v11106_v46 }
 0x7c2   : > { %v9665_v25 = vrot.slane %v29760_v31, 7  ;;  %v24257_v46 = vld [vmem:[#allocation21 + $0x1ac] ss:$8 sps:$4 sm:$0xff]  }
 0x7c4   : > { %v9696_v9 = vsel %vm4207_vm5, 0, %v9665_v25  ;;  %v24230_v25 = vld [vmem:[#allocation21 + $0x48] ss:$8 sps:$4 sm:$0xff]  }
 0x7c8   : > { %21014 = vmatmul.mubr.msk.bf16.gmra.mrb[144].mxu0 %vm9805_vm9, %v27833_v0 }
 0x7c9   : > { %10412 = vmatprep.mubr.bf16.mxu0 %v29686_v24 }
 0x7d0   : > { %21015 = vmatmul.mubr.msk.bf16.gmra.mrb[148].mxu0 %vm9805_vm9, %v27840_v49 }
 0x7d1   : > { %10422 = vmatprep.mubr.bf16.mxu0 %v29686_v24 }
 0x7d8   : > { %21016 = vmatmul.mubr.msk.bf16.gmra.mrb[152].mxu0 %vm9805_vm9, %v27847_v3 }
 0x7d9   : > { %10432 = vmatprep.mubr.bf16.mxu0 %v29686_v24 }
 0x7e0   : > { %21017 = vmatmul.mubr.msk.bf16.gmra.mrb[156].mxu0 %vm9805_vm9, %v27854_v36 }
 0x7e1   : > { %10442 = vmatprep.mubr.bf16.mxu0 %v29686_v24 }
 0x7e8   : > { %21018 = vmatmul.mubr.msk.bf16.gmra.mrb[160].mxu0 %vm9805_vm9, %v27861_v13 }
 0x7e9   : > { %10452 = vmatprep.mubr.bf16.mxu0 %v29686_v24 }
 0x7f0   : > { %21019 = vmatmul.mubr.msk.bf16.gmra.mrb[164].mxu0 %vm9805_vm9, %v9696_v9 }
 0x7f1   : > { %10462 = vmatprep.mubr.bf16.mxu0 %v29686_v24 }
 0x7f8   : > { %21020 = vmatmul.mubr.msk.bf16.gmra.mrb[168].mxu0 %vm9805_vm9, %v9698_v47 }
 0x7f9   : > { %10746 = vmatprep.mubr.bf16.mxu0 %v29686_v24 }
 0x800   : > { %21030 = vmatmul.mubr.msk.bf16.vlgmr.msra.gmra.mrb[108].mxu0 %vm9805_vm9, %v27750_v16  ;;  %v11185_v16 = vsel %vm1216_vm1, %v21050_v39, 0  ;;  %v24246_v39 = vld [vmem:[#allocation21 + $0x104] ss:$8 sps:$4 sm:$0xff]  }
 0x801   : > { %11191 = vmatpush1.bf16.msra.mxu0 %v24227_v18  ;;  %10756 = vmatprep.mubr.bf16.mxu0 %v29686_v24  ;;  %v24240_v18 = vld [vmem:[#allocation21 + $0xe4] ss:$8 sps:$4 sm:$0xff]  }
 0x802   : > { %11192 = vmatprep.subr.bf16.mxu0 %v24232_v30  ;;  %v24255_v30 = vld [vmem:[#allocation21 + $0x1a8] ss:$8 sps:$4 sm:$0xff]  }
 0x805   : > { %11193 = vmatpush1.bf16.msra.mxu0 %v24230_v25 }
 0x806   : > { %11194 = vmatprep.subr.bf16.mxu0 %v24235_v17  ;;  %v12022_v17 = vld [vmem:[#allocation21 + $0x1b8] sm:$0xff] }
 0x808   : > { %21031 = vmatmul.mubr.msk.bf16.gmra.mrb[112].mxu0 %vm9805_vm9, %v27765_v53  ;;  %v24238_v53 = vld [vmem:[#allocation21 + $0xe0] ss:$8 sps:$4 sm:$0xff]  }
 0x809   : > { %10766 = vmatprep.mubr.bf16.mxu0 %v29686_v24  ;;  %11195 = vmatpush1.bf16.msra.mxu0 %v24233_v57  ;;  %v24241_v57 = vld [vmem:[#allocation21 + $0xf0] ss:$8 sps:$4 sm:$0xff]  }
 0x80a   : > { %21052 = vmatprep.subr.msk.bf16.mxu0 %vm1216_vm1, %v21051_v60  ;;  %v24262_v60 = vld [vmem:[#allocation21 + $0x74] ss:$8 sps:$4 sm:$0xff]  }
 0x80d   : > { %11197 = vmatpush1.bf16.msra.mxu0 %v11185_v16  ;;  %v24260_v16 = vld [vmem:[#allocation21 + $0x70] ss:$8 sps:$4 sm:$0xff]  }
 0x80e   : > { %11630 = vmatprep.subr.bf16.mxu0 %v24240_v18  ;;  %v24265_v18 = vld [vmem:[#allocation21 + $0x84] ss:$8 sps:$4 sm:$0xff]  }
 0x810   : > { %21032 = vmatmul.mubr.msk.bf16.gmra.mrb[116].mxu0 %vm9805_vm9, %v27780_v35  ;;  %v24243_v35 = vld [vmem:[#allocation21 + $0xf4] ss:$8 sps:$4 sm:$0xff]  }
 0x811   : > { %10776 = vmatprep.mubr.bf16.mxu0 %v29686_v24 }
 0x818   : > { %21033 = vmatmul.mubr.msk.bf16.gmra.mrb[120].mxu0 %vm9805_vm9, %v27795_v52  ;;  %v11582_v52 = vld [vmem:[#allocation21 + $0x110] sm:$0xff] }
 0x819   : > { %10786 = vmatprep.mubr.bf16.mxu0 %v29686_v24 }
 0x820   : > { %21034 = vmatmul.mubr.msk.bf16.gmra.mrb[124].mxu0 %vm9805_vm9, %v27810_v21  ;;  %v24244_v21 = vld [vmem:[#allocation21 + $0x100] ss:$8 sps:$4 sm:$0xff]  }
 0x821   : > { %10796 = vmatprep.mubr.bf16.mxu0 %v29686_v24 }
 0x828   : > { %21035 = vmatmul.mubr.msk.bf16.gmra.mrb[128].mxu0 %vm9805_vm9, %v27819_v51  ;;  %v21074_v51 = vcombine.high %v11582_v52, %v11582_v52 }
 0x829   : > { %10806 = vmatprep.mubr.bf16.mxu0 %v29686_v24 }
 0x830   : > { %21036 = vmatmul.mubr.msk.bf16.gmra.mrb[132].mxu0 %vm9805_vm9, %v27826_v10  ;;  %v21073_v10 = vcombine.low %v11582_v52, %v11582_v52 }
 0x831   : > { %10816 = vmatprep.mubr.bf16.mxu0 %v29686_v24 }
 0x838   : > { %21037 = vmatmul.mubr.msk.bf16.gmra.mrb[136].mxu0 %vm9805_vm9, %v27833_v0  ;;  %v11625_v0 = vsel %vm1216_vm1, %v21073_v10, 0  ;;  %v24273_v10 = vld [vmem:[#allocation21 + $0x11c] ss:$8 sps:$4 sm:$0xff]  }
 0x839   : > { %10826 = vmatprep.mubr.bf16.mxu0 %v29686_v24 }
 0x840   : > { %21038 = vmatmul.mubr.msk.bf16.gmra.mrb[140].mxu0 %vm9805_vm9, %v27840_v49  ;;  %v24251_v49 = vld [vmem:[#allocation21 + $0x18c] ss:$8 sps:$4 sm:$0xff]  }
 0x841   : > { %10836 = vmatprep.mubr.bf16.mxu0 %v29686_v24 }
 0x848   : > { %21039 = vmatmul.mubr.msk.bf16.gmra.mrb[144].mxu0 %vm9805_vm9, %v27847_v3  ;;  %v24249_v3 = vld [vmem:[#allocation21 + $0x188] ss:$8 sps:$4 sm:$0xff]  }
 0x849   : > { %10846 = vmatprep.mubr.bf16.mxu0 %v29686_v24 }
 0x850   : > { %21040 = vmatmul.mubr.msk.bf16.gmra.mrb[148].mxu0 %vm9805_vm9, %v27854_v36  ;;  %v24254_v36 = vld [vmem:[#allocation21 + $0x19c] ss:$8 sps:$4 sm:$0xff]  }
 0x851   : > { %10856 = vmatprep.mubr.bf16.mxu0 %v29686_v24 }
 0x858   : > { %21041 = vmatmul.mubr.msk.bf16.gmra.mrb[152].mxu0 %vm9805_vm9, %v27861_v13  ;;  %v24252_v13 = vld [vmem:[#allocation21 + $0x198] ss:$8 sps:$4 sm:$0xff]  }
 0x859   : > { %10866 = vmatprep.mubr.bf16.mxu0 %v29686_v24 }
 0x860   : > { %21042 = vmatmul.mubr.msk.bf16.gmra.mrb[156].mxu0 %vm9805_vm9, %v9696_v9  ;;  %v21098_v9 = vcombine.low %v12022_v17, %v12022_v17 }
 0x861   : > { %10876 = vmatprep.mubr.bf16.mxu0 %v29686_v24 }
 0x862   : > { %v12059_v25 = vsel %vm1216_vm1, %v21098_v9, 0  ;;  %v24284_v9 = vld [vmem:[#allocation21 + $0x1c4] ss:$8 sps:$4 sm:$0xff]  }
 0x868   : > { %21043 = vmatmul.mubr.msk.bf16.gmra.mrb[160].mxu0 %vm9805_vm9, %v9698_v47  ;;  %v21099_v47 = vcombine.high %v12022_v17, %v12022_v17 }
 0x869   : > { %10886 = vmatprep.mubr.bf16.mxu0 %v29686_v24 }
 0x870   : > { %10887 = vmatmul.mubr.bf16.gmra.mrb[164].mxu0 %v29686_v24 }
 0x871   : > { %10896 = vmatprep.mubr.bf16.mxu0 %v29686_v24 }
 0x878   : > { %10897 = vmatmul.mubr.bf16.gmra.mrb[168].mxu0 %v29686_v24 }
 0x879   : > { %11222 = vmatprep.mubr.bf16.mxu0 %v29686_v24 }
 0x880   : > { %11223 = vmatmul.mubr.bf16.vlgmr.msra.gmra.mrb[108].mxu0 %v29686_v24 }
 0x881   : > { %11631 = vmatpush1.bf16.msra.mxu0 %v24238_v53  ;;  %11232 = vmatprep.mubr.bf16.mxu0 %v29686_v24  ;;  %v24263_v53 = vld [vmem:[#allocation21 + $0x80] ss:$8 sps:$4 sm:$0xff]  }
 0x882   : > { %11632 = vmatprep.subr.bf16.mxu0 %v24243_v35  ;;  %v24268_v35 = vld [vmem:[#allocation21 + $0x94] ss:$8 sps:$4 sm:$0xff]  }
 0x885   : > { %11633 = vmatpush1.bf16.msra.mxu0 %v24241_v57  ;;  %v12504_v57 = vld [vmem:[#allocation21 + $0xa0] sm:$0xff] }
 0x886   : > { %11634 = vmatprep.subr.bf16.mxu0 %v24246_v39  ;;  %v24266_v39 = vld [vmem:[#allocation21 + $0x90] ss:$8 sps:$4 sm:$0xff]   ;;  %v21122_v52 = vcombine.high %v12504_v57, %v12504_v57 }
 0x888   : > { %11233 = vmatmul.mubr.bf16.gmra.mrb[112].mxu0 %v29686_v24 }
 0x889   : > { %11242 = vmatprep.mubr.bf16.mxu0 %v29686_v24  ;;  %11635 = vmatpush1.bf16.msra.mxu0 %v24244_v21  ;;  %v21121_v21 = vcombine.low %v12504_v57, %v12504_v57 }
 0x88a   : > { %21075 = vmatprep.subr.msk.bf16.mxu0 %vm1216_vm1, %v21074_v51 }
 0x88b   : > { %v12569_v51 = vsel %vm1216_vm1, %v21121_v21, 0 }
 0x88d   : > { %11637 = vmatpush1.bf16.msra.mxu0 %v11625_v0  ;;  %v24271_v0 = vld [vmem:[#allocation21 + $0x118] ss:$8 sps:$4 sm:$0xff]  }
 0x88e   : > { %12064 = vmatprep.subr.bf16.mxu0 %v24251_v49  ;;  %v24276_v49 = vld [vmem:[#allocation21 + $0x12c] ss:$8 sps:$4 sm:$0xff]  }
 0x890   : > { %21053 = vmatmul.mubr.msk.bf16.gmra.mrb[116].mxu0 %vm9805_vm9, %v29707_v29 }
 0x891   : > { %11252 = vmatprep.mubr.bf16.mxu0 %v29686_v24 }
 0x898   : > { %21054 = vmatmul.mubr.msk.bf16.gmra.mrb[120].mxu0 %vm9805_vm9, %v29708_v38 }
 0x899   : > { %11262 = vmatprep.mubr.bf16.mxu0 %v29686_v24 }
 0x8a0   : > { %21055 = vmatmul.mubr.msk.bf16.gmra.mrb[124].mxu0 %vm9805_vm9, %v29709_v27 }
 0x8a1   : > { %11272 = vmatprep.mubr.bf16.mxu0 %v29686_v24 }
 0x8a8   : > { %21056 = vmatmul.mubr.msk.bf16.gmra.mrb[128].mxu0 %vm9805_vm9, %v29710_v6 }
 0x8a9   : > { %11282 = vmatprep.mubr.bf16.mxu0 %v29686_v24 }
 0x8b0   : > { %21057 = vmatmul.mubr.msk.bf16.gmra.mrb[132].mxu0 %vm9805_vm9, %v29711_v43 }
 0x8b1   : > { %11292 = vmatprep.mubr.bf16.mxu0 %v29686_v24 }
 0x8b8   : > { %21058 = vmatmul.mubr.msk.bf16.gmra.mrb[136].mxu0 %vm9805_vm9, %v29713_v14 }
 0x8b9   : > { %11302 = vmatprep.mubr.bf16.mxu0 %v29686_v24 }
 0x8c0   : > { %21059 = vmatmul.mubr.msk.bf16.gmra.mrb[140].mxu0 %vm9805_vm9, %v29718_v34 }
 0x8c1   : > { %11312 = vmatprep.mubr.bf16.mxu0 %v29686_v24 }
 0x8c8   : > { %21060 = vmatmul.mubr.msk.bf16.gmra.mrb[144].mxu0 %vm9805_vm9, %v29723_v15 }
 0x8c9   : > { %11322 = vmatprep.mubr.bf16.mxu0 %v29686_v24 }
 0x8d0   : > { %21061 = vmatmul.mubr.msk.bf16.gmra.mrb[148].mxu0 %vm9805_vm9, %v29724_v58 }
 0x8d1   : > { %11332 = vmatprep.mubr.bf16.mxu0 %v29686_v24 }
 0x8d8   : > { %21062 = vmatmul.mubr.msk.bf16.gmra.mrb[152].mxu0 %vm9805_vm9, %v29725_v32 }
 0x8d9   : > { %11342 = vmatprep.mubr.bf16.mxu0 %v29686_v24 }
 0x8e0   : > { %21063 = vmatmul.mubr.msk.bf16.gmra.mrb[156].mxu0 %vm9805_vm9, %v29726_v55 }
 0x8e1   : > { %11352 = vmatprep.mubr.bf16.mxu0 %v29686_v24 }
 0x8e8   : > { %21064 = vmatmul.mubr.msk.bf16.gmra.mrb[160].mxu0 %vm9805_vm9, %v29727_v37 }
 0x8e9   : > { %11362 = vmatprep.mubr.bf16.mxu0 %v29686_v24 }
 0x8f0   : > { %21065 = vmatmul.mubr.msk.bf16.gmra.mrb[164].mxu0 %vm9805_vm9, %v29728_v59 }
 0x8f1   : > { %11372 = vmatprep.mubr.bf16.mxu0 %v29686_v24 }
 0x8f8   : > { %21066 = vmatmul.mubr.msk.bf16.gmra.mrb[168].mxu0 %vm9805_vm9, %v29729_v61 }
 0x8f9   : > { %11662 = vmatprep.mubr.bf16.mxu0 %v29686_v24 }
 0x900   : > { %21076 = vmatmul.mubr.msk.bf16.vlgmr.msra.gmra.mrb[108].mxu0 %vm9805_vm9, %v29707_v29 }
 0x901   : > { %12065 = vmatpush1.bf16.msra.mxu0 %v24249_v3  ;;  %11672 = vmatprep.mubr.bf16.mxu0 %v29686_v24  ;;  %v24274_v3 = vld [vmem:[#allocation21 + $0x128] ss:$8 sps:$4 sm:$0xff]  }
 0x902   : > { %12066 = vmatprep.subr.bf16.mxu0 %v24254_v36  ;;  %v24279_v36 = vld [vmem:[#allocation21 + $0x13c] ss:$8 sps:$4 sm:$0xff]  }
 0x905   : > { %12067 = vmatpush1.bf16.msra.mxu0 %v24252_v13  ;;  %v12966_v13 = vld [vmem:[#allocation21 + $0x148] sm:$0xff] }
 0x906   : > { %12068 = vmatprep.subr.bf16.mxu0 %v24257_v46  ;;  %v24277_v46 = vld [vmem:[#allocation21 + $0x138] ss:$8 sps:$4 sm:$0xff]   ;;  %v21145_v17 = vcombine.high %v12966_v13, %v12966_v13 }
 0x908   : > { %21077 = vmatmul.mubr.msk.bf16.gmra.mrb[112].mxu0 %vm9805_vm9, %v29708_v38 }
 0x909   : > { %11682 = vmatprep.mubr.bf16.mxu0 %v29686_v24  ;;  %12069 = vmatpush1.bf16.msra.mxu0 %v24255_v30  ;;  %v21144_v30 = vcombine.low %v12966_v13, %v12966_v13  ;;  %v24282_v13 = vld [vmem:[#allocation21 + $0x1c0] ss:$8 sps:$4 sm:$0xff]  }
 0x90a   : > { %21100 = vmatprep.subr.msk.bf16.mxu0 %vm1216_vm1, %v21099_v47 }
 0x90b   : > { %v13007_v47 = vsel %vm1216_vm1, %v21144_v30, 0  ;;  %v13404_v30 = vld [vmem:[#allocation21 + $0x1f0] sm:$0xff] }
 0x90d   : > { %12071 = vmatpush1.bf16.msra.mxu0 %v12059_v25  ;;  %v12385_v25 = vrot.slane %v29707_v29, 1  ;;  %v12387_v29 = vrot.slane %v29709_v27, 1 }
 0x90e   : > { %12574 = vmatprep.subr.bf16.mxu0 %v24262_v60 }
 0x90f   : > { %v12402_v60 = vsel %vm7804_vm8, %v12385_v25, 0 }
 0x910   : > { %21078 = vmatmul.mubr.msk.bf16.gmra.mrb[116].mxu0 %vm9805_vm9, %v29709_v27 }
 0x911   : > { %11692 = vmatprep.mubr.bf16.mxu0 %v29686_v24 }
 0x918   : > { %21079 = vmatmul.mubr.msk.bf16.gmra.mrb[120].mxu0 %vm9805_vm9, %v29710_v6 }
 0x919   : > { %11702 = vmatprep.mubr.bf16.mxu0 %v29686_v24 }
 0x920   : > { %21080 = vmatmul.mubr.msk.bf16.gmra.mrb[124].mxu0 %vm9805_vm9, %v29711_v43 }
 0x921   : > { %11712 = vmatprep.mubr.bf16.mxu0 %v29686_v24 }
 0x928   : > { %21081 = vmatmul.mubr.msk.bf16.gmra.mrb[128].mxu0 %vm9805_vm9, %v29713_v14 }
 0x929   : > { %11722 = vmatprep.mubr.bf16.mxu0 %v29686_v24 }
 0x930   : > { %21082 = vmatmul.mubr.msk.bf16.gmra.mrb[132].mxu0 %vm9805_vm9, %v29718_v34 }
 0x931   : > { %11732 = vmatprep.mubr.bf16.mxu0 %v29686_v24 }
 0x938   : > { %21083 = vmatmul.mubr.msk.bf16.gmra.mrb[136].mxu0 %vm9805_vm9, %v29723_v15 }
 0x939   : > { %11742 = vmatprep.mubr.bf16.mxu0 %v29686_v24 }
 0x940   : > { %21084 = vmatmul.mubr.msk.bf16.gmra.mrb[140].mxu0 %vm9805_vm9, %v29724_v58 }
 0x941   : > { %11752 = vmatprep.mubr.bf16.mxu0 %v29686_v24 }
 0x948   : > { %21085 = vmatmul.mubr.msk.bf16.gmra.mrb[144].mxu0 %vm9805_vm9, %v29725_v32 }
 0x949   : > { %11762 = vmatprep.mubr.bf16.mxu0 %v29686_v24 }
 0x950   : > { %21086 = vmatmul.mubr.msk.bf16.gmra.mrb[148].mxu0 %vm9805_vm9, %v29726_v55 }
 0x951   : > { %11772 = vmatprep.mubr.bf16.mxu0 %v29686_v24 }
 0x958   : > { %21087 = vmatmul.mubr.msk.bf16.gmra.mrb[152].mxu0 %vm9805_vm9, %v29727_v37 }
 0x959   : > { %11782 = vmatprep.mubr.bf16.mxu0 %v29686_v24 }
 0x960   : > { %21088 = vmatmul.mubr.msk.bf16.gmra.mrb[156].mxu0 %vm9805_vm9, %v29728_v59 }
 0x961   : > { %11792 = vmatprep.mubr.bf16.mxu0 %v29686_v24 }
 0x968   : > { %21089 = vmatmul.mubr.msk.bf16.gmra.mrb[160].mxu0 %vm9805_vm9, %v29729_v61 }
 0x969   : > { %11802 = vmatprep.mubr.bf16.mxu0 %v29686_v24 }
 0x970   : > { %21090 = vmatmul.mubr.msk.bf16.gmra.mrb[164].mxu0 %vm9805_vm9, %v29760_v31 }
 0x971   : > { %11812 = vmatprep.mubr.bf16.mxu0 %v29686_v24 }
 0x978   : > { %21091 = vmatmul.mubr.msk.bf16.gmra.mrb[168].mxu0 %vm9805_vm9, %v29761_v40 }
 0x979   : > { %12096 = vmatprep.mubr.bf16.mxu0 %v29686_v24 }
 0x980   : > { %21101 = vmatmul.mubr.msk.bf16.vlgmr.msra.gmra.mrb[108].mxu0 %vm9805_vm9, %v29709_v27  ;;  %v12389_v27 = vrot.slane %v29711_v43, 1 }
 0x981   : > { %12575 = vmatpush1.bf16.msra.mxu0 %v24260_v16  ;;  %12106 = vmatprep.mubr.bf16.mxu0 %v29686_v24  ;;  %v12386_v16 = vrot.slane %v29708_v38, 1  ;;  %v12388_v38 = vrot.slane %v29710_v6, 1 }
 0x982   : > { %12576 = vmatprep.subr.bf16.mxu0 %v24265_v18  ;;  %v28207_v57 = vsel %vm7804_vm8, %v12389_v27, 0  ;;  %v24295_v27 = vld [vmem:[#allocation24 + $0x4] ss:$8 sps:$4 sm:$0xff]  }
 0x983   : > { %v28186_v18 = vsel %vm7804_vm8, %v12386_v16, 0  ;;  %14614 = vmatprep.subr.bf16.mxu1 %v24295_v27  ;;  %v24350_v27 = vld [vmem:[#allocation24 + $0x330] ss:$8 sps:$4 sm:$0xff]  }
 0x985   : > { %12577 = vmatpush1.bf16.msra.mxu0 %v24263_v53  ;;  %v28193_v53 = vsel %vm7804_vm8, %v12387_v29, 0 }
 0x986   : > { %12578 = vmatprep.subr.bf16.mxu0 %v24268_v35  ;;  %v28200_v35 = vsel %vm7804_vm8, %v12388_v38, 0  ;;  %v24293_v38 = vld [vmem:[#allocation24] ss:$8 sps:$4 sm:$0xff]  }
 0x987   : > { %14615 = vmatpush1.bf16.msra.mxu1 %v24293_v38  ;;  %v24349_v38 = vld [vmem:[#allocation24 + $0x324] ss:$8 sps:$4 sm:$0xff]  }
 0x988   : > { %21102 = vmatmul.mubr.msk.bf16.gmra.mrb[112].mxu0 %vm9805_vm9, %v29710_v6  ;;  %v12390_v6 = vrot.slane %v29713_v14, 1 }
 0x989   : > { %12116 = vmatprep.mubr.bf16.mxu0 %v29686_v24  ;;  %12579 = vmatpush1.bf16.msra.mxu0 %v24266_v39 }
 0x98a   : > { %21123 = vmatprep.subr.msk.bf16.mxu0 %vm1216_vm1, %v21122_v52  ;;  %v28214_v39 = vsel %vm7804_vm8, %v12390_v6, 0  ;;  %v24296_v6 = vld [vmem:[#allocation24 + $0x10] ss:$8 sps:$4 sm:$0xff]  }
 0x98d   : > { %12581 = vmatpush1.bf16.msra.mxu0 %v12569_v51 }
 0x98e   : > { %13012 = vmatprep.subr.bf16.mxu0 %v24273_v10 }
 0x990   : > { %21103 = vmatmul.mubr.msk.bf16.gmra.mrb[116].mxu0 %vm9805_vm9, %v29711_v43  ;;  %v12391_v43 = vrot.slane %v29718_v34, 1 }
 0x991   : > { %12126 = vmatprep.mubr.bf16.mxu0 %v29686_v24 }
 0x992   : > { %v28221_v52 = vsel %vm7804_vm8, %v12391_v43, 0  ;;  %v24301_v43 = vld [vmem:[#allocation24 + $0x24] ss:$8 sps:$4 sm:$0xff]  }
 0x998   : > { %21104 = vmatmul.mubr.msk.bf16.gmra.mrb[120].mxu0 %vm9805_vm9, %v29713_v14  ;;  %v12392_v14 = vrot.slane %v29723_v15, 1 }
 0x999   : > { %12136 = vmatprep.mubr.bf16.mxu0 %v29686_v24 }
 0x99a   : > { %v28228_v21 = vsel %vm7804_vm8, %v12392_v14, 0  ;;  %v24299_v14 = vld [vmem:[#allocation24 + $0x20] ss:$8 sps:$4 sm:$0xff]  }
 0x9a0   : > { %21105 = vmatmul.mubr.msk.bf16.gmra.mrb[124].mxu0 %vm9805_vm9, %v29718_v34  ;;  %v12393_v34 = vrot.slane %v29724_v58, 1 }
 0x9a1   : > { %12146 = vmatprep.mubr.bf16.mxu0 %v29686_v24 }
 0x9a2   : > { %v28235_v51 = vsel %vm7804_vm8, %v12393_v34, 0  ;;  %v24302_v34 = vld [vmem:[#allocation24 + $0x30] ss:$8 sps:$4 sm:$0xff]  }
 0x9a8   : > { %21106 = vmatmul.mubr.msk.bf16.gmra.mrb[128].mxu0 %vm9805_vm9, %v29723_v15  ;;  %v12394_v15 = vrot.slane %v29725_v32, 1 }
 0x9a9   : > { %12156 = vmatprep.mubr.bf16.mxu0 %v29686_v24 }
 0x9aa   : > { %v28242_v10 = vsel %vm7804_vm8, %v12394_v15, 0  ;;  %v24307_v15 = vld [vmem:[#allocation24 + $0x44] ss:$8 sps:$4 sm:$0xff]  }
 0x9b0   : > { %21107 = vmatmul.mubr.msk.bf16.gmra.mrb[132].mxu0 %vm9805_vm9, %v29724_v58  ;;  %v12395_v58 = vrot.slane %v29726_v55, 1 }
 0x9b1   : > { %12166 = vmatprep.mubr.bf16.mxu0 %v29686_v24 }
 0x9b8   : > { %21108 = vmatmul.mubr.msk.bf16.gmra.mrb[136].mxu0 %vm9805_vm9, %v29725_v32  ;;  %v12396_v32 = vrot.slane %v29727_v37, 1 }
 0x9b9   : > { %12176 = vmatprep.mubr.bf16.mxu0 %v29686_v24 }
 0x9c0   : > { %21109 = vmatmul.mubr.msk.bf16.gmra.mrb[140].mxu0 %vm9805_vm9, %v29726_v55  ;;  %v12397_v55 = vrot.slane %v29728_v59, 1 }
 0x9c1   : > { %12186 = vmatprep.mubr.bf16.mxu0 %v29686_v24 }
 0x9c8   : > { %21110 = vmatmul.mubr.msk.bf16.gmra.mrb[144].mxu0 %vm9805_vm9, %v29727_v37  ;;  %v12398_v37 = vrot.slane %v29729_v61, 1 }
 0x9c9   : > { %12196 = vmatprep.mubr.bf16.mxu0 %v29686_v24 }
 0x9d0   : > { %21111 = vmatmul.mubr.msk.bf16.gmra.mrb[148].mxu0 %vm9805_vm9, %v29728_v59  ;;  %v24287_v59 = vld [vmem:[#allocation21 + $0x1d4] ss:$8 sps:$4 sm:$0xff]  }
 0x9d1   : > { %12206 = vmatprep.mubr.bf16.mxu0 %v29686_v24 }
 0x9d8   : > { %21112 = vmatmul.mubr.msk.bf16.gmra.mrb[152].mxu0 %vm9805_vm9, %v29729_v61  ;;  %v24288_v61 = vld [vmem:[#allocation21 + $0x1e0] ss:$8 sps:$4 sm:$0xff]  }
 0x9d9   : > { %12216 = vmatprep.mubr.bf16.mxu0 %v29686_v24 }
 0x9e0   : > { %21113 = vmatmul.mubr.msk.bf16.gmra.mrb[156].mxu0 %vm9805_vm9, %v29760_v31 }
 0x9e1   : > { %12226 = vmatprep.mubr.bf16.mxu0 %v29686_v24 }
 0x9e8   : > { %21114 = vmatmul.mubr.msk.bf16.gmra.mrb[160].mxu0 %vm9805_vm9, %v29761_v40 }
 0x9e9   : > { %12236 = vmatprep.mubr.bf16.mxu0 %v29686_v24 }
 0x9f0   : > { %12237 = vmatmul.mubr.bf16.gmra.mrb[164].mxu0 %v29686_v24 }
 0x9f1   : > { %12246 = vmatprep.mubr.bf16.mxu0 %v29686_v24 }
 0x9f8   : > { %12247 = vmatmul.mubr.bf16.gmra.mrb[168].mxu0 %v29686_v24 }
 0x9f9   : > { %12606 = vmatprep.mubr.bf16.mxu0 %v29686_v24 }
 0xa00   : > { %12607 = vmatmul.mubr.bf16.vlgmr.msra.gmra.mrb[108].mxu0 %v29686_v24 }
 0xa01   : > { %13013 = vmatpush1.bf16.msra.mxu0 %v24271_v0  ;;  %12616 = vmatprep.mubr.bf16.mxu0 %v29686_v24  ;;  %v28249_v0 = vsel %vm7804_vm8, %v12395_v58, 0  ;;  %v24305_v58 = vld [vmem:[#allocation24 + $0x40] ss:$8 sps:$4 sm:$0xff]  }
 0xa02   : > { %13014 = vmatprep.subr.bf16.mxu0 %v24276_v49  ;;  %v28256_v49 = vsel %vm7804_vm8, %v12396_v32, 0  ;;  %v24310_v32 = vld [vmem:[#allocation24 + $0x54] ss:$8 sps:$4 sm:$0xff]  }
 0xa05   : > { %13015 = vmatpush1.bf16.msra.mxu0 %v24274_v3  ;;  %v28263_v3 = vsel %vm7804_vm8, %v12397_v55, 0  ;;  %v24308_v55 = vld [vmem:[#allocation24 + $0x50] ss:$8 sps:$4 sm:$0xff]  }
 0xa06   : > { %13016 = vmatprep.subr.bf16.mxu0 %v24279_v36  ;;  %v28270_v36 = vsel %vm7804_vm8, %v12398_v37, 0  ;;  %v24311_v37 = vld [vmem:[#allocation24 + $0x60] ss:$8 sps:$4 sm:$0xff]  }
 0xa08   : > { %12617 = vmatmul.mubr.bf16.gmra.mrb[112].mxu0 %v29686_v24 }
 0xa09   : > { %12626 = vmatprep.mubr.bf16.mxu0 %v29686_v24  ;;  %13017 = vmatpush1.bf16.msra.mxu0 %v24277_v46  ;;  %v24285_v46 = vld [vmem:[#allocation21 + $0x1d0] ss:$8 sps:$4 sm:$0xff]  }
 0xa0a   : > { %21146 = vmatprep.subr.msk.bf16.mxu0 %vm1216_vm1, %v21145_v17  ;;  %v24290_v17 = vld [vmem:[#allocation21 + $0x1e4] ss:$8 sps:$4 sm:$0xff]  }
 0xa0d   : > { %13019 = vmatpush1.bf16.msra.mxu0 %v13007_v47  ;;  %v21170_v47 = vcombine.high %v13404_v30, %v13404_v30 }
 0xa0e   : > { %13446 = vmatprep.subr.bf16.mxu0 %v24284_v9  ;;  %v21169_v9 = vcombine.low %v13404_v30, %v13404_v30  ;;  %v24320_v30 = vld [vmem:[#allocation24 + $0x90] ss:$8 sps:$4 sm:$0xff]  }
 0xa10   : > { %21124 = vmatmul.mubr.msk.bf16.gmra.mrb[116].mxu0 %vm9805_vm9, %v12402_v60  ;;  %v13441_v25 = vsel %vm1216_vm1, %v21169_v9, 0  ;;  %v24326_v9 = vld [vmem:[#allocation24 + $0xb0] ss:$8 sps:$4 sm:$0xff]  }
 0xa11   : > { %12636 = vmatprep.mubr.bf16.mxu0 %v29686_v24 }
 0xa18   : > { %21125 = vmatmul.mubr.msk.bf16.gmra.mrb[120].mxu0 %vm9805_vm9, %v28186_v18 }
 0xa19   : > { %12646 = vmatprep.mubr.bf16.mxu0 %v29686_v24 }
 0xa20   : > { %21126 = vmatmul.mubr.msk.bf16.gmra.mrb[124].mxu0 %vm9805_vm9, %v28193_v53 }
 0xa21   : > { %12656 = vmatprep.mubr.bf16.mxu0 %v29686_v24 }
 0xa28   : > { %21127 = vmatmul.mubr.msk.bf16.gmra.mrb[128].mxu0 %vm9805_vm9, %v28200_v35 }
 0xa29   : > { %12666 = vmatprep.mubr.bf16.mxu0 %v29686_v24 }
 0xa30   : > { %21128 = vmatmul.mubr.msk.bf16.gmra.mrb[132].mxu0 %vm9805_vm9, %v28207_v57 }
 0xa31   : > { %12676 = vmatprep.mubr.bf16.mxu0 %v29686_v24 }
 0xa38   : > { %21129 = vmatmul.mubr.msk.bf16.gmra.mrb[136].mxu0 %vm9805_vm9, %v28214_v39 }
 0xa39   : > { %12686 = vmatprep.mubr.bf16.mxu0 %v29686_v24 }
 0xa40   : > { %21130 = vmatmul.mubr.msk.bf16.gmra.mrb[140].mxu0 %vm9805_vm9, %v28221_v52 }
 0xa41   : > { %12696 = vmatprep.mubr.bf16.mxu0 %v29686_v24 }
 0xa48   : > { %21131 = vmatmul.mubr.msk.bf16.gmra.mrb[144].mxu0 %vm9805_vm9, %v28228_v21 }
 0xa49   : > { %12706 = vmatprep.mubr.bf16.mxu0 %v29686_v24 }
 0xa50   : > { %21132 = vmatmul.mubr.msk.bf16.gmra.mrb[148].mxu0 %vm9805_vm9, %v28235_v51 }
 0xa51   : > { %12716 = vmatprep.mubr.bf16.mxu0 %v29686_v24 }
 0xa58   : > { %21133 = vmatmul.mubr.msk.bf16.gmra.mrb[152].mxu0 %vm9805_vm9, %v28242_v10 }
 0xa59   : > { %12726 = vmatprep.mubr.bf16.mxu0 %v29686_v24 }
 0xa60   : > { %21134 = vmatmul.mubr.msk.bf16.gmra.mrb[156].mxu0 %vm9805_vm9, %v28249_v0 }
 0xa61   : > { %12736 = vmatprep.mubr.bf16.mxu0 %v29686_v24 }
 0xa68   : > { %21135 = vmatmul.mubr.msk.bf16.gmra.mrb[160].mxu0 %vm9805_vm9, %v28256_v49 }
 0xa69   : > { %12746 = vmatprep.mubr.bf16.mxu0 %v29686_v24 }
 0xa70   : > { %21136 = vmatmul.mubr.msk.bf16.gmra.mrb[164].mxu0 %vm9805_vm9, %v28263_v3 }
 0xa71   : > { %12756 = vmatprep.mubr.bf16.mxu0 %v29686_v24 }
 0xa78   : > { %21137 = vmatmul.mubr.msk.bf16.gmra.mrb[168].mxu0 %vm9805_vm9, %v28270_v36 }
 0xa79   : > { %13044 = vmatprep.mubr.bf16.mxu0 %v29686_v24 }
 0xa80   : > { %21147 = vmatmul.mubr.msk.bf16.vlgmr.msra.gmra.mrb[108].mxu0 %vm9805_vm9, %v12402_v60  ;;  %v12399_v60 = vrot.slane %v29760_v31, 1  ;;  %v24298_v31 = vld [vmem:[#allocation24 + $0x14] ss:$8 sps:$4 sm:$0xff]  }
 0xa81   : > { %13447 = vmatpush1.bf16.msra.mxu0 %v24282_v13  ;;  %13054 = vmatprep.mubr.bf16.mxu0 %v29686_v24  ;;  %v24316_v13 = vld [vmem:[#allocation24 + $0x74] ss:$8 sps:$4 sm:$0xff]  }
 0xa82   : > { %13448 = vmatprep.subr.bf16.mxu0 %v24287_v59  ;;  %v28320_v16 = vsel %vm7804_vm8, %v12399_v60, 0  ;;  %14616 = vmatprep.subr.bf16.mxu1 %v24298_v31  ;;  %v24314_v59 = vld [vmem:[#allocation24 + $0x70] ss:$8 sps:$4 sm:$0xff]   ;;  %v24343_v60 = vld [vmem:[#allocation24 + $0x304] ss:$8 sps:$4 sm:$0xff]  }
 0xa83   : > { %14617 = vmatpush1.bf16.msra.mxu1 %v24296_v6  ;;  %v24352_v31 = vld [vmem:[#allocation24 + $0x334] ss:$8 sps:$4 sm:$0xff]   ;;  %v24355_v6 = vld [vmem:[#allocation24 + $0x344] ss:$8 sps:$4 sm:$0xff]  }
 0xa84   : > { %14618 = vmatprep.subr.bf16.mxu1 %v24301_v43  ;;  %v24356_v43 = vld [vmem:[#allocation24 + $0x350] ss:$8 sps:$4 sm:$0xff]  }
 0xa85   : > { %13449 = vmatpush1.bf16.msra.mxu0 %v24285_v46  ;;  %v24317_v46 = vld [vmem:[#allocation24 + $0x80] ss:$8 sps:$4 sm:$0xff]  }
 0xa86   : > { %13450 = vmatprep.subr.bf16.mxu0 %v24290_v17  ;;  %v24322_v17 = vld [vmem:[#allocation24 + $0x94] ss:$8 sps:$4 sm:$0xff]  }
 0xa87   : > { %14619 = vmatpush1.bf16.msra.mxu1 %v24299_v14  ;;  %v24358_v14 = vld [vmem:[#allocation24 + $0x354] ss:$8 sps:$4 sm:$0xff]  }
 0xa88   : > { %21148 = vmatmul.mubr.msk.bf16.gmra.mrb[112].mxu0 %vm9805_vm9, %v28186_v18  ;;  %v12400_v18 = vrot.slane %v29761_v40, 1  ;;  %v24304_v40 = vld [vmem:[#allocation24 + $0x34] ss:$8 sps:$4 sm:$0xff]  }
 0xa89   : > { %13064 = vmatprep.mubr.bf16.mxu0 %v29686_v24  ;;  %13451 = vmatpush1.bf16.msra.mxu0 %v24288_v61  ;;  %v24323_v61 = vld [vmem:[#allocation24 + $0xa0] ss:$8 sps:$4 sm:$0xff]  }
 0xa8a   : > { %21171 = vmatprep.subr.msk.bf16.mxu0 %vm1216_vm1, %v21170_v47  ;;  %v28327_v29 = vsel %vm7804_vm8, %v12400_v18, 0  ;;  %14620 = vmatprep.subr.bf16.mxu1 %v24304_v40  ;;  %v24328_v47 = vld [vmem:[#allocation24 + $0xb4] ss:$8 sps:$4 sm:$0xff]   ;;  %v24359_v40 = vld [vmem:[#allocation24 + $0x360] ss:$8 sps:$4 sm:$0xff]  }
 0xa8b   : > { %14621 = vmatpush1.bf16.msra.mxu1 %v24302_v34  ;;  %v24346_v18 = vld [vmem:[#allocation24 + $0x314] ss:$8 sps:$4 sm:$0xff]   ;;  %v24361_v34 = vld [vmem:[#allocation24 + $0x364] ss:$8 sps:$4 sm:$0xff]  }
 0xa8c   : > { %14622 = vmatprep.subr.bf16.mxu1 %v24307_v15  ;;  %v24362_v15 = vld [vmem:[#allocation24 + $0x370] ss:$8 sps:$4 sm:$0xff]  }
 0xa8d   : > { %13453 = vmatpush1.bf16.msra.mxu0 %v13441_v25  ;;  %v24329_v25 = vld [vmem:[#allocation24 + $0xc0] ss:$8 sps:$4 sm:$0xff]  }
 0xa8f   : > { %14623 = vmatpush1.bf16.msra.mxu1 %v24305_v58  ;;  %v24364_v58 = vld [vmem:[#allocation24 + $0x374] ss:$8 sps:$4 sm:$0xff]  }
 0xa90   : > { %21149 = vmatmul.mubr.msk.bf16.gmra.mrb[116].mxu0 %vm9805_vm9, %v28193_v53  ;;  %14624 = vmatprep.subr.bf16.mxu1 %v24310_v32  ;;  %v24365_v32 = vld [vmem:[#allocation24 + $0x380] ss:$8 sps:$4 sm:$0xff]  }
 0xa91   : > { %13074 = vmatprep.mubr.bf16.mxu0 %v29686_v24 }
 0xa93   : > { %14625 = vmatpush1.bf16.msra.mxu1 %v24308_v55  ;;  %v24367_v55 = vld [vmem:[#allocation24 + $0x384] ss:$8 sps:$4 sm:$0xff]  }
 0xa98   : > { %21150 = vmatmul.mubr.msk.bf16.gmra.mrb[120].mxu0 %vm9805_vm9, %v28200_v35 }
 0xa99   : > { %13084 = vmatprep.mubr.bf16.mxu0 %v29686_v24 }
 0xaa0   : > { %21151 = vmatmul.mubr.msk.bf16.gmra.mrb[124].mxu0 %vm9805_vm9, %v28207_v57 }
 0xaa1   : > { %13094 = vmatprep.mubr.bf16.mxu0 %v29686_v24 }
 0xaa8   : > { %21152 = vmatmul.mubr.msk.bf16.gmra.mrb[128].mxu0 %vm9805_vm9, %v28214_v39 }
 0xaa9   : > { %13104 = vmatprep.mubr.bf16.mxu0 %v29686_v24 }
 0xab0   : > { %21153 = vmatmul.mubr.msk.bf16.gmra.mrb[132].mxu0 %vm9805_vm9, %v28221_v52 }
 0xab1   : > { %13114 = vmatprep.mubr.bf16.mxu0 %v29686_v24 }
 0xab8   : > { %21154 = vmatmul.mubr.msk.bf16.gmra.mrb[136].mxu0 %vm9805_vm9, %v28228_v21 }
 0xab9   : > { %13124 = vmatprep.mubr.bf16.mxu0 %v29686_v24 }
 0xac0   : > { %21155 = vmatmul.mubr.msk.bf16.gmra.mrb[140].mxu0 %vm9805_vm9, %v28235_v51 }
 0xac1   : > { %13134 = vmatprep.mubr.bf16.mxu0 %v29686_v24 }
 0xac8   : > { %21156 = vmatmul.mubr.msk.bf16.gmra.mrb[144].mxu0 %vm9805_vm9, %v28242_v10 }
 0xac9   : > { %13144 = vmatprep.mubr.bf16.mxu0 %v29686_v24 }
 0xad0   : > { %21157 = vmatmul.mubr.msk.bf16.gmra.mrb[148].mxu0 %vm9805_vm9, %v28249_v0 }
 0xad1   : > { %13154 = vmatprep.mubr.bf16.mxu0 %v29686_v24 }
 0xad8   : > { %21158 = vmatmul.mubr.msk.bf16.gmra.mrb[152].mxu0 %vm9805_vm9, %v28256_v49 }
 0xad9   : > { %13164 = vmatprep.mubr.bf16.mxu0 %v29686_v24 }
 0xae0   : > { %21159 = vmatmul.mubr.msk.bf16.gmra.mrb[156].mxu0 %vm9805_vm9, %v28263_v3 }
 0xae1   : > { %13174 = vmatprep.mubr.bf16.mxu0 %v29686_v24 }
 0xae8   : > { %21160 = vmatmul.mubr.msk.bf16.gmra.mrb[160].mxu0 %vm9805_vm9, %v28270_v36 }
 0xae9   : > { %13184 = vmatprep.mubr.bf16.mxu0 %v29686_v24 }
 0xaf0   : > { %21161 = vmatmul.mubr.msk.bf16.gmra.mrb[164].mxu0 %vm9805_vm9, %v28320_v16 }
 0xaf1   : > { %13194 = vmatprep.mubr.bf16.mxu0 %v29686_v24 }
 0xaf8   : > { %21162 = vmatmul.mubr.msk.bf16.gmra.mrb[168].mxu0 %vm9805_vm9, %v28327_v29 }
 0xaf9   : > { %13478 = vmatprep.mubr.bf16.mxu0 %v29686_v24 }
 0xb00   : > { %21172 = vmatmul.mubr.msk.bf16.vlgmr.msra.gmra.mrb[108].mxu0 %vm9805_vm9, %v28193_v53  ;;  %v24313_v53 = vld [vmem:[#allocation24 + $0x64] ss:$8 sps:$4 sm:$0xff]  }
 0xb01   : > { %13488 = vmatprep.mubr.bf16.mxu0 %v29686_v24  ;;  %14626 = vmatprep.subr.bf16.mxu1 %v24313_v53  ;;  %v24368_v53 = vld [vmem:[#allocation24 + $0x390] ss:$8 sps:$4 sm:$0xff]  }
 0xb02   : > { %14627 = vmatpush1.bf16.msra.mxu1 %v24311_v37  ;;  %v24370_v37 = vld [vmem:[#allocation24 + $0x394] ss:$8 sps:$4 sm:$0xff]  }
 0xb03   : > { %14628 = vmatprep.subr.bf16.mxu1 %v24316_v13  ;;  %v24371_v13 = vld [vmem:[#allocation24 + $0x3a0] ss:$8 sps:$4 sm:$0xff]  }
 0xb06   : > { %14629 = vmatpush1.bf16.msra.mxu1 %v24314_v59  ;;  %v24373_v59 = vld [vmem:[#allocation24 + $0x3a4] ss:$8 sps:$4 sm:$0xff]  }
 0xb08   : > { %21173 = vmatmul.mubr.msk.bf16.gmra.mrb[112].mxu0 %vm9805_vm9, %v28200_v35  ;;  %v24319_v35 = vld [vmem:[#allocation24 + $0x84] ss:$8 sps:$4 sm:$0xff]  }
 0xb09   : > { %13498 = vmatprep.mubr.bf16.mxu0 %v29686_v24  ;;  %14630 = vmatprep.subr.bf16.mxu1 %v24319_v35  ;;  %v24374_v35 = vld [vmem:[#allocation24 + $0x3b0] ss:$8 sps:$4 sm:$0xff]  }
 0xb0a   : > { %14631 = vmatpush1.bf16.msra.mxu1 %v24317_v46  ;;  %v24376_v46 = vld [vmem:[#allocation24 + $0x3b4] ss:$8 sps:$4 sm:$0xff]  }
 0xb0b   : > { %14632 = vmatprep.subr.bf16.mxu1 %v24322_v17  ;;  %v24377_v17 = vld [vmem:[#allocation24 + $0x3c0] ss:$8 sps:$4 sm:$0xff]  }
 0xb0e   : > { %14633 = vmatpush1.bf16.msra.mxu1 %v24320_v30  ;;  %v24379_v30 = vld [vmem:[#allocation24 + $0x3c4] ss:$8 sps:$4 sm:$0xff]  }
 0xb10   : > { %21174 = vmatmul.mubr.msk.bf16.gmra.mrb[116].mxu0 %vm9805_vm9, %v28207_v57  ;;  %v24325_v57 = vld [vmem:[#allocation24 + $0xa4] ss:$8 sps:$4 sm:$0xff]  }
 0xb11   : > { %13508 = vmatprep.mubr.bf16.mxu0 %v29686_v24  ;;  %14634 = vmatprep.subr.bf16.mxu1 %v24325_v57  ;;  %v13833_v57 = vlaneseq }
 0xb12   : > { %14635 = vmatpush1.bf16.msra.mxu1 %v24323_v61 }
 0xb13   : > { %14636 = vmatprep.subr.bf16.mxu1 %v24328_v47  ;;  %v28378_v61 = vshrl.u32 %v13833_v57, 7  ;;  %v24380_v47 = vld [vmem:[#allocation24 + $0x3d0] ss:$8 sps:$4 sm:$0xff]  }
 0xb15   : > { %29762 = vst [vmem:[#allocation71_spill] sm:$0xff] %v28378_v61 }
 0xb16   : > { %14637 = vmatpush1.bf16.msra.mxu1 %v24326_v9  ;;  %v24382_v9 = vld [vmem:[#allocation24 + $0x3d4] ss:$8 sps:$4 sm:$0xff]  }
 0xb18   : > { %21175 = vmatmul.mubr.msk.bf16.gmra.mrb[120].mxu0 %vm9805_vm9, %v28214_v39  ;;  %v24331_v39 = vld [vmem:[#allocation24 + $0xc4] ss:$8 sps:$4 sm:$0xff]  }
 0xb19   : > { %13518 = vmatprep.mubr.bf16.mxu0 %v29686_v24  ;;  %14638 = vmatprep.subr.bf16.mxu1 %v24331_v39  ;;  %v29531_v39 = vsub.s32 0, %v28378_v61 }
 0xb1a   : > { %14639 = vmatpush1.bf16.msra.mxu1 %v24329_v25  ;;  %v13831_v25 = vld [vmem:[#allocation23] sm:$0x3] }
 0xb20   : > { %21176 = vmatmul.mubr.msk.bf16.gmra.mrb[124].mxu0 %vm9805_vm9, %v28221_v52  ;;  %v24334_v52 = vld [vmem:[#allocation24 + $0xd4] ss:$8 sps:$4 sm:$0xff]  }
 0xb21   : > { %13528 = vmatprep.mubr.bf16.mxu0 %v29686_v24  ;;  %14640 = vmatprep.subr.bf16.mxu1 %v24334_v52  ;;  %v29530_v52 = vsub.s32 1, %v28378_v61 }
 0xb28   : > { %21177 = vmatmul.mubr.msk.bf16.gmra.mrb[128].mxu0 %vm9805_vm9, %v28228_v21  ;;  %v24332_v21 = vld [vmem:[#allocation24 + $0xd0] ss:$8 sps:$4 sm:$0xff]  }
 0xb29   : > { %13538 = vmatprep.mubr.bf16.mxu0 %v29686_v24  ;;  %14641 = vmatpush1.bf16.msra.mxu1 %v24332_v21  ;;  %v28384_v21 = vrot.slane %v13831_v25, %v29531_v39 }
 0xb30   : > { %21178 = vmatmul.mubr.msk.bf16.gmra.mrb[132].mxu0 %vm9805_vm9, %v28235_v51  ;;  %v24337_v51 = vld [vmem:[#allocation24 + $0xe4] ss:$8 sps:$4 sm:$0xff]  }
 0xb31   : > { %13548 = vmatprep.mubr.bf16.mxu0 %v29686_v24  ;;  %14642 = vmatprep.subr.bf16.mxu1 %v24337_v51 }
 0xb38   : > { %21179 = vmatmul.mubr.msk.bf16.gmra.mrb[136].mxu0 %vm9805_vm9, %v28242_v10  ;;  %v24335_v10 = vld [vmem:[#allocation24 + $0xe0] ss:$8 sps:$4 sm:$0xff]  }
 0xb39   : > { %13558 = vmatprep.mubr.bf16.mxu0 %v29686_v24  ;;  %14643 = vmatpush1.bf16.msra.mxu1 %v24335_v10  ;;  %v28388_v10 = vrot.slane %v13831_v25, %v29530_v52  ;;  %v24391_v25 = vld [vmem:[#allocation24 + $0x604] ss:$8 sps:$4 sm:$0xff]  }
 0xb40   : > { %21180 = vmatmul.mubr.msk.bf16.gmra.mrb[140].mxu0 %vm9805_vm9, %v28249_v0  ;;  %v24340_v0 = vld [vmem:[#allocation24 + $0xf4] ss:$8 sps:$4 sm:$0xff]  }
 0xb41   : > { %13568 = vmatprep.mubr.bf16.mxu0 %v29686_v24  ;;  %14644 = vmatprep.subr.bf16.mxu1 %v24340_v0 }
 0xb48   : > { %21181 = vmatmul.mubr.msk.bf16.gmra.mrb[144].mxu0 %vm9805_vm9, %v28256_v49  ;;  %v24338_v49 = vld [vmem:[#allocation24 + $0xf0] ss:$8 sps:$4 sm:$0xff]  }
 0xb49   : > { %13578 = vmatprep.mubr.bf16.mxu0 %v29686_v24  ;;  %14645 = vmatpush1.bf16.msra.mxu1 %v24338_v49 }
 0xb4a   : > { %15192 = vmatprep.subr.bf16.mxu1 %v24343_v60 }
 0xb4c   : > { %14647 = vmatmul.mubr.bf16.vlgmr.msra.gmra.mrb[180].mxu1 %v29686_v24 }
 0xb50   : > { %21182 = vmatmul.mubr.msk.bf16.gmra.mrb[148].mxu0 %vm9805_vm9, %v28263_v3  ;;  %v24341_v3 = vld [vmem:[#allocation24 + $0x300] ss:$8 sps:$4 sm:$0xff]  }
 0xb51   : > { %13588 = vmatprep.mubr.bf16.mxu0 %v29686_v24  ;;  %15193 = vmatpush1.bf16.msra.mxu1 %v24341_v3 }
 0xb52   : > { %15194 = vmatprep.subr.bf16.mxu1 %v24346_v18  ;;  %v24385_v18 = vld [vmem:[#allocation24 + $0x3e4] ss:$8 sps:$4 sm:$0xff]  }
 0xb58   : > { %21183 = vmatmul.mubr.msk.bf16.gmra.mrb[152].mxu0 %vm9805_vm9, %v28270_v36  ;;  %v24344_v36 = vld [vmem:[#allocation24 + $0x310] ss:$8 sps:$4 sm:$0xff]  }
 0xb59   : > { %13598 = vmatprep.mubr.bf16.mxu0 %v29686_v24  ;;  %15195 = vmatpush1.bf16.msra.mxu1 %v24344_v36  ;;  %v24383_v36 = vld [vmem:[#allocation24 + $0x3e0] ss:$8 sps:$4 sm:$0xff]  }
 0xb5a   : > { %15196 = vmatprep.subr.bf16.mxu1 %v24349_v38 }
 0xb60   : > { %21184 = vmatmul.mubr.msk.bf16.gmra.mrb[156].mxu0 %vm9805_vm9, %v28320_v16  ;;  %v24347_v16 = vld [vmem:[#allocation24 + $0x320] ss:$8 sps:$4 sm:$0xff]  }
 0xb61   : > { %13608 = vmatprep.mubr.bf16.mxu0 %v29686_v24  ;;  %15197 = vmatpush1.bf16.msra.mxu1 %v24347_v16 }
 0xb62   : > { %15198 = vmatprep.subr.bf16.mxu1 %v24352_v31 }
 0xb65   : > { %15199 = vmatpush1.bf16.msra.mxu1 %v24350_v27 }
 0xb66   : > { %15200 = vmatprep.subr.bf16.mxu1 %v24355_v6 }
 0xb68   : > { %21185 = vmatmul.mubr.msk.bf16.gmra.mrb[160].mxu0 %vm9805_vm9, %v28327_v29  ;;  %v24353_v29 = vld [vmem:[#allocation24 + $0x340] ss:$8 sps:$4 sm:$0xff]  }
 0xb69   : > { %13618 = vmatprep.mubr.bf16.mxu0 %v29686_v24  ;;  %15201 = vmatpush1.bf16.msra.mxu1 %v24353_v29 }
 0xb6a   : > { %15202 = vmatprep.subr.bf16.mxu1 %v24358_v14 }
 0xb6d   : > { %15203 = vmatpush1.bf16.msra.mxu1 %v24356_v43  ;;  %v24388_v43 = vld [vmem:[#allocation24 + $0x3f4] ss:$8 sps:$4 sm:$0xff]  }
 0xb6e   : > { %15204 = vmatprep.subr.bf16.mxu1 %v24361_v34 }
 0xb70   : > { %13619 = vmatmul.mubr.bf16.gmra.mrb[164].mxu0 %v29686_v24 }
 0xb71   : > { %13628 = vmatprep.mubr.bf16.mxu0 %v29686_v24  ;;  %15205 = vmatpush1.bf16.msra.mxu1 %v24359_v40 }
 0xb72   : > { %15206 = vmatprep.subr.bf16.mxu1 %v24364_v58 }
 0xb75   : > { %15207 = vmatpush1.bf16.msra.mxu1 %v24362_v15 }
 0xb76   : > { %15208 = vmatprep.subr.bf16.mxu1 %v24367_v55 }
 0xb78   : > { %13629 = vmatmul.mubr.bf16.gmra.mrb[168].mxu0 %v29686_v24 }
 0xb79   : > { %15209 = vmatpush1.bf16.msra.mxu1 %v24365_v32 }
 0xb7a   : > { %15210 = vmatprep.subr.bf16.mxu1 %v24370_v37 }
 0xb7d   : > { %15211 = vmatpush1.bf16.msra.mxu1 %v24368_v53 }
 0xb7e   : > { %15212 = vmatprep.subr.bf16.mxu1 %v24373_v59 }
 0xb81   : > { %15213 = vmatpush1.bf16.msra.mxu1 %v24371_v13 }
 0xb82   : > { %15214 = vmatprep.subr.bf16.mxu1 %v24376_v46 }
 0xb85   : > { %15215 = vmatpush1.bf16.msra.mxu1 %v24374_v35 }
 0xb86   : > { %15216 = vmatprep.subr.bf16.mxu1 %v24379_v30 }
 0xb89   : > { %15217 = vmatpush1.bf16.msra.mxu1 %v24377_v17 }
 0xb8a   : > { %15218 = vmatprep.subr.bf16.mxu1 %v24382_v9 }
 0xb8d   : > { %15219 = vmatpush1.bf16.msra.mxu1 %v24380_v47 }
 0xb8e   : > { %15220 = vmatprep.subr.bf16.mxu1 %v24385_v18 }
 0xb91   : > { %15221 = vmatpush1.bf16.msra.mxu1 %v24383_v36 }
 0xb92   : > { %15222 = vmatprep.subr.bf16.mxu1 %v24388_v43 }
 0xbd3   : > { %v13480_v51 = vpop.f32.mrb[108].mxu0 }
 0xbd4   : > { %v21838_v0 = vadd.f32 %v13480_v51, %v27700_v28  ;;  %v13482_v49 = vpop.f32.mrb[109].mxu0  ;;  %v24386_v28 = vld [vmem:[#allocation24 + $0x3f0] ss:$8 sps:$4 sm:$0xff]  }
 0xbd5   : > { %v21839_v3 = vadd.f32 %v13482_v49, %v27702_v8  ;;  %v13484_v60 = vpop.f32.mrb[110].mxu0  ;;  %15223 = vmatpush1.bf16.msra.mxu1 %v24386_v28 }
 0xbd6   : > { %v13843_v16 = vadd.f32 %v21838_v0, %v28384_v21  ;;  %v21840_v38 = vadd.f32 %v13484_v60, %v27704_v26  ;;  %v13486_v27 = vpop.f32.mrb[111].mxu0  ;;  %15770 = vmatprep.subr.bf16.mxu1 %v24391_v25  ;;  %v24448_v60 = vld [vmem:[#allocation24 + $0x134] ss:$8 sps:$4 sm:$0xff]  }
 0xbd7   : > { %v13844_v31 = vadd.f32 %v21839_v3, %v28388_v10  ;;  %v21841_v29 = vadd.f32 %v13486_v27, %v27706_v19 }
 0xbd8   : > { %v13845_v6 = vadd.f32 %v21840_v38, %v28384_v21  ;;  %v13907_v14 = vmax.f32 %v13843_v16, 0.0 }
 0xbd9   : > { %v13846_v8 = vadd.f32 %v21841_v29, %v28388_v10  ;;  %v13908_v34 = vmax.f32 %v13844_v31, 0.0 }
 0xbda   : > { %v13909_v40 = vmax.f32 %v13845_v6, 0.0 }
 0xbdb   : > { %v13910_v15 = vmax.f32 %v13846_v8, 0.0  ;;  %v13490_v58 = vpop.f32.mrb[112].mxu0 }
 0xbdc   : > { %v28398_v26 = vpack.c.bf16 %v13909_v40, %v13907_v14  ;;  %v21842_v32 = vadd.f32 %v13490_v58, %v27713_v4  ;;  %v13492_v55 = vpop.f32.mrb[113].mxu0 }
 0xbdd   : > { %v28401_v19 = vpack.c.bf16 %v13910_v15, %v13908_v34  ;;  %v21843_v53 = vadd.f32 %v13492_v55, %v27715_v22  ;;  %v13494_v37 = vpop.f32.mrb[114].mxu0 }
 0xbde   : > { %v13847_v13 = vadd.f32 %v21842_v32, %v28384_v21  ;;  %v21844_v59 = vadd.f32 %v13494_v37, %v27717_v62  ;;  %v13496_v35 = vpop.f32.mrb[115].mxu0  ;;  %v14068_v46 = vshrl.u32 %v28398_v26, 16  ;;  %v14071_v17 = vshll.u32 %v28398_v26, 16 }
 0xbdf   : > { %v13848_v30 = vadd.f32 %v21843_v53, %v28388_v10  ;;  %v21845_v4 = vadd.f32 %v13496_v35, %v27722_v23  ;;  %v14075_v57 = vshrl.u32 %v28401_v19, 16  ;;  %v14078_v47 = vshll.u32 %v28401_v19, 16 }
 0xbe0   : > { %v13849_v22 = vadd.f32 %v21844_v59, %v28384_v21  ;;  %v14070_v9 = vrot.slane %v14068_v46, 7  ;;  %v13911_v49 = vmax.f32 %v13847_v13, 0.0  ;;  %v17825_v36 = vrot.slane %v14071_v17, 1 }
 0xbe1   : > { %v13850_v51 = vadd.f32 %v21845_v4, %v28388_v10  ;;  %v14077_v62 = vrot.slane %v14075_v57, 7  ;;  %v17827_v0 = vrot.slane %v14078_v47, 1  ;;  %v13912_v18 = vmax.f32 %v13848_v30, 0.0 }
 0xbe2   : > { %v13913_v3 = vmax.f32 %v13849_v22, 0.0  ;;  %v14073_v23 = vor.u32 %v14071_v17, %v14070_v9  ;;  %v28425_v43 = vor.u32 %v17825_v36, %v14068_v46 }
 0xbe3   : > { %v13914_v16 = vmax.f32 %v13850_v51, 0.0  ;;  %v13500_v38 = vpop.f32.mrb[116].mxu0  ;;  %v14080_v27 = vor.u32 %v14078_v47, %v14077_v62  ;;  %v28420_v31 = vor.u32 %v17827_v0, %v14075_v57 }
 0xbe4   : > { %v28422_v29 = vpack.c.bf16 %v13913_v3, %v13911_v49  ;;  %v21846_v6 = vadd.f32 %v13500_v38, %v27728_v7  ;;  %v13502_v28 = vpop.f32.mrb[117].mxu0  ;;  %29766 = vst [vmem:[#allocation87_spill] sm:$0xff] %v28425_v43  ;;  %v28436_v15 = vsel %vm28416_vm11, 0, %v14073_v23 }
 0xbe5   : > { %29765 = vst [vmem:[#allocation73_spill] sm:$0xff] %v28420_v31  ;;  %v28427_v8 = vpack.c.bf16 %v13914_v16, %v13912_v18  ;;  %v21847_v14 = vadd.f32 %v13502_v28, %v27730_v11  ;;  %v13504_v40 = vpop.f32.mrb[118].mxu0  ;;  %v28432_v34 = vsel %vm28416_vm11, 0, %v14080_v27 }
 0xbe6   : > { %v13851_v58 = vadd.f32 %v21846_v6, %v28384_v21  ;;  %v21848_v7 = vadd.f32 %v13504_v40, %v27732_v50  ;;  %v13506_v32 = vpop.f32.mrb[119].mxu0  ;;  %14656 = vmatprep.mubr.bf16.mxu1 %v28432_v34  ;;  %v14082_v55 = vshrl.u32 %v28422_v29, 16  ;;  %v14085_v11 = vshll.u32 %v28422_v29, 16 }
 0xbe7   : > { %v13852_v53 = vadd.f32 %v21847_v14, %v28388_v10  ;;  %v21849_v37 = vadd.f32 %v13506_v32, %v27737_v20  ;;  %14657 = vmatmul.mubr.bf16.gmra.mrb[184].mxu1 %v28436_v15  ;;  %v14089_v13 = vshrl.u32 %v28427_v8, 16  ;;  %v14092_v59 = vshll.u32 %v28427_v8, 16 }
 0xbe8   : > { %v13853_v35 = vadd.f32 %v21848_v7, %v28384_v21  ;;  %v14084_v50 = vrot.slane %v14082_v55, 7  ;;  %v13915_v46 = vmax.f32 %v13851_v58, 0.0  ;;  %v17829_v22 = vrot.slane %v14085_v11, 1 }
 0xbe9   : > { %v13854_v17 = vadd.f32 %v21849_v37, %v28388_v10  ;;  %v14091_v30 = vrot.slane %v14089_v13, 7  ;;  %v17831_v47 = vrot.slane %v14092_v59, 1  ;;  %v13916_v9 = vmax.f32 %v13852_v53, 0.0 }
 0xbea   : > { %v13917_v4 = vmax.f32 %v13853_v35, 0.0  ;;  %v14087_v57 = vor.u32 %v14085_v11, %v14084_v50  ;;  %v28466_v27 = vor.u32 %v17829_v22, %v14082_v55 }
 0xbeb   : > { %v13918_v25 = vmax.f32 %v13854_v17, 0.0  ;;  %v13510_v20 = vpop.f32.mrb[120].mxu0  ;;  %v14094_v51 = vor.u32 %v14092_v59, %v14091_v30  ;;  %v28457_v23 = vor.u32 %v17831_v47, %v14089_v13 }
 0xbec   : > { %v28450_v62 = vpack.c.bf16 %v13917_v4, %v13915_v46  ;;  %v21850_v0 = vadd.f32 %v13510_v20, %v27743_v41  ;;  %v13512_v49 = vpop.f32.mrb[121].mxu0  ;;  %v28455_v3 = vsel %vm28416_vm11, 0, %v14087_v57  ;;  %29768 = vst [vmem:[#allocation89_spill] sm:$0xff] %v28466_v27  ;;  %v29807_v27 = vld [vmem:[#allocation54_spill] sm:$0xff] }
 0xbed   : > { %29767 = vst [vmem:[#allocation88_spill] sm:$0xff] %v28457_v23  ;;  %v28459_v36 = vpack.c.bf16 %v13918_v25, %v13916_v9  ;;  %v21851_v18 = vadd.f32 %v13512_v49, %v27745_v56  ;;  %v13514_v16 = vpop.f32.mrb[122].mxu0  ;;  %v28464_v38 = vsel %vm28416_vm11, 0, %v14094_v51 }
 0xbee   : > { %v13855_v41 = vadd.f32 %v21850_v0, %v28384_v21  ;;  %v21852_v6 = vadd.f32 %v13514_v16, %v27747_v12  ;;  %v13516_v28 = vpop.f32.mrb[123].mxu0  ;;  %14666 = vmatprep.mubr.bf16.mxu1 %v28464_v38  ;;  %v14096_v14 = vshrl.u32 %v28450_v62, 16  ;;  %v14099_v40 = vshll.u32 %v28450_v62, 16 }
 0xbef   : > { %v13856_v56 = vadd.f32 %v21851_v18, %v28388_v10  ;;  %v21853_v58 = vadd.f32 %v13516_v28, %v27752_v44  ;;  %14667 = vmatmul.mubr.bf16.gmra.mrb[188].mxu1 %v28455_v3  ;;  %v14103_v7 = vshrl.u32 %v28459_v36, 16  ;;  %v14106_v32 = vshll.u32 %v28459_v36, 16 }
 0xbf0   : > { %v13857_v55 = vadd.f32 %v21852_v6, %v28384_v21  ;;  %v14098_v12 = vrot.slane %v14096_v14, 7  ;;  %v13919_v37 = vmax.f32 %v13855_v41, 0.0  ;;  %v17833_v30 = vrot.slane %v14099_v40, 1 }
 0xbf1   : > { %v13858_v11 = vadd.f32 %v21853_v58, %v28388_v10  ;;  %v14105_v53 = vrot.slane %v14103_v7, 7  ;;  %v17835_v35 = vrot.slane %v14106_v32, 1  ;;  %v13920_v50 = vmax.f32 %v13856_v56, 0.0 }
 0xbf2   : > { %v13921_v13 = vmax.f32 %v13857_v55, 0.0  ;;  %v14101_v59 = vor.u32 %v14099_v40, %v14098_v12  ;;  %v28496_v49 = vor.u32 %v17833_v30, %v14096_v14 }
 0xbf3   : > { %v13922_v46 = vmax.f32 %v13858_v11, 0.0  ;;  %v13520_v17 = vpop.f32.mrb[124].mxu0  ;;  %v14108_v44 = vor.u32 %v14106_v32, %v14105_v53  ;;  %v28487_v9 = vor.u32 %v17835_v35, %v14103_v7 }
 0xbf4   : > { %v28480_v4 = vpack.c.bf16 %v13921_v13, %v13919_v37  ;;  %v21854_v57 = vadd.f32 %v13520_v17, %v27758_v42  ;;  %v13522_v47 = vpop.f32.mrb[125].mxu0  ;;  %v28485_v22 = vsel %vm28416_vm11, 0, %v14101_v59  ;;  %29770 = vst [vmem:[#allocation91_spill] sm:$0xff] %v28496_v49 }
 0xbf5   : > { %29769 = vst [vmem:[#allocation90_spill] sm:$0xff] %v28487_v9  ;;  %v28489_v25 = vpack.c.bf16 %v13922_v46, %v13920_v50  ;;  %v21855_v20 = vadd.f32 %v13522_v47, %v27760_v5  ;;  %v13524_v51 = vpop.f32.mrb[126].mxu0  ;;  %v28494_v0 = vsel %vm28416_vm11, 0, %v14108_v44 }
 0xbf6   : > { %v13859_v42 = vadd.f32 %v21854_v57, %v28384_v21  ;;  %v21856_v18 = vadd.f32 %v13524_v51, %v27762_v54  ;;  %v13526_v16 = vpop.f32.mrb[127].mxu0  ;;  %14676 = vmatprep.mubr.bf16.mxu1 %v28494_v0  ;;  %v14110_v41 = vshrl.u32 %v28480_v4, 16  ;;  %v14113_v6 = vshll.u32 %v28480_v4, 16 }
 0xbf7   : > { %v13860_v5 = vadd.f32 %v21855_v20, %v28388_v10  ;;  %v21857_v28 = vadd.f32 %v13526_v16, %v27767_v33  ;;  %14677 = vmatmul.mubr.bf16.gmra.mrb[192].mxu1 %v28485_v22  ;;  %v14117_v14 = vshrl.u32 %v28489_v25, 16  ;;  %v14120_v40 = vshll.u32 %v28489_v25, 16 }
 0xbf8   : > { %v13861_v56 = vadd.f32 %v21856_v18, %v28384_v21  ;;  %v14112_v54 = vrot.slane %v14110_v41, 7  ;;  %v13923_v32 = vmax.f32 %v13859_v42, 0.0  ;;  %v17837_v59 = vrot.slane %v14113_v6, 1 }
 0xbf9   : > { %v13862_v58 = vadd.f32 %v21857_v28, %v28388_v10  ;;  %v14119_v7 = vrot.slane %v14117_v14, 7  ;;  %v17839_v11 = vrot.slane %v14120_v40, 1  ;;  %v13924_v53 = vmax.f32 %v13860_v5, 0.0  ;;  %v29775_v5 = vld [vmem:[#allocation66_spill] sm:$0xff] }
 0xbfa   : > { %v13925_v55 = vmax.f32 %v13861_v56, 0.0  ;;  %v14115_v12 = vor.u32 %v14113_v6, %v14112_v54  ;;  %v28526_v51 = vor.u32 %v17837_v59, %v14110_v41  ;;  %v29777_v59 = vld [vmem:[#allocation55_spill] sm:$0xff] }
 0xbfb   : > { %v13926_v37 = vmax.f32 %v13862_v58, 0.0  ;;  %v13530_v13 = vpop.f32.mrb[128].mxu0  ;;  %v14122_v33 = vor.u32 %v14120_v40, %v14119_v7  ;;  %v28517_v44 = vor.u32 %v17839_v11, %v14117_v14 }
 0xbfc   : > { %v28510_v35 = vpack.c.bf16 %v13925_v55, %v13923_v32  ;;  %v21858_v50 = vadd.f32 %v13530_v13, %v27773_v45  ;;  %v13532_v46 = vpop.f32.mrb[129].mxu0  ;;  %v28515_v17 = vsel %vm28416_vm11, 0, %v14115_v12  ;;  %29774 = vst [vmem:[#allocation95_spill] sm:$0xff] %v28526_v51  ;;  %v29799_v51 = vld [vmem:[#allocation61_spill] sm:$0xff] }
 0xbfd   : > { %29772 = vst [vmem:[#allocation93_spill] sm:$0xff] %v28517_v44  ;;  %v28519_v30 = vpack.c.bf16 %v13926_v37, %v13924_v53  ;;  %v21859_v57 = vadd.f32 %v13532_v46, %v27775_v63  ;;  %v13534_v47 = vpop.f32.mrb[130].mxu0  ;;  %v28524_v20 = vsel %vm28416_vm11, 0, %v14122_v33 }
 0xbfe   : > { %29771 = vst [vmem:[#allocation92_spill] sm:$0xff] %v28510_v35  ;;  %v13863_v45 = vadd.f32 %v21858_v50, %v28384_v21  ;;  %v21860_v42 = vadd.f32 %v13534_v47, %v27777_v2  ;;  %v13536_v18 = vpop.f32.mrb[131].mxu0  ;;  %14686 = vmatprep.mubr.bf16.mxu1 %v28524_v20  ;;  %v14124_v16 = vshrl.u32 %v28510_v35, 16  ;;  %v14127_v6 = vshll.u32 %v28510_v35, 16 }
 0xbff   : > { %29773 = vst [vmem:[#allocation94_spill] sm:$0xff] %v28519_v30  ;;  %v13864_v63 = vadd.f32 %v21859_v57, %v28388_v10  ;;  %v21861_v28 = vadd.f32 %v13536_v18, %v29775_v5  ;;  %14687 = vmatmul.mubr.bf16.gmra.mrb[196].mxu1 %v28515_v17  ;;  %v14131_v41 = vshrl.u32 %v28519_v30, 16  ;;  %v14134_v14 = vshll.u32 %v28519_v30, 16 }
 0xc00   : > { %v13865_v40 = vadd.f32 %v21860_v42, %v28384_v21  ;;  %v14126_v2 = vrot.slane %v14124_v16, 7  ;;  %v13927_v58 = vmax.f32 %v13863_v45, 0.0  ;;  %v17841_v13 = vrot.slane %v14127_v6, 1  ;;  %v29780_v42 = vld [vmem:[#allocation53_spill] sm:$0xff] }
 0xc01   : > { %v13866_v56 = vadd.f32 %v21861_v28, %v28388_v10  ;;  %v14133_v54 = vrot.slane %v14131_v41, 7  ;;  %v17843_v55 = vrot.slane %v14134_v14, 1  ;;  %v13928_v12 = vmax.f32 %v13864_v63, 0.0 }
 0xc02   : > { %v13929_v7 = vmax.f32 %v13865_v40, 0.0  ;;  %v14129_v32 = vor.u32 %v14127_v6, %v14126_v2  ;;  %v28556_v6 = vor.u32 %v17841_v13, %v14124_v16 }
 0xc03   : > { %v13930_v11 = vmax.f32 %v13866_v56, 0.0  ;;  %v13540_v53 = vpop.f32.mrb[132].mxu0  ;;  %v14136_v37 = vor.u32 %v14134_v14, %v14133_v54  ;;  %v28547_v47 = vor.u32 %v17843_v55, %v14131_v41  ;;  %v29782_v14 = vld [vmem:[#allocation64_spill] sm:$0xff] }
 0xc04   : > { %v28540_v33 = vpack.c.bf16 %v13929_v7, %v13927_v58  ;;  %v21862_v50 = vadd.f32 %v13540_v53, %v29777_v59  ;;  %v13542_v46 = vpop.f32.mrb[133].mxu0  ;;  %v28545_v57 = vsel %vm28416_vm11, 0, %v14129_v32  ;;  %29781 = vst [vmem:[#allocation53_spill] sm:$0xff] %v28556_v6  ;;  %v29783_v58 = vld [vmem:[#allocation67_spill] sm:$0xff] }
 0xc05   : > { %29778 = vst [vmem:[#allocation55_spill] sm:$0xff] %v28547_v47  ;;  %v28549_v45 = vpack.c.bf16 %v13930_v11, %v13928_v12  ;;  %v21863_v18 = vadd.f32 %v13542_v46, %v29780_v42  ;;  %v13544_v63 = vpop.f32.mrb[134].mxu0  ;;  %v28554_v5 = vsel %vm28416_vm11, 0, %v14136_v37 }
 0xc06   : > { %29776 = vst [vmem:[#allocation66_spill] sm:$0xff] %v28540_v33  ;;  %v13867_v28 = vadd.f32 %v21862_v50, %v28384_v21  ;;  %v21864_v40 = vadd.f32 %v13544_v63, %v29782_v14  ;;  %v13546_v2 = vpop.f32.mrb[135].mxu0  ;;  %14696 = vmatprep.mubr.bf16.mxu1 %v28554_v5  ;;  %v14138_v41 = vshrl.u32 %v28540_v33, 16  ;;  %v14141_v56 = vshll.u32 %v28540_v33, 16 }
 0xc07   : > { %29779 = vst [vmem:[#allocation96_spill] sm:$0xff] %v28549_v45  ;;  %v13868_v54 = vadd.f32 %v21863_v18, %v28388_v10  ;;  %v21865_v7 = vadd.f32 %v13546_v2, %v29783_v58  ;;  %14697 = vmatmul.mubr.bf16.gmra.mrb[200].mxu1 %v28545_v57  ;;  %v14145_v16 = vshrl.u32 %v28549_v45, 16  ;;  %v14148_v32 = vshll.u32 %v28549_v45, 16  ;;  %v29785_v58 = vld [vmem:[#allocation47_spill] sm:$0xff] }
 0xc08   : > { %v13869_v55 = vadd.f32 %v21864_v40, %v28384_v21  ;;  %v14140_v12 = vrot.slane %v14138_v41, 7  ;;  %v13931_v37 = vmax.f32 %v13867_v28, 0.0  ;;  %v17845_v14 = vrot.slane %v14141_v56, 1  ;;  %v29847_v45 = vld [vmem:[#allocation83_spill] sm:$0xff] }
 0xc09   : > { %v13870_v11 = vadd.f32 %v21865_v7, %v28388_v10  ;;  %v14147_v53 = vrot.slane %v14145_v16, 7  ;;  %v17847_v50 = vrot.slane %v14148_v32, 1  ;;  %v13932_v46 = vmax.f32 %v13868_v54, 0.0 }
 0xc0a   : > { %v13933_v13 = vmax.f32 %v13869_v55, 0.0  ;;  %v14143_v59 = vor.u32 %v14141_v56, %v14140_v12  ;;  %v29788_v55 = vld [vmem:[#allocation46_spill] sm:$0xff]  ;;  %v28586_v56 = vor.u32 %v17845_v14, %v14138_v41 }
 0xc0b   : > { %v13934_v42 = vmax.f32 %v13870_v11, 0.0  ;;  %v13550_v18 = vpop.f32.mrb[136].mxu0  ;;  %v14150_v63 = vor.u32 %v14148_v32, %v14147_v53  ;;  %v28577_v7 = vor.u32 %v17847_v50, %v14145_v16  ;;  %v29790_v53 = vld [vmem:[#allocation59_spill] sm:$0xff]  ;;  %v29791_v50 = vld [vmem:[#allocation58_spill] sm:$0xff] }
 0xc0c   : > { %v28570_v2 = vpack.c.bf16 %v13933_v13, %v13931_v37  ;;  %v21866_v52 = vadd.f32 %v13550_v18, %v29785_v58  ;;  %v13552_v39 = vpop.f32.mrb[137].mxu0  ;;  %v28575_v40 = vsel %vm28416_vm11, 0, %v14143_v59  ;;  %29789 = vst [vmem:[#allocation46_spill] sm:$0xff] %v28586_v56 }
 0xc0d   : > { %29786 = vst [vmem:[#allocation67_spill] sm:$0xff] %v28577_v7  ;;  %v28579_v28 = vpack.c.bf16 %v13934_v42, %v13932_v46  ;;  %v21867_v12 = vadd.f32 %v13552_v39, %v29788_v55  ;;  %v13554_v54 = vpop.f32.mrb[138].mxu0  ;;  %v28584_v32 = vsel %vm28416_vm11, 0, %v14150_v63 }
 0xc0e   : > { %29784 = vst [vmem:[#allocation64_spill] sm:$0xff] %v28570_v2  ;;  %v13871_v11 = vadd.f32 %v21866_v52, %v28384_v21  ;;  %v21868_v37 = vadd.f32 %v13554_v54, %v29790_v53  ;;  %v13556_v13 = vpop.f32.mrb[139].mxu0  ;;  %14706 = vmatprep.mubr.bf16.mxu1 %v28584_v32  ;;  %v14152_v16 = vshrl.u32 %v28570_v2, 16  ;;  %v14155_v59 = vshll.u32 %v28570_v2, 16 }
 0xc0f   : > { %29787 = vst [vmem:[#allocation47_spill] sm:$0xff] %v28579_v28  ;;  %v13872_v39 = vadd.f32 %v21867_v12, %v28388_v10  ;;  %v21869_v46 = vadd.f32 %v13556_v13, %v29791_v50  ;;  %14707 = vmatmul.mubr.bf16.gmra.mrb[204].mxu1 %v28575_v40  ;;  %v14159_v41 = vshrl.u32 %v28579_v28, 16  ;;  %v14162_v42 = vshll.u32 %v28579_v28, 16  ;;  %v29839_v28 = vld [vmem:[#allocation79_spill] sm:$0xff] }
 0xc10   : > { %v13873_v52 = vadd.f32 %v21868_v37, %v28384_v21  ;;  %v14154_v18 = vrot.slane %v14152_v16, 7  ;;  %v13935_v58 = vmax.f32 %v13871_v11, 0.0  ;;  %v17849_v50 = vrot.slane %v14155_v59, 1 }
 0xc11   : > { %v13874_v63 = vadd.f32 %v21869_v46, %v28388_v10  ;;  %v14161_v14 = vrot.slane %v14159_v41, 7  ;;  %v17851_v53 = vrot.slane %v14162_v42, 1  ;;  %v13936_v61 = vmax.f32 %v13872_v39, 0.0 }
 0xc12   : > { %v13937_v55 = vmax.f32 %v13873_v52, 0.0  ;;  %v14157_v54 = vor.u32 %v14155_v59, %v14154_v18  ;;  %v28616_v59 = vor.u32 %v17849_v50, %v14152_v16 }
 0xc13   : > { %v13938_v12 = vmax.f32 %v13874_v63, 0.0  ;;  %v13560_v56 = vpop.f32.mrb[140].mxu0  ;;  %v14164_v13 = vor.u32 %v14162_v42, %v14161_v14  ;;  %v28607_v46 = vor.u32 %v17851_v53, %v14159_v41 }
 0xc14   : > { %v28600_v7 = vpack.c.bf16 %v13937_v55, %v13935_v58  ;;  %v21870_v6 = vadd.f32 %v13560_v56, %v27869_v48  ;;  %v13562_v47 = vpop.f32.mrb[141].mxu0  ;;  %v28605_v37 = vsel %vm28416_vm11, 0, %v14157_v54  ;;  %29795 = vst [vmem:[#allocation98_spill] sm:$0xff] %v28616_v59  ;;  %v29796_v56 = vld [vmem:[#allocation50_spill] sm:$0xff] }
 0xc15   : > { %29793 = vst [vmem:[#allocation58_spill] sm:$0xff] %v28607_v46  ;;  %v28609_v11 = vpack.c.bf16 %v13938_v12, %v13936_v61  ;;  %v21871_v52 = vadd.f32 %v13562_v47, %v27871_v1  ;;  %v13564_v39 = vpop.f32.mrb[142].mxu0  ;;  %v28614_v42 = vsel %vm28416_vm11, 0, %v14164_v13  ;;  %v29797_v47 = vld [vmem:[#allocation49_spill] sm:$0xff] }
 0xc16   : > { %29792 = vst [vmem:[#allocation59_spill] sm:$0xff] %v28600_v7  ;;  %v13875_v48 = vadd.f32 %v21870_v6, %v28384_v21  ;;  %v21872_v18 = vadd.f32 %v13564_v39, %v29796_v56  ;;  %v13566_v63 = vpop.f32.mrb[143].mxu0  ;;  %14716 = vmatprep.mubr.bf16.mxu1 %v28614_v42  ;;  %v14166_v41 = vshrl.u32 %v28600_v7, 16  ;;  %v14169_v61 = vshll.u32 %v28600_v7, 16 }
 0xc17   : > { %29794 = vst [vmem:[#allocation97_spill] sm:$0xff] %v28609_v11  ;;  %v13876_v1 = vadd.f32 %v21871_v52, %v28388_v10  ;;  %v21873_v14 = vadd.f32 %v13566_v63, %v29797_v47  ;;  %14717 = vmatmul.mubr.bf16.gmra.mrb[208].mxu1 %v28605_v37  ;;  %v14173_v16 = vshrl.u32 %v28609_v11, 16  ;;  %v14176_v58 = vshll.u32 %v28609_v11, 16  ;;  %v29831_v11 = vld [vmem:[#allocation75_spill] sm:$0xff] }
 0xc18   : > { %v13877_v6 = vadd.f32 %v21872_v18, %v28384_v21  ;;  %v14168_v55 = vrot.slane %v14166_v41, 7  ;;  %v13939_v12 = vmax.f32 %v13875_v48, 0.0  ;;  %v17853_v47 = vrot.slane %v14169_v61, 1 }
 0xc19   : > { %v13878_v54 = vadd.f32 %v21873_v14, %v28388_v10  ;;  %v14175_v53 = vrot.slane %v14173_v16, 7  ;;  %v17855_v39 = vrot.slane %v14176_v58, 1  ;;  %v13940_v56 = vmax.f32 %v13876_v1, 0.0 }
 0xc1a   : > { %v13941_v13 = vmax.f32 %v13877_v6, 0.0  ;;  %v14171_v50 = vor.u32 %v14169_v61, %v14168_v55  ;;  %v29802_v6 = vld [vmem:[#allocation48_spill] sm:$0xff]  ;;  %v28646_v61 = vor.u32 %v17853_v47, %v14166_v41 }
 0xc1b   : > { %v13942_v52 = vmax.f32 %v13878_v54, 0.0  ;;  %v13570_v59 = vpop.f32.mrb[144].mxu0  ;;  %v14178_v63 = vor.u32 %v14176_v58, %v14175_v53  ;;  %v28637_v14 = vor.u32 %v17855_v39, %v14173_v16 }
 0xc1c   : > { %v28630_v46 = vpack.c.bf16 %v13941_v13, %v13939_v12  ;;  %v21874_v44 = vadd.f32 %v13570_v59, %v29799_v51  ;;  %v13572_v49 = vpop.f32.mrb[145].mxu0  ;;  %v28635_v18 = vsel %vm28416_vm11, 0, %v14171_v50  ;;  %29803 = vst [vmem:[#allocation48_spill] sm:$0xff] %v28646_v61  ;;  %v29804_v59 = vld [vmem:[#allocation51_spill] sm:$0xff]  ;;  %v29805_v13 = vld [vmem:[#allocation52_spill] sm:$0xff] }
 0xc1d   : > { %29800 = vst [vmem:[#allocation49_spill] sm:$0xff] %v28637_v14  ;;  %v28639_v48 = vpack.c.bf16 %v13942_v52, %v13940_v56  ;;  %v21875_v55 = vadd.f32 %v13572_v49, %v29802_v6  ;;  %v13574_v1 = vpop.f32.mrb[146].mxu0  ;;  %v28644_v58 = vsel %vm28416_vm11, 0, %v14178_v63 }
 0xc1e   : > { %29798 = vst [vmem:[#allocation50_spill] sm:$0xff] %v28630_v46  ;;  %v13879_v51 = vadd.f32 %v21874_v44, %v28384_v21  ;;  %v21876_v54 = vadd.f32 %v13574_v1, %v29804_v59  ;;  %v13576_v53 = vpop.f32.mrb[147].mxu0  ;;  %14726 = vmatprep.mubr.bf16.mxu1 %v28644_v58  ;;  %v14180_v16 = vshrl.u32 %v28630_v46, 16  ;;  %v14183_v12 = vshll.u32 %v28630_v46, 16 }
 0xc1f   : > { %29801 = vst [vmem:[#allocation61_spill] sm:$0xff] %v28639_v48  ;;  %v13880_v49 = vadd.f32 %v21875_v55, %v28388_v10  ;;  %v21877_v50 = vadd.f32 %v13576_v53, %v29805_v13  ;;  %14727 = vmatmul.mubr.bf16.gmra.mrb[212].mxu1 %v28635_v18  ;;  %v14187_v41 = vshrl.u32 %v28639_v48, 16  ;;  %v14190_v39 = vshll.u32 %v28639_v48, 16  ;;  %v29823_v48 = vld [vmem:[#allocation70_spill] sm:$0xff] }
 0xc20   : > { %v13881_v44 = vadd.f32 %v21876_v54, %v28384_v21  ;;  %v14182_v56 = vrot.slane %v14180_v16, 7  ;;  %v13943_v47 = vmax.f32 %v13879_v51, 0.0  ;;  %v17857_v13 = vrot.slane %v14183_v12, 1 }
 0xc21   : > { %v13882_v52 = vadd.f32 %v21877_v50, %v28388_v10  ;;  %v14189_v63 = vrot.slane %v14187_v41, 7  ;;  %v17859_v59 = vrot.slane %v14190_v39, 1  ;;  %v13944_v61 = vmax.f32 %v13880_v49, 0.0 }
 0xc22   : > { %v13945_v6 = vmax.f32 %v13881_v44, 0.0  ;;  %v14185_v1 = vor.u32 %v14183_v12, %v14182_v56  ;;  %v29810_v44 = vld [vmem:[#allocation56_spill] sm:$0xff]  ;;  %v28676_v12 = vor.u32 %v17857_v13, %v14180_v16 }
 0xc23   : > { %v13946_v55 = vmax.f32 %v13882_v52, 0.0  ;;  %v13580_v14 = vpop.f32.mrb[148].mxu0  ;;  %v14192_v53 = vor.u32 %v14190_v39, %v14189_v63  ;;  %v28667_v50 = vor.u32 %v17859_v59, %v14187_v41 }
 0xc24   : > { %v28660_v9 = vpack.c.bf16 %v13945_v6, %v13943_v47  ;;  %v21878_v23 = vadd.f32 %v13580_v14, %v29807_v27  ;;  %v13582_v43 = vpop.f32.mrb[149].mxu0  ;;  %v28665_v54 = vsel %vm28416_vm11, 0, %v14185_v1  ;;  %29811 = vst [vmem:[#allocation56_spill] sm:$0xff] %v28676_v12  ;;  %v29812_v14 = vld [vmem:[#allocation57_spill] sm:$0xff]  ;;  %v29813_v47 = vld [vmem:[#allocation60_spill] sm:$0xff] }
 0xc25   : > { %29808 = vst [vmem:[#allocation52_spill] sm:$0xff] %v28667_v50  ;;  %v28669_v51 = vpack.c.bf16 %v13946_v55, %v13944_v61  ;;  %v21879_v56 = vadd.f32 %v13582_v43, %v29810_v44  ;;  %v13584_v49 = vpop.f32.mrb[150].mxu0  ;;  %v28674_v39 = vsel %vm28416_vm11, 0, %v14192_v53 }
 0xc26   : > { %29806 = vst [vmem:[#allocation51_spill] sm:$0xff] %v28660_v9  ;;  %v13883_v27 = vadd.f32 %v21878_v23, %v28384_v21  ;;  %v21880_v52 = vadd.f32 %v13584_v49, %v29812_v14  ;;  %v13586_v63 = vpop.f32.mrb[151].mxu0  ;;  %14736 = vmatprep.mubr.bf16.mxu1 %v28674_v39  ;;  %v14194_v41 = vshrl.u32 %v28660_v9, 16  ;;  %v14197_v61 = vshll.u32 %v28660_v9, 16  ;;  %v29815_v9 = vld [vmem:[#allocation62_spill] sm:$0xff] }
 0xc27   : > { %29809 = vst [vmem:[#allocation54_spill] sm:$0xff] %v28669_v51  ;;  %v13884_v43 = vadd.f32 %v21879_v56, %v28388_v10  ;;  %v21881_v6 = vadd.f32 %v13586_v63, %v29813_v47  ;;  %14737 = vmatmul.mubr.bf16.gmra.mrb[216].mxu1 %v28665_v54  ;;  %v14201_v16 = vshrl.u32 %v28669_v51, 16  ;;  %v14204_v1 = vshll.u32 %v28669_v51, 16 }
 0xc28   : > { %v13885_v23 = vadd.f32 %v21880_v52, %v28384_v21  ;;  %v14196_v59 = vrot.slane %v14194_v41, 7  ;;  %v13947_v13 = vmax.f32 %v13883_v27, 0.0  ;;  %v17861_v47 = vrot.slane %v14197_v61, 1 }
 0xc29   : > { %v13886_v55 = vadd.f32 %v21881_v6, %v28388_v10  ;;  %v14203_v53 = vrot.slane %v14201_v16, 7  ;;  %v17863_v14 = vrot.slane %v14204_v1, 1  ;;  %v13948_v12 = vmax.f32 %v13884_v43, 0.0 }
 0xc2a   : > { %v13949_v44 = vmax.f32 %v13885_v23, 0.0  ;;  %v14199_v49 = vor.u32 %v14197_v61, %v14196_v59  ;;  %v29818_v23 = vld [vmem:[#allocation63_spill] sm:$0xff]  ;;  %v28706_v61 = vor.u32 %v17861_v47, %v14194_v41 }
 0xc2b   : > { %v13950_v56 = vmax.f32 %v13886_v55, 0.0  ;;  %v13590_v50 = vpop.f32.mrb[152].mxu0  ;;  %v14206_v63 = vor.u32 %v14204_v1, %v14203_v53  ;;  %v28697_v6 = vor.u32 %v17863_v14, %v14201_v16 }
 0xc2c   : > { %v28690_v31 = vpack.c.bf16 %v13949_v44, %v13947_v13  ;;  %v21882_v46 = vadd.f32 %v13590_v50, %v29815_v9  ;;  %v13592_v51 = vpop.f32.mrb[153].mxu0  ;;  %v28695_v52 = vsel %vm28416_vm11, 0, %v14199_v49  ;;  %29819 = vst [vmem:[#allocation63_spill] sm:$0xff] %v28706_v61  ;;  %v29820_v50 = vld [vmem:[#allocation65_spill] sm:$0xff]  ;;  %v29821_v13 = vld [vmem:[#allocation68_spill] sm:$0xff] }
 0xc2d   : > { %29816 = vst [vmem:[#allocation60_spill] sm:$0xff] %v28697_v6  ;;  %v28699_v27 = vpack.c.bf16 %v13950_v56, %v13948_v12  ;;  %v21883_v59 = vadd.f32 %v13592_v51, %v29818_v23  ;;  %v13594_v43 = vpop.f32.mrb[154].mxu0  ;;  %v28704_v1 = vsel %vm28416_vm11, 0, %v14206_v63 }
 0xc2e   : > { %29814 = vst [vmem:[#allocation57_spill] sm:$0xff] %v28690_v31  ;;  %v13887_v9 = vadd.f32 %v21882_v46, %v28384_v21  ;;  %v21884_v55 = vadd.f32 %v13594_v43, %v29820_v50  ;;  %v13596_v53 = vpop.f32.mrb[155].mxu0  ;;  %14746 = vmatprep.mubr.bf16.mxu1 %v28704_v1  ;;  %v14208_v16 = vshrl.u32 %v28690_v31, 16  ;;  %v14211_v12 = vshll.u32 %v28690_v31, 16 }
 0xc2f   : > { %29817 = vst [vmem:[#allocation62_spill] sm:$0xff] %v28699_v27  ;;  %v13888_v51 = vadd.f32 %v21883_v59, %v28388_v10  ;;  %v21885_v44 = vadd.f32 %v13596_v53, %v29821_v13  ;;  %14747 = vmatmul.mubr.bf16.gmra.mrb[220].mxu1 %v28695_v52  ;;  %v14215_v41 = vshrl.u32 %v28699_v27, 16  ;;  %v14218_v49 = vshll.u32 %v28699_v27, 16 }
 0xc30   : > { %v13889_v46 = vadd.f32 %v21884_v55, %v28384_v21  ;;  %v14210_v14 = vrot.slane %v14208_v16, 7  ;;  %v13951_v47 = vmax.f32 %v13887_v9, 0.0  ;;  %v17865_v13 = vrot.slane %v14211_v12, 1 }
 0xc31   : > { %v13890_v56 = vadd.f32 %v21885_v44, %v28388_v10  ;;  %v14217_v63 = vrot.slane %v14215_v41, 7  ;;  %v17867_v50 = vrot.slane %v14218_v49, 1  ;;  %v13952_v61 = vmax.f32 %v13888_v51, 0.0 }
 0xc32   : > { %v13953_v23 = vmax.f32 %v13889_v46, 0.0  ;;  %v14213_v43 = vor.u32 %v14211_v12, %v14210_v14  ;;  %v29826_v46 = vld [vmem:[#allocation69_spill] sm:$0xff]  ;;  %v28736_v12 = vor.u32 %v17865_v13, %v14208_v16 }
 0xc33   : > { %v13954_v59 = vmax.f32 %v13890_v56, 0.0  ;;  %v13600_v6 = vpop.f32.mrb[156].mxu0  ;;  %v14220_v53 = vor.u32 %v14218_v49, %v14217_v63  ;;  %v28727_v44 = vor.u32 %v17867_v50, %v14215_v41 }
 0xc34   : > { %v28720_v31 = vpack.c.bf16 %v13953_v23, %v13951_v47  ;;  %v21886_v7 = vadd.f32 %v13600_v6, %v29823_v48  ;;  %v13602_v27 = vpop.f32.mrb[157].mxu0  ;;  %v28725_v55 = vsel %vm28416_vm11, 0, %v14213_v43  ;;  %29827 = vst [vmem:[#allocation69_spill] sm:$0xff] %v28736_v12  ;;  %v29828_v6 = vld [vmem:[#allocation72_spill] sm:$0xff]  ;;  %v29829_v47 = vld [vmem:[#allocation74_spill] sm:$0xff] }
 0xc35   : > { %29824 = vst [vmem:[#allocation68_spill] sm:$0xff] %v28727_v44  ;;  %v28729_v9 = vpack.c.bf16 %v13954_v59, %v13952_v61  ;;  %v21887_v14 = vadd.f32 %v13602_v27, %v29826_v46  ;;  %v13604_v51 = vpop.f32.mrb[158].mxu0  ;;  %v28734_v49 = vsel %vm28416_vm11, 0, %v14220_v53 }
 0xc36   : > { %29822 = vst [vmem:[#allocation65_spill] sm:$0xff] %v28720_v31  ;;  %v13891_v48 = vadd.f32 %v21886_v7, %v28384_v21  ;;  %v21888_v56 = vadd.f32 %v13604_v51, %v29828_v6  ;;  %v13606_v63 = vpop.f32.mrb[159].mxu0  ;;  %14756 = vmatprep.mubr.bf16.mxu1 %v28734_v49  ;;  %v14222_v41 = vshrl.u32 %v28720_v31, 16  ;;  %v14225_v61 = vshll.u32 %v28720_v31, 16 }
 0xc37   : > { %29825 = vst [vmem:[#allocation70_spill] sm:$0xff] %v28729_v9  ;;  %v13892_v27 = vadd.f32 %v21887_v14, %v28388_v10  ;;  %v21889_v23 = vadd.f32 %v13606_v63, %v29829_v47  ;;  %14757 = vmatmul.mubr.bf16.gmra.mrb[224].mxu1 %v28725_v55  ;;  %v14229_v16 = vshrl.u32 %v28729_v9, 16  ;;  %v14232_v43 = vshll.u32 %v28729_v9, 16 }
 0xc38   : > { %v13893_v7 = vadd.f32 %v21888_v56, %v28384_v21  ;;  %v14224_v50 = vrot.slane %v14222_v41, 7  ;;  %v13955_v13 = vmax.f32 %v13891_v48, 0.0  ;;  %v17869_v47 = vrot.slane %v14225_v61, 1 }
 0xc39   : > { %v13894_v59 = vadd.f32 %v21889_v23, %v28388_v10  ;;  %v14231_v53 = vrot.slane %v14229_v16, 7  ;;  %v17871_v6 = vrot.slane %v14232_v43, 1  ;;  %v13956_v12 = vmax.f32 %v13892_v27, 0.0 }
 0xc3a   : > { %v13957_v46 = vmax.f32 %v13893_v7, 0.0  ;;  %v14227_v51 = vor.u32 %v14225_v61, %v14224_v50  ;;  %v29834_v7 = vld [vmem:[#allocation76_spill] sm:$0xff]  ;;  %v28766_v61 = vor.u32 %v17869_v47, %v14222_v41 }
 0xc3b   : > { %v13958_v14 = vmax.f32 %v13894_v59, 0.0  ;;  %v13610_v44 = vpop.f32.mrb[160].mxu0  ;;  %v14234_v63 = vor.u32 %v14232_v43, %v14231_v53  ;;  %v28757_v23 = vor.u32 %v17871_v6, %v14229_v16 }
 0xc3c   : > { %v28750_v31 = vpack.c.bf16 %v13957_v46, %v13955_v13  ;;  %v21890_v2 = vadd.f32 %v13610_v44, %v29831_v11  ;;  %v13612_v9 = vpop.f32.mrb[161].mxu0  ;;  %v28755_v56 = vsel %vm28416_vm11, 0, %v14227_v51  ;;  %29835 = vst [vmem:[#allocation76_spill] sm:$0xff] %v28766_v61  ;;  %v29836_v44 = vld [vmem:[#allocation77_spill] sm:$0xff]  ;;  %v29837_v13 = vld [vmem:[#allocation78_spill] sm:$0xff] }
 0xc3d   : > { %29832 = vst [vmem:[#allocation74_spill] sm:$0xff] %v28757_v23  ;;  %v28759_v48 = vpack.c.bf16 %v13958_v14, %v13956_v12  ;;  %v21891_v50 = vadd.f32 %v13612_v9, %v29834_v7  ;;  %v13614_v27 = vpop.f32.mrb[162].mxu0  ;;  %v28764_v43 = vsel %vm28416_vm11, 0, %v14234_v63 }
 0xc3e   : > { %29830 = vst [vmem:[#allocation72_spill] sm:$0xff] %v28750_v31  ;;  %v13895_v11 = vadd.f32 %v21890_v2, %v28384_v21  ;;  %v21892_v59 = vadd.f32 %v13614_v27, %v29836_v44  ;;  %v13616_v53 = vpop.f32.mrb[163].mxu0  ;;  %14766 = vmatprep.mubr.bf16.mxu1 %v28764_v43  ;;  %v14236_v16 = vshrl.u32 %v28750_v31, 16  ;;  %v14239_v12 = vshll.u32 %v28750_v31, 16 }
 0xc3f   : > { %29833 = vst [vmem:[#allocation75_spill] sm:$0xff] %v28759_v48  ;;  %v13896_v9 = vadd.f32 %v21891_v50, %v28388_v10  ;;  %v21893_v46 = vadd.f32 %v13616_v53, %v29837_v13  ;;  %14767 = vmatmul.mubr.bf16.gmra.mrb[228].mxu1 %v28755_v56  ;;  %v14243_v41 = vshrl.u32 %v28759_v48, 16  ;;  %v14246_v51 = vshll.u32 %v28759_v48, 16 }
 0xc40   : > { %v13897_v2 = vadd.f32 %v21892_v59, %v28384_v21  ;;  %v14238_v6 = vrot.slane %v14236_v16, 7  ;;  %v13959_v47 = vmax.f32 %v13895_v11, 0.0  ;;  %v17873_v13 = vrot.slane %v14239_v12, 1 }
 0xc41   : > { %v13898_v14 = vadd.f32 %v21893_v46, %v28388_v10  ;;  %v14245_v63 = vrot.slane %v14243_v41, 7  ;;  %v17875_v44 = vrot.slane %v14246_v51, 1  ;;  %v13960_v61 = vmax.f32 %v13896_v9, 0.0 }
 0xc42   : > { %v13961_v7 = vmax.f32 %v13897_v2, 0.0  ;;  %v14241_v27 = vor.u32 %v14239_v12, %v14238_v6  ;;  %v29842_v2 = vld [vmem:[#allocation80_spill] sm:$0xff]  ;;  %v28796_v12 = vor.u32 %v17873_v13, %v14236_v16 }
 0xc43   : > { %v13962_v50 = vmax.f32 %v13898_v14, 0.0  ;;  %v13620_v23 = vpop.f32.mrb[164].mxu0  ;;  %v14248_v53 = vor.u32 %v14246_v51, %v14245_v63  ;;  %v28787_v46 = vor.u32 %v17875_v44, %v14243_v41 }
 0xc44   : > { %v28780_v31 = vpack.c.bf16 %v13961_v7, %v13959_v47  ;;  %v21894_v33 = vadd.f32 %v13620_v23, %v29839_v28  ;;  %v13622_v48 = vpop.f32.mrb[165].mxu0  ;;  %v28785_v59 = vsel %vm28416_vm11, 0, %v14241_v27  ;;  %29843 = vst [vmem:[#allocation80_spill] sm:$0xff] %v28796_v12  ;;  %v29844_v23 = vld [vmem:[#allocation81_spill] sm:$0xff]  ;;  %v29845_v47 = vld [vmem:[#allocation82_spill] sm:$0xff] }
 0xc45   : > { %29840 = vst [vmem:[#allocation78_spill] sm:$0xff] %v28787_v46  ;;  %v28789_v11 = vpack.c.bf16 %v13962_v50, %v13960_v61  ;;  %v21895_v6 = vadd.f32 %v13622_v48, %v29842_v2  ;;  %v13624_v9 = vpop.f32.mrb[166].mxu0  ;;  %v28794_v51 = vsel %vm28416_vm11, 0, %v14248_v53 }
 0xc46   : > { %29838 = vst [vmem:[#allocation77_spill] sm:$0xff] %v28780_v31  ;;  %v13899_v28 = vadd.f32 %v21894_v33, %v28384_v21  ;;  %v21896_v14 = vadd.f32 %v13624_v9, %v29844_v23  ;;  %v13626_v63 = vpop.f32.mrb[167].mxu0  ;;  %14776 = vmatprep.mubr.bf16.mxu1 %v28794_v51  ;;  %v14250_v41 = vshrl.u32 %v28780_v31, 16  ;;  %v14253_v61 = vshll.u32 %v28780_v31, 16 }
 0xc47   : > { %29841 = vst [vmem:[#allocation79_spill] sm:$0xff] %v28789_v11  ;;  %v13900_v48 = vadd.f32 %v21895_v6, %v28388_v10  ;;  %v21897_v7 = vadd.f32 %v13626_v63, %v29845_v47  ;;  %14777 = vmatmul.mubr.bf16.gmra.mrb[232].mxu1 %v28785_v59  ;;  %v14257_v16 = vshrl.u32 %v28789_v11, 16  ;;  %v14260_v27 = vshll.u32 %v28789_v11, 16 }
 0xc48   : > { %v13901_v33 = vadd.f32 %v21896_v14, %v28384_v21  ;;  %v14252_v44 = vrot.slane %v14250_v41, 7  ;;  %v13963_v13 = vmax.f32 %v13899_v28, 0.0  ;;  %v17877_v47 = vrot.slane %v14253_v61, 1 }
 0xc49   : > { %v13902_v50 = vadd.f32 %v21897_v7, %v28388_v10  ;;  %v14259_v53 = vrot.slane %v14257_v16, 7  ;;  %v17879_v23 = vrot.slane %v14260_v27, 1  ;;  %v13964_v12 = vmax.f32 %v13900_v48, 0.0 }
 0xc4a   : > { %v13965_v2 = vmax.f32 %v13901_v33, 0.0  ;;  %v14255_v9 = vor.u32 %v14253_v61, %v14252_v44  ;;  %v29849_v33 = vld [vmem:[#allocation84_spill] sm:$0xff]  ;;  %v28826_v61 = vor.u32 %v17877_v47, %v14250_v41 }
 0xc4b   : > { %v13966_v6 = vmax.f32 %v13902_v50, 0.0  ;;  %v13630_v46 = vpop.f32.mrb[168].mxu0  ;;  %v14262_v63 = vor.u32 %v14260_v27, %v14259_v53  ;;  %v28817_v7 = vor.u32 %v17879_v23, %v14257_v16 }
 0xc4c   : > { %v28810_v31 = vpack.c.bf16 %v13965_v2, %v13963_v13  ;;  %v21898_v35 = vadd.f32 %v13630_v46, %v29847_v45  ;;  %v13632_v11 = vpop.f32.mrb[169].mxu0  ;;  %v28815_v14 = vsel %vm28416_vm11, 0, %v14255_v9  ;;  %29850 = vst [vmem:[#allocation83_spill] sm:$0xff] %v28826_v61  ;;  %v29851_v46 = vld [vmem:[#allocation85_spill] sm:$0xff]  ;;  %v29852_v13 = vld [vmem:[#allocation86_spill] sm:$0xff] }
 0xc4d   : > { %29848 = vst [vmem:[#allocation82_spill] sm:$0xff] %v28817_v7  ;;  %v28819_v28 = vpack.c.bf16 %v13966_v6, %v13964_v12  ;;  %v21899_v44 = vadd.f32 %v13632_v11, %v29849_v33  ;;  %v13634_v48 = vpop.f32.mrb[170].mxu0  ;;  %v28824_v27 = vsel %vm28416_vm11, 0, %v14262_v63 }
 0xc4e   : > { %29846 = vst [vmem:[#allocation81_spill] sm:$0xff] %v28810_v31  ;;  %v13903_v45 = vadd.f32 %v21898_v35, %v28384_v21  ;;  %v21900_v50 = vadd.f32 %v13634_v48, %v29851_v46  ;;  %v13636_v53 = vpop.f32.mrb[171].mxu0  ;;  %14786 = vmatprep.mubr.bf16.mxu1 %v28824_v27  ;;  %v14264_v16 = vshrl.u32 %v28810_v31, 16  ;;  %v14267_v12 = vshll.u32 %v28810_v31, 16 }
 0xc4f   : > { %v13904_v11 = vadd.f32 %v21899_v44, %v28388_v10  ;;  %v21901_v2 = vadd.f32 %v13636_v53, %v29852_v13  ;;  %14787 = vmatmul.mubr.bf16.gmra.mrb[236].mxu1 %v28815_v14  ;;  %v14271_v41 = vshrl.u32 %v28819_v28, 16  ;;  %v14274_v9 = vshll.u32 %v28819_v28, 16 }
 0xc50   : > { %v13905_v35 = vadd.f32 %v21900_v50, %v28384_v21  ;;  %v14266_v23 = vrot.slane %v14264_v16, 7  ;;  %v13967_v47 = vmax.f32 %v13903_v45, 0.0  ;;  %v17881_v53 = vrot.slane %v14267_v12, 1 }
 0xc51   : > { %v13906_v6 = vadd.f32 %v21901_v2, %v28388_v10  ;;  %v14273_v63 = vrot.slane %v14271_v41, 7  ;;  %v17883_v46 = vrot.slane %v14274_v9, 1  ;;  %v13968_v61 = vmax.f32 %v13904_v11, 0.0 }
 0xc52   : > { %v13969_v33 = vmax.f32 %v13905_v35, 0.0  ;;  %v14269_v48 = vor.u32 %v14267_v12, %v14266_v23  ;;  %v28850_v10 = vor.u32 %v17881_v53, %v14264_v16  ;;  %v24392_v35 = vld [vmem:[#allocation24 + $0x610] ss:$8 sps:$4 sm:$0xff]   ;;  %v24397_v23 = vld [vmem:[#allocation24 + $0x624] ss:$8 sps:$4 sm:$0xff]  }
 0xc53   : > { %v13970_v44 = vmax.f32 %v13906_v6, 0.0  ;;  %v14276_v7 = vor.u32 %v14274_v9, %v14273_v63  ;;  %v28842_v31 = vor.u32 %v17883_v46, %v14271_v41  ;;  %v24389_v9 = vld [vmem:[#allocation24 + $0x600] ss:$8 sps:$4 sm:$0xff]   ;;  %v24400_v63 = vld [vmem:[#allocation24 + $0x634] ss:$8 sps:$4 sm:$0xff]  }
 0xc54   : > { %v28840_v13 = vpack.c.bf16 %v13969_v33, %v13967_v47  ;;  %v28855_v45 = vsel %vm28416_vm11, 0, %v14269_v48  ;;  %v24395_v6 = vld [vmem:[#allocation24 + $0x620] ss:$8 sps:$4 sm:$0xff]   ;;  %v24398_v47 = vld [vmem:[#allocation24 + $0x630] ss:$8 sps:$4 sm:$0xff]  }
 0xc55   : > { %v28844_v30 = vpack.c.bf16 %v13970_v44, %v13968_v61  ;;  %v28848_v21 = vsel %vm28416_vm11, 0, %v14276_v7  ;;  %v24403_v33 = vld [vmem:[#allocation24 + $0x644] ss:$8 sps:$4 sm:$0xff]   ;;  %v24406_v48 = vld [vmem:[#allocation24 + $0x654] ss:$8 sps:$4 sm:$0xff]  }
 0xc56   : > { %14796 = vmatprep.mubr.bf16.mxu1 %v28848_v21  ;;  %v14281_v50 = vshll.u32 %v28840_v13, 16  ;;  %v14278_v61 = vshrl.u32 %v28840_v13, 16  ;;  %v24404_v46 = vld [vmem:[#allocation24 + $0x650] ss:$8 sps:$4 sm:$0xff]   ;;  %v24409_v44 = vld [vmem:[#allocation24 + $0x664] ss:$8 sps:$4 sm:$0xff]  }
 0xc57   : > { %14797 = vmatmul.mubr.bf16.gmra.mrb[240].mxu1 %v28855_v45  ;;  %v14288_v12 = vshll.u32 %v28844_v30, 16  ;;  %v14285_v16 = vshrl.u32 %v28844_v30, 16  ;;  %v24407_v53 = vld [vmem:[#allocation24 + $0x660] ss:$8 sps:$4 sm:$0xff]  }
 0xc58   : > { %15224 = vmatprep.mubr.bf16.mxu1 %v28432_v34  ;;  %v17885_v7 = vrot.slane %v14281_v50, 1  ;;  %v24394_v34 = vld [vmem:[#allocation24 + $0x614] ss:$8 sps:$4 sm:$0xff]  }
 0xc59   : > { %v17887_v11 = vrot.slane %v14288_v12, 1 }
 0xc5a   : > { %v28869_v2 = vor.u32 %v17885_v7, %v14278_v61  ;;  %v24412_v7 = vld [vmem:[#allocation24 + $0x674] ss:$8 sps:$4 sm:$0xff]  }
 0xc5b   : > { %v28873_v41 = vor.u32 %v17887_v11, %v14285_v16  ;;  %v24410_v11 = vld [vmem:[#allocation24 + $0x670] ss:$8 sps:$4 sm:$0xff]  }
 0xc5f   : > { %15225 = vmatmul.mubr.bf16.vlgmr.msra.gmra.mrb[180].mxu1 %v28436_v15  ;;  %v24401_v15 = vld [vmem:[#allocation24 + $0x640] ss:$8 sps:$4 sm:$0xff]  }
 0xc60   : > { %15234 = vmatprep.mubr.bf16.mxu1 %v28464_v38  ;;  %15771 = vmatpush1.bf16.msra.mxu1 %v24389_v9  ;;  %v24415_v9 = vld [vmem:[#allocation24 + $0x684] ss:$8 sps:$4 sm:$0xff]  }
 0xc61   : > { %15772 = vmatprep.subr.bf16.mxu1 %v24394_v34  ;;  %v24413_v34 = vld [vmem:[#allocation24 + $0x680] ss:$8 sps:$4 sm:$0xff]  }
 0xc64   : > { %15773 = vmatpush1.bf16.msra.mxu1 %v24392_v35  ;;  %v24418_v35 = vld [vmem:[#allocation24 + $0x694] ss:$8 sps:$4 sm:$0xff]  }
 0xc65   : > { %15774 = vmatprep.subr.bf16.mxu1 %v24397_v23  ;;  %v24416_v23 = vld [vmem:[#allocation24 + $0x690] ss:$8 sps:$4 sm:$0xff]  }
 0xc67   : > { %15235 = vmatmul.mubr.bf16.gmra.mrb[184].mxu1 %v28455_v3 }
 0xc68   : > { %15244 = vmatprep.mubr.bf16.mxu1 %v28494_v0  ;;  %15775 = vmatpush1.bf16.msra.mxu1 %v24395_v6  ;;  %v24421_v6 = vld [vmem:[#allocation24 + $0x6a4] ss:$8 sps:$4 sm:$0xff]  }
 0xc69   : > { %15776 = vmatprep.subr.bf16.mxu1 %v24400_v63  ;;  %v24419_v63 = vld [vmem:[#allocation24 + $0x6a0] ss:$8 sps:$4 sm:$0xff]  }
 0xc6c   : > { %15777 = vmatpush1.bf16.msra.mxu1 %v24398_v47  ;;  %v24424_v47 = vld [vmem:[#allocation24 + $0x6b4] ss:$8 sps:$4 sm:$0xff]  }
 0xc6d   : > { %15778 = vmatprep.subr.bf16.mxu1 %v24403_v33  ;;  %v24422_v33 = vld [vmem:[#allocation24 + $0x6b0] ss:$8 sps:$4 sm:$0xff]  }
 0xc6f   : > { %15245 = vmatmul.mubr.bf16.gmra.mrb[188].mxu1 %v28485_v22 }
 0xc70   : > { %15254 = vmatprep.mubr.bf16.mxu1 %v28524_v20  ;;  %15779 = vmatpush1.bf16.msra.mxu1 %v24401_v15  ;;  %v24427_v15 = vld [vmem:[#allocation24 + $0x6c4] ss:$8 sps:$4 sm:$0xff]  }
 0xc71   : > { %15780 = vmatprep.subr.bf16.mxu1 %v24406_v48  ;;  %v24425_v48 = vld [vmem:[#allocation24 + $0x6c0] ss:$8 sps:$4 sm:$0xff]  }
 0xc74   : > { %15781 = vmatpush1.bf16.msra.mxu1 %v24404_v46  ;;  %v24430_v46 = vld [vmem:[#allocation24 + $0x6d4] ss:$8 sps:$4 sm:$0xff]  }
 0xc75   : > { %15782 = vmatprep.subr.bf16.mxu1 %v24409_v44  ;;  %v24428_v44 = vld [vmem:[#allocation24 + $0x6d0] ss:$8 sps:$4 sm:$0xff]  }
 0xc77   : > { %15255 = vmatmul.mubr.bf16.gmra.mrb[192].mxu1 %v28515_v17 }
 0xc78   : > { %15264 = vmatprep.mubr.bf16.mxu1 %v28554_v5  ;;  %15783 = vmatpush1.bf16.msra.mxu1 %v24407_v53  ;;  %v24433_v53 = vld [vmem:[#allocation24 + $0x6e4] ss:$8 sps:$4 sm:$0xff]  }
 0xc79   : > { %15784 = vmatprep.subr.bf16.mxu1 %v24412_v7  ;;  %v24431_v7 = vld [vmem:[#allocation24 + $0x6e0] ss:$8 sps:$4 sm:$0xff]  }
 0xc7c   : > { %15785 = vmatpush1.bf16.msra.mxu1 %v24410_v11  ;;  %v24436_v11 = vld [vmem:[#allocation24 + $0x6f4] ss:$8 sps:$4 sm:$0xff]  }
 0xc7d   : > { %15786 = vmatprep.subr.bf16.mxu1 %v24415_v9  ;;  %v24434_v9 = vld [vmem:[#allocation24 + $0x6f0] ss:$8 sps:$4 sm:$0xff]  }
 0xc7f   : > { %15265 = vmatmul.mubr.bf16.gmra.mrb[196].mxu1 %v28545_v57 }
 0xc80   : > { %15274 = vmatprep.mubr.bf16.mxu1 %v28584_v32  ;;  %15787 = vmatpush1.bf16.msra.mxu1 %v24413_v34  ;;  %v24439_v34 = vld [vmem:[#allocation24 + $0x104] ss:$8 sps:$4 sm:$0xff]  }
 0xc81   : > { %15788 = vmatprep.subr.bf16.mxu1 %v24418_v35  ;;  %v14287_v35 = vrot.slane %v14285_v16, 7 }
 0xc84   : > { %15789 = vmatpush1.bf16.msra.mxu1 %v24416_v23  ;;  %v14290_v23 = vor.u32 %v14288_v12, %v14287_v35  ;;  %v24437_v12 = vld [vmem:[#allocation24 + $0x100] ss:$8 sps:$4 sm:$0xff]   ;;  %v24475_v35 = vld [vmem:[#allocation24 + $0x1c4] ss:$8 sps:$4 sm:$0xff]  }
 0xc85   : > { %15790 = vmatprep.subr.bf16.mxu1 %v24421_v6  ;;  %v14280_v6 = vrot.slane %v14278_v61, 7  ;;  %v24442_v61 = vld [vmem:[#allocation24 + $0x114] ss:$8 sps:$4 sm:$0xff]  }
 0xc87   : > { %15275 = vmatmul.mubr.bf16.gmra.mrb[200].mxu1 %v28575_v40 }
 0xc88   : > { %15284 = vmatprep.mubr.bf16.mxu1 %v28614_v42  ;;  %15791 = vmatpush1.bf16.msra.mxu1 %v24419_v63  ;;  %v28912_v63 = vsel %vm28416_vm11, 0, %v14290_v23  ;;  %v24476_v23 = vld [vmem:[#allocation24 + $0x1d0] ss:$8 sps:$4 sm:$0xff]  }
 0xc89   : > { %15792 = vmatprep.subr.bf16.mxu1 %v24424_v47  ;;  %v14283_v47 = vor.u32 %v14281_v50, %v14280_v6  ;;  %v24443_v50 = vld [vmem:[#allocation24 + $0x120] ss:$8 sps:$4 sm:$0xff]   ;;  %v24481_v6 = vld [vmem:[#allocation24 + $0x1e4] ss:$8 sps:$4 sm:$0xff]  }
 0xc8b   : > { %v28919_v16 = vsel %vm28416_vm11, 0, %v14283_v47  ;;  %v24482_v47 = vld [vmem:[#allocation24 + $0x1f0] ss:$8 sps:$4 sm:$0xff]  }
 0xc8c   : > { %15793 = vmatpush1.bf16.msra.mxu1 %v24422_v33  ;;  %v24440_v33 = vld [vmem:[#allocation24 + $0x110] ss:$8 sps:$4 sm:$0xff]  }
 0xc8d   : > { %15794 = vmatprep.subr.bf16.mxu1 %v24427_v15  ;;  %v24445_v15 = vld [vmem:[#allocation24 + $0x124] ss:$8 sps:$4 sm:$0xff]  }
 0xc8f   : > { %15285 = vmatmul.mubr.bf16.gmra.mrb[204].mxu1 %v28605_v37 }
 0xc90   : > { %15294 = vmatprep.mubr.bf16.mxu1 %v28644_v58  ;;  %15795 = vmatpush1.bf16.msra.mxu1 %v24425_v48  ;;  %v24451_v48 = vld [vmem:[#allocation24 + $0x144] ss:$8 sps:$4 sm:$0xff]  }
 0xc91   : > { %15796 = vmatprep.subr.bf16.mxu1 %v24430_v46  ;;  %v24452_v46 = vld [vmem:[#allocation24 + $0x150] ss:$8 sps:$4 sm:$0xff]  }
 0xc94   : > { %15797 = vmatpush1.bf16.msra.mxu1 %v24428_v44  ;;  %v24457_v44 = vld [vmem:[#allocation24 + $0x164] ss:$8 sps:$4 sm:$0xff]  }
 0xc95   : > { %15798 = vmatprep.subr.bf16.mxu1 %v24433_v53  ;;  %v24458_v53 = vld [vmem:[#allocation24 + $0x170] ss:$8 sps:$4 sm:$0xff]  }
 0xc97   : > { %15295 = vmatmul.mubr.bf16.gmra.mrb[208].mxu1 %v28635_v18 }
 0xc98   : > { %15304 = vmatprep.mubr.bf16.mxu1 %v28674_v39  ;;  %15799 = vmatpush1.bf16.msra.mxu1 %v24431_v7  ;;  %v24463_v7 = vld [vmem:[#allocation24 + $0x184] ss:$8 sps:$4 sm:$0xff]  }
 0xc99   : > { %15800 = vmatprep.subr.bf16.mxu1 %v24436_v11  ;;  %v24464_v11 = vld [vmem:[#allocation24 + $0x190] ss:$8 sps:$4 sm:$0xff]  }
 0xc9c   : > { %15801 = vmatpush1.bf16.msra.mxu1 %v24434_v9  ;;  %v24469_v9 = vld [vmem:[#allocation24 + $0x1a4] ss:$8 sps:$4 sm:$0xff]  }
 0xc9d   : > { %16348 = vmatprep.subr.bf16.mxu1 %v24439_v34  ;;  %v24470_v34 = vld [vmem:[#allocation24 + $0x1b0] ss:$8 sps:$4 sm:$0xff]  }
 0xc9f   : > { %15305 = vmatmul.mubr.bf16.gmra.mrb[212].mxu1 %v28665_v54 }
 0xca0   : > { %15314 = vmatprep.mubr.bf16.mxu1 %v28704_v1 }
 0xca7   : > { %15315 = vmatmul.mubr.bf16.gmra.mrb[216].mxu1 %v28695_v52 }
 0xca8   : > { %15324 = vmatprep.mubr.bf16.mxu1 %v28734_v49 }
 0xcaf   : > { %15325 = vmatmul.mubr.bf16.gmra.mrb[220].mxu1 %v28725_v55 }
 0xcb0   : > { %15334 = vmatprep.mubr.bf16.mxu1 %v28764_v43 }
 0xcb7   : > { %15335 = vmatmul.mubr.bf16.gmra.mrb[224].mxu1 %v28755_v56 }
 0xcb8   : > { %15344 = vmatprep.mubr.bf16.mxu1 %v28794_v51 }
 0xcbf   : > { %15345 = vmatmul.mubr.bf16.gmra.mrb[228].mxu1 %v28785_v59 }
 0xcc0   : > { %15354 = vmatprep.mubr.bf16.mxu1 %v28824_v27 }
 0xcc7   : > { %15355 = vmatmul.mubr.bf16.gmra.mrb[232].mxu1 %v28815_v14 }
 0xcc8   : > { %15364 = vmatprep.mubr.bf16.mxu1 %v28848_v21 }
 0xccf   : > { %15365 = vmatmul.mubr.bf16.gmra.mrb[236].mxu1 %v28855_v45 }
 0xcd0   : > { %15374 = vmatprep.mubr.bf16.mxu1 %v28912_v63 }
 0xcd7   : > { %15375 = vmatmul.mubr.bf16.gmra.mrb[240].mxu1 %v28919_v16 }
 0xcd8   : > { %15802 = vmatprep.mubr.bf16.mxu1 %v28464_v38  ;;  %v24446_v38 = vld [vmem:[#allocation24 + $0x130] ss:$8 sps:$4 sm:$0xff]  }
 0xcdf   : > { %15803 = vmatmul.mubr.bf16.vlgmr.msra.gmra.mrb[180].mxu1 %v28455_v3  ;;  %v24449_v3 = vld [vmem:[#allocation24 + $0x140] ss:$8 sps:$4 sm:$0xff]  }
 0xce0   : > { %15812 = vmatprep.mubr.bf16.mxu1 %v28494_v0  ;;  %16349 = vmatpush1.bf16.msra.mxu1 %v24437_v12  ;;  %v24454_v0 = vld [vmem:[#allocation24 + $0x154] ss:$8 sps:$4 sm:$0xff]   ;;  %v24487_v12 = vld [vmem:[#allocation24 + $0x404] ss:$8 sps:$4 sm:$0xff]  }
 0xce1   : > { %16350 = vmatprep.subr.bf16.mxu1 %v24442_v61  ;;  %v24514_v61 = vld [vmem:[#allocation24 + $0x494] ss:$8 sps:$4 sm:$0xff]  }
 0xce4   : > { %16351 = vmatpush1.bf16.msra.mxu1 %v24440_v33  ;;  %v29853_v33 = vld [vmem:[#allocation94_spill] sm:$0xff] }
 0xce5   : > { %16352 = vmatprep.subr.bf16.mxu1 %v24445_v15  ;;  %v24512_v15 = vld [vmem:[#allocation24 + $0x490] ss:$8 sps:$4 sm:$0xff]  }
 0xce7   : > { %15813 = vmatmul.mubr.bf16.gmra.mrb[184].mxu1 %v28485_v22  ;;  %v24455_v22 = vld [vmem:[#allocation24 + $0x160] ss:$8 sps:$4 sm:$0xff]  }
 0xce8   : > { %15822 = vmatprep.mubr.bf16.mxu1 %v28524_v20  ;;  %16353 = vmatpush1.bf16.msra.mxu1 %v24443_v50  ;;  %v24460_v20 = vld [vmem:[#allocation24 + $0x174] ss:$8 sps:$4 sm:$0xff]   ;;  %v24517_v50 = vld [vmem:[#allocation24 + $0x4a4] ss:$8 sps:$4 sm:$0xff]  }
 0xce9   : > { %16354 = vmatprep.subr.bf16.mxu1 %v24448_v60  ;;  %v24515_v60 = vld [vmem:[#allocation24 + $0x4a0] ss:$8 sps:$4 sm:$0xff]  }
 0xcec   : > { %16355 = vmatpush1.bf16.msra.mxu1 %v24446_v38  ;;  %v24520_v38 = vld [vmem:[#allocation24 + $0x4b4] ss:$8 sps:$4 sm:$0xff]  }
 0xced   : > { %16356 = vmatprep.subr.bf16.mxu1 %v24451_v48  ;;  %v29854_v48 = vld [vmem:[#allocation92_spill] sm:$0xff] }
 0xcef   : > { %15823 = vmatmul.mubr.bf16.gmra.mrb[188].mxu1 %v28515_v17  ;;  %v24461_v17 = vld [vmem:[#allocation24 + $0x180] ss:$8 sps:$4 sm:$0xff]  }
 0xcf0   : > { %15832 = vmatprep.mubr.bf16.mxu1 %v28554_v5  ;;  %16357 = vmatpush1.bf16.msra.mxu1 %v24449_v3  ;;  %v24466_v5 = vld [vmem:[#allocation24 + $0x194] ss:$8 sps:$4 sm:$0xff]   ;;  %v29855_v3 = vld [vmem:[#allocation96_spill] sm:$0xff] }
 0xcf1   : > { %16358 = vmatprep.subr.bf16.mxu1 %v24454_v0  ;;  %v24518_v0 = vld [vmem:[#allocation24 + $0x4b0] ss:$8 sps:$4 sm:$0xff]  }
 0xcf4   : > { %16359 = vmatpush1.bf16.msra.mxu1 %v24452_v46  ;;  %v24523_v46 = vld [vmem:[#allocation24 + $0x4c4] ss:$8 sps:$4 sm:$0xff]  }
 0xcf5   : > { %16360 = vmatprep.subr.bf16.mxu1 %v24457_v44  ;;  %v24521_v44 = vld [vmem:[#allocation24 + $0x4c0] ss:$8 sps:$4 sm:$0xff]  }
 0xcf7   : > { %15833 = vmatmul.mubr.bf16.gmra.mrb[192].mxu1 %v28545_v57  ;;  %v24467_v57 = vld [vmem:[#allocation24 + $0x1a0] ss:$8 sps:$4 sm:$0xff]  }
 0xcf8   : > { %15842 = vmatprep.mubr.bf16.mxu1 %v28584_v32  ;;  %16361 = vmatpush1.bf16.msra.mxu1 %v24455_v22  ;;  %v24472_v32 = vld [vmem:[#allocation24 + $0x1b4] ss:$8 sps:$4 sm:$0xff]  }
 0xcf9   : > { %16362 = vmatprep.subr.bf16.mxu1 %v24460_v20  ;;  %v24526_v22 = vld [vmem:[#allocation24 + $0x4d4] ss:$8 sps:$4 sm:$0xff]  }
 0xcfa   : > { %v29856_v20 = vld [vmem:[#allocation66_spill] sm:$0xff] }
 0xcfc   : > { %16363 = vmatpush1.bf16.msra.mxu1 %v24458_v53  ;;  %v29857_v53 = vld [vmem:[#allocation47_spill] sm:$0xff] }
 0xcfd   : > { %16364 = vmatprep.subr.bf16.mxu1 %v24463_v7  ;;  %v24524_v7 = vld [vmem:[#allocation24 + $0x4d0] ss:$8 sps:$4 sm:$0xff]  }
 0xcff   : > { %15843 = vmatmul.mubr.bf16.gmra.mrb[196].mxu1 %v28575_v40  ;;  %v24473_v40 = vld [vmem:[#allocation24 + $0x1c0] ss:$8 sps:$4 sm:$0xff]  }
 0xd00   : > { %15852 = vmatprep.mubr.bf16.mxu1 %v28614_v42  ;;  %16365 = vmatpush1.bf16.msra.mxu1 %v24461_v17  ;;  %v24478_v42 = vld [vmem:[#allocation24 + $0x1d4] ss:$8 sps:$4 sm:$0xff]   ;;  %v24529_v17 = vld [vmem:[#allocation24 + $0x4e4] ss:$8 sps:$4 sm:$0xff]  }
 0xd01   : > { %16366 = vmatprep.subr.bf16.mxu1 %v24466_v5  ;;  %v24527_v5 = vld [vmem:[#allocation24 + $0x4e0] ss:$8 sps:$4 sm:$0xff]  }
 0xd04   : > { %16367 = vmatpush1.bf16.msra.mxu1 %v24464_v11  ;;  %v24532_v11 = vld [vmem:[#allocation24 + $0x4f4] ss:$8 sps:$4 sm:$0xff]  }
 0xd05   : > { %16368 = vmatprep.subr.bf16.mxu1 %v24469_v9  ;;  %v29858_v9 = vld [vmem:[#allocation64_spill] sm:$0xff] }
 0xd07   : > { %15853 = vmatmul.mubr.bf16.gmra.mrb[200].mxu1 %v28605_v37  ;;  %v24479_v37 = vld [vmem:[#allocation24 + $0x1e0] ss:$8 sps:$4 sm:$0xff]  }
 0xd08   : > { %15862 = vmatprep.mubr.bf16.mxu1 %v28644_v58  ;;  %16369 = vmatpush1.bf16.msra.mxu1 %v24467_v57  ;;  %v24484_v58 = vld [vmem:[#allocation24 + $0x1f4] ss:$8 sps:$4 sm:$0xff]   ;;  %v29859_v57 = vld [vmem:[#allocation97_spill] sm:$0xff] }
 0xd09   : > { %16370 = vmatprep.subr.bf16.mxu1 %v24472_v32  ;;  %v24530_v32 = vld [vmem:[#allocation24 + $0x4f0] ss:$8 sps:$4 sm:$0xff]  }
 0xd0c   : > { %16371 = vmatpush1.bf16.msra.mxu1 %v24470_v34  ;;  %v24535_v34 = vld [vmem:[#allocation24 + $0x704] ss:$8 sps:$4 sm:$0xff]  }
 0xd0d   : > { %16372 = vmatprep.subr.bf16.mxu1 %v24475_v35  ;;  %v29860_v35 = vld [vmem:[#allocation59_spill] sm:$0xff] }
 0xd0f   : > { %15863 = vmatmul.mubr.bf16.gmra.mrb[204].mxu1 %v28635_v18  ;;  %v24485_v18 = vld [vmem:[#allocation24 + $0x400] ss:$8 sps:$4 sm:$0xff]  }
 0xd10   : > { %15872 = vmatprep.mubr.bf16.mxu1 %v28674_v39  ;;  %16373 = vmatpush1.bf16.msra.mxu1 %v24473_v40  ;;  %v24488_v39 = vld [vmem:[#allocation24 + $0x410] ss:$8 sps:$4 sm:$0xff]  }
 0xd11   : > { %16374 = vmatprep.subr.bf16.mxu1 %v24478_v42  ;;  %v29861_v40 = vld [vmem:[#allocation61_spill] sm:$0xff]  ;;  %v29862_v42 = vld [vmem:[#allocation50_spill] sm:$0xff] }
 0xd14   : > { %16375 = vmatpush1.bf16.msra.mxu1 %v24476_v23  ;;  %v29863_v23 = vld [vmem:[#allocation54_spill] sm:$0xff] }
 0xd15   : > { %16376 = vmatprep.subr.bf16.mxu1 %v24481_v6  ;;  %v29864_v6 = vld [vmem:[#allocation51_spill] sm:$0xff] }
 0xd17   : > { %15873 = vmatmul.mubr.bf16.gmra.mrb[208].mxu1 %v28665_v54  ;;  %v24490_v54 = vld [vmem:[#allocation24 + $0x414] ss:$8 sps:$4 sm:$0xff]  }
 0xd18   : > { %15882 = vmatprep.mubr.bf16.mxu1 %v28704_v1  ;;  %16377 = vmatpush1.bf16.msra.mxu1 %v24479_v37  ;;  %v24491_v1 = vld [vmem:[#allocation24 + $0x420] ss:$8 sps:$4 sm:$0xff]   ;;  %v29865_v37 = vld [vmem:[#allocation62_spill] sm:$0xff] }
 0xd19   : > { %16378 = vmatprep.subr.bf16.mxu1 %v24484_v58  ;;  %v29866_v58 = vld [vmem:[#allocation57_spill] sm:$0xff] }
 0xd1c   : > { %16379 = vmatpush1.bf16.msra.mxu1 %v24482_v47  ;;  %v29867_v47 = vld [vmem:[#allocation70_spill] sm:$0xff] }
 0xd1d   : > { %16926 = vmatprep.subr.bf16.mxu1 %v24487_v12  ;;  %v29868_v12 = vld [vmem:[#allocation65_spill] sm:$0xff] }
 0xd1f   : > { %15883 = vmatmul.mubr.bf16.gmra.mrb[212].mxu1 %v28695_v52  ;;  %v24493_v52 = vld [vmem:[#allocation24 + $0x424] ss:$8 sps:$4 sm:$0xff]  }
 0xd20   : > { %15892 = vmatprep.mubr.bf16.mxu1 %v28734_v49  ;;  %v24494_v49 = vld [vmem:[#allocation24 + $0x430] ss:$8 sps:$4 sm:$0xff]  }
 0xd27   : > { %15893 = vmatmul.mubr.bf16.gmra.mrb[216].mxu1 %v28725_v55  ;;  %v24496_v55 = vld [vmem:[#allocation24 + $0x434] ss:$8 sps:$4 sm:$0xff]  }
 0xd28   : > { %15902 = vmatprep.mubr.bf16.mxu1 %v28764_v43  ;;  %v24497_v43 = vld [vmem:[#allocation24 + $0x440] ss:$8 sps:$4 sm:$0xff]  }
 0xd2f   : > { %15903 = vmatmul.mubr.bf16.gmra.mrb[220].mxu1 %v28755_v56  ;;  %v24499_v56 = vld [vmem:[#allocation24 + $0x444] ss:$8 sps:$4 sm:$0xff]  }
 0xd30   : > { %15912 = vmatprep.mubr.bf16.mxu1 %v28794_v51  ;;  %v24500_v51 = vld [vmem:[#allocation24 + $0x450] ss:$8 sps:$4 sm:$0xff]  }
 0xd37   : > { %15913 = vmatmul.mubr.bf16.gmra.mrb[224].mxu1 %v28785_v59  ;;  %v24502_v59 = vld [vmem:[#allocation24 + $0x454] ss:$8 sps:$4 sm:$0xff]  }
 0xd38   : > { %15922 = vmatprep.mubr.bf16.mxu1 %v28824_v27  ;;  %v24503_v27 = vld [vmem:[#allocation24 + $0x460] ss:$8 sps:$4 sm:$0xff]  }
 0xd3f   : > { %15923 = vmatmul.mubr.bf16.gmra.mrb[228].mxu1 %v28815_v14  ;;  %v24505_v14 = vld [vmem:[#allocation24 + $0x464] ss:$8 sps:$4 sm:$0xff]  }
 0xd40   : > { %15932 = vmatprep.mubr.bf16.mxu1 %v28848_v21  ;;  %v24508_v21 = vld [vmem:[#allocation24 + $0x474] ss:$8 sps:$4 sm:$0xff]  }
 0xd47   : > { %15933 = vmatmul.mubr.bf16.gmra.mrb[232].mxu1 %v28855_v45  ;;  %v24506_v45 = vld [vmem:[#allocation24 + $0x470] ss:$8 sps:$4 sm:$0xff]  }
 0xd48   : > { %15942 = vmatprep.mubr.bf16.mxu1 %v28912_v63  ;;  %v24511_v63 = vld [vmem:[#allocation24 + $0x484] ss:$8 sps:$4 sm:$0xff]  }
 0xd4f   : > { %15943 = vmatmul.mubr.bf16.gmra.mrb[236].mxu1 %v28919_v16  ;;  %v24509_v16 = vld [vmem:[#allocation24 + $0x480] ss:$8 sps:$4 sm:$0xff]  }
 0xd50   : > { %15952 = vmatprep.mubr.bf16.mxu1 %v29686_v24 }
 0xd57   : > { %15953 = vmatmul.mubr.bf16.gmra.mrb[240].mxu1 %v29686_v24 }
 0xd58   : > { %16380 = vmatprep.mubr.bf16.mxu1 %v29686_v24 }
 0xd5f   : > { %16381 = vmatmul.mubr.bf16.vlgmr.msra.gmra.mrb[180].mxu1 %v29686_v24 }
 0xd60   : > { %16390 = vmatprep.mubr.bf16.mxu1 %v28401_v19  ;;  %16927 = vmatpush1.bf16.msra.mxu1 %v24485_v18  ;;  %v29869_v18 = vld [vmem:[#allocation75_spill] sm:$0xff] }
 0xd61   : > { %16928 = vmatprep.subr.bf16.mxu1 %v24490_v54  ;;  %v29870_v54 = vld [vmem:[#allocation72_spill] sm:$0xff] }
 0xd64   : > { %16929 = vmatpush1.bf16.msra.mxu1 %v24488_v39  ;;  %v29871_v39 = vld [vmem:[#allocation79_spill] sm:$0xff] }
 0xd65   : > { %16930 = vmatprep.subr.bf16.mxu1 %v24493_v52  ;;  %v29872_v52 = vld [vmem:[#allocation77_spill] sm:$0xff] }
 0xd67   : > { %16391 = vmatmul.mubr.bf16.gmra.mrb[184].mxu1 %v28398_v26 }
 0xd68   : > { %16400 = vmatprep.mubr.bf16.mxu1 %v28427_v8  ;;  %16931 = vmatpush1.bf16.msra.mxu1 %v24491_v1  ;;  %v29873_v1 = vld [vmem:[#allocation81_spill] sm:$0xff] }
 0xd69   : > { %16932 = vmatprep.subr.bf16.mxu1 %v24496_v55  ;;  %v24533_v55 = vld [vmem:[#allocation24 + $0x700] ss:$8 sps:$4 sm:$0xff]  }
 0xd6c   : > { %16933 = vmatpush1.bf16.msra.mxu1 %v24494_v49  ;;  %v24538_v49 = vld [vmem:[#allocation24 + $0x714] ss:$8 sps:$4 sm:$0xff]  }
 0xd6d   : > { %16934 = vmatprep.subr.bf16.mxu1 %v24499_v56  ;;  %v24536_v56 = vld [vmem:[#allocation24 + $0x710] ss:$8 sps:$4 sm:$0xff]  }
 0xd6f   : > { %16401 = vmatmul.mubr.bf16.gmra.mrb[188].mxu1 %v28422_v29 }
 0xd70   : > { %16410 = vmatprep.mubr.bf16.mxu1 %v28459_v36  ;;  %16935 = vmatpush1.bf16.msra.mxu1 %v24497_v43  ;;  %v24541_v43 = vld [vmem:[#allocation24 + $0x724] ss:$8 sps:$4 sm:$0xff]  }
 0xd71   : > { %16936 = vmatprep.subr.bf16.mxu1 %v24502_v59  ;;  %v24539_v59 = vld [vmem:[#allocation24 + $0x720] ss:$8 sps:$4 sm:$0xff]  }
 0xd74   : > { %16937 = vmatpush1.bf16.msra.mxu1 %v24500_v51  ;;  %v24544_v51 = vld [vmem:[#allocation24 + $0x734] ss:$8 sps:$4 sm:$0xff]  }
 0xd75   : > { %16938 = vmatprep.subr.bf16.mxu1 %v24505_v14  ;;  %v24547_v14 = vld [vmem:[#allocation24 + $0x744] ss:$8 sps:$4 sm:$0xff]  }
 0xd77   : > { %16411 = vmatmul.mubr.bf16.gmra.mrb[192].mxu1 %v28450_v62 }
 0xd78   : > { %16420 = vmatprep.mubr.bf16.mxu1 %v28489_v25  ;;  %16939 = vmatpush1.bf16.msra.mxu1 %v24503_v27  ;;  %v24550_v27 = vld [vmem:[#allocation24 + $0x754] ss:$8 sps:$4 sm:$0xff]  }
 0xd79   : > { %16940 = vmatprep.subr.bf16.mxu1 %v24508_v21  ;;  %v24548_v21 = vld [vmem:[#allocation24 + $0x750] ss:$8 sps:$4 sm:$0xff]  }
 0xd7c   : > { %16941 = vmatpush1.bf16.msra.mxu1 %v24506_v45  ;;  %v24553_v45 = vld [vmem:[#allocation24 + $0x764] ss:$8 sps:$4 sm:$0xff]  }
 0xd7d   : > { %16942 = vmatprep.subr.bf16.mxu1 %v24511_v63  ;;  %v24551_v63 = vld [vmem:[#allocation24 + $0x760] ss:$8 sps:$4 sm:$0xff]  }
 0xd7f   : > { %16421 = vmatmul.mubr.bf16.gmra.mrb[196].mxu1 %v28480_v4 }
 0xd80   : > { %16430 = vmatprep.mubr.bf16.mxu1 %v29853_v33  ;;  %16943 = vmatpush1.bf16.msra.mxu1 %v24509_v16  ;;  %v24556_v16 = vld [vmem:[#allocation24 + $0x774] ss:$8 sps:$4 sm:$0xff]  }
 0xd81   : > { %16944 = vmatprep.subr.bf16.mxu1 %v24514_v61  ;;  %v24554_v61 = vld [vmem:[#allocation24 + $0x770] ss:$8 sps:$4 sm:$0xff]  }
 0xd84   : > { %16945 = vmatpush1.bf16.msra.mxu1 %v24512_v15  ;;  %v24559_v15 = vld [vmem:[#allocation24 + $0x784] ss:$8 sps:$4 sm:$0xff]  }
 0xd85   : > { %16946 = vmatprep.subr.bf16.mxu1 %v24517_v50  ;;  %v24557_v50 = vld [vmem:[#allocation24 + $0x780] ss:$8 sps:$4 sm:$0xff]  }
 0xd87   : > { %16431 = vmatmul.mubr.bf16.gmra.mrb[200].mxu1 %v29854_v48 }
 0xd88   : > { %16440 = vmatprep.mubr.bf16.mxu1 %v29855_v3  ;;  %16947 = vmatpush1.bf16.msra.mxu1 %v24515_v60  ;;  %v24562_v60 = vld [vmem:[#allocation24 + $0x794] ss:$8 sps:$4 sm:$0xff]  }
 0xd89   : > { %16948 = vmatprep.subr.bf16.mxu1 %v24520_v38  ;;  %v24560_v38 = vld [vmem:[#allocation24 + $0x790] ss:$8 sps:$4 sm:$0xff]  }
 0xd8c   : > { %16949 = vmatpush1.bf16.msra.mxu1 %v24518_v0  ;;  %v24565_v0 = vld [vmem:[#allocation24 + $0x7a4] ss:$8 sps:$4 sm:$0xff]  }
 0xd8d   : > { %16950 = vmatprep.subr.bf16.mxu1 %v24523_v46  ;;  %v24563_v46 = vld [vmem:[#allocation24 + $0x7a0] ss:$8 sps:$4 sm:$0xff]  }
 0xd8f   : > { %16441 = vmatmul.mubr.bf16.gmra.mrb[204].mxu1 %v29856_v20 }
 0xd90   : > { %16450 = vmatprep.mubr.bf16.mxu1 %v29857_v53  ;;  %16951 = vmatpush1.bf16.msra.mxu1 %v24521_v44  ;;  %v24568_v44 = vld [vmem:[#allocation24 + $0x7b4] ss:$8 sps:$4 sm:$0xff]  }
 0xd91   : > { %16952 = vmatprep.subr.bf16.mxu1 %v24526_v22  ;;  %v24566_v22 = vld [vmem:[#allocation24 + $0x7b0] ss:$8 sps:$4 sm:$0xff]  }
 0xd94   : > { %16953 = vmatpush1.bf16.msra.mxu1 %v24524_v7  ;;  %v24571_v7 = vld [vmem:[#allocation24 + $0x7c4] ss:$8 sps:$4 sm:$0xff]  }
 0xd95   : > { %16954 = vmatprep.subr.bf16.mxu1 %v24529_v17  ;;  %v24569_v17 = vld [vmem:[#allocation24 + $0x7c0] ss:$8 sps:$4 sm:$0xff]  }
 0xd97   : > { %16451 = vmatmul.mubr.bf16.gmra.mrb[208].mxu1 %v29858_v9 }
 0xd98   : > { %16460 = vmatprep.mubr.bf16.mxu1 %v29859_v57  ;;  %16955 = vmatpush1.bf16.msra.mxu1 %v24527_v5  ;;  %v24574_v5 = vld [vmem:[#allocation24 + $0x7d4] ss:$8 sps:$4 sm:$0xff]  }
 0xd99   : > { %16956 = vmatprep.subr.bf16.mxu1 %v24532_v11  ;;  %v24572_v11 = vld [vmem:[#allocation24 + $0x7d0] ss:$8 sps:$4 sm:$0xff]  }
 0xd9c   : > { %16957 = vmatpush1.bf16.msra.mxu1 %v24530_v32  ;;  %v24577_v32 = vld [vmem:[#allocation24 + $0x7e4] ss:$8 sps:$4 sm:$0xff]  }
 0xd9d   : > { %17504 = vmatprep.subr.bf16.mxu1 %v24535_v34  ;;  %v24575_v34 = vld [vmem:[#allocation24 + $0x7e0] ss:$8 sps:$4 sm:$0xff]  }
 0xd9f   : > { %16461 = vmatmul.mubr.bf16.gmra.mrb[212].mxu1 %v29860_v35 }
 0xda0   : > { %16470 = vmatprep.mubr.bf16.mxu1 %v29861_v40 }
 0xda7   : > { %16471 = vmatmul.mubr.bf16.gmra.mrb[216].mxu1 %v29862_v42 }
 0xda8   : > { %16480 = vmatprep.mubr.bf16.mxu1 %v29863_v23 }
 0xdaf   : > { %16481 = vmatmul.mubr.bf16.gmra.mrb[220].mxu1 %v29864_v6 }
 0xdb0   : > { %16490 = vmatprep.mubr.bf16.mxu1 %v29865_v37 }
 0xdb7   : > { %16491 = vmatmul.mubr.bf16.gmra.mrb[224].mxu1 %v29866_v58 }
 0xdb8   : > { %16500 = vmatprep.mubr.bf16.mxu1 %v29867_v47 }
 0xdbf   : > { %16501 = vmatmul.mubr.bf16.gmra.mrb[228].mxu1 %v29868_v12 }
 0xdc0   : > { %16510 = vmatprep.mubr.bf16.mxu1 %v29869_v18 }
 0xdc7   : > { %16511 = vmatmul.mubr.bf16.gmra.mrb[232].mxu1 %v29870_v54 }
 0xdc8   : > { %16520 = vmatprep.mubr.bf16.mxu1 %v29871_v39 }
 0xdcf   : > { %16521 = vmatmul.mubr.bf16.gmra.mrb[236].mxu1 %v29872_v52 }
 0xdd0   : > { %16530 = vmatprep.mubr.bf16.mxu1 %v28819_v28 }
 0xdd7   : > { %16531 = vmatmul.mubr.bf16.gmra.mrb[240].mxu1 %v29873_v1 }
 0xdd8   : > { %16958 = vmatprep.mubr.bf16.mxu1 %v28401_v19  ;;  %v24542_v19 = vld [vmem:[#allocation24 + $0x730] ss:$8 sps:$4 sm:$0xff]  }
 0xddf   : > { %16959 = vmatmul.mubr.bf16.vlgmr.msra.gmra.mrb[180].mxu1 %v28398_v26  ;;  %v24545_v26 = vld [vmem:[#allocation24 + $0x740] ss:$8 sps:$4 sm:$0xff]  }
 0xde0   : > { %16968 = vmatprep.mubr.bf16.mxu1 %v28427_v8  ;;  %17505 = vmatpush1.bf16.msra.mxu1 %v24533_v55  ;;  %v24580_v55 = vld [vmem:[#allocation24 + $0x7f4] ss:$8 sps:$4 sm:$0xff]  }
 0xde1   : > { %17506 = vmatprep.subr.bf16.mxu1 %v24538_v49  ;;  %v24578_v49 = vld [vmem:[#allocation24 + $0x7f0] ss:$8 sps:$4 sm:$0xff]  }
 0xde4   : > { %17507 = vmatpush1.bf16.msra.mxu1 %v24536_v56  ;;  %v24583_v56 = vld [vmem:[#allocation24 + $0x204] ss:$8 sps:$4 sm:$0xff]  }
 0xde5   : > { %17508 = vmatprep.subr.bf16.mxu1 %v24541_v43  ;;  %v24581_v43 = vld [vmem:[#allocation24 + $0x200] ss:$8 sps:$4 sm:$0xff]  }
 0xde7   : > { %16969 = vmatmul.mubr.bf16.gmra.mrb[184].mxu1 %v28422_v29 }
 0xde8   : > { %16978 = vmatprep.mubr.bf16.mxu1 %v28459_v36  ;;  %17509 = vmatpush1.bf16.msra.mxu1 %v24539_v59  ;;  %v24586_v59 = vld [vmem:[#allocation24 + $0x214] ss:$8 sps:$4 sm:$0xff]  }
 0xde9   : > { %17510 = vmatprep.subr.bf16.mxu1 %v24544_v51  ;;  %v24584_v51 = vld [vmem:[#allocation24 + $0x210] ss:$8 sps:$4 sm:$0xff]  }
 0xdec   : > { %17511 = vmatpush1.bf16.msra.mxu1 %v24542_v19  ;;  %v24589_v19 = vld [vmem:[#allocation24 + $0x224] ss:$8 sps:$4 sm:$0xff]  }
 0xded   : > { %17512 = vmatprep.subr.bf16.mxu1 %v24547_v14  ;;  %v24587_v14 = vld [vmem:[#allocation24 + $0x220] ss:$8 sps:$4 sm:$0xff]  }
 0xdef   : > { %16979 = vmatmul.mubr.bf16.gmra.mrb[188].mxu1 %v28450_v62 }
 0xdf0   : > { %16988 = vmatprep.mubr.bf16.mxu1 %v28489_v25  ;;  %17513 = vmatpush1.bf16.msra.mxu1 %v24545_v26  ;;  %v24592_v26 = vld [vmem:[#allocation24 + $0x234] ss:$8 sps:$4 sm:$0xff]  }
 0xdf1   : > { %17514 = vmatprep.subr.bf16.mxu1 %v24550_v27  ;;  %v24595_v27 = vld [vmem:[#allocation24 + $0x244] ss:$8 sps:$4 sm:$0xff]  }
 0xdf4   : > { %17515 = vmatpush1.bf16.msra.mxu1 %v24548_v21  ;;  %v24596_v21 = vld [vmem:[#allocation24 + $0x250] ss:$8 sps:$4 sm:$0xff]  }
 0xdf5   : > { %17516 = vmatprep.subr.bf16.mxu1 %v24553_v45  ;;  %v24601_v45 = vld [vmem:[#allocation24 + $0x264] ss:$8 sps:$4 sm:$0xff]  }
 0xdf7   : > { %16989 = vmatmul.mubr.bf16.gmra.mrb[192].mxu1 %v28480_v4 }
 0xdf8   : > { %16998 = vmatprep.mubr.bf16.mxu1 %v29853_v33  ;;  %17517 = vmatpush1.bf16.msra.mxu1 %v24551_v63  ;;  %v24602_v63 = vld [vmem:[#allocation24 + $0x270] ss:$8 sps:$4 sm:$0xff]  }
 0xdf9   : > { %17518 = vmatprep.subr.bf16.mxu1 %v24556_v16  ;;  %v24607_v16 = vld [vmem:[#allocation24 + $0x284] ss:$8 sps:$4 sm:$0xff]  }
 0xdfc   : > { %17519 = vmatpush1.bf16.msra.mxu1 %v24554_v61  ;;  %v24608_v61 = vld [vmem:[#allocation24 + $0x290] ss:$8 sps:$4 sm:$0xff]  }
 0xdfd   : > { %17520 = vmatprep.subr.bf16.mxu1 %v24559_v15  ;;  %v24613_v15 = vld [vmem:[#allocation24 + $0x2a4] ss:$8 sps:$4 sm:$0xff]  }
 0xdff   : > { %16999 = vmatmul.mubr.bf16.gmra.mrb[196].mxu1 %v29854_v48 }
 0xe00   : > { %17008 = vmatprep.mubr.bf16.mxu1 %v29855_v3  ;;  %17521 = vmatpush1.bf16.msra.mxu1 %v24557_v50  ;;  %v24614_v50 = vld [vmem:[#allocation24 + $0x2b0] ss:$8 sps:$4 sm:$0xff]  }
 0xe01   : > { %17522 = vmatprep.subr.bf16.mxu1 %v24562_v60  ;;  %v24619_v60 = vld [vmem:[#allocation24 + $0x2c4] ss:$8 sps:$4 sm:$0xff]  }
 0xe04   : > { %17523 = vmatpush1.bf16.msra.mxu1 %v24560_v38  ;;  %v24620_v38 = vld [vmem:[#allocation24 + $0x2d0] ss:$8 sps:$4 sm:$0xff]  }
 0xe05   : > { %17524 = vmatprep.subr.bf16.mxu1 %v24565_v0  ;;  %v24625_v0 = vld [vmem:[#allocation24 + $0x2e4] ss:$8 sps:$4 sm:$0xff]  }
 0xe07   : > { %17009 = vmatmul.mubr.bf16.gmra.mrb[200].mxu1 %v29856_v20 }
 0xe08   : > { %17018 = vmatprep.mubr.bf16.mxu1 %v29857_v53  ;;  %17525 = vmatpush1.bf16.msra.mxu1 %v24563_v46  ;;  %v24626_v46 = vld [vmem:[#allocation24 + $0x2f0] ss:$8 sps:$4 sm:$0xff]  }
 0xe09   : > { %17526 = vmatprep.subr.bf16.mxu1 %v24568_v44  ;;  %v24631_v44 = vld [vmem:[#allocation24 + $0x504] ss:$8 sps:$4 sm:$0xff]  }
 0xe0c   : > { %17527 = vmatpush1.bf16.msra.mxu1 %v24566_v22  ;;  %v29879_v22 = vld [vmem:[#allocation89_spill] sm:$0xff] }
 0xe0d   : > { %17528 = vmatprep.subr.bf16.mxu1 %v24571_v7  ;;  %v29077_v7 = vsel %vm29051_vm14, %v29879_v22, 0 }
 0xe0f   : > { %17019 = vmatmul.mubr.bf16.gmra.mrb[204].mxu1 %v29858_v9 }
 0xe10   : > { %17028 = vmatprep.mubr.bf16.mxu1 %v29859_v57  ;;  %17529 = vmatpush1.bf16.msra.mxu1 %v24569_v17  ;;  %v29880_v17 = vld [vmem:[#allocation90_spill] sm:$0xff] }
 0xe11   : > { %17530 = vmatprep.subr.bf16.mxu1 %v24574_v5  ;;  %v29083_v5 = vsel %vm29051_vm14, %v29880_v17, 0  ;;  %v29896_v17 = vld [vmem:[#allocation68_spill] sm:$0xff] }
 0xe14   : > { %17531 = vmatpush1.bf16.msra.mxu1 %v24572_v11  ;;  %v24644_v11 = vld [vmem:[#allocation24 + $0x550] ss:$8 sps:$4 sm:$0xff]  }
 0xe15   : > { %17532 = vmatprep.subr.bf16.mxu1 %v24577_v32  ;;  %v24649_v32 = vld [vmem:[#allocation24 + $0x564] ss:$8 sps:$4 sm:$0xff]  }
 0xe17   : > { %17029 = vmatmul.mubr.bf16.gmra.mrb[208].mxu1 %v29860_v35 }
 0xe18   : > { %17038 = vmatprep.mubr.bf16.mxu1 %v29861_v40  ;;  %17533 = vmatpush1.bf16.msra.mxu1 %v24575_v34  ;;  %v24647_v34 = vld [vmem:[#allocation24 + $0x560] ss:$8 sps:$4 sm:$0xff]  }
 0xe19   : > { %17534 = vmatprep.subr.bf16.mxu1 %v24580_v55  ;;  %v24652_v55 = vld [vmem:[#allocation24 + $0x574] ss:$8 sps:$4 sm:$0xff]  }
 0xe1c   : > { %17535 = vmatpush1.bf16.msra.mxu1 %v24578_v49  ;;  %v29881_v49 = vld [vmem:[#allocation91_spill] sm:$0xff] }
 0xe1d   : > { %18213 = vmatprep.subr.bf16.mxu1 %v24583_v56  ;;  %v29089_v56 = vsel %vm29051_vm14, %v29881_v49, 0 }
 0xe1f   : > { %17039 = vmatmul.mubr.bf16.gmra.mrb[212].mxu1 %v29862_v42 }
 0xe20   : > { %17048 = vmatprep.mubr.bf16.mxu1 %v29863_v23 }
 0xe27   : > { %17049 = vmatmul.mubr.bf16.gmra.mrb[216].mxu1 %v29864_v6 }
 0xe28   : > { %17058 = vmatprep.mubr.bf16.mxu1 %v29865_v37 }
 0xe2f   : > { %17059 = vmatmul.mubr.bf16.gmra.mrb[220].mxu1 %v29866_v58 }
 0xe30   : > { %17068 = vmatprep.mubr.bf16.mxu1 %v29867_v47 }
 0xe37   : > { %17069 = vmatmul.mubr.bf16.gmra.mrb[224].mxu1 %v29868_v12 }
 0xe38   : > { %17078 = vmatprep.mubr.bf16.mxu1 %v29869_v18 }
 0xe3f   : > { %17079 = vmatmul.mubr.bf16.gmra.mrb[228].mxu1 %v29870_v54 }
 0xe40   : > { %17088 = vmatprep.mubr.bf16.mxu1 %v29871_v39 }
 0xe47   : > { %17089 = vmatmul.mubr.bf16.gmra.mrb[232].mxu1 %v29872_v52 }
 0xe48   : > { %17098 = vmatprep.mubr.bf16.mxu1 %v28819_v28 }
 0xe4f   : > { %17099 = vmatmul.mubr.bf16.gmra.mrb[236].mxu1 %v29873_v1 }
 0xe50   : > { %17108 = vmatprep.mubr.bf16.mxu1 %v28844_v30 }
 0xe57   : > { %17109 = vmatmul.mubr.bf16.gmra.mrb[240].mxu1 %v28840_v13 }
 0xe58   : > { %17536 = vmatprep.mubr.bf16.mxu1 %v28427_v8  ;;  %v24590_v8 = vld [vmem:[#allocation24 + $0x230] ss:$8 sps:$4 sm:$0xff]  }
 0xe5f   : > { %17537 = vmatmul.mubr.bf16.vlgmr.msra.gmra.mrb[180].mxu1 %v28422_v29  ;;  %v24593_v29 = vld [vmem:[#allocation24 + $0x240] ss:$8 sps:$4 sm:$0xff]  }
 0xe60   : > { %17546 = vmatprep.mubr.bf16.mxu1 %v28459_v36  ;;  %18214 = vmatpush1.bf16.msra.mxu1 %v24581_v43  ;;  %v24598_v36 = vld [vmem:[#allocation24 + $0x254] ss:$8 sps:$4 sm:$0xff]   ;;  %v29882_v43 = vld [vmem:[#allocation93_spill] sm:$0xff] }
 0xe61   : > { %18215 = vmatprep.subr.bf16.mxu1 %v24586_v59  ;;  %v29095_v59 = vsel %vm29051_vm14, %v29882_v43, 0  ;;  %v29899_v43 = vld [vmem:[#allocation76_spill] sm:$0xff] }
 0xe64   : > { %18216 = vmatpush1.bf16.msra.mxu1 %v24584_v51  ;;  %v24650_v51 = vld [vmem:[#allocation24 + $0x570] ss:$8 sps:$4 sm:$0xff]  }
 0xe65   : > { %18217 = vmatprep.subr.bf16.mxu1 %v24589_v19  ;;  %v24655_v19 = vld [vmem:[#allocation24 + $0x584] ss:$8 sps:$4 sm:$0xff]  }
 0xe67   : > { %17547 = vmatmul.mubr.bf16.gmra.mrb[184].mxu1 %v28450_v62  ;;  %v24599_v62 = vld [vmem:[#allocation24 + $0x260] ss:$8 sps:$4 sm:$0xff]  }
 0xe68   : > { %17556 = vmatprep.mubr.bf16.mxu1 %v28489_v25  ;;  %18218 = vmatpush1.bf16.msra.mxu1 %v24587_v14  ;;  %v24604_v25 = vld [vmem:[#allocation24 + $0x274] ss:$8 sps:$4 sm:$0xff]   ;;  %v24653_v14 = vld [vmem:[#allocation24 + $0x580] ss:$8 sps:$4 sm:$0xff]  }
 0xe69   : > { %18219 = vmatprep.subr.bf16.mxu1 %v24592_v26  ;;  %v24658_v26 = vld [vmem:[#allocation24 + $0x594] ss:$8 sps:$4 sm:$0xff]  }
 0xe6c   : > { %18220 = vmatpush1.bf16.msra.mxu1 %v24590_v8  ;;  %v29883_v8 = vld [vmem:[#allocation95_spill] sm:$0xff] }
 0xe6d   : > { %18221 = vmatprep.subr.bf16.mxu1 %v24595_v27  ;;  %v29101_v27 = vsel %vm29051_vm14, %v29883_v8, 0 }
 0xe6f   : > { %17557 = vmatmul.mubr.bf16.gmra.mrb[188].mxu1 %v28480_v4  ;;  %v24605_v4 = vld [vmem:[#allocation24 + $0x280] ss:$8 sps:$4 sm:$0xff]  }
 0xe70   : > { %17566 = vmatprep.mubr.bf16.mxu1 %v29853_v33  ;;  %18222 = vmatpush1.bf16.msra.mxu1 %v24593_v29  ;;  %v24610_v33 = vld [vmem:[#allocation24 + $0x294] ss:$8 sps:$4 sm:$0xff]  }
 0xe71   : > { %18223 = vmatprep.subr.bf16.mxu1 %v24598_v36  ;;  %v29884_v29 = vld [vmem:[#allocation55_spill] sm:$0xff] }
 0xe72   : > { %v29107_v36 = vsel %vm29051_vm14, %v29884_v29, 0  ;;  %v29902_v29 = vld [vmem:[#allocation82_spill] sm:$0xff] }
 0xe74   : > { %18224 = vmatpush1.bf16.msra.mxu1 %v24596_v21  ;;  %v24656_v21 = vld [vmem:[#allocation24 + $0x590] ss:$8 sps:$4 sm:$0xff]  }
 0xe75   : > { %18225 = vmatprep.subr.bf16.mxu1 %v24601_v45  ;;  %v24661_v45 = vld [vmem:[#allocation24 + $0x5a4] ss:$8 sps:$4 sm:$0xff]  }
 0xe77   : > { %17567 = vmatmul.mubr.bf16.gmra.mrb[192].mxu1 %v29854_v48  ;;  %v24611_v48 = vld [vmem:[#allocation24 + $0x2a0] ss:$8 sps:$4 sm:$0xff]  }
 0xe78   : > { %17576 = vmatprep.mubr.bf16.mxu1 %v29855_v3  ;;  %18226 = vmatpush1.bf16.msra.mxu1 %v24599_v62  ;;  %v24616_v3 = vld [vmem:[#allocation24 + $0x2b4] ss:$8 sps:$4 sm:$0xff]   ;;  %v24659_v62 = vld [vmem:[#allocation24 + $0x5a0] ss:$8 sps:$4 sm:$0xff]  }
 0xe79   : > { %18227 = vmatprep.subr.bf16.mxu1 %v24604_v25  ;;  %v24664_v25 = vld [vmem:[#allocation24 + $0x5b4] ss:$8 sps:$4 sm:$0xff]  }
 0xe7c   : > { %18228 = vmatpush1.bf16.msra.mxu1 %v24602_v63  ;;  %v29885_v63 = vld [vmem:[#allocation53_spill] sm:$0xff] }
 0xe7d   : > { %18229 = vmatprep.subr.bf16.mxu1 %v24607_v16  ;;  %v29113_v16 = vsel %vm29051_vm14, %v29885_v63, 0  ;;  %v29233_v63 = vsel %vm29051_vm14, %v28850_v10, 0  ;;  %v24686_v10 = vld [vmem:[#allocation24 + $0x830] ss:$8 sps:$4 sm:$0xff]  }
 0xe7f   : > { %17577 = vmatmul.mubr.bf16.gmra.mrb[196].mxu1 %v29856_v20  ;;  %v24617_v20 = vld [vmem:[#allocation24 + $0x2c0] ss:$8 sps:$4 sm:$0xff]  }
 0xe80   : > { %17586 = vmatprep.mubr.bf16.mxu1 %v29857_v53  ;;  %18230 = vmatpush1.bf16.msra.mxu1 %v24605_v4  ;;  %v24622_v53 = vld [vmem:[#allocation24 + $0x2d4] ss:$8 sps:$4 sm:$0xff]  }
 0xe81   : > { %18231 = vmatprep.subr.bf16.mxu1 %v24610_v33  ;;  %v29886_v4 = vld [vmem:[#allocation67_spill] sm:$0xff] }
 0xe82   : > { %v29119_v33 = vsel %vm29051_vm14, %v29886_v4, 0  ;;  %v24677_v4 = vld [vmem:[#allocation24 + $0x800] ss:$8 sps:$4 sm:$0xff]  }
 0xe84   : > { %18232 = vmatpush1.bf16.msra.mxu1 %v24608_v61  ;;  %v24662_v61 = vld [vmem:[#allocation24 + $0x5b0] ss:$8 sps:$4 sm:$0xff]  }
 0xe85   : > { %18233 = vmatprep.subr.bf16.mxu1 %v24613_v15  ;;  %v24667_v15 = vld [vmem:[#allocation24 + $0x5c4] ss:$8 sps:$4 sm:$0xff]  }
 0xe87   : > { %17587 = vmatmul.mubr.bf16.gmra.mrb[200].mxu1 %v29858_v9  ;;  %v24623_v9 = vld [vmem:[#allocation24 + $0x2e0] ss:$8 sps:$4 sm:$0xff]  }
 0xe88   : > { %17596 = vmatprep.mubr.bf16.mxu1 %v29859_v57  ;;  %18234 = vmatpush1.bf16.msra.mxu1 %v24611_v48  ;;  %v24628_v57 = vld [vmem:[#allocation24 + $0x2f4] ss:$8 sps:$4 sm:$0xff]   ;;  %v24665_v48 = vld [vmem:[#allocation24 + $0x5c0] ss:$8 sps:$4 sm:$0xff]  }
 0xe89   : > { %18235 = vmatprep.subr.bf16.mxu1 %v24616_v3  ;;  %v24670_v3 = vld [vmem:[#allocation24 + $0x5d4] ss:$8 sps:$4 sm:$0xff]  }
 0xe8c   : > { %18236 = vmatpush1.bf16.msra.mxu1 %v24614_v50  ;;  %v29887_v50 = vld [vmem:[#allocation46_spill] sm:$0xff] }
 0xe8d   : > { %18237 = vmatprep.subr.bf16.mxu1 %v24619_v60  ;;  %v29125_v60 = vsel %vm29051_vm14, %v29887_v50, 0  ;;  %v24694_v50 = vld [vmem:[#allocation24 + $0x854] ss:$8 sps:$4 sm:$0xff]  }
 0xe8f   : > { %17597 = vmatmul.mubr.bf16.gmra.mrb[204].mxu1 %v29860_v35 }
 0xe90   : > { %17606 = vmatprep.mubr.bf16.mxu1 %v29861_v40  ;;  %18238 = vmatpush1.bf16.msra.mxu1 %v24617_v20  ;;  %v24629_v40 = vld [vmem:[#allocation24 + $0x500] ss:$8 sps:$4 sm:$0xff]   ;;  %v29888_v20 = vld [vmem:[#allocation58_spill] sm:$0xff] }
 0xe91   : > { %18239 = vmatprep.subr.bf16.mxu1 %v24622_v53  ;;  %v29131_v53 = vsel %vm29051_vm14, %v29888_v20, 0  ;;  %v24692_v20 = vld [vmem:[#allocation24 + $0x850] ss:$8 sps:$4 sm:$0xff]  }
 0xe94   : > { %18240 = vmatpush1.bf16.msra.mxu1 %v24620_v38  ;;  %v24668_v38 = vld [vmem:[#allocation24 + $0x5d0] ss:$8 sps:$4 sm:$0xff]  }
 0xe95   : > { %18241 = vmatprep.subr.bf16.mxu1 %v24625_v0  ;;  %v24673_v0 = vld [vmem:[#allocation24 + $0x5e4] ss:$8 sps:$4 sm:$0xff]  }
 0xe97   : > { %17607 = vmatmul.mubr.bf16.gmra.mrb[208].mxu1 %v29862_v42  ;;  %v29876_v42 = vld [vmem:[#allocation73_spill] sm:$0xff] }
 0xe98   : > { %17616 = vmatprep.mubr.bf16.mxu1 %v29863_v23  ;;  %18242 = vmatpush1.bf16.msra.mxu1 %v24623_v9  ;;  %v24637_v23 = vld [vmem:[#allocation24 + $0x524] ss:$8 sps:$4 sm:$0xff]   ;;  %v24671_v9 = vld [vmem:[#allocation24 + $0x5e0] ss:$8 sps:$4 sm:$0xff]  }
 0xe99   : > { %18243 = vmatprep.subr.bf16.mxu1 %v24628_v57  ;;  %v24676_v57 = vld [vmem:[#allocation24 + $0x5f4] ss:$8 sps:$4 sm:$0xff]  }
 0xe9c   : > { %18244 = vmatpush1.bf16.msra.mxu1 %v24626_v46  ;;  %v29889_v46 = vld [vmem:[#allocation98_spill] sm:$0xff] }
 0xe9d   : > { %18791 = vmatprep.subr.bf16.mxu1 %v24631_v44  ;;  %v29137_v44 = vsel %vm29051_vm14, %v29889_v46, 0  ;;  %v24703_v46 = vld [vmem:[#allocation24 + $0x884] ss:$8 sps:$4 sm:$0xff]  }
 0xe9f   : > { %17617 = vmatmul.mubr.bf16.gmra.mrb[212].mxu1 %v29864_v6  ;;  %v24635_v6 = vld [vmem:[#allocation24 + $0x520] ss:$8 sps:$4 sm:$0xff]  }
 0xea0   : > { %17626 = vmatprep.mubr.bf16.mxu1 %v29865_v37  ;;  %v24640_v37 = vld [vmem:[#allocation24 + $0x534] ss:$8 sps:$4 sm:$0xff]  }
 0xea7   : > { %17627 = vmatmul.mubr.bf16.gmra.mrb[216].mxu1 %v29866_v58  ;;  %v29877_v58 = vld [vmem:[#allocation87_spill] sm:$0xff] }
 0xea8   : > { %17636 = vmatprep.mubr.bf16.mxu1 %v29867_v47  ;;  %v29065_v47 = vsel %vm29051_vm14, %v29877_v58, 0 }
 0xeaf   : > { %17637 = vmatmul.mubr.bf16.gmra.mrb[220].mxu1 %v29868_v12  ;;  %v29878_v12 = vld [vmem:[#allocation88_spill] sm:$0xff] }
 0xeb0   : > { %17646 = vmatprep.mubr.bf16.mxu1 %v29869_v18  ;;  %v29071_v18 = vsel %vm29051_vm14, %v29878_v12, 0  ;;  %v29893_v12 = vld [vmem:[#allocation56_spill] sm:$0xff] }
 0xeb7   : > { %17647 = vmatmul.mubr.bf16.gmra.mrb[224].mxu1 %v29870_v54  ;;  %v24638_v54 = vld [vmem:[#allocation24 + $0x530] ss:$8 sps:$4 sm:$0xff]  }
 0xeb8   : > { %17656 = vmatprep.mubr.bf16.mxu1 %v29871_v39  ;;  %v24643_v39 = vld [vmem:[#allocation24 + $0x544] ss:$8 sps:$4 sm:$0xff]  }
 0xebf   : > { %17657 = vmatmul.mubr.bf16.gmra.mrb[228].mxu1 %v29872_v52  ;;  %v24641_v52 = vld [vmem:[#allocation24 + $0x540] ss:$8 sps:$4 sm:$0xff]  }
 0xec0   : > { %17666 = vmatprep.mubr.bf16.mxu1 %v28819_v28  ;;  %v24634_v28 = vld [vmem:[#allocation24 + $0x514] ss:$8 sps:$4 sm:$0xff]  }
 0xec7   : > { %17667 = vmatmul.mubr.bf16.gmra.mrb[232].mxu1 %v29873_v1  ;;  %v24646_v1 = vld [vmem:[#allocation24 + $0x554] ss:$8 sps:$4 sm:$0xff]  }
 0xec8   : > { %17676 = vmatprep.mubr.bf16.mxu1 %v28844_v30  ;;  %v29059_v30 = vsel %vm29051_vm14, %v29876_v42, 0  ;;  %v24674_v42 = vld [vmem:[#allocation24 + $0x5f0] ss:$8 sps:$4 sm:$0xff]  }
 0xecf   : > { %17677 = vmatmul.mubr.bf16.gmra.mrb[236].mxu1 %v28840_v13  ;;  %v24632_v13 = vld [vmem:[#allocation24 + $0x510] ss:$8 sps:$4 sm:$0xff]  }
 0xed0   : > { %17686 = vmatprep.mubr.bf16.mxu1 %v29686_v24 }
 0xed7   : > { %17687 = vmatmul.mubr.bf16.gmra.mrb[240].mxu1 %v29686_v24 }
 0xed8   : > { %18245 = vmatprep.mubr.bf16.mxu1 %v29686_v24 }
 0xedf   : > { %18246 = vmatmul.mubr.bf16.vlgmr.msra.gmra.mrb[180].mxu1 %v29686_v24 }
 0xee0   : > { %18255 = vmatprep.mubr.bf16.mxu1 %v29059_v30  ;;  %18792 = vmatpush1.bf16.msra.mxu1 %v24629_v40  ;;  %v29890_v40 = vld [vmem:[#allocation49_spill] sm:$0xff] }
 0xee1   : > { %18793 = vmatprep.subr.bf16.mxu1 %v24634_v28  ;;  %v29143_v28 = vsel %vm29051_vm14, %v29890_v40, 0  ;;  %v24701_v40 = vld [vmem:[#allocation24 + $0x880] ss:$8 sps:$4 sm:$0xff]  }
 0xee4   : > { %18794 = vmatpush1.bf16.msra.mxu1 %v24632_v13  ;;  %v24679_v13 = vld [vmem:[#allocation24 + $0x804] ss:$8 sps:$4 sm:$0xff]  }
 0xee5   : > { %18795 = vmatprep.subr.bf16.mxu1 %v24637_v23  ;;  %v29891_v23 = vld [vmem:[#allocation48_spill] sm:$0xff] }
 0xee7   : > { %18256 = vmatmul.mubr.bf16.gmra.mrb[184].mxu1 %v29065_v47 }
 0xee8   : > { %18265 = vmatprep.mubr.bf16.mxu1 %v29071_v18  ;;  %18796 = vmatpush1.bf16.msra.mxu1 %v24635_v6  ;;  %v29149_v6 = vsel %vm29051_vm14, %v29891_v23, 0  ;;  %v24709_v23 = vld [vmem:[#allocation24 + $0x8a4] ss:$8 sps:$4 sm:$0xff]  }
 0xee9   : > { %18797 = vmatprep.subr.bf16.mxu1 %v24640_v37  ;;  %v29892_v37 = vld [vmem:[#allocation52_spill] sm:$0xff] }
 0xeea   : > { %v29155_v58 = vsel %vm29051_vm14, %v29892_v37, 0  ;;  %v24707_v37 = vld [vmem:[#allocation24 + $0x8a0] ss:$8 sps:$4 sm:$0xff]  }
 0xeec   : > { %18798 = vmatpush1.bf16.msra.mxu1 %v24638_v54  ;;  %v29161_v54 = vsel %vm29051_vm14, %v29893_v12, 0  ;;  %v24712_v12 = vld [vmem:[#allocation24 + $0x8b4] ss:$8 sps:$4 sm:$0xff]  }
 0xeed   : > { %18799 = vmatprep.subr.bf16.mxu1 %v24643_v39  ;;  %v29894_v39 = vld [vmem:[#allocation60_spill] sm:$0xff] }
 0xeef   : > { %18266 = vmatmul.mubr.bf16.gmra.mrb[188].mxu1 %v29077_v7 }
 0xef0   : > { %18275 = vmatprep.mubr.bf16.mxu1 %v29083_v5  ;;  %18800 = vmatpush1.bf16.msra.mxu1 %v24641_v52  ;;  %v29167_v52 = vsel %vm29051_vm14, %v29894_v39, 0  ;;  %v24710_v39 = vld [vmem:[#allocation24 + $0x8b0] ss:$8 sps:$4 sm:$0xff]  }
 0xef1   : > { %18801 = vmatprep.subr.bf16.mxu1 %v24646_v1  ;;  %v29895_v1 = vld [vmem:[#allocation63_spill] sm:$0xff] }
 0xef2   : > { %v29173_v22 = vsel %vm29051_vm14, %v29895_v1, 0  ;;  %v24715_v1 = vld [vmem:[#allocation24 + $0x8c4] ss:$8 sps:$4 sm:$0xff]  }
 0xef4   : > { %18802 = vmatpush1.bf16.msra.mxu1 %v24644_v11  ;;  %v29179_v11 = vsel %vm29051_vm14, %v29896_v17, 0  ;;  %v24713_v17 = vld [vmem:[#allocation24 + $0x8c0] ss:$8 sps:$4 sm:$0xff]  }
 0xef5   : > { %18803 = vmatprep.subr.bf16.mxu1 %v24649_v32  ;;  %v29897_v32 = vld [vmem:[#allocation69_spill] sm:$0xff] }
 0xef7   : > { %18276 = vmatmul.mubr.bf16.gmra.mrb[192].mxu1 %v29089_v56 }
 0xef8   : > { %18285 = vmatprep.mubr.bf16.mxu1 %v29095_v59  ;;  %18804 = vmatpush1.bf16.msra.mxu1 %v24647_v34  ;;  %v29185_v34 = vsel %vm29051_vm14, %v29897_v32, 0  ;;  %v24718_v32 = vld [vmem:[#allocation24 + $0x8d4] ss:$8 sps:$4 sm:$0xff]  }
 0xef9   : > { %18805 = vmatprep.subr.bf16.mxu1 %v24652_v55  ;;  %v29898_v55 = vld [vmem:[#allocation74_spill] sm:$0xff] }
 0xefa   : > { %v29191_v49 = vsel %vm29051_vm14, %v29898_v55, 0  ;;  %v24716_v55 = vld [vmem:[#allocation24 + $0x8d0] ss:$8 sps:$4 sm:$0xff]  }
 0xefc   : > { %18806 = vmatpush1.bf16.msra.mxu1 %v24650_v51  ;;  %v29197_v51 = vsel %vm29051_vm14, %v29899_v43, 0  ;;  %v24721_v43 = vld [vmem:[#allocation24 + $0x8e4] ss:$8 sps:$4 sm:$0xff]  }
 0xefd   : > { %18807 = vmatprep.subr.bf16.mxu1 %v24655_v19  ;;  %v29900_v19 = vld [vmem:[#allocation78_spill] sm:$0xff] }
 0xeff   : > { %18286 = vmatmul.mubr.bf16.gmra.mrb[196].mxu1 %v29101_v27 }
 0xf00   : > { %18295 = vmatprep.mubr.bf16.mxu1 %v29107_v36  ;;  %18808 = vmatpush1.bf16.msra.mxu1 %v24653_v14  ;;  %v29203_v14 = vsel %vm29051_vm14, %v29900_v19, 0  ;;  %v24719_v19 = vld [vmem:[#allocation24 + $0x8e0] ss:$8 sps:$4 sm:$0xff]  }
 0xf01   : > { %18809 = vmatprep.subr.bf16.mxu1 %v24658_v26  ;;  %v29901_v26 = vld [vmem:[#allocation80_spill] sm:$0xff] }
 0xf02   : > { %v29209_v8 = vsel %vm29051_vm14, %v29901_v26, 0  ;;  %v24724_v26 = vld [vmem:[#allocation24 + $0x8f4] ss:$8 sps:$4 sm:$0xff]  }
 0xf04   : > { %18810 = vmatpush1.bf16.msra.mxu1 %v24656_v21  ;;  %v29215_v21 = vsel %vm29051_vm14, %v29902_v29, 0  ;;  %v24722_v29 = vld [vmem:[#allocation24 + $0x8f0] ss:$8 sps:$4 sm:$0xff]  }
 0xf05   : > { %18811 = vmatprep.subr.bf16.mxu1 %v24661_v45  ;;  %v29903_v45 = vld [vmem:[#allocation83_spill] sm:$0xff] }
 0xf07   : > { %18296 = vmatmul.mubr.bf16.gmra.mrb[200].mxu1 %v29113_v16 }
 0xf08   : > { %18305 = vmatprep.mubr.bf16.mxu1 %v29119_v33  ;;  %18812 = vmatpush1.bf16.msra.mxu1 %v24659_v62  ;;  %v29221_v62 = vsel %vm29051_vm14, %v29903_v45, 0  ;;  %v17955_v45 = vsel %vm29051_vm14, %v28873_v41, 0  ;;  %v29904_v41 = vld [vmem:[#allocation71_spill] sm:$0xff] }
 0xf09   : > { %18813 = vmatprep.subr.bf16.mxu1 %v24664_v25  ;;  %v29227_v25 = vsel %vm29051_vm14, %v28842_v31, 0  ;;  %v24680_v31 = vld [vmem:[#allocation24 + $0x810] ss:$8 sps:$4 sm:$0xff]   ;;  %v29905_v35 = vsub.s32 0, %v29904_v41 }
 0xf0c   : > { %18814 = vmatpush1.bf16.msra.mxu1 %v24662_v61  ;;  %v24682_v61 = vld [vmem:[#allocation24 + $0x814] ss:$8 sps:$4 sm:$0xff]  }
 0xf0d   : > { %18815 = vmatprep.subr.bf16.mxu1 %v24667_v15  ;;  %v24685_v15 = vld [vmem:[#allocation24 + $0x824] ss:$8 sps:$4 sm:$0xff]  }
 0xf0f   : > { %18306 = vmatmul.mubr.bf16.gmra.mrb[204].mxu1 %v29125_v60 }
 0xf10   : > { %18315 = vmatprep.mubr.bf16.mxu1 %v29131_v53  ;;  %18816 = vmatpush1.bf16.msra.mxu1 %v24665_v48  ;;  %v24683_v48 = vld [vmem:[#allocation24 + $0x820] ss:$8 sps:$4 sm:$0xff]  }
 0xf11   : > { %18817 = vmatprep.subr.bf16.mxu1 %v24670_v3  ;;  %v24688_v3 = vld [vmem:[#allocation24 + $0x834] ss:$8 sps:$4 sm:$0xff]  }
 0xf14   : > { %18818 = vmatpush1.bf16.msra.mxu1 %v24668_v38  ;;  %v24697_v38 = vld [vmem:[#allocation24 + $0x864] ss:$8 sps:$4 sm:$0xff]  }
 0xf15   : > { %18819 = vmatprep.subr.bf16.mxu1 %v24673_v0  ;;  %v24695_v0 = vld [vmem:[#allocation24 + $0x860] ss:$8 sps:$4 sm:$0xff]  }
 0xf17   : > { %18316 = vmatmul.mubr.bf16.gmra.mrb[208].mxu1 %v29137_v44 }
 0xf18   : > { %18325 = vmatprep.mubr.bf16.mxu1 %v29143_v28  ;;  %18820 = vmatpush1.bf16.msra.mxu1 %v24671_v9  ;;  %v24700_v9 = vld [vmem:[#allocation24 + $0x874] ss:$8 sps:$4 sm:$0xff]  }
 0xf19   : > { %18821 = vmatprep.subr.bf16.mxu1 %v24676_v57  ;;  %v24698_v57 = vld [vmem:[#allocation24 + $0x870] ss:$8 sps:$4 sm:$0xff]  }
 0xf1c   : > { %18822 = vmatpush1.bf16.msra.mxu1 %v24674_v42  ;;  %v24706_v42 = vld [vmem:[#allocation24 + $0x894] ss:$8 sps:$4 sm:$0xff]  }
 0xf1d   : > { %19369 = vmatprep.subr.bf16.mxu1 %v24679_v13  ;;  %v24704_v13 = vld [vmem:[#allocation24 + $0x890] ss:$8 sps:$4 sm:$0xff]  }
 0xf1f   : > { %18326 = vmatmul.mubr.bf16.gmra.mrb[212].mxu1 %v29149_v6 }
 0xf20   : > { %18335 = vmatprep.mubr.bf16.mxu1 %v29155_v58 }
 0xf27   : > { %18336 = vmatmul.mubr.bf16.gmra.mrb[216].mxu1 %v29161_v54 }
 0xf28   : > { %18345 = vmatprep.mubr.bf16.mxu1 %v29167_v52 }
 0xf2f   : > { %18346 = vmatmul.mubr.bf16.gmra.mrb[220].mxu1 %v29173_v22 }
 0xf30   : > { %18355 = vmatprep.mubr.bf16.mxu1 %v29179_v11 }
 0xf37   : > { %18356 = vmatmul.mubr.bf16.gmra.mrb[224].mxu1 %v29185_v34 }
 0xf38   : > { %18365 = vmatprep.mubr.bf16.mxu1 %v29191_v49 }
 0xf3f   : > { %18366 = vmatmul.mubr.bf16.gmra.mrb[228].mxu1 %v29197_v51 }
 0xf40   : > { %18375 = vmatprep.mubr.bf16.mxu1 %v29203_v14 }
 0xf47   : > { %18376 = vmatmul.mubr.bf16.gmra.mrb[232].mxu1 %v29209_v8 }
 0xf48   : > { %18385 = vmatprep.mubr.bf16.mxu1 %v29215_v21 }
 0xf4f   : > { %18386 = vmatmul.mubr.bf16.gmra.mrb[236].mxu1 %v29221_v62 }
 0xf50   : > { %18395 = vmatprep.mubr.bf16.mxu1 %v29227_v25 }
 0xf57   : > { %18396 = vmatmul.mubr.bf16.gmra.mrb[240].mxu1 %v29233_v63 }
 0xf58   : > { %18823 = vmatprep.mubr.bf16.mxu1 %v29059_v30  ;;  %v24691_v30 = vld [vmem:[#allocation24 + $0x844] ss:$8 sps:$4 sm:$0xff]  }
 0xf5f   : > { %18824 = vmatmul.mubr.bf16.vlgmr.msra.gmra.mrb[180].mxu1 %v29065_v47  ;;  %v24689_v47 = vld [vmem:[#allocation24 + $0x840] ss:$8 sps:$4 sm:$0xff]  }
 0xf60   : > { %18833 = vmatprep.mubr.bf16.mxu1 %v29071_v18  ;;  %19370 = vmatpush1.bf16.msra.mxu1 %v24677_v4  ;;  %v17954_v4 = vsel %vm29051_vm14, %v28869_v2, 0  ;;  %v19754_v2 = vld [vmem:[#allocation26] sm:$0x3] }
 0xf61   : > { %19371 = vmatprep.subr.bf16.mxu1 %v24682_v61 }
 0xf64   : > { %19372 = vmatpush1.bf16.msra.mxu1 %v24680_v31 }
 0xf65   : > { %19373 = vmatprep.subr.bf16.mxu1 %v24685_v15 }
 0xf67   : > { %18834 = vmatmul.mubr.bf16.gmra.mrb[184].mxu1 %v29077_v7 }
 0xf68   : > { %18843 = vmatprep.mubr.bf16.mxu1 %v29083_v5  ;;  %19374 = vmatpush1.bf16.msra.mxu1 %v24683_v48 }
 0xf69   : > { %19375 = vmatprep.subr.bf16.mxu1 %v24688_v3 }
 0xf6c   : > { %19376 = vmatpush1.bf16.msra.mxu1 %v24686_v10 }
 0xf6d   : > { %19377 = vmatprep.subr.bf16.mxu1 %v24691_v30 }
 0xf6f   : > { %18844 = vmatmul.mubr.bf16.gmra.mrb[188].mxu1 %v29089_v56 }
 0xf70   : > { %18853 = vmatprep.mubr.bf16.mxu1 %v29095_v59  ;;  %19378 = vmatpush1.bf16.msra.mxu1 %v24689_v47 }
 0xf71   : > { %19379 = vmatprep.subr.bf16.mxu1 %v24694_v50 }
 0xf74   : > { %19380 = vmatpush1.bf16.msra.mxu1 %v24692_v20 }
 0xf75   : > { %19381 = vmatprep.subr.bf16.mxu1 %v24697_v38 }
 0xf77   : > { %18854 = vmatmul.mubr.bf16.gmra.mrb[192].mxu1 %v29101_v27 }
 0xf78   : > { %18863 = vmatprep.mubr.bf16.mxu1 %v29107_v36  ;;  %19382 = vmatpush1.bf16.msra.mxu1 %v24695_v0 }
 0xf79   : > { %19383 = vmatprep.subr.bf16.mxu1 %v24700_v9 }
 0xf7c   : > { %19384 = vmatpush1.bf16.msra.mxu1 %v24698_v57 }
 0xf7d   : > { %19385 = vmatprep.subr.bf16.mxu1 %v24703_v46 }
 0xf7f   : > { %18864 = vmatmul.mubr.bf16.gmra.mrb[196].mxu1 %v29113_v16 }
 0xf80   : > { %18873 = vmatprep.mubr.bf16.mxu1 %v29119_v33  ;;  %19386 = vmatpush1.bf16.msra.mxu1 %v24701_v40 }
 0xf81   : > { %19387 = vmatprep.subr.bf16.mxu1 %v24706_v42 }
 0xf84   : > { %19388 = vmatpush1.bf16.msra.mxu1 %v24704_v13 }
 0xf85   : > { %19389 = vmatprep.subr.bf16.mxu1 %v24709_v23 }
 0xf87   : > { %18874 = vmatmul.mubr.bf16.gmra.mrb[200].mxu1 %v29125_v60 }
 0xf88   : > { %18883 = vmatprep.mubr.bf16.mxu1 %v29131_v53  ;;  %19390 = vmatpush1.bf16.msra.mxu1 %v24707_v37 }
 0xf89   : > { %19391 = vmatprep.subr.bf16.mxu1 %v24712_v12 }
 0xf8c   : > { %19392 = vmatpush1.bf16.msra.mxu1 %v24710_v39 }
 0xf8d   : > { %19393 = vmatprep.subr.bf16.mxu1 %v24715_v1 }
 0xf8f   : > { %18884 = vmatmul.mubr.bf16.gmra.mrb[204].mxu1 %v29137_v44 }
 0xf90   : > { %18893 = vmatprep.mubr.bf16.mxu1 %v29143_v28  ;;  %19394 = vmatpush1.bf16.msra.mxu1 %v24713_v17 }
 0xf91   : > { %19395 = vmatprep.subr.bf16.mxu1 %v24718_v32 }
 0xf94   : > { %19396 = vmatpush1.bf16.msra.mxu1 %v24716_v55 }
 0xf95   : > { %19397 = vmatprep.subr.bf16.mxu1 %v24721_v43 }
 0xf97   : > { %18894 = vmatmul.mubr.bf16.gmra.mrb[208].mxu1 %v29149_v6 }
 0xf98   : > { %18903 = vmatprep.mubr.bf16.mxu1 %v29155_v58  ;;  %19398 = vmatpush1.bf16.msra.mxu1 %v24719_v19 }
 0xf99   : > { %19399 = vmatprep.subr.bf16.mxu1 %v24724_v26 }
 0xf9c   : > { %19400 = vmatpush1.bf16.msra.mxu1 %v24722_v29 }
 0xf9f   : > { %18904 = vmatmul.mubr.bf16.gmra.mrb[212].mxu1 %v29161_v54 }
 0xfa0   : > { %18913 = vmatprep.mubr.bf16.mxu1 %v29167_v52 }
 0xfa7   : > { %18914 = vmatmul.mubr.bf16.gmra.mrb[216].mxu1 %v29173_v22 }
 0xfa8   : > { %18923 = vmatprep.mubr.bf16.mxu1 %v29179_v11 }
 0xfaf   : > { %18924 = vmatmul.mubr.bf16.gmra.mrb[220].mxu1 %v29185_v34 }
 0xfb0   : > { %18933 = vmatprep.mubr.bf16.mxu1 %v29191_v49 }
 0xfb7   : > { %18934 = vmatmul.mubr.bf16.gmra.mrb[224].mxu1 %v29197_v51 }
 0xfb8   : > { %18943 = vmatprep.mubr.bf16.mxu1 %v29203_v14 }
 0xfbf   : > { %18944 = vmatmul.mubr.bf16.gmra.mrb[228].mxu1 %v29209_v8 }
 0xfc0   : > { %18953 = vmatprep.mubr.bf16.mxu1 %v29215_v21 }
 0xfc7   : > { %18954 = vmatmul.mubr.bf16.gmra.mrb[232].mxu1 %v29221_v62 }
 0xfc8   : > { %18963 = vmatprep.mubr.bf16.mxu1 %v29227_v25 }
 0xfcf   : > { %18964 = vmatmul.mubr.bf16.gmra.mrb[236].mxu1 %v29233_v63 }
 0xfd0   : > { %18973 = vmatprep.mubr.bf16.mxu1 %v17955_v45 }
 0xfd7   : > { %18974 = vmatmul.mubr.bf16.gmra.mrb[240].mxu1 %v17954_v4 }
 0xfd8   : > { %19401 = vmatprep.mubr.bf16.mxu1 %v29071_v18  ;;  %v29304_v18 = vrot.slane %v19754_v2, %v29905_v35 }
 0xfdf   : > { %19402 = vmatmul.mubr.bf16.vlgmr.msra.gmra.mrb[180].mxu1 %v29077_v7  ;;  %v29906_v7 = vsub.s32 1, %v29904_v41 }
 0xfe0   : > { %19411 = vmatprep.mubr.bf16.mxu1 %v29083_v5 }
 0xfe1   : > { %v29308_v5 = vrot.slane %v19754_v2, %v29906_v7 }
 0xfe7   : > { %19412 = vmatmul.mubr.bf16.gmra.mrb[184].mxu1 %v29089_v56 }
 0xfe8   : > { %19421 = vmatprep.mubr.bf16.mxu1 %v29095_v59 }
 0xfef   : > { %19422 = vmatmul.mubr.bf16.gmra.mrb[188].mxu1 %v29101_v27 }
 0xff0   : > { %19431 = vmatprep.mubr.bf16.mxu1 %v29107_v36 }
 0xff7   : > { %19432 = vmatmul.mubr.bf16.gmra.mrb[192].mxu1 %v29113_v16 }
 0xff8   : > { %19441 = vmatprep.mubr.bf16.mxu1 %v29119_v33 }
 0xfff   : > { %19442 = vmatmul.mubr.bf16.gmra.mrb[196].mxu1 %v29125_v60 }
0x1000   : > { %19451 = vmatprep.mubr.bf16.mxu1 %v29131_v53 }
0x1007   : > { %19452 = vmatmul.mubr.bf16.gmra.mrb[200].mxu1 %v29137_v44 }
0x1008   : > { %19461 = vmatprep.mubr.bf16.mxu1 %v29143_v28 }
0x100f   : > { %19462 = vmatmul.mubr.bf16.gmra.mrb[204].mxu1 %v29149_v6 }
0x1010   : > { %19471 = vmatprep.mubr.bf16.mxu1 %v29155_v58 }
0x1017   : > { %19472 = vmatmul.mubr.bf16.gmra.mrb[208].mxu1 %v29161_v54 }
0x1018   : > { %19481 = vmatprep.mubr.bf16.mxu1 %v29167_v52 }
0x101f   : > { %19482 = vmatmul.mubr.bf16.gmra.mrb[212].mxu1 %v29173_v22 }
0x1020   : > { %19491 = vmatprep.mubr.bf16.mxu1 %v29179_v11 }
0x1027   : > { %19492 = vmatmul.mubr.bf16.gmra.mrb[216].mxu1 %v29185_v34 }
0x1028   : > { %19501 = vmatprep.mubr.bf16.mxu1 %v29191_v49 }
0x102f   : > { %19502 = vmatmul.mubr.bf16.gmra.mrb[220].mxu1 %v29197_v51 }
0x1030   : > { %19511 = vmatprep.mubr.bf16.mxu1 %v29203_v14 }
0x1037   : > { %19512 = vmatmul.mubr.bf16.gmra.mrb[224].mxu1 %v29209_v8  ;;  %v19927_v8 = vld [vmem:[#allocation29] sm:$0xff] }
0x1038   : > { %19521 = vmatprep.mubr.bf16.mxu1 %v29215_v21  ;;  %19930 = vperm.xlu0 %23718, %v19927_v8  }
0x103f   : > { %19522 = vmatmul.mubr.bf16.gmra.mrb[228].mxu1 %v29221_v62 }
0x1040   : > { %19531 = vmatprep.mubr.bf16.mxu1 %v29227_v25 }
0x1047   : > { %19532 = vmatmul.mubr.bf16.gmra.mrb[232].mxu1 %v29233_v63 }
0x1048   : > { %19541 = vmatprep.mubr.bf16.mxu1 %v17955_v45 }
0x104f   : > { %19542 = vmatmul.mubr.bf16.gmra.mrb[236].mxu1 %v17954_v4 }
0x1050   : > { %19551 = vmatprep.mubr.bf16.mxu1 %v29686_v24 }
0x1057   : > { %19552 = vmatmul.mubr.bf16.gmra.mrb[240].mxu1 %v29686_v24  ;;  %v29313_v24 = vld [vmem:[#allocation27] sm:$0xff] }
0x1058   : > { %v21475_v44 = vcombine.high %v29313_v24, %v29313_v24 }
0x105a   : > { %19972 = vmatprep.mubr.bf16.mxu1 %v21475_v44 }
0x10b2   : > { %v19403_v56 = vpop.f32.mrb[180].mxu1 }
0x10b3   : > { %v19766_v59 = vadd.f32 %v29304_v18, %v19403_v56  ;;  %v19405_v27 = vpop.f32.mrb[181].mxu1 }
0x10b4   : > { %v19767_v36 = vadd.f32 %v29308_v5, %v19405_v27  ;;  %v19407_v16 = vpop.f32.mrb[182].mxu1 }
0x10b5   : > { %v19768_v33 = vadd.f32 %v29304_v18, %v19407_v16  ;;  %v19409_v60 = vpop.f32.mrb[183].mxu1  ;;  %v19830_v28 = vmax.f32 %v19766_v59, 0.0 }
0x10b6   : > { %v19769_v53 = vadd.f32 %v29308_v5, %v19409_v60  ;;  %v19831_v58 = vmax.f32 %v19767_v36, 0.0 }
0x10b7   : > { %v19832_v6 = vmax.f32 %v19768_v33, 0.0 }
0x10b8   : > { %v19833_v54 = vmax.f32 %v19769_v53, 0.0 }
0x10b9   : > { %v19894_v52 = vpack.c.bf16 %v19832_v6, %v19830_v28 }
0x10ba   : > { %v19895_v22 = vpack.c.bf16 %v19833_v54, %v19831_v58  ;;  %v19413_v11 = vpop.f32.mrb[184].mxu1 }
0x10bb   : > { %v19770_v34 = vadd.f32 %v29304_v18, %v19413_v11  ;;  %v19415_v49 = vpop.f32.mrb[185].mxu1 }
0x10bc   : > { %v19771_v51 = vadd.f32 %v29308_v5, %v19415_v49  ;;  %v19417_v14 = vpop.f32.mrb[186].mxu1  ;;  %19940 = vmatprep.subr.bf16.mxu1 %v19895_v22 }
0x10bd   : > { %v19772_v21 = vadd.f32 %v29304_v18, %v19417_v14  ;;  %v19419_v62 = vpop.f32.mrb[187].mxu1  ;;  %19941 = vmatpush1.bf16.xpose.msra.mxu1 %v19894_v52  ;;  %v19834_v63 = vmax.f32 %v19770_v34, 0.0 }
0x10be   : > { %v19773_v25 = vadd.f32 %v29308_v5, %v19419_v62  ;;  %v19835_v31 = vmax.f32 %v19771_v51, 0.0 }
0x10bf   : > { %v19836_v61 = vmax.f32 %v19772_v21, 0.0 }
0x10c0   : > { %v19837_v15 = vmax.f32 %v19773_v25, 0.0 }
0x10c1   : > { %v19896_v48 = vpack.c.bf16 %v19836_v61, %v19834_v63 }
0x10c2   : > { %v19897_v3 = vpack.c.bf16 %v19837_v15, %v19835_v31  ;;  %v19423_v10 = vpop.f32.mrb[188].mxu1 }
0x10c3   : > { %v19774_v30 = vadd.f32 %v29304_v18, %v19423_v10  ;;  %v19425_v47 = vpop.f32.mrb[189].mxu1 }
0x10c4   : > { %v19775_v50 = vadd.f32 %v29308_v5, %v19425_v47  ;;  %v19427_v20 = vpop.f32.mrb[190].mxu1  ;;  %19942 = vmatprep.subr.bf16.mxu1 %v19897_v3 }
0x10c5   : > { %v19776_v38 = vadd.f32 %v29304_v18, %v19427_v20  ;;  %v19429_v0 = vpop.f32.mrb[191].mxu1  ;;  %19943 = vmatpush1.bf16.xpose.msra.mxu1 %v19896_v48  ;;  %v19838_v57 = vmax.f32 %v19774_v30, 0.0 }
0x10c6   : > { %v19777_v9 = vadd.f32 %v29308_v5, %v19429_v0  ;;  %v19839_v40 = vmax.f32 %v19775_v50, 0.0 }
0x10c7   : > { %v19840_v46 = vmax.f32 %v19776_v38, 0.0 }
0x10c8   : > { %v19841_v42 = vmax.f32 %v19777_v9, 0.0 }
0x10c9   : > { %v19898_v13 = vpack.c.bf16 %v19840_v46, %v19838_v57 }
0x10ca   : > { %v19899_v23 = vpack.c.bf16 %v19841_v42, %v19839_v40  ;;  %v19433_v37 = vpop.f32.mrb[192].mxu1 }
0x10cb   : > { %v19778_v12 = vadd.f32 %v29304_v18, %v19433_v37  ;;  %v19435_v39 = vpop.f32.mrb[193].mxu1 }
0x10cc   : > { %v19779_v1 = vadd.f32 %v29308_v5, %v19435_v39  ;;  %v19437_v17 = vpop.f32.mrb[194].mxu1  ;;  %19944 = vmatprep.subr.bf16.mxu1 %v19899_v23 }
0x10cd   : > { %v19780_v32 = vadd.f32 %v29304_v18, %v19437_v17  ;;  %v19439_v55 = vpop.f32.mrb[195].mxu1  ;;  %19945 = vmatpush1.bf16.xpose.msra.mxu1 %v19898_v13  ;;  %v19842_v19 = vmax.f32 %v19778_v12, 0.0 }
0x10ce   : > { %v19781_v43 = vadd.f32 %v29308_v5, %v19439_v55  ;;  %v19843_v29 = vmax.f32 %v19779_v1, 0.0 }
0x10cf   : > { %v19844_v26 = vmax.f32 %v19780_v32, 0.0 }
0x10d0   : > { %v19845_v45 = vmax.f32 %v19781_v43, 0.0 }
0x10d1   : > { %v19900_v4 = vpack.c.bf16 %v19844_v26, %v19842_v19 }
0x10d2   : > { %v19901_v2 = vpack.c.bf16 %v19845_v45, %v19843_v29  ;;  %v19443_v41 = vpop.f32.mrb[196].mxu1 }
0x10d3   : > { %v19782_v35 = vadd.f32 %v29304_v18, %v19443_v41  ;;  %v19445_v7 = vpop.f32.mrb[197].mxu1 }
0x10d4   : > { %v19783_v56 = vadd.f32 %v29308_v5, %v19445_v7  ;;  %v19447_v59 = vpop.f32.mrb[198].mxu1  ;;  %19946 = vmatprep.subr.bf16.mxu1 %v19901_v2 }
0x10d5   : > { %v19784_v27 = vadd.f32 %v29304_v18, %v19447_v59  ;;  %v19449_v36 = vpop.f32.mrb[199].mxu1  ;;  %19947 = vmatpush1.bf16.xpose.msra.mxu1 %v19900_v4  ;;  %v19846_v33 = vmax.f32 %v19782_v35, 0.0 }
0x10d6   : > { %v19785_v16 = vadd.f32 %v29308_v5, %v19449_v36  ;;  %v19847_v53 = vmax.f32 %v19783_v56, 0.0 }
0x10d7   : > { %v19848_v60 = vmax.f32 %v19784_v27, 0.0 }
0x10d8   : > { %v19849_v44 = vmax.f32 %v19785_v16, 0.0 }
0x10d9   : > { %v19902_v28 = vpack.c.bf16 %v19848_v60, %v19846_v33 }
0x10da   : > { %v19903_v6 = vpack.c.bf16 %v19849_v44, %v19847_v53  ;;  %v19453_v58 = vpop.f32.mrb[200].mxu1 }
0x10db   : > { %v19786_v54 = vadd.f32 %v29304_v18, %v19453_v58  ;;  %v19455_v52 = vpop.f32.mrb[201].mxu1 }
0x10dc   : > { %v19787_v22 = vadd.f32 %v29308_v5, %v19455_v52  ;;  %v19457_v11 = vpop.f32.mrb[202].mxu1  ;;  %19948 = vmatprep.subr.bf16.mxu1 %v19903_v6 }
0x10dd   : > { %v19788_v34 = vadd.f32 %v29304_v18, %v19457_v11  ;;  %v19459_v49 = vpop.f32.mrb[203].mxu1  ;;  %19949 = vmatpush1.bf16.xpose.msra.mxu1 %v19902_v28  ;;  %v19850_v14 = vmax.f32 %v19786_v54, 0.0 }
0x10de   : > { %v19789_v51 = vadd.f32 %v29308_v5, %v19459_v49  ;;  %v19851_v21 = vmax.f32 %v19787_v22, 0.0 }
0x10df   : > { %v19852_v8 = vmax.f32 %v19788_v34, 0.0 }
0x10e0   : > { %v19853_v62 = vmax.f32 %v19789_v51, 0.0 }
0x10e1   : > { %v19904_v25 = vpack.c.bf16 %v19852_v8, %v19850_v14 }
0x10e2   : > { %v19905_v63 = vpack.c.bf16 %v19853_v62, %v19851_v21  ;;  %v19463_v61 = vpop.f32.mrb[204].mxu1 }
0x10e3   : > { %v19790_v31 = vadd.f32 %v29304_v18, %v19463_v61  ;;  %v19465_v15 = vpop.f32.mrb[205].mxu1 }
0x10e4   : > { %v19791_v48 = vadd.f32 %v29308_v5, %v19465_v15  ;;  %v19467_v3 = vpop.f32.mrb[206].mxu1  ;;  %19950 = vmatprep.subr.bf16.mxu1 %v19905_v63 }
0x10e5   : > { %v19792_v10 = vadd.f32 %v29304_v18, %v19467_v3  ;;  %v19469_v30 = vpop.f32.mrb[207].mxu1  ;;  %19951 = vmatpush1.bf16.xpose.msra.mxu1 %v19904_v25  ;;  %v19854_v50 = vmax.f32 %v19790_v31, 0.0 }
0x10e6   : > { %v19793_v47 = vadd.f32 %v29308_v5, %v19469_v30  ;;  %v19855_v38 = vmax.f32 %v19791_v48, 0.0 }
0x10e7   : > { %v19856_v20 = vmax.f32 %v19792_v10, 0.0 }
0x10e8   : > { %v19857_v0 = vmax.f32 %v19793_v47, 0.0 }
0x10e9   : > { %v19906_v9 = vpack.c.bf16 %v19856_v20, %v19854_v50 }
0x10ea   : > { %v19907_v57 = vpack.c.bf16 %v19857_v0, %v19855_v38  ;;  %v19473_v46 = vpop.f32.mrb[208].mxu1 }
0x10eb   : > { %v19794_v40 = vadd.f32 %v29304_v18, %v19473_v46  ;;  %v19475_v42 = vpop.f32.mrb[209].mxu1 }
0x10ec   : > { %v19795_v13 = vadd.f32 %v29308_v5, %v19475_v42  ;;  %v19477_v23 = vpop.f32.mrb[210].mxu1  ;;  %19952 = vmatprep.subr.bf16.mxu1 %v19907_v57 }
0x10ed   : > { %v19796_v37 = vadd.f32 %v29304_v18, %v19477_v23  ;;  %v19479_v12 = vpop.f32.mrb[211].mxu1  ;;  %19953 = vmatpush1.bf16.xpose.msra.mxu1 %v19906_v9  ;;  %v19858_v1 = vmax.f32 %v19794_v40, 0.0 }
0x10ee   : > { %v19797_v39 = vadd.f32 %v29308_v5, %v19479_v12  ;;  %v19859_v32 = vmax.f32 %v19795_v13, 0.0 }
0x10ef   : > { %v19860_v17 = vmax.f32 %v19796_v37, 0.0 }
0x10f0   : > { %v19861_v55 = vmax.f32 %v19797_v39, 0.0 }
0x10f1   : > { %v19908_v43 = vpack.c.bf16 %v19860_v17, %v19858_v1 }
0x10f2   : > { %v19909_v19 = vpack.c.bf16 %v19861_v55, %v19859_v32  ;;  %v19483_v26 = vpop.f32.mrb[212].mxu1 }
0x10f3   : > { %v19798_v29 = vadd.f32 %v29304_v18, %v19483_v26  ;;  %v19485_v45 = vpop.f32.mrb[213].mxu1 }
0x10f4   : > { %v19799_v4 = vadd.f32 %v29308_v5, %v19485_v45  ;;  %v19487_v2 = vpop.f32.mrb[214].mxu1  ;;  %19954 = vmatprep.subr.bf16.mxu1 %v19909_v19 }
0x10f5   : > { %v19800_v41 = vadd.f32 %v29304_v18, %v19487_v2  ;;  %v19489_v35 = vpop.f32.mrb[215].mxu1  ;;  %19955 = vmatpush1.bf16.xpose.msra.mxu1 %v19908_v43  ;;  %v19862_v56 = vmax.f32 %v19798_v29, 0.0 }
0x10f6   : > { %v19801_v7 = vadd.f32 %v29308_v5, %v19489_v35  ;;  %v19863_v27 = vmax.f32 %v19799_v4, 0.0 }
0x10f7   : > { %v19864_v59 = vmax.f32 %v19800_v41, 0.0 }
0x10f8   : > { %v19865_v36 = vmax.f32 %v19801_v7, 0.0 }
0x10f9   : > { %v19910_v16 = vpack.c.bf16 %v19864_v59, %v19862_v56 }
0x10fa   : > { %v19911_v33 = vpack.c.bf16 %v19865_v36, %v19863_v27  ;;  %v19493_v60 = vpop.f32.mrb[216].mxu1 }
0x10fb   : > { %v19802_v53 = vadd.f32 %v29304_v18, %v19493_v60  ;;  %v19495_v44 = vpop.f32.mrb[217].mxu1 }
0x10fc   : > { %v19803_v28 = vadd.f32 %v29308_v5, %v19495_v44  ;;  %v19497_v6 = vpop.f32.mrb[218].mxu1  ;;  %19956 = vmatprep.subr.bf16.mxu1 %v19911_v33 }
0x10fd   : > { %v19804_v58 = vadd.f32 %v29304_v18, %v19497_v6  ;;  %v19499_v54 = vpop.f32.mrb[219].mxu1  ;;  %19957 = vmatpush1.bf16.xpose.msra.mxu1 %v19910_v16  ;;  %v19866_v22 = vmax.f32 %v19802_v53, 0.0 }
0x10fe   : > { %v19805_v52 = vadd.f32 %v29308_v5, %v19499_v54  ;;  %v19867_v34 = vmax.f32 %v19803_v28, 0.0 }
0x10ff   : > { %v19868_v11 = vmax.f32 %v19804_v58, 0.0 }
0x1100   : > { %v19869_v49 = vmax.f32 %v19805_v52, 0.0 }
0x1101   : > { %v19912_v51 = vpack.c.bf16 %v19868_v11, %v19866_v22 }
0x1102   : > { %v19913_v14 = vpack.c.bf16 %v19869_v49, %v19867_v34  ;;  %v19503_v8 = vpop.f32.mrb[220].mxu1 }
0x1103   : > { %v19806_v21 = vadd.f32 %v29304_v18, %v19503_v8  ;;  %v19505_v62 = vpop.f32.mrb[221].mxu1 }
0x1104   : > { %v19807_v25 = vadd.f32 %v29308_v5, %v19505_v62  ;;  %v19507_v63 = vpop.f32.mrb[222].mxu1  ;;  %19958 = vmatprep.subr.bf16.mxu1 %v19913_v14 }
0x1105   : > { %v19808_v61 = vadd.f32 %v29304_v18, %v19507_v63  ;;  %v19509_v31 = vpop.f32.mrb[223].mxu1  ;;  %19959 = vmatpush1.bf16.xpose.msra.mxu1 %v19912_v51  ;;  %v19870_v48 = vmax.f32 %v19806_v21, 0.0 }
0x1106   : > { %v19809_v15 = vadd.f32 %v29308_v5, %v19509_v31  ;;  %v19871_v10 = vmax.f32 %v19807_v25, 0.0 }
0x1107   : > { %v19872_v3 = vmax.f32 %v19808_v61, 0.0 }
0x1108   : > { %v19873_v30 = vmax.f32 %v19809_v15, 0.0 }
0x1109   : > { %v19914_v47 = vpack.c.bf16 %v19872_v3, %v19870_v48 }
0x110a   : > { %v19915_v50 = vpack.c.bf16 %v19873_v30, %v19871_v10  ;;  %v19513_v20 = vpop.f32.mrb[224].mxu1 }
0x110b   : > { %v19810_v38 = vadd.f32 %v29304_v18, %v19513_v20  ;;  %v19515_v0 = vpop.f32.mrb[225].mxu1 }
0x110c   : > { %v19811_v9 = vadd.f32 %v29308_v5, %v19515_v0  ;;  %v19517_v57 = vpop.f32.mrb[226].mxu1  ;;  %19960 = vmatprep.subr.bf16.mxu1 %v19915_v50 }
0x110d   : > { %v19812_v46 = vadd.f32 %v29304_v18, %v19517_v57  ;;  %v19519_v40 = vpop.f32.mrb[227].mxu1  ;;  %19961 = vmatpush1.bf16.xpose.msra.mxu1 %v19914_v47  ;;  %v19874_v13 = vmax.f32 %v19810_v38, 0.0 }
0x110e   : > { %v19813_v42 = vadd.f32 %v29308_v5, %v19519_v40  ;;  %v19875_v37 = vmax.f32 %v19811_v9, 0.0 }
0x110f   : > { %v19876_v23 = vmax.f32 %v19812_v46, 0.0 }
0x1110   : > { %v19877_v12 = vmax.f32 %v19813_v42, 0.0 }
0x1111   : > { %v19916_v39 = vpack.c.bf16 %v19876_v23, %v19874_v13  ;;  %v21474_v23 = vcombine.low %v29313_v24, %v29313_v24 }
0x1112   : > { %v19917_v1 = vpack.c.bf16 %v19877_v12, %v19875_v37  ;;  %v19523_v17 = vpop.f32.mrb[228].mxu1 }
0x1113   : > { %v19814_v32 = vadd.f32 %v29304_v18, %v19523_v17  ;;  %v19525_v55 = vpop.f32.mrb[229].mxu1 }
0x1114   : > { %v19815_v43 = vadd.f32 %v29308_v5, %v19525_v55  ;;  %v19527_v19 = vpop.f32.mrb[230].mxu1  ;;  %19962 = vmatprep.subr.bf16.mxu1 %v19917_v1 }
0x1115   : > { %v19816_v26 = vadd.f32 %v29304_v18, %v19527_v19  ;;  %v19529_v29 = vpop.f32.mrb[231].mxu1  ;;  %19963 = vmatpush1.bf16.xpose.msra.mxu1 %v19916_v39  ;;  %v19878_v4 = vmax.f32 %v19814_v32, 0.0 }
0x1116   : > { %v19817_v45 = vadd.f32 %v29308_v5, %v19529_v29  ;;  %v19879_v41 = vmax.f32 %v19815_v43, 0.0 }
0x1117   : > { %v19880_v2 = vmax.f32 %v19816_v26, 0.0 }
0x1118   : > { %v19881_v35 = vmax.f32 %v19817_v45, 0.0 }
0x1119   : > { %v19918_v7 = vpack.c.bf16 %v19880_v2, %v19878_v4 }
0x111a   : > { %v19919_v56 = vpack.c.bf16 %v19881_v35, %v19879_v41  ;;  %v19533_v59 = vpop.f32.mrb[232].mxu1 }
0x111b   : > { %v19818_v27 = vadd.f32 %v29304_v18, %v19533_v59  ;;  %v19535_v36 = vpop.f32.mrb[233].mxu1 }
0x111c   : > { %v19819_v16 = vadd.f32 %v29308_v5, %v19535_v36  ;;  %v19537_v33 = vpop.f32.mrb[234].mxu1  ;;  %19964 = vmatprep.subr.bf16.mxu1 %v19919_v56 }
0x111d   : > { %v19820_v60 = vadd.f32 %v29304_v18, %v19537_v33  ;;  %v19539_v53 = vpop.f32.mrb[235].mxu1  ;;  %19965 = vmatpush1.bf16.xpose.msra.mxu1 %v19918_v7  ;;  %v19882_v28 = vmax.f32 %v19818_v27, 0.0 }
0x111e   : > { %v19821_v44 = vadd.f32 %v29308_v5, %v19539_v53  ;;  %v19883_v58 = vmax.f32 %v19819_v16, 0.0 }
0x111f   : > { %v19884_v6 = vmax.f32 %v19820_v60, 0.0 }
0x1120   : > { %v19885_v54 = vmax.f32 %v19821_v44, 0.0 }
0x1121   : > { %v19920_v52 = vpack.c.bf16 %v19884_v6, %v19882_v28 }
0x1122   : > { %v19921_v22 = vpack.c.bf16 %v19885_v54, %v19883_v58  ;;  %v19543_v11 = vpop.f32.mrb[236].mxu1 }
0x1123   : > { %v19822_v34 = vadd.f32 %v29304_v18, %v19543_v11  ;;  %v19545_v49 = vpop.f32.mrb[237].mxu1 }
0x1124   : > { %v19823_v51 = vadd.f32 %v29308_v5, %v19545_v49  ;;  %v19547_v14 = vpop.f32.mrb[238].mxu1  ;;  %19966 = vmatprep.subr.bf16.mxu1 %v19921_v22 }
0x1125   : > { %v19824_v8 = vadd.f32 %v29304_v18, %v19547_v14  ;;  %v19549_v21 = vpop.f32.mrb[239].mxu1  ;;  %19967 = vmatpush1.bf16.xpose.msra.mxu1 %v19920_v52  ;;  %v19886_v25 = vmax.f32 %v19822_v34, 0.0 }
0x1126   : > { %v19825_v62 = vadd.f32 %v29308_v5, %v19549_v21  ;;  %v19887_v61 = vmax.f32 %v19823_v51, 0.0 }
0x1127   : > { %v19888_v63 = vmax.f32 %v19824_v8, 0.0 }
0x1128   : > { %v19889_v31 = vmax.f32 %v19825_v62, 0.0 }
0x1129   : > { %v19922_v15 = vpack.c.bf16 %v19888_v63, %v19886_v25 }
0x112a   : > { %v19923_v48 = vpack.c.bf16 %v19889_v31, %v19887_v61  ;;  %v19553_v3 = vpop.f32.mrb[240].mxu1 }
0x112b   : > { %v19826_v10 = vadd.f32 %v29304_v18, %v19553_v3  ;;  %v19555_v30 = vpop.f32.mrb[241].mxu1 }
0x112c   : > { %v19827_v47 = vadd.f32 %v29308_v5, %v19555_v30  ;;  %v19557_v50 = vpop.f32.mrb[242].mxu1  ;;  %19968 = vmatprep.subr.bf16.mxu1 %v19923_v48 }
0x112d   : > { %v19828_v20 = vadd.f32 %v29304_v18, %v19557_v50  ;;  %v19559_v38 = vpop.f32.mrb[243].mxu1  ;;  %19969 = vmatpush1.bf16.xpose.msra.mxu1 %v19922_v15  ;;  %v19890_v9 = vmax.f32 %v19826_v10, 0.0  ;;  %v19931_v18 = vpop.permute.xlu0 %19930 }
0x112e   : > { %v19829_v0 = vadd.f32 %v29308_v5, %v19559_v38  ;;  %v19891_v46 = vmax.f32 %v19827_v47, 0.0 }
0x112f   : > { %v19892_v57 = vmax.f32 %v19828_v20, 0.0 }
0x1130   : > { %v19893_v40 = vmax.f32 %v19829_v0, 0.0 }
0x1131   : > { %v19924_v42 = vpack.c.bf16 %v19892_v57, %v19890_v9 }
0x1132   : > { %v19925_v13 = vpack.c.bf16 %v19893_v40, %v19891_v46 }
0x1134   : > { %19970 = vmatprep.subr.bf16.mxu1 %v19925_v13 }
0x1135   : > { %19971 = vmatpush1.bf16.xpose.msra.mxu1 %v19924_v42 }
0x113c   : > { %19973 = vmatmul.mubr.bf16.vlgmr.msra.gmra.mrb[244].mxu1 %v21474_v23 }
0x120f   : > { %v19974_v5 = vpop.f32.mrb[244].mxu1 }
0x1210   : > { %v19976_v37 = vpop.f32.mrb[245].mxu1  ;;  %v19975_v12 = vadd.f32 %v19974_v5, %v19931_v18 }
0x1211   : > { %v19978_v39 = vpop.f32.mrb[246].mxu1  ;;  %v19977_v1 = vadd.f32 %v19976_v37, %v19931_v18 }
0x1212   : > { %19981 = vst [vmem:[%s859_s10] sm:$0xff] %v19975_v12  ;;  %v19979_v24 = vpop.f32.mrb[247].mxu1 }
0x1213   : > { %19982 = vst [vmem:[%s859_s10 + $0x8] sm:$0xff] %v19977_v1 }
0x1214   : > { %25320 = shalt.err (!%p25317_p1)
}
0x1215   : > { %s25321_s13 = scalar_lea.hbm %s29385_s7, 256  ;;  %s25325_s1 = scalar_lea.hbm %s29907_s9, 512 }
0x1216   : > { %p25322_p10 = scmp.ne.s32.totalorder %s29385_s7, %s25321_s13  ;;  %p25326_p9 = scmp.lt.u32.totalorder %s29385_s7, %s29907_s9 }
0x1217   : > { %p25327_p6 = scmp.lt.u32.totalorder %s25325_s1, %s25321_s13  ;;  %p25329_p13 = scmp.lt.u32.totalorder %s25321_s13, %s29385_s7 }
0x1218   : > { %p25323_p0 = pnand %p25322_p10, %p29908_p8 }
0x1219   : > { %p25328_p5 = por %p25327_p6, %p25326_p9 }
0x121a   : > { %p25324_p7 = pneg %p25323_p0 }
0x121b   : > { %p25330_p3 = por %p25329_p13, %p25328_p5 }
0x121d   : > { %p25331_p4 = pnand %p25330_p3, %p25324_p7 }
0x121f   : > { %25334 = shalt.err (!%p25331_p4)
}
0x1220   : > { %23498 = dma.vmem_to_hbm [thread:$0]  (%p29908_p8), %s29387_s4, 256, %s29385_s7, %s19984_s0  }
0x1221 PF: > { %s20010_s19 = sand.u32 1, %s25397_s24   ;;  %p29909_p12 = scmp.ne.s32.totalorder %s29611_s22, 0 }
0x1222   : > { %p29910_p2 = scmp.ge.s32.totalorder %s25409_s27, 2  ;;  %s20011_s26 = scalar_lea.sflag [#allocation5], %s20010_s19 }
0x1224   : > { %p23554_p11 = pnand %p29910_p2, %p29909_p12 }
0x1226   : > { %25392 = dma.done.wait (!%p23554_p11), %s20011_s26, 256  }
0x1227   : > { %25394 = vsyncadd (!%p23554_p11), %s20011_s26, 4294967040  ;;  %s29911_s27 = sld [smem:[#allocation44_spill]]  ;;  %s29912_s16 = sld [smem:[#allocation42_spill]] }
0x1228   : > { %s29913_s26 = sld [smem:[#allocation45_spill]]  ;;  %s29914_s24 = smov %s25401_s25 }
0x122d   : > { %p42_p1 = scmp.ge.s32.totalorder %s29911_s27, 4   ;;  %s29915_s25 = smov %s29912_s16 }
0x122f   :  { %44 = sbr.rel (!%p42_p1) target bundleno = 34 (0x22), region = 246 }
0x1236   :  { %20016 = vsyncpa [#allocation4], 1 }
0x1237   :  { %20018 = vsyncpa [#allocation4 + $0x1], 1 }
0x1238   :  { %20019 = vsyncpa [#allocation7], 1 }
0x1239   :  { %20021 = vsyncpa [#allocation7 + $0x1], 1 }
0x123a   :  { %20022 = vsyncpa [#allocation10], 1 }
0x123b   :  { %20024 = vsyncpa [#allocation10 + $0x1], 1 }
0x123c   :  { %20025 = vsyncpa [#allocation13], 1 }
0x123d   :  { %20026 = vsyncpa [#allocation16], 1 }
0x123e   :  { %20027 = vsyncpa [#allocation19], 1 }
0x123f   :  { %20028 = vsyncpa [#allocation22], 1 }
0x1240   :  { %20029 = vsyncpa [#allocation25], 1 }
0x1241   :  { %20030 = vsyncpa [#allocation28], 1 }
0x1242   :  { %20031 = vsyncpa [#allocation5], 1 }
0x1243   :  { %20033 = vsyncpa [#allocation5 + $0x1], 1 }

</bundles_post_ra>
